<compile_context>
chip_gen: v6e
topology: v6e:2x2x1
jax: 0.10.0
libtpu: 0.0.40
codegen_flags: <defaults>
</compile_context>

<pallas_src>
import math

import jax
import jax.numpy as jnp
from jax.experimental import pallas as pl
from jax.experimental.pallas import tpu as pltpu

# ----------------------------- small synthetic "bert-mini-like" config -------
VOCAB = 128
MAX_POS = 64
TYPE_VOCAB = 2
HIDDEN = 32
NUM_HEADS = 4
HEAD_DIM = HIDDEN // NUM_HEADS
INTERMEDIATE = 64
NUM_LAYERS = 4            # hidden_states has NUM_LAYERS+1 entries; we use [-2]
LIVE_LAYERS = NUM_LAYERS - 1   # the final encoder layer's output is never used
N_CLASSES = 3
LN_EPS = 1e-12
MASK_BIAS = -1e9          # additive attention-mask bias
NEG_FILL = -1e30          # large finite fill for masked max-pool

# rows inside the packed per-layer (8, 128) vector slab
ROW_BQKV, ROW_BO, ROW_LN1G, ROW_LN1B, ROW_BI, ROW_BD, ROW_LN2G, ROW_LN2B = range(8)
# rows inside the packed misc (8, 128) slab
ROW_EMB_G, ROW_EMB_B, ROW_CLS_B1, ROW_CLS_B2 = range(4)

_VMEM = pl.BlockSpec(memory_space=pltpu.MemorySpace.VMEM)


def _mxu_dot(x, w):
    """MXU matmul: bf16 operands, f32 accumulation."""
    return jnp.dot(x.astype(jnp.bfloat16), w, preferred_element_type=jnp.float32)


def _layer_norm(x, gamma, beta, eps=LN_EPS):
    mean = jnp.mean(x, axis=-1, keepdims=True)
    var = jnp.mean((x - mean) ** 2, axis=-1, keepdims=True)
    return (x - mean) * jax.lax.rsqrt(var + eps) * gamma + beta


def _softmax_last(x):
    m = jnp.max(x, axis=-1, keepdims=True)
    e = jnp.exp(x - m)
    # divide -> EUP reciprocal (frees VALU slots)
    return e * pl.reciprocal(jnp.sum(e, axis=-1, keepdims=True), approx=True)


# ----------------------------- fused Pallas kernel ----------------------------
def fused_bert_classifier_kernel(
        emb_ref, mask_ref, wqkv_ref, wo_ref, wi_ref, wd_ref,
        lvec_ref, misc_ref, w1_ref, w2_ref, o_ref):
    emb = emb_ref[...].astype(jnp.float32)                  # (B, S, H)
    B, S, H = emb.shape
    NH, D, I = NUM_HEADS, HEAD_DIM, INTERMEDIATE
    mask_f = mask_ref[...].astype(jnp.float32)              # (B, S)

    misc = misc_ref[...]                                    # (8, 128) f32
    emb_g = misc[ROW_EMB_G:ROW_EMB_G + 1, :H]
    emb_b = misc[ROW_EMB_B:ROW_EMB_B + 1, :H]
    cls_b1 = misc[ROW_CLS_B1:ROW_CLS_B1 + 1, :H]
    cls_b2 = misc[ROW_CLS_B2:ROW_CLS_B2 + 1, :N_CLASSES]

    # additive attention-mask bias, computed & broadcast ONCE for all layers/heads
    bias = (1.0 - mask_f) * MASK_BIAS                                    # (B, S)
    maskb = jnp.broadcast_to(bias[None, :, None, :],
                             (NH, B, 1, S)).reshape(NH * B, 1, S)        # (NH*B, 1, S)

    # hidden_states[0]: embedding layer-norm (f32)
    h2 = _layer_norm(emb.reshape(B * S, H), emb_g, emb_b)                # (B*S, H)

    scale = 1.0 / math.sqrt(D)

    # statically unrolled live encoder layers; all weights resident in VMEM
    for l in range(LIVE_LAYERS):
        vecs = lvec_ref[l]                                               # (8, 128) f32
        bqkv = vecs[ROW_BQKV:ROW_BQKV + 1, :3 * H]
        bo = vecs[ROW_BO:ROW_BO + 1, :H]
        ln1g = vecs[ROW_LN1G:ROW_LN1G + 1, :H]
        ln1b = vecs[ROW_LN1B:ROW_LN1B + 1, :H]
        bi = vecs[ROW_BI:ROW_BI + 1, :I]
        bd = vecs[ROW_BD:ROW_BD + 1, :H]
        ln2g = vecs[ROW_LN2G:ROW_LN2G + 1, :H]
        ln2b = vecs[ROW_LN2B:ROW_LN2B + 1, :H]

        # fused Q/K/V projection: one (B*S, H) @ (H, 3H) MXU pass
        qkv = _mxu_dot(h2, wqkv_ref[l]) + bqkv                           # (B*S, 3H) f32
        # split channels head-wise: (B*S, 3H) -> (B, S, 3*NH, D); channel = part*NH + head
        qkv4 = qkv.reshape(B, S, 3 * NH, D)

        # batched-head attention: fold (head, batch) into one leading batch dim n = h*B + b
        qh = jnp.concatenate([qkv4[:, :, h, :] for h in range(NH)],
                             axis=0).astype(jnp.bfloat16)                # (NH*B, S, D)
        kh = jnp.concatenate([qkv4[:, :, NH + h, :] for h in range(NH)],
                             axis=0).astype(jnp.bfloat16)
        vh = jnp.concatenate([qkv4[:, :, 2 * NH + h, :] for h in range(NH)],
                             axis=0).astype(jnp.bfloat16)

        scores = jnp.einsum('nqd,nkd->nqk', qh, kh,
                            preferred_element_type=jnp.float32) * scale + maskb
        probs = _softmax_last(scores)                                    # (NH*B, S, S) f32
        ctx = jnp.einsum('nqk,nkd->nqd', probs.astype(jnp.bfloat16), vh,
                         preferred_element_type=jnp.float32)             # (NH*B, S, D) f32

        # merge heads back onto the lane axis and apply ONE output projection
        ctx2d = jnp.concatenate(
            [ctx[h * B:(h + 1) * B].reshape(B * S, D) for h in range(NH)],
            axis=-1)                                                     # (B*S, H)
        attn = _mxu_dot(ctx2d, wo_ref[l]) + bo

        h1 = _layer_norm(attn + h2, ln1g, ln1b)

        inter = _mxu_dot(h1, wi_ref[l]) + bi
        # TODO(synk): HF BERT uses exact (erf) GELU; tanh-approx GELU here (EUP-friendly).
        inter = jax.nn.gelu(inter, approximate=True)
        ffn = _mxu_dot(inter, wd_ref[l]) + bd
        h2 = _layer_norm(ffn + h1, ln2g, ln2b)

    # h2 is now hidden_states[-2] (output of the second-to-last encoder layer)
    h3 = h2.reshape(B, S, H)
    mr = mask_f[:, :, None]                                              # (B, S, 1)

    # masked mean pooling (denominator clamped to avoid NaN on all-masked rows)
    denom = jnp.maximum(jnp.sum(mr, axis=1), 1.0)                        # (B, 1)
    mean_pooled = jnp.sum(h3 * mr, axis=1) * pl.reciprocal(denom, approx=True)

    # masked max pooling (large finite fill instead of -inf)
    masked = jnp.where(mr == 0.0, jnp.float32(NEG_FILL), h3)
    max_pooled = jnp.max(masked, axis=1)                                 # (B, H)

    # dropout(0.2) is identity here (deterministic / eval-mode forward)
    # Linear(2H -> H) without a lane-concatenate: weight split into pool halves
    hid = (_mxu_dot(mean_pooled, w1_ref[0]) + _mxu_dot(max_pooled, w1_ref[1])
           + cls_b1)
    hid = jnp.maximum(hid, 0.0)                                          # ReLU
    o_ref[...] = _mxu_dot(hid, w2_ref[...]) + cls_b2


# ----------------------------- parameter init --------------------------------
def init_params(key):
    keys = iter(jax.random.split(key, 32))

    def nrm(shape, dtype=jnp.bfloat16, std=0.02):
        return (std * jax.random.normal(next(keys), shape, jnp.float32)).astype(dtype)

    H, I = HIDDEN, INTERMEDIATE

    params = {
        'word_emb': nrm((VOCAB, H), jnp.float32),
        'pos_emb': nrm((MAX_POS, H), jnp.float32),
        'type_emb': nrm((TYPE_VOCAB, H), jnp.float32),
    }

    # Only the first NUM_LAYERS-1 encoder layers are ever consumed
    # (hidden_states[-2]); the module's final layer is dead code and omitted.
    wqkv, wo, wi, wd, lvecs = [], [], [], [], []
    for _ in range(LIVE_LAYERS):
        wq, wk, wv = nrm((H, H)), nrm((H, H)), nrm((H, H))
        wqkv.append(jnp.concatenate([wq, wk, wv], axis=1))   # (H, 3H) fused QKV, bf16
        wo.append(nrm((H, H)))
        wi.append(nrm((H, I)))
        wd.append(nrm((I, H)))
        # per-layer small vectors packed one-per-sublane-row (lane offset 0)
        slab = jnp.zeros((8, 128), jnp.float32)
        slab = slab.at[ROW_LN1G, :H].set(1.0)                # LN gammas = 1
        slab = slab.at[ROW_LN2G, :H].set(1.0)
        # bqkv / bo / LN betas / bi / bd stay zero-initialized
        lvecs.append(slab)

    misc = jnp.zeros((8, 128), jnp.float32)
    misc = misc.at[ROW_EMB_G, :H].set(1.0)                   # embedding LN gamma = 1
    # embedding LN beta, classifier biases stay zero

    params.update({
        'wqkv': jnp.stack(wqkv), 'wo': jnp.stack(wo),
        'wi': jnp.stack(wi), 'wd': jnp.stack(wd),
        'layer_vecs': jnp.stack(lvecs),                      # (L, 8, 128) f32
        'misc_vecs': misc,                                   # (8, 128) f32
        # classifier Linear(2H->H) split into mean-/max-pool halves, stacked
        'cls_w1': jnp.stack([nrm((H, H)), nrm((H, H))]),     # (2, H, H) bf16
        'cls_w2': nrm((H, N_CLASSES)),                       # (H, n_classes) bf16
    })
    return params


# ----------------------------- forward wrapper --------------------------------
def bert_classifier_forward(params, indices, mask):
    B, S = indices.shape
    mask_f = mask.astype(jnp.float32)

    # --- embeddings (gather glue in plain JAX) ---
    word = params['word_emb'][indices]                          # (B, S, H)
    pos = params['pos_emb'][jnp.arange(S)][None, :, :]          # (1, S, H)
    typ = params['type_emb'][0][None, None, :]                  # (1, 1, H)
    emb = word + pos + typ

    # single fused pallas_call: emb-LN + 3 live encoder layers + pool + classify
    logits = pl.pallas_call(
        fused_bert_classifier_kernel,
        out_shape=jax.ShapeDtypeStruct((B, N_CLASSES), jnp.float32),
        in_specs=[_VMEM] * 10,
        out_specs=_VMEM,
    )(emb, mask_f,
      params['wqkv'], params['wo'], params['wi'], params['wd'],
      params['layer_vecs'], params['misc_vecs'],
      params['cls_w1'], params['cls_w2'])
    return logits


# ----------------------------- main -------------------------------------------
if __name__ == "__main__":
    key = jax.random.PRNGKey(0)
    pkey, ikey = jax.random.split(key)

    params = init_params(pkey)

    B, S = 2, 8
    indices = jax.random.randint(ikey, (B, S), 0, VOCAB, dtype=jnp.int32)
    mask = jnp.array([[1, 1, 1, 1, 1, 1, 1, 1],
                      [1, 1, 1, 1, 1, 0, 0, 0]], dtype=jnp.int32)

    fwd = jax.jit(bert_classifier_forward)
    logits = fwd(params, indices, mask)
    logits = jax.block_until_ready(logits)
    assert logits.shape == (B, N_CLASSES)
    assert bool(jnp.all(jnp.isfinite(logits)))
    print("KERNEL_OK")
</pallas_src>

<mosaic_0001>
module attributes {stable_mosaic.version = 11 : i64} {
  func.func @fused_bert_classifier_kernel(%arg0: memref<2x8x32xf32, #tpu.memory_space<vmem>>, %arg1: memref<2x8xf32, #tpu.memory_space<vmem>>, %arg2: memref<3x32x96xbf16, #tpu.memory_space<vmem>>, %arg3: memref<3x32x32xbf16, #tpu.memory_space<vmem>>, %arg4: memref<3x32x64xbf16, #tpu.memory_space<vmem>>, %arg5: memref<3x64x32xbf16, #tpu.memory_space<vmem>>, %arg6: memref<3x8x128xf32, #tpu.memory_space<vmem>>, %arg7: memref<8x128xf32, #tpu.memory_space<vmem>>, %arg8: memref<2x32x32xbf16, #tpu.memory_space<vmem>>, %arg9: memref<32x3xbf16, #tpu.memory_space<vmem>>, %arg10: memref<2x3xf32, #tpu.memory_space<vmem>>) attributes {dimension_semantics = [], scalar_prefetch = 0 : i64, scratch_operands = 0 : i64, tpu.core_type = #tpu.core_type<tc>} {
    %c0 = arith.constant 0 : index
    %c0_0 = arith.constant 0 : index
    %c0_1 = arith.constant 0 : index
    %0 = vector.load %arg0[%c0, %c0_0, %c0_1] : memref<2x8x32xf32, #tpu.memory_space<vmem>>, vector<2x8x32xf32>
    %c0_2 = arith.constant 0 : index
    %c0_3 = arith.constant 0 : index
    %1 = vector.load %arg1[%c0_2, %c0_3] : memref<2x8xf32, #tpu.memory_space<vmem>>, vector<2x8xf32>
    %c0_4 = arith.constant 0 : index
    %c0_5 = arith.constant 0 : index
    %2 = vector.load %arg7[%c0_4, %c0_5] : memref<8x128xf32, #tpu.memory_space<vmem>>, vector<8x128xf32>
    %3 = vector.extract_strided_slice %2 {offsets = [0, 0], sizes = [1, 32], strides = [1, 1]} : vector<8x128xf32> to vector<1x32xf32>
    %4 = vector.extract_strided_slice %2 {offsets = [1, 0], sizes = [1, 32], strides = [1, 1]} : vector<8x128xf32> to vector<1x32xf32>
    %5 = vector.extract_strided_slice %2 {offsets = [2, 0], sizes = [1, 32], strides = [1, 1]} : vector<8x128xf32> to vector<1x32xf32>
    %6 = vector.extract_strided_slice %2 {offsets = [3, 0], sizes = [1, 3], strides = [1, 1]} : vector<8x128xf32> to vector<1x3xf32>
    %cst = arith.constant 1.000000e+00 : f32
    %7 = vector.broadcast %cst : f32 to vector<2x8xf32>
    %8 = arith.subf %7, %1 : vector<2x8xf32>
    %cst_6 = arith.constant -1.000000e+09 : f32
    %9 = vector.broadcast %cst_6 : f32 to vector<2x8xf32>
    %10 = arith.mulf %8, %9 : vector<2x8xf32>
    %11 = vector.shape_cast %10 : vector<2x8xf32> to vector<1x2x1x8xf32>
    %12 = vector.shape_cast %11 : vector<1x2x1x8xf32> to vector<1x2x1x8xf32>
    %13 = vector.broadcast %12 : vector<1x2x1x8xf32> to vector<4x2x1x8xf32>
    %14 = vector.shape_cast %13 : vector<4x2x1x8xf32> to vector<8x1x8xf32>
    %15 = vector.shape_cast %0 : vector<2x8x32xf32> to vector<16x32xf32>
    %cst_7 = arith.constant dense<0.000000e+00> : vector<16xf32>
    %16 = vector.multi_reduction <add>, %15, %cst_7 [1] : vector<16x32xf32> to vector<16xf32>
    %17 = vector.shape_cast %16 : vector<16xf32> to vector<16x1xf32>
    %cst_8 = arith.constant 3.200000e+01 : f32
    %18 = vector.broadcast %cst_8 : f32 to vector<16x1xf32>
    %19 = arith.divf %17, %18 : vector<16x1xf32>
    %20 = vector.broadcast %19 : vector<16x1xf32> to vector<16x32xf32>
    %21 = arith.subf %15, %20 : vector<16x32xf32>
    %22 = arith.mulf %21, %21 : vector<16x32xf32>
    %cst_9 = arith.constant dense<0.000000e+00> : vector<16xf32>
    %23 = vector.multi_reduction <add>, %22, %cst_9 [1] : vector<16x32xf32> to vector<16xf32>
    %24 = vector.shape_cast %23 : vector<16xf32> to vector<16x1xf32>
    %cst_10 = arith.constant 3.200000e+01 : f32
    %25 = vector.broadcast %cst_10 : f32 to vector<16x1xf32>
    %26 = arith.divf %24, %25 : vector<16x1xf32>
    %27 = vector.broadcast %19 : vector<16x1xf32> to vector<16x32xf32>
    %28 = arith.subf %15, %27 : vector<16x32xf32>
    %cst_11 = arith.constant 9.99999996E-13 : f32
    %29 = vector.broadcast %cst_11 : f32 to vector<16x1xf32>
    %30 = arith.addf %26, %29 : vector<16x1xf32>
    %31 = math.rsqrt %30 : vector<16x1xf32>
    %32 = vector.broadcast %31 : vector<16x1xf32> to vector<16x32xf32>
    %33 = arith.mulf %28, %32 : vector<16x32xf32>
    %34 = vector.broadcast %3 : vector<1x32xf32> to vector<16x32xf32>
    %35 = arith.mulf %33, %34 : vector<16x32xf32>
    %36 = vector.broadcast %4 : vector<1x32xf32> to vector<16x32xf32>
    %37 = arith.addf %35, %36 : vector<16x32xf32>
    %c0_12 = arith.constant 0 : index
    %c0_13 = arith.constant 0 : index
    %c0_14 = arith.constant 0 : index
    %38 = vector.load %arg6[%c0_12, %c0_13, %c0_14] : memref<3x8x128xf32, #tpu.memory_space<vmem>>, vector<1x8x128xf32>
    %39 = vector.shape_cast %38 : vector<1x8x128xf32> to vector<8x128xf32>
    %40 = vector.extract_strided_slice %39 {offsets = [0, 0], sizes = [1, 96], strides = [1, 1]} : vector<8x128xf32> to vector<1x96xf32>
    %41 = vector.extract_strided_slice %39 {offsets = [1, 0], sizes = [1, 32], strides = [1, 1]} : vector<8x128xf32> to vector<1x32xf32>
    %42 = vector.extract_strided_slice %39 {offsets = [2, 0], sizes = [1, 32], strides = [1, 1]} : vector<8x128xf32> to vector<1x32xf32>
    %43 = vector.extract_strided_slice %39 {offsets = [3, 0], sizes = [1, 32], strides = [1, 1]} : vector<8x128xf32> to vector<1x32xf32>
    %44 = vector.extract_strided_slice %39 {offsets = [4, 0], sizes = [1, 64], strides = [1, 1]} : vector<8x128xf32> to vector<1x64xf32>
    %45 = vector.extract_strided_slice %39 {offsets = [5, 0], sizes = [1, 32], strides = [1, 1]} : vector<8x128xf32> to vector<1x32xf32>
    %46 = vector.extract_strided_slice %39 {offsets = [6, 0], sizes = [1, 32], strides = [1, 1]} : vector<8x128xf32> to vector<1x32xf32>
    %47 = vector.extract_strided_slice %39 {offsets = [7, 0], sizes = [1, 32], strides = [1, 1]} : vector<8x128xf32> to vector<1x32xf32>
    %c0_15 = arith.constant 0 : index
    %c0_16 = arith.constant 0 : index
    %c0_17 = arith.constant 0 : index
    %48 = vector.load %arg2[%c0_15, %c0_16, %c0_17] : memref<3x32x96xbf16, #tpu.memory_space<vmem>>, vector<1x32x96xbf16>
    %49 = vector.shape_cast %48 : vector<1x32x96xbf16> to vector<32x96xbf16>
    %50 = arith.truncf %37 : vector<16x32xf32> to vector<16x32xbf16>
    %cst_18 = arith.constant dense<0.000000e+00> : vector<16x96xf32>
    %51 = tpu.matmul %50, %49, %cst_18 {dimension_numbers = #tpu.dot_dimension_numbers<[1], [0], [0], [1], [0, 0, 1, 1], [], []>} : vector<16x32xbf16>, vector<32x96xbf16>, vector<16x96xf32> -> vector<16x96xf32>
    %52 = vector.broadcast %40 : vector<1x96xf32> to vector<16x96xf32>
    %53 = arith.addf %51, %52 : vector<16x96xf32>
    %54 = vector.shape_cast %53 : vector<16x96xf32> to vector<2x8x12x8xf32>
    %55 = vector.extract_strided_slice %54 {offsets = [0, 0, 0, 0], sizes = [2, 8, 1, 8], strides = [1, 1, 1, 1]} : vector<2x8x12x8xf32> to vector<2x8x1x8xf32>
    %56 = vector.shape_cast %55 : vector<2x8x1x8xf32> to vector<2x8x8xf32>
    %57 = vector.extract_strided_slice %54 {offsets = [0, 0, 1, 0], sizes = [2, 8, 1, 8], strides = [1, 1, 1, 1]} : vector<2x8x12x8xf32> to vector<2x8x1x8xf32>
    %58 = vector.shape_cast %57 : vector<2x8x1x8xf32> to vector<2x8x8xf32>
    %59 = vector.extract_strided_slice %54 {offsets = [0, 0, 2, 0], sizes = [2, 8, 1, 8], strides = [1, 1, 1, 1]} : vector<2x8x12x8xf32> to vector<2x8x1x8xf32>
    %60 = vector.shape_cast %59 : vector<2x8x1x8xf32> to vector<2x8x8xf32>
    %61 = vector.extract_strided_slice %54 {offsets = [0, 0, 3, 0], sizes = [2, 8, 1, 8], strides = [1, 1, 1, 1]} : vector<2x8x12x8xf32> to vector<2x8x1x8xf32>
    %62 = vector.shape_cast %61 : vector<2x8x1x8xf32> to vector<2x8x8xf32>
    %63 = tpu.concatenate %56, %58, %60, %62 in 0 : vector<2x8x8xf32>, vector<2x8x8xf32>, vector<2x8x8xf32>, vector<2x8x8xf32> -> vector<8x8x8xf32>
    %64 = arith.truncf %63 : vector<8x8x8xf32> to vector<8x8x8xbf16>
    %65 = vector.extract_strided_slice %54 {offsets = [0, 0, 4, 0], sizes = [2, 8, 1, 8], strides = [1, 1, 1, 1]} : vector<2x8x12x8xf32> to vector<2x8x1x8xf32>
    %66 = vector.shape_cast %65 : vector<2x8x1x8xf32> to vector<2x8x8xf32>
    %67 = vector.extract_strided_slice %54 {offsets = [0, 0, 5, 0], sizes = [2, 8, 1, 8], strides = [1, 1, 1, 1]} : vector<2x8x12x8xf32> to vector<2x8x1x8xf32>
    %68 = vector.shape_cast %67 : vector<2x8x1x8xf32> to vector<2x8x8xf32>
    %69 = vector.extract_strided_slice %54 {offsets = [0, 0, 6, 0], sizes = [2, 8, 1, 8], strides = [1, 1, 1, 1]} : vector<2x8x12x8xf32> to vector<2x8x1x8xf32>
    %70 = vector.shape_cast %69 : vector<2x8x1x8xf32> to vector<2x8x8xf32>
    %71 = vector.extract_strided_slice %54 {offsets = [0, 0, 7, 0], sizes = [2, 8, 1, 8], strides = [1, 1, 1, 1]} : vector<2x8x12x8xf32> to vector<2x8x1x8xf32>
    %72 = vector.shape_cast %71 : vector<2x8x1x8xf32> to vector<2x8x8xf32>
    %73 = tpu.concatenate %66, %68, %70, %72 in 0 : vector<2x8x8xf32>, vector<2x8x8xf32>, vector<2x8x8xf32>, vector<2x8x8xf32> -> vector<8x8x8xf32>
    %74 = arith.truncf %73 : vector<8x8x8xf32> to vector<8x8x8xbf16>
    %75 = vector.extract_strided_slice %54 {offsets = [0, 0, 8, 0], sizes = [2, 8, 1, 8], strides = [1, 1, 1, 1]} : vector<2x8x12x8xf32> to vector<2x8x1x8xf32>
    %76 = vector.shape_cast %75 : vector<2x8x1x8xf32> to vector<2x8x8xf32>
    %77 = vector.extract_strided_slice %54 {offsets = [0, 0, 9, 0], sizes = [2, 8, 1, 8], strides = [1, 1, 1, 1]} : vector<2x8x12x8xf32> to vector<2x8x1x8xf32>
    %78 = vector.shape_cast %77 : vector<2x8x1x8xf32> to vector<2x8x8xf32>
    %79 = vector.extract_strided_slice %54 {offsets = [0, 0, 10, 0], sizes = [2, 8, 1, 8], strides = [1, 1, 1, 1]} : vector<2x8x12x8xf32> to vector<2x8x1x8xf32>
    %80 = vector.shape_cast %79 : vector<2x8x1x8xf32> to vector<2x8x8xf32>
    %81 = vector.extract_strided_slice %54 {offsets = [0, 0, 11, 0], sizes = [2, 8, 1, 8], strides = [1, 1, 1, 1]} : vector<2x8x12x8xf32> to vector<2x8x1x8xf32>
    %82 = vector.shape_cast %81 : vector<2x8x1x8xf32> to vector<2x8x8xf32>
    %83 = tpu.concatenate %76, %78, %80, %82 in 0 : vector<2x8x8xf32>, vector<2x8x8xf32>, vector<2x8x8xf32>, vector<2x8x8xf32> -> vector<8x8x8xf32>
    %84 = arith.truncf %83 : vector<8x8x8xf32> to vector<8x8x8xbf16>
    "tpu.trace_start"() <{level = 10 : i32, message = "nqd,nkd->nqk"}> : () -> ()
    %cst_19 = arith.constant dense<0.000000e+00> : vector<8x8x8xf32>
    %85 = tpu.matmul %64, %74, %cst_19 {dimension_numbers = #tpu.dot_dimension_numbers<[2], [2], [1], [1], [0, 0, 0, 1, 1, 1], [0], [0]>} : vector<8x8x8xbf16>, vector<8x8x8xbf16>, vector<8x8x8xf32> -> vector<8x8x8xf32>
    "tpu.trace_stop"() : () -> ()
    %cst_20 = arith.constant 0.353553385 : f32
    %86 = vector.broadcast %cst_20 : f32 to vector<8x8x8xf32>
    %87 = arith.mulf %85, %86 : vector<8x8x8xf32>
    %88 = vector.broadcast %14 : vector<8x1x8xf32> to vector<8x8x8xf32>
    %89 = arith.addf %87, %88 : vector<8x8x8xf32>
    %cst_21 = arith.constant dense<0xFF800000> : vector<8x8xf32>
    %90 = vector.multi_reduction <maximumf>, %89, %cst_21 [2] : vector<8x8x8xf32> to vector<8x8xf32>
    %91 = vector.shape_cast %90 : vector<8x8xf32> to vector<8x8x1xf32>
    %92 = vector.broadcast %91 : vector<8x8x1xf32> to vector<8x8x8xf32>
    %93 = arith.subf %89, %92 : vector<8x8x8xf32>
    %94 = math.exp %93 : vector<8x8x8xf32>
    %cst_22 = arith.constant dense<0.000000e+00> : vector<8x8xf32>
    %95 = vector.multi_reduction <add>, %94, %cst_22 [2] : vector<8x8x8xf32> to vector<8x8xf32>
    %96 = vector.shape_cast %95 : vector<8x8xf32> to vector<8x8x1xf32>
    %97 = tpu.reciprocal %96 {approx = true} : vector<8x8x1xf32> -> vector<8x8x1xf32>
    %98 = vector.broadcast %97 : vector<8x8x1xf32> to vector<8x8x8xf32>
    %99 = arith.mulf %94, %98 : vector<8x8x8xf32>
    %100 = arith.truncf %99 : vector<8x8x8xf32> to vector<8x8x8xbf16>
    "tpu.trace_start"() <{level = 10 : i32, message = "nqk,nkd->nqd"}> : () -> ()
    %cst_23 = arith.constant dense<0.000000e+00> : vector<8x8x8xf32>
    %101 = tpu.matmul %100, %84, %cst_23 {dimension_numbers = #tpu.dot_dimension_numbers<[2], [1], [1], [2], [0, 0, 0, 1, 1, 2], [0], [0]>} : vector<8x8x8xbf16>, vector<8x8x8xbf16>, vector<8x8x8xf32> -> vector<8x8x8xf32>
    "tpu.trace_stop"() : () -> ()
    %102 = vector.extract_strided_slice %101 {offsets = [0, 0, 0], sizes = [2, 8, 8], strides = [1, 1, 1]} : vector<8x8x8xf32> to vector<2x8x8xf32>
    %103 = vector.shape_cast %102 : vector<2x8x8xf32> to vector<16x8xf32>
    %104 = vector.extract_strided_slice %101 {offsets = [2, 0, 0], sizes = [2, 8, 8], strides = [1, 1, 1]} : vector<8x8x8xf32> to vector<2x8x8xf32>
    %105 = vector.shape_cast %104 : vector<2x8x8xf32> to vector<16x8xf32>
    %106 = vector.extract_strided_slice %101 {offsets = [4, 0, 0], sizes = [2, 8, 8], strides = [1, 1, 1]} : vector<8x8x8xf32> to vector<2x8x8xf32>
    %107 = vector.shape_cast %106 : vector<2x8x8xf32> to vector<16x8xf32>
    %108 = vector.extract_strided_slice %101 {offsets = [6, 0, 0], sizes = [2, 8, 8], strides = [1, 1, 1]} : vector<8x8x8xf32> to vector<2x8x8xf32>
    %109 = vector.shape_cast %108 : vector<2x8x8xf32> to vector<16x8xf32>
    %110 = tpu.concatenate %103, %105, %107, %109 in 1 : vector<16x8xf32>, vector<16x8xf32>, vector<16x8xf32>, vector<16x8xf32> -> vector<16x32xf32>
    %c0_24 = arith.constant 0 : index
    %c0_25 = arith.constant 0 : index
    %c0_26 = arith.constant 0 : index
    %111 = vector.load %arg3[%c0_24, %c0_25, %c0_26] : memref<3x32x32xbf16, #tpu.memory_space<vmem>>, vector<1x32x32xbf16>
    %112 = vector.shape_cast %111 : vector<1x32x32xbf16> to vector<32x32xbf16>
    %113 = arith.truncf %110 : vector<16x32xf32> to vector<16x32xbf16>
    %cst_27 = arith.constant dense<0.000000e+00> : vector<16x32xf32>
    %114 = tpu.matmul %113, %112, %cst_27 {dimension_numbers = #tpu.dot_dimension_numbers<[1], [0], [0], [1], [0, 0, 1, 1], [], []>} : vector<16x32xbf16>, vector<32x32xbf16>, vector<16x32xf32> -> vector<16x32xf32>
    %115 = vector.broadcast %41 : vector<1x32xf32> to vector<16x32xf32>
    %116 = arith.addf %114, %115 : vector<16x32xf32>
    %117 = arith.addf %116, %37 : vector<16x32xf32>
    %cst_28 = arith.constant dense<0.000000e+00> : vector<16xf32>
    %118 = vector.multi_reduction <add>, %117, %cst_28 [1] : vector<16x32xf32> to vector<16xf32>
    %119 = vector.shape_cast %118 : vector<16xf32> to vector<16x1xf32>
    %cst_29 = arith.constant 3.200000e+01 : f32
    %120 = vector.broadcast %cst_29 : f32 to vector<16x1xf32>
    %121 = arith.divf %119, %120 : vector<16x1xf32>
    %122 = vector.broadcast %121 : vector<16x1xf32> to vector<16x32xf32>
    %123 = arith.subf %117, %122 : vector<16x32xf32>
    %124 = arith.mulf %123, %123 : vector<16x32xf32>
    %cst_30 = arith.constant dense<0.000000e+00> : vector<16xf32>
    %125 = vector.multi_reduction <add>, %124, %cst_30 [1] : vector<16x32xf32> to vector<16xf32>
    %126 = vector.shape_cast %125 : vector<16xf32> to vector<16x1xf32>
    %cst_31 = arith.constant 3.200000e+01 : f32
    %127 = vector.broadcast %cst_31 : f32 to vector<16x1xf32>
    %128 = arith.divf %126, %127 : vector<16x1xf32>
    %129 = vector.broadcast %121 : vector<16x1xf32> to vector<16x32xf32>
    %130 = arith.subf %117, %129 : vector<16x32xf32>
    %cst_32 = arith.constant 9.99999996E-13 : f32
    %131 = vector.broadcast %cst_32 : f32 to vector<16x1xf32>
    %132 = arith.addf %128, %131 : vector<16x1xf32>
    %133 = math.rsqrt %132 : vector<16x1xf32>
    %134 = vector.broadcast %133 : vector<16x1xf32> to vector<16x32xf32>
    %135 = arith.mulf %130, %134 : vector<16x32xf32>
    %136 = vector.broadcast %42 : vector<1x32xf32> to vector<16x32xf32>
    %137 = arith.mulf %135, %136 : vector<16x32xf32>
    %138 = vector.broadcast %43 : vector<1x32xf32> to vector<16x32xf32>
    %139 = arith.addf %137, %138 : vector<16x32xf32>
    %c0_33 = arith.constant 0 : index
    %c0_34 = arith.constant 0 : index
    %c0_35 = arith.constant 0 : index
    %140 = vector.load %arg4[%c0_33, %c0_34, %c0_35] : memref<3x32x64xbf16, #tpu.memory_space<vmem>>, vector<1x32x64xbf16>
    %141 = vector.shape_cast %140 : vector<1x32x64xbf16> to vector<32x64xbf16>
    %142 = arith.truncf %139 : vector<16x32xf32> to vector<16x32xbf16>
    %cst_36 = arith.constant dense<0.000000e+00> : vector<16x64xf32>
    %143 = tpu.matmul %142, %141, %cst_36 {dimension_numbers = #tpu.dot_dimension_numbers<[1], [0], [0], [1], [0, 0, 1, 1], [], []>} : vector<16x32xbf16>, vector<32x64xbf16>, vector<16x64xf32> -> vector<16x64xf32>
    %144 = vector.broadcast %44 : vector<1x64xf32> to vector<16x64xf32>
    %145 = arith.addf %143, %144 : vector<16x64xf32>
    %146 = arith.mulf %145, %145 : vector<16x64xf32>
    %147 = arith.mulf %145, %146 : vector<16x64xf32>
    %cst_37 = arith.constant 4.471500e-02 : f32
    %148 = vector.broadcast %cst_37 : f32 to vector<16x64xf32>
    %149 = arith.mulf %148, %147 : vector<16x64xf32>
    %150 = arith.addf %145, %149 : vector<16x64xf32>
    %cst_38 = arith.constant 0.797884583 : f32
    %151 = vector.broadcast %cst_38 : f32 to vector<16x64xf32>
    %152 = arith.mulf %151, %150 : vector<16x64xf32>
    %153 = math.tanh %152 : vector<16x64xf32>
    %cst_39 = arith.constant 1.000000e+00 : f32
    %154 = vector.broadcast %cst_39 : f32 to vector<16x64xf32>
    %155 = arith.addf %154, %153 : vector<16x64xf32>
    %cst_40 = arith.constant 5.000000e-01 : f32
    %156 = vector.broadcast %cst_40 : f32 to vector<16x64xf32>
    %157 = arith.mulf %156, %155 : vector<16x64xf32>
    %158 = arith.mulf %145, %157 : vector<16x64xf32>
    %c0_41 = arith.constant 0 : index
    %c0_42 = arith.constant 0 : index
    %c0_43 = arith.constant 0 : index
    %159 = vector.load %arg5[%c0_41, %c0_42, %c0_43] : memref<3x64x32xbf16, #tpu.memory_space<vmem>>, vector<1x64x32xbf16>
    %160 = vector.shape_cast %159 : vector<1x64x32xbf16> to vector<64x32xbf16>
    %161 = arith.truncf %158 : vector<16x64xf32> to vector<16x64xbf16>
    %cst_44 = arith.constant dense<0.000000e+00> : vector<16x32xf32>
    %162 = tpu.matmul %161, %160, %cst_44 {dimension_numbers = #tpu.dot_dimension_numbers<[1], [0], [0], [1], [0, 0, 1, 1], [], []>} : vector<16x64xbf16>, vector<64x32xbf16>, vector<16x32xf32> -> vector<16x32xf32>
    %163 = vector.broadcast %45 : vector<1x32xf32> to vector<16x32xf32>
    %164 = arith.addf %162, %163 : vector<16x32xf32>
    %165 = arith.addf %164, %139 : vector<16x32xf32>
    %cst_45 = arith.constant dense<0.000000e+00> : vector<16xf32>
    %166 = vector.multi_reduction <add>, %165, %cst_45 [1] : vector<16x32xf32> to vector<16xf32>
    %167 = vector.shape_cast %166 : vector<16xf32> to vector<16x1xf32>
    %cst_46 = arith.constant 3.200000e+01 : f32
    %168 = vector.broadcast %cst_46 : f32 to vector<16x1xf32>
    %169 = arith.divf %167, %168 : vector<16x1xf32>
    %170 = vector.broadcast %169 : vector<16x1xf32> to vector<16x32xf32>
    %171 = arith.subf %165, %170 : vector<16x32xf32>
    %172 = arith.mulf %171, %171 : vector<16x32xf32>
    %cst_47 = arith.constant dense<0.000000e+00> : vector<16xf32>
    %173 = vector.multi_reduction <add>, %172, %cst_47 [1] : vector<16x32xf32> to vector<16xf32>
    %174 = vector.shape_cast %173 : vector<16xf32> to vector<16x1xf32>
    %cst_48 = arith.constant 3.200000e+01 : f32
    %175 = vector.broadcast %cst_48 : f32 to vector<16x1xf32>
    %176 = arith.divf %174, %175 : vector<16x1xf32>
    %177 = vector.broadcast %169 : vector<16x1xf32> to vector<16x32xf32>
    %178 = arith.subf %165, %177 : vector<16x32xf32>
    %cst_49 = arith.constant 9.99999996E-13 : f32
    %179 = vector.broadcast %cst_49 : f32 to vector<16x1xf32>
    %180 = arith.addf %176, %179 : vector<16x1xf32>
    %181 = math.rsqrt %180 : vector<16x1xf32>
    %182 = vector.broadcast %181 : vector<16x1xf32> to vector<16x32xf32>
    %183 = arith.mulf %178, %182 : vector<16x32xf32>
    %184 = vector.broadcast %46 : vector<1x32xf32> to vector<16x32xf32>
    %185 = arith.mulf %183, %184 : vector<16x32xf32>
    %186 = vector.broadcast %47 : vector<1x32xf32> to vector<16x32xf32>
    %187 = arith.addf %185, %186 : vector<16x32xf32>
    %c1 = arith.constant 1 : index
    %c0_50 = arith.constant 0 : index
    %c0_51 = arith.constant 0 : index
    %188 = vector.load %arg6[%c1, %c0_50, %c0_51] : memref<3x8x128xf32, #tpu.memory_space<vmem>>, vector<1x8x128xf32>
    %189 = vector.shape_cast %188 : vector<1x8x128xf32> to vector<8x128xf32>
    %190 = vector.extract_strided_slice %189 {offsets = [0, 0], sizes = [1, 96], strides = [1, 1]} : vector<8x128xf32> to vector<1x96xf32>
    %191 = vector.extract_strided_slice %189 {offsets = [1, 0], sizes = [1, 32], strides = [1, 1]} : vector<8x128xf32> to vector<1x32xf32>
    %192 = vector.extract_strided_slice %189 {offsets = [2, 0], sizes = [1, 32], strides = [1, 1]} : vector<8x128xf32> to vector<1x32xf32>
    %193 = vector.extract_strided_slice %189 {offsets = [3, 0], sizes = [1, 32], strides = [1, 1]} : vector<8x128xf32> to vector<1x32xf32>
    %194 = vector.extract_strided_slice %189 {offsets = [4, 0], sizes = [1, 64], strides = [1, 1]} : vector<8x128xf32> to vector<1x64xf32>
    %195 = vector.extract_strided_slice %189 {offsets = [5, 0], sizes = [1, 32], strides = [1, 1]} : vector<8x128xf32> to vector<1x32xf32>
    %196 = vector.extract_strided_slice %189 {offsets = [6, 0], sizes = [1, 32], strides = [1, 1]} : vector<8x128xf32> to vector<1x32xf32>
    %197 = vector.extract_strided_slice %189 {offsets = [7, 0], sizes = [1, 32], strides = [1, 1]} : vector<8x128xf32> to vector<1x32xf32>
    %c1_52 = arith.constant 1 : index
    %c0_53 = arith.constant 0 : index
    %c0_54 = arith.constant 0 : index
    %198 = vector.load %arg2[%c1_52, %c0_53, %c0_54] : memref<3x32x96xbf16, #tpu.memory_space<vmem>>, vector<1x32x96xbf16>
    %199 = vector.shape_cast %198 : vector<1x32x96xbf16> to vector<32x96xbf16>
    %200 = arith.truncf %187 : vector<16x32xf32> to vector<16x32xbf16>
    %cst_55 = arith.constant dense<0.000000e+00> : vector<16x96xf32>
    %201 = tpu.matmul %200, %199, %cst_55 {dimension_numbers = #tpu.dot_dimension_numbers<[1], [0], [0], [1], [0, 0, 1, 1], [], []>} : vector<16x32xbf16>, vector<32x96xbf16>, vector<16x96xf32> -> vector<16x96xf32>
    %202 = vector.broadcast %190 : vector<1x96xf32> to vector<16x96xf32>
    %203 = arith.addf %201, %202 : vector<16x96xf32>
    %204 = vector.shape_cast %203 : vector<16x96xf32> to vector<2x8x12x8xf32>
    %205 = vector.extract_strided_slice %204 {offsets = [0, 0, 0, 0], sizes = [2, 8, 1, 8], strides = [1, 1, 1, 1]} : vector<2x8x12x8xf32> to vector<2x8x1x8xf32>
    %206 = vector.shape_cast %205 : vector<2x8x1x8xf32> to vector<2x8x8xf32>
    %207 = vector.extract_strided_slice %204 {offsets = [0, 0, 1, 0], sizes = [2, 8, 1, 8], strides = [1, 1, 1, 1]} : vector<2x8x12x8xf32> to vector<2x8x1x8xf32>
    %208 = vector.shape_cast %207 : vector<2x8x1x8xf32> to vector<2x8x8xf32>
    %209 = vector.extract_strided_slice %204 {offsets = [0, 0, 2, 0], sizes = [2, 8, 1, 8], strides = [1, 1, 1, 1]} : vector<2x8x12x8xf32> to vector<2x8x1x8xf32>
    %210 = vector.shape_cast %209 : vector<2x8x1x8xf32> to vector<2x8x8xf32>
    %211 = vector.extract_strided_slice %204 {offsets = [0, 0, 3, 0], sizes = [2, 8, 1, 8], strides = [1, 1, 1, 1]} : vector<2x8x12x8xf32> to vector<2x8x1x8xf32>
    %212 = vector.shape_cast %211 : vector<2x8x1x8xf32> to vector<2x8x8xf32>
    %213 = tpu.concatenate %206, %208, %210, %212 in 0 : vector<2x8x8xf32>, vector<2x8x8xf32>, vector<2x8x8xf32>, vector<2x8x8xf32> -> vector<8x8x8xf32>
    %214 = arith.truncf %213 : vector<8x8x8xf32> to vector<8x8x8xbf16>
    %215 = vector.extract_strided_slice %204 {offsets = [0, 0, 4, 0], sizes = [2, 8, 1, 8], strides = [1, 1, 1, 1]} : vector<2x8x12x8xf32> to vector<2x8x1x8xf32>
    %216 = vector.shape_cast %215 : vector<2x8x1x8xf32> to vector<2x8x8xf32>
    %217 = vector.extract_strided_slice %204 {offsets = [0, 0, 5, 0], sizes = [2, 8, 1, 8], strides = [1, 1, 1, 1]} : vector<2x8x12x8xf32> to vector<2x8x1x8xf32>
    %218 = vector.shape_cast %217 : vector<2x8x1x8xf32> to vector<2x8x8xf32>
    %219 = vector.extract_strided_slice %204 {offsets = [0, 0, 6, 0], sizes = [2, 8, 1, 8], strides = [1, 1, 1, 1]} : vector<2x8x12x8xf32> to vector<2x8x1x8xf32>
    %220 = vector.shape_cast %219 : vector<2x8x1x8xf32> to vector<2x8x8xf32>
    %221 = vector.extract_strided_slice %204 {offsets = [0, 0, 7, 0], sizes = [2, 8, 1, 8], strides = [1, 1, 1, 1]} : vector<2x8x12x8xf32> to vector<2x8x1x8xf32>
    %222 = vector.shape_cast %221 : vector<2x8x1x8xf32> to vector<2x8x8xf32>
    %223 = tpu.concatenate %216, %218, %220, %222 in 0 : vector<2x8x8xf32>, vector<2x8x8xf32>, vector<2x8x8xf32>, vector<2x8x8xf32> -> vector<8x8x8xf32>
    %224 = arith.truncf %223 : vector<8x8x8xf32> to vector<8x8x8xbf16>
    %225 = vector.extract_strided_slice %204 {offsets = [0, 0, 8, 0], sizes = [2, 8, 1, 8], strides = [1, 1, 1, 1]} : vector<2x8x12x8xf32> to vector<2x8x1x8xf32>
    %226 = vector.shape_cast %225 : vector<2x8x1x8xf32> to vector<2x8x8xf32>
    %227 = vector.extract_strided_slice %204 {offsets = [0, 0, 9, 0], sizes = [2, 8, 1, 8], strides = [1, 1, 1, 1]} : vector<2x8x12x8xf32> to vector<2x8x1x8xf32>
    %228 = vector.shape_cast %227 : vector<2x8x1x8xf32> to vector<2x8x8xf32>
    %229 = vector.extract_strided_slice %204 {offsets = [0, 0, 10, 0], sizes = [2, 8, 1, 8], strides = [1, 1, 1, 1]} : vector<2x8x12x8xf32> to vector<2x8x1x8xf32>
    %230 = vector.shape_cast %229 : vector<2x8x1x8xf32> to vector<2x8x8xf32>
    %231 = vector.extract_strided_slice %204 {offsets = [0, 0, 11, 0], sizes = [2, 8, 1, 8], strides = [1, 1, 1, 1]} : vector<2x8x12x8xf32> to vector<2x8x1x8xf32>
    %232 = vector.shape_cast %231 : vector<2x8x1x8xf32> to vector<2x8x8xf32>
    %233 = tpu.concatenate %226, %228, %230, %232 in 0 : vector<2x8x8xf32>, vector<2x8x8xf32>, vector<2x8x8xf32>, vector<2x8x8xf32> -> vector<8x8x8xf32>
    %234 = arith.truncf %233 : vector<8x8x8xf32> to vector<8x8x8xbf16>
    "tpu.trace_start"() <{level = 10 : i32, message = "nqd,nkd->nqk"}> : () -> ()
    %cst_56 = arith.constant dense<0.000000e+00> : vector<8x8x8xf32>
    %235 = tpu.matmul %214, %224, %cst_56 {dimension_numbers = #tpu.dot_dimension_numbers<[2], [2], [1], [1], [0, 0, 0, 1, 1, 1], [0], [0]>} : vector<8x8x8xbf16>, vector<8x8x8xbf16>, vector<8x8x8xf32> -> vector<8x8x8xf32>
    "tpu.trace_stop"() : () -> ()
    %cst_57 = arith.constant 0.353553385 : f32
    %236 = vector.broadcast %cst_57 : f32 to vector<8x8x8xf32>
    %237 = arith.mulf %235, %236 : vector<8x8x8xf32>
    %238 = vector.broadcast %14 : vector<8x1x8xf32> to vector<8x8x8xf32>
    %239 = arith.addf %237, %238 : vector<8x8x8xf32>
    %cst_58 = arith.constant dense<0xFF800000> : vector<8x8xf32>
    %240 = vector.multi_reduction <maximumf>, %239, %cst_58 [2] : vector<8x8x8xf32> to vector<8x8xf32>
    %241 = vector.shape_cast %240 : vector<8x8xf32> to vector<8x8x1xf32>
    %242 = vector.broadcast %241 : vector<8x8x1xf32> to vector<8x8x8xf32>
    %243 = arith.subf %239, %242 : vector<8x8x8xf32>
    %244 = math.exp %243 : vector<8x8x8xf32>
    %cst_59 = arith.constant dense<0.000000e+00> : vector<8x8xf32>
    %245 = vector.multi_reduction <add>, %244, %cst_59 [2] : vector<8x8x8xf32> to vector<8x8xf32>
    %246 = vector.shape_cast %245 : vector<8x8xf32> to vector<8x8x1xf32>
    %247 = tpu.reciprocal %246 {approx = true} : vector<8x8x1xf32> -> vector<8x8x1xf32>
    %248 = vector.broadcast %247 : vector<8x8x1xf32> to vector<8x8x8xf32>
    %249 = arith.mulf %244, %248 : vector<8x8x8xf32>
    %250 = arith.truncf %249 : vector<8x8x8xf32> to vector<8x8x8xbf16>
    "tpu.trace_start"() <{level = 10 : i32, message = "nqk,nkd->nqd"}> : () -> ()
    %cst_60 = arith.constant dense<0.000000e+00> : vector<8x8x8xf32>
    %251 = tpu.matmul %250, %234, %cst_60 {dimension_numbers = #tpu.dot_dimension_numbers<[2], [1], [1], [2], [0, 0, 0, 1, 1, 2], [0], [0]>} : vector<8x8x8xbf16>, vector<8x8x8xbf16>, vector<8x8x8xf32> -> vector<8x8x8xf32>
    "tpu.trace_stop"() : () -> ()
    %252 = vector.extract_strided_slice %251 {offsets = [0, 0, 0], sizes = [2, 8, 8], strides = [1, 1, 1]} : vector<8x8x8xf32> to vector<2x8x8xf32>
    %253 = vector.shape_cast %252 : vector<2x8x8xf32> to vector<16x8xf32>
    %254 = vector.extract_strided_slice %251 {offsets = [2, 0, 0], sizes = [2, 8, 8], strides = [1, 1, 1]} : vector<8x8x8xf32> to vector<2x8x8xf32>
    %255 = vector.shape_cast %254 : vector<2x8x8xf32> to vector<16x8xf32>
    %256 = vector.extract_strided_slice %251 {offsets = [4, 0, 0], sizes = [2, 8, 8], strides = [1, 1, 1]} : vector<8x8x8xf32> to vector<2x8x8xf32>
    %257 = vector.shape_cast %256 : vector<2x8x8xf32> to vector<16x8xf32>
    %258 = vector.extract_strided_slice %251 {offsets = [6, 0, 0], sizes = [2, 8, 8], strides = [1, 1, 1]} : vector<8x8x8xf32> to vector<2x8x8xf32>
    %259 = vector.shape_cast %258 : vector<2x8x8xf32> to vector<16x8xf32>
    %260 = tpu.concatenate %253, %255, %257, %259 in 1 : vector<16x8xf32>, vector<16x8xf32>, vector<16x8xf32>, vector<16x8xf32> -> vector<16x32xf32>
    %c1_61 = arith.constant 1 : index
    %c0_62 = arith.constant 0 : index
    %c0_63 = arith.constant 0 : index
    %261 = vector.load %arg3[%c1_61, %c0_62, %c0_63] : memref<3x32x32xbf16, #tpu.memory_space<vmem>>, vector<1x32x32xbf16>
    %262 = vector.shape_cast %261 : vector<1x32x32xbf16> to vector<32x32xbf16>
    %263 = arith.truncf %260 : vector<16x32xf32> to vector<16x32xbf16>
    %cst_64 = arith.constant dense<0.000000e+00> : vector<16x32xf32>
    %264 = tpu.matmul %263, %262, %cst_64 {dimension_numbers = #tpu.dot_dimension_numbers<[1], [0], [0], [1], [0, 0, 1, 1], [], []>} : vector<16x32xbf16>, vector<32x32xbf16>, vector<16x32xf32> -> vector<16x32xf32>
    %265 = vector.broadcast %191 : vector<1x32xf32> to vector<16x32xf32>
    %266 = arith.addf %264, %265 : vector<16x32xf32>
    %267 = arith.addf %266, %187 : vector<16x32xf32>
    %cst_65 = arith.constant dense<0.000000e+00> : vector<16xf32>
    %268 = vector.multi_reduction <add>, %267, %cst_65 [1] : vector<16x32xf32> to vector<16xf32>
    %269 = vector.shape_cast %268 : vector<16xf32> to vector<16x1xf32>
    %cst_66 = arith.constant 3.200000e+01 : f32
    %270 = vector.broadcast %cst_66 : f32 to vector<16x1xf32>
    %271 = arith.divf %269, %270 : vector<16x1xf32>
    %272 = vector.broadcast %271 : vector<16x1xf32> to vector<16x32xf32>
    %273 = arith.subf %267, %272 : vector<16x32xf32>
    %274 = arith.mulf %273, %273 : vector<16x32xf32>
    %cst_67 = arith.constant dense<0.000000e+00> : vector<16xf32>
    %275 = vector.multi_reduction <add>, %274, %cst_67 [1] : vector<16x32xf32> to vector<16xf32>
    %276 = vector.shape_cast %275 : vector<16xf32> to vector<16x1xf32>
    %cst_68 = arith.constant 3.200000e+01 : f32
    %277 = vector.broadcast %cst_68 : f32 to vector<16x1xf32>
    %278 = arith.divf %276, %277 : vector<16x1xf32>
    %279 = vector.broadcast %271 : vector<16x1xf32> to vector<16x32xf32>
    %280 = arith.subf %267, %279 : vector<16x32xf32>
    %cst_69 = arith.constant 9.99999996E-13 : f32
    %281 = vector.broadcast %cst_69 : f32 to vector<16x1xf32>
    %282 = arith.addf %278, %281 : vector<16x1xf32>
    %283 = math.rsqrt %282 : vector<16x1xf32>
    %284 = vector.broadcast %283 : vector<16x1xf32> to vector<16x32xf32>
    %285 = arith.mulf %280, %284 : vector<16x32xf32>
    %286 = vector.broadcast %192 : vector<1x32xf32> to vector<16x32xf32>
    %287 = arith.mulf %285, %286 : vector<16x32xf32>
    %288 = vector.broadcast %193 : vector<1x32xf32> to vector<16x32xf32>
    %289 = arith.addf %287, %288 : vector<16x32xf32>
    %c1_70 = arith.constant 1 : index
    %c0_71 = arith.constant 0 : index
    %c0_72 = arith.constant 0 : index
    %290 = vector.load %arg4[%c1_70, %c0_71, %c0_72] : memref<3x32x64xbf16, #tpu.memory_space<vmem>>, vector<1x32x64xbf16>
    %291 = vector.shape_cast %290 : vector<1x32x64xbf16> to vector<32x64xbf16>
    %292 = arith.truncf %289 : vector<16x32xf32> to vector<16x32xbf16>
    %cst_73 = arith.constant dense<0.000000e+00> : vector<16x64xf32>
    %293 = tpu.matmul %292, %291, %cst_73 {dimension_numbers = #tpu.dot_dimension_numbers<[1], [0], [0], [1], [0, 0, 1, 1], [], []>} : vector<16x32xbf16>, vector<32x64xbf16>, vector<16x64xf32> -> vector<16x64xf32>
    %294 = vector.broadcast %194 : vector<1x64xf32> to vector<16x64xf32>
    %295 = arith.addf %293, %294 : vector<16x64xf32>
    %296 = arith.mulf %295, %295 : vector<16x64xf32>
    %297 = arith.mulf %295, %296 : vector<16x64xf32>
    %cst_74 = arith.constant 4.471500e-02 : f32
    %298 = vector.broadcast %cst_74 : f32 to vector<16x64xf32>
    %299 = arith.mulf %298, %297 : vector<16x64xf32>
    %300 = arith.addf %295, %299 : vector<16x64xf32>
    %cst_75 = arith.constant 0.797884583 : f32
    %301 = vector.broadcast %cst_75 : f32 to vector<16x64xf32>
    %302 = arith.mulf %301, %300 : vector<16x64xf32>
    %303 = math.tanh %302 : vector<16x64xf32>
    %cst_76 = arith.constant 1.000000e+00 : f32
    %304 = vector.broadcast %cst_76 : f32 to vector<16x64xf32>
    %305 = arith.addf %304, %303 : vector<16x64xf32>
    %cst_77 = arith.constant 5.000000e-01 : f32
    %306 = vector.broadcast %cst_77 : f32 to vector<16x64xf32>
    %307 = arith.mulf %306, %305 : vector<16x64xf32>
    %308 = arith.mulf %295, %307 : vector<16x64xf32>
    %c1_78 = arith.constant 1 : index
    %c0_79 = arith.constant 0 : index
    %c0_80 = arith.constant 0 : index
    %309 = vector.load %arg5[%c1_78, %c0_79, %c0_80] : memref<3x64x32xbf16, #tpu.memory_space<vmem>>, vector<1x64x32xbf16>
    %310 = vector.shape_cast %309 : vector<1x64x32xbf16> to vector<64x32xbf16>
    %311 = arith.truncf %308 : vector<16x64xf32> to vector<16x64xbf16>
    %cst_81 = arith.constant dense<0.000000e+00> : vector<16x32xf32>
    %312 = tpu.matmul %311, %310, %cst_81 {dimension_numbers = #tpu.dot_dimension_numbers<[1], [0], [0], [1], [0, 0, 1, 1], [], []>} : vector<16x64xbf16>, vector<64x32xbf16>, vector<16x32xf32> -> vector<16x32xf32>
    %313 = vector.broadcast %195 : vector<1x32xf32> to vector<16x32xf32>
    %314 = arith.addf %312, %313 : vector<16x32xf32>
    %315 = arith.addf %314, %289 : vector<16x32xf32>
    %cst_82 = arith.constant dense<0.000000e+00> : vector<16xf32>
    %316 = vector.multi_reduction <add>, %315, %cst_82 [1] : vector<16x32xf32> to vector<16xf32>
    %317 = vector.shape_cast %316 : vector<16xf32> to vector<16x1xf32>
    %cst_83 = arith.constant 3.200000e+01 : f32
    %318 = vector.broadcast %cst_83 : f32 to vector<16x1xf32>
    %319 = arith.divf %317, %318 : vector<16x1xf32>
    %320 = vector.broadcast %319 : vector<16x1xf32> to vector<16x32xf32>
    %321 = arith.subf %315, %320 : vector<16x32xf32>
    %322 = arith.mulf %321, %321 : vector<16x32xf32>
    %cst_84 = arith.constant dense<0.000000e+00> : vector<16xf32>
    %323 = vector.multi_reduction <add>, %322, %cst_84 [1] : vector<16x32xf32> to vector<16xf32>
    %324 = vector.shape_cast %323 : vector<16xf32> to vector<16x1xf32>
    %cst_85 = arith.constant 3.200000e+01 : f32
    %325 = vector.broadcast %cst_85 : f32 to vector<16x1xf32>
    %326 = arith.divf %324, %325 : vector<16x1xf32>
    %327 = vector.broadcast %319 : vector<16x1xf32> to vector<16x32xf32>
    %328 = arith.subf %315, %327 : vector<16x32xf32>
    %cst_86 = arith.constant 9.99999996E-13 : f32
    %329 = vector.broadcast %cst_86 : f32 to vector<16x1xf32>
    %330 = arith.addf %326, %329 : vector<16x1xf32>
    %331 = math.rsqrt %330 : vector<16x1xf32>
    %332 = vector.broadcast %331 : vector<16x1xf32> to vector<16x32xf32>
    %333 = arith.mulf %328, %332 : vector<16x32xf32>
    %334 = vector.broadcast %196 : vector<1x32xf32> to vector<16x32xf32>
    %335 = arith.mulf %333, %334 : vector<16x32xf32>
    %336 = vector.broadcast %197 : vector<1x32xf32> to vector<16x32xf32>
    %337 = arith.addf %335, %336 : vector<16x32xf32>
    %c2 = arith.constant 2 : index
    %c0_87 = arith.constant 0 : index
    %c0_88 = arith.constant 0 : index
    %338 = vector.load %arg6[%c2, %c0_87, %c0_88] : memref<3x8x128xf32, #tpu.memory_space<vmem>>, vector<1x8x128xf32>
    %339 = vector.shape_cast %338 : vector<1x8x128xf32> to vector<8x128xf32>
    %340 = vector.extract_strided_slice %339 {offsets = [0, 0], sizes = [1, 96], strides = [1, 1]} : vector<8x128xf32> to vector<1x96xf32>
    %341 = vector.extract_strided_slice %339 {offsets = [1, 0], sizes = [1, 32], strides = [1, 1]} : vector<8x128xf32> to vector<1x32xf32>
    %342 = vector.extract_strided_slice %339 {offsets = [2, 0], sizes = [1, 32], strides = [1, 1]} : vector<8x128xf32> to vector<1x32xf32>
    %343 = vector.extract_strided_slice %339 {offsets = [3, 0], sizes = [1, 32], strides = [1, 1]} : vector<8x128xf32> to vector<1x32xf32>
    %344 = vector.extract_strided_slice %339 {offsets = [4, 0], sizes = [1, 64], strides = [1, 1]} : vector<8x128xf32> to vector<1x64xf32>
    %345 = vector.extract_strided_slice %339 {offsets = [5, 0], sizes = [1, 32], strides = [1, 1]} : vector<8x128xf32> to vector<1x32xf32>
    %346 = vector.extract_strided_slice %339 {offsets = [6, 0], sizes = [1, 32], strides = [1, 1]} : vector<8x128xf32> to vector<1x32xf32>
    %347 = vector.extract_strided_slice %339 {offsets = [7, 0], sizes = [1, 32], strides = [1, 1]} : vector<8x128xf32> to vector<1x32xf32>
    %c2_89 = arith.constant 2 : index
    %c0_90 = arith.constant 0 : index
    %c0_91 = arith.constant 0 : index
    %348 = vector.load %arg2[%c2_89, %c0_90, %c0_91] : memref<3x32x96xbf16, #tpu.memory_space<vmem>>, vector<1x32x96xbf16>
    %349 = vector.shape_cast %348 : vector<1x32x96xbf16> to vector<32x96xbf16>
    %350 = arith.truncf %337 : vector<16x32xf32> to vector<16x32xbf16>
    %cst_92 = arith.constant dense<0.000000e+00> : vector<16x96xf32>
    %351 = tpu.matmul %350, %349, %cst_92 {dimension_numbers = #tpu.dot_dimension_numbers<[1], [0], [0], [1], [0, 0, 1, 1], [], []>} : vector<16x32xbf16>, vector<32x96xbf16>, vector<16x96xf32> -> vector<16x96xf32>
    %352 = vector.broadcast %340 : vector<1x96xf32> to vector<16x96xf32>
    %353 = arith.addf %351, %352 : vector<16x96xf32>
    %354 = vector.shape_cast %353 : vector<16x96xf32> to vector<2x8x12x8xf32>
    %355 = vector.extract_strided_slice %354 {offsets = [0, 0, 0, 0], sizes = [2, 8, 1, 8], strides = [1, 1, 1, 1]} : vector<2x8x12x8xf32> to vector<2x8x1x8xf32>
    %356 = vector.shape_cast %355 : vector<2x8x1x8xf32> to vector<2x8x8xf32>
    %357 = vector.extract_strided_slice %354 {offsets = [0, 0, 1, 0], sizes = [2, 8, 1, 8], strides = [1, 1, 1, 1]} : vector<2x8x12x8xf32> to vector<2x8x1x8xf32>
    %358 = vector.shape_cast %357 : vector<2x8x1x8xf32> to vector<2x8x8xf32>
    %359 = vector.extract_strided_slice %354 {offsets = [0, 0, 2, 0], sizes = [2, 8, 1, 8], strides = [1, 1, 1, 1]} : vector<2x8x12x8xf32> to vector<2x8x1x8xf32>
    %360 = vector.shape_cast %359 : vector<2x8x1x8xf32> to vector<2x8x8xf32>
    %361 = vector.extract_strided_slice %354 {offsets = [0, 0, 3, 0], sizes = [2, 8, 1, 8], strides = [1, 1, 1, 1]} : vector<2x8x12x8xf32> to vector<2x8x1x8xf32>
    %362 = vector.shape_cast %361 : vector<2x8x1x8xf32> to vector<2x8x8xf32>
    %363 = tpu.concatenate %356, %358, %360, %362 in 0 : vector<2x8x8xf32>, vector<2x8x8xf32>, vector<2x8x8xf32>, vector<2x8x8xf32> -> vector<8x8x8xf32>
    %364 = arith.truncf %363 : vector<8x8x8xf32> to vector<8x8x8xbf16>
    %365 = vector.extract_strided_slice %354 {offsets = [0, 0, 4, 0], sizes = [2, 8, 1, 8], strides = [1, 1, 1, 1]} : vector<2x8x12x8xf32> to vector<2x8x1x8xf32>
    %366 = vector.shape_cast %365 : vector<2x8x1x8xf32> to vector<2x8x8xf32>
    %367 = vector.extract_strided_slice %354 {offsets = [0, 0, 5, 0], sizes = [2, 8, 1, 8], strides = [1, 1, 1, 1]} : vector<2x8x12x8xf32> to vector<2x8x1x8xf32>
    %368 = vector.shape_cast %367 : vector<2x8x1x8xf32> to vector<2x8x8xf32>
    %369 = vector.extract_strided_slice %354 {offsets = [0, 0, 6, 0], sizes = [2, 8, 1, 8], strides = [1, 1, 1, 1]} : vector<2x8x12x8xf32> to vector<2x8x1x8xf32>
    %370 = vector.shape_cast %369 : vector<2x8x1x8xf32> to vector<2x8x8xf32>
    %371 = vector.extract_strided_slice %354 {offsets = [0, 0, 7, 0], sizes = [2, 8, 1, 8], strides = [1, 1, 1, 1]} : vector<2x8x12x8xf32> to vector<2x8x1x8xf32>
    %372 = vector.shape_cast %371 : vector<2x8x1x8xf32> to vector<2x8x8xf32>
    %373 = tpu.concatenate %366, %368, %370, %372 in 0 : vector<2x8x8xf32>, vector<2x8x8xf32>, vector<2x8x8xf32>, vector<2x8x8xf32> -> vector<8x8x8xf32>
    %374 = arith.truncf %373 : vector<8x8x8xf32> to vector<8x8x8xbf16>
    %375 = vector.extract_strided_slice %354 {offsets = [0, 0, 8, 0], sizes = [2, 8, 1, 8], strides = [1, 1, 1, 1]} : vector<2x8x12x8xf32> to vector<2x8x1x8xf32>
    %376 = vector.shape_cast %375 : vector<2x8x1x8xf32> to vector<2x8x8xf32>
    %377 = vector.extract_strided_slice %354 {offsets = [0, 0, 9, 0], sizes = [2, 8, 1, 8], strides = [1, 1, 1, 1]} : vector<2x8x12x8xf32> to vector<2x8x1x8xf32>
    %378 = vector.shape_cast %377 : vector<2x8x1x8xf32> to vector<2x8x8xf32>
    %379 = vector.extract_strided_slice %354 {offsets = [0, 0, 10, 0], sizes = [2, 8, 1, 8], strides = [1, 1, 1, 1]} : vector<2x8x12x8xf32> to vector<2x8x1x8xf32>
    %380 = vector.shape_cast %379 : vector<2x8x1x8xf32> to vector<2x8x8xf32>
    %381 = vector.extract_strided_slice %354 {offsets = [0, 0, 11, 0], sizes = [2, 8, 1, 8], strides = [1, 1, 1, 1]} : vector<2x8x12x8xf32> to vector<2x8x1x8xf32>
    %382 = vector.shape_cast %381 : vector<2x8x1x8xf32> to vector<2x8x8xf32>
    %383 = tpu.concatenate %376, %378, %380, %382 in 0 : vector<2x8x8xf32>, vector<2x8x8xf32>, vector<2x8x8xf32>, vector<2x8x8xf32> -> vector<8x8x8xf32>
    %384 = arith.truncf %383 : vector<8x8x8xf32> to vector<8x8x8xbf16>
    "tpu.trace_start"() <{level = 10 : i32, message = "nqd,nkd->nqk"}> : () -> ()
    %cst_93 = arith.constant dense<0.000000e+00> : vector<8x8x8xf32>
    %385 = tpu.matmul %364, %374, %cst_93 {dimension_numbers = #tpu.dot_dimension_numbers<[2], [2], [1], [1], [0, 0, 0, 1, 1, 1], [0], [0]>} : vector<8x8x8xbf16>, vector<8x8x8xbf16>, vector<8x8x8xf32> -> vector<8x8x8xf32>
    "tpu.trace_stop"() : () -> ()
    %cst_94 = arith.constant 0.353553385 : f32
    %386 = vector.broadcast %cst_94 : f32 to vector<8x8x8xf32>
    %387 = arith.mulf %385, %386 : vector<8x8x8xf32>
    %388 = vector.broadcast %14 : vector<8x1x8xf32> to vector<8x8x8xf32>
    %389 = arith.addf %387, %388 : vector<8x8x8xf32>
    %cst_95 = arith.constant dense<0xFF800000> : vector<8x8xf32>
    %390 = vector.multi_reduction <maximumf>, %389, %cst_95 [2] : vector<8x8x8xf32> to vector<8x8xf32>
    %391 = vector.shape_cast %390 : vector<8x8xf32> to vector<8x8x1xf32>
    %392 = vector.broadcast %391 : vector<8x8x1xf32> to vector<8x8x8xf32>
    %393 = arith.subf %389, %392 : vector<8x8x8xf32>
    %394 = math.exp %393 : vector<8x8x8xf32>
    %cst_96 = arith.constant dense<0.000000e+00> : vector<8x8xf32>
    %395 = vector.multi_reduction <add>, %394, %cst_96 [2] : vector<8x8x8xf32> to vector<8x8xf32>
    %396 = vector.shape_cast %395 : vector<8x8xf32> to vector<8x8x1xf32>
    %397 = tpu.reciprocal %396 {approx = true} : vector<8x8x1xf32> -> vector<8x8x1xf32>
    %398 = vector.broadcast %397 : vector<8x8x1xf32> to vector<8x8x8xf32>
    %399 = arith.mulf %394, %398 : vector<8x8x8xf32>
    %400 = arith.truncf %399 : vector<8x8x8xf32> to vector<8x8x8xbf16>
    "tpu.trace_start"() <{level = 10 : i32, message = "nqk,nkd->nqd"}> : () -> ()
    %cst_97 = arith.constant dense<0.000000e+00> : vector<8x8x8xf32>
    %401 = tpu.matmul %400, %384, %cst_97 {dimension_numbers = #tpu.dot_dimension_numbers<[2], [1], [1], [2], [0, 0, 0, 1, 1, 2], [0], [0]>} : vector<8x8x8xbf16>, vector<8x8x8xbf16>, vector<8x8x8xf32> -> vector<8x8x8xf32>
    "tpu.trace_stop"() : () -> ()
    %402 = vector.extract_strided_slice %401 {offsets = [0, 0, 0], sizes = [2, 8, 8], strides = [1, 1, 1]} : vector<8x8x8xf32> to vector<2x8x8xf32>
    %403 = vector.shape_cast %402 : vector<2x8x8xf32> to vector<16x8xf32>
    %404 = vector.extract_strided_slice %401 {offsets = [2, 0, 0], sizes = [2, 8, 8], strides = [1, 1, 1]} : vector<8x8x8xf32> to vector<2x8x8xf32>
    %405 = vector.shape_cast %404 : vector<2x8x8xf32> to vector<16x8xf32>
    %406 = vector.extract_strided_slice %401 {offsets = [4, 0, 0], sizes = [2, 8, 8], strides = [1, 1, 1]} : vector<8x8x8xf32> to vector<2x8x8xf32>
    %407 = vector.shape_cast %406 : vector<2x8x8xf32> to vector<16x8xf32>
    %408 = vector.extract_strided_slice %401 {offsets = [6, 0, 0], sizes = [2, 8, 8], strides = [1, 1, 1]} : vector<8x8x8xf32> to vector<2x8x8xf32>
    %409 = vector.shape_cast %408 : vector<2x8x8xf32> to vector<16x8xf32>
    %410 = tpu.concatenate %403, %405, %407, %409 in 1 : vector<16x8xf32>, vector<16x8xf32>, vector<16x8xf32>, vector<16x8xf32> -> vector<16x32xf32>
    %c2_98 = arith.constant 2 : index
    %c0_99 = arith.constant 0 : index
    %c0_100 = arith.constant 0 : index
    %411 = vector.load %arg3[%c2_98, %c0_99, %c0_100] : memref<3x32x32xbf16, #tpu.memory_space<vmem>>, vector<1x32x32xbf16>
    %412 = vector.shape_cast %411 : vector<1x32x32xbf16> to vector<32x32xbf16>
    %413 = arith.truncf %410 : vector<16x32xf32> to vector<16x32xbf16>
    %cst_101 = arith.constant dense<0.000000e+00> : vector<16x32xf32>
    %414 = tpu.matmul %413, %412, %cst_101 {dimension_numbers = #tpu.dot_dimension_numbers<[1], [0], [0], [1], [0, 0, 1, 1], [], []>} : vector<16x32xbf16>, vector<32x32xbf16>, vector<16x32xf32> -> vector<16x32xf32>
    %415 = vector.broadcast %341 : vector<1x32xf32> to vector<16x32xf32>
    %416 = arith.addf %414, %415 : vector<16x32xf32>
    %417 = arith.addf %416, %337 : vector<16x32xf32>
    %cst_102 = arith.constant dense<0.000000e+00> : vector<16xf32>
    %418 = vector.multi_reduction <add>, %417, %cst_102 [1] : vector<16x32xf32> to vector<16xf32>
    %419 = vector.shape_cast %418 : vector<16xf32> to vector<16x1xf32>
    %cst_103 = arith.constant 3.200000e+01 : f32
    %420 = vector.broadcast %cst_103 : f32 to vector<16x1xf32>
    %421 = arith.divf %419, %420 : vector<16x1xf32>
    %422 = vector.broadcast %421 : vector<16x1xf32> to vector<16x32xf32>
    %423 = arith.subf %417, %422 : vector<16x32xf32>
    %424 = arith.mulf %423, %423 : vector<16x32xf32>
    %cst_104 = arith.constant dense<0.000000e+00> : vector<16xf32>
    %425 = vector.multi_reduction <add>, %424, %cst_104 [1] : vector<16x32xf32> to vector<16xf32>
    %426 = vector.shape_cast %425 : vector<16xf32> to vector<16x1xf32>
    %cst_105 = arith.constant 3.200000e+01 : f32
    %427 = vector.broadcast %cst_105 : f32 to vector<16x1xf32>
    %428 = arith.divf %426, %427 : vector<16x1xf32>
    %429 = vector.broadcast %421 : vector<16x1xf32> to vector<16x32xf32>
    %430 = arith.subf %417, %429 : vector<16x32xf32>
    %cst_106 = arith.constant 9.99999996E-13 : f32
    %431 = vector.broadcast %cst_106 : f32 to vector<16x1xf32>
    %432 = arith.addf %428, %431 : vector<16x1xf32>
    %433 = math.rsqrt %432 : vector<16x1xf32>
    %434 = vector.broadcast %433 : vector<16x1xf32> to vector<16x32xf32>
    %435 = arith.mulf %430, %434 : vector<16x32xf32>
    %436 = vector.broadcast %342 : vector<1x32xf32> to vector<16x32xf32>
    %437 = arith.mulf %435, %436 : vector<16x32xf32>
    %438 = vector.broadcast %343 : vector<1x32xf32> to vector<16x32xf32>
    %439 = arith.addf %437, %438 : vector<16x32xf32>
    %c2_107 = arith.constant 2 : index
    %c0_108 = arith.constant 0 : index
    %c0_109 = arith.constant 0 : index
    %440 = vector.load %arg4[%c2_107, %c0_108, %c0_109] : memref<3x32x64xbf16, #tpu.memory_space<vmem>>, vector<1x32x64xbf16>
    %441 = vector.shape_cast %440 : vector<1x32x64xbf16> to vector<32x64xbf16>
    %442 = arith.truncf %439 : vector<16x32xf32> to vector<16x32xbf16>
    %cst_110 = arith.constant dense<0.000000e+00> : vector<16x64xf32>
    %443 = tpu.matmul %442, %441, %cst_110 {dimension_numbers = #tpu.dot_dimension_numbers<[1], [0], [0], [1], [0, 0, 1, 1], [], []>} : vector<16x32xbf16>, vector<32x64xbf16>, vector<16x64xf32> -> vector<16x64xf32>
    %444 = vector.broadcast %344 : vector<1x64xf32> to vector<16x64xf32>
    %445 = arith.addf %443, %444 : vector<16x64xf32>
    %446 = arith.mulf %445, %445 : vector<16x64xf32>
    %447 = arith.mulf %445, %446 : vector<16x64xf32>
    %cst_111 = arith.constant 4.471500e-02 : f32
    %448 = vector.broadcast %cst_111 : f32 to vector<16x64xf32>
    %449 = arith.mulf %448, %447 : vector<16x64xf32>
    %450 = arith.addf %445, %449 : vector<16x64xf32>
    %cst_112 = arith.constant 0.797884583 : f32
    %451 = vector.broadcast %cst_112 : f32 to vector<16x64xf32>
    %452 = arith.mulf %451, %450 : vector<16x64xf32>
    %453 = math.tanh %452 : vector<16x64xf32>
    %cst_113 = arith.constant 1.000000e+00 : f32
    %454 = vector.broadcast %cst_113 : f32 to vector<16x64xf32>
    %455 = arith.addf %454, %453 : vector<16x64xf32>
    %cst_114 = arith.constant 5.000000e-01 : f32
    %456 = vector.broadcast %cst_114 : f32 to vector<16x64xf32>
    %457 = arith.mulf %456, %455 : vector<16x64xf32>
    %458 = arith.mulf %445, %457 : vector<16x64xf32>
    %c2_115 = arith.constant 2 : index
    %c0_116 = arith.constant 0 : index
    %c0_117 = arith.constant 0 : index
    %459 = vector.load %arg5[%c2_115, %c0_116, %c0_117] : memref<3x64x32xbf16, #tpu.memory_space<vmem>>, vector<1x64x32xbf16>
    %460 = vector.shape_cast %459 : vector<1x64x32xbf16> to vector<64x32xbf16>
    %461 = arith.truncf %458 : vector<16x64xf32> to vector<16x64xbf16>
    %cst_118 = arith.constant dense<0.000000e+00> : vector<16x32xf32>
    %462 = tpu.matmul %461, %460, %cst_118 {dimension_numbers = #tpu.dot_dimension_numbers<[1], [0], [0], [1], [0, 0, 1, 1], [], []>} : vector<16x64xbf16>, vector<64x32xbf16>, vector<16x32xf32> -> vector<16x32xf32>
    %463 = vector.broadcast %345 : vector<1x32xf32> to vector<16x32xf32>
    %464 = arith.addf %462, %463 : vector<16x32xf32>
    %465 = arith.addf %464, %439 : vector<16x32xf32>
    %cst_119 = arith.constant dense<0.000000e+00> : vector<16xf32>
    %466 = vector.multi_reduction <add>, %465, %cst_119 [1] : vector<16x32xf32> to vector<16xf32>
    %467 = vector.shape_cast %466 : vector<16xf32> to vector<16x1xf32>
    %cst_120 = arith.constant 3.200000e+01 : f32
    %468 = vector.broadcast %cst_120 : f32 to vector<16x1xf32>
    %469 = arith.divf %467, %468 : vector<16x1xf32>
    %470 = vector.broadcast %469 : vector<16x1xf32> to vector<16x32xf32>
    %471 = arith.subf %465, %470 : vector<16x32xf32>
    %472 = arith.mulf %471, %471 : vector<16x32xf32>
    %cst_121 = arith.constant dense<0.000000e+00> : vector<16xf32>
    %473 = vector.multi_reduction <add>, %472, %cst_121 [1] : vector<16x32xf32> to vector<16xf32>
    %474 = vector.shape_cast %473 : vector<16xf32> to vector<16x1xf32>
    %cst_122 = arith.constant 3.200000e+01 : f32
    %475 = vector.broadcast %cst_122 : f32 to vector<16x1xf32>
    %476 = arith.divf %474, %475 : vector<16x1xf32>
    %477 = vector.broadcast %469 : vector<16x1xf32> to vector<16x32xf32>
    %478 = arith.subf %465, %477 : vector<16x32xf32>
    %cst_123 = arith.constant 9.99999996E-13 : f32
    %479 = vector.broadcast %cst_123 : f32 to vector<16x1xf32>
    %480 = arith.addf %476, %479 : vector<16x1xf32>
    %481 = math.rsqrt %480 : vector<16x1xf32>
    %482 = vector.broadcast %481 : vector<16x1xf32> to vector<16x32xf32>
    %483 = arith.mulf %478, %482 : vector<16x32xf32>
    %484 = vector.broadcast %346 : vector<1x32xf32> to vector<16x32xf32>
    %485 = arith.mulf %483, %484 : vector<16x32xf32>
    %486 = vector.broadcast %347 : vector<1x32xf32> to vector<16x32xf32>
    %487 = arith.addf %485, %486 : vector<16x32xf32>
    %488 = vector.shape_cast %487 : vector<16x32xf32> to vector<2x8x32xf32>
    %489 = vector.shape_cast %1 : vector<2x8xf32> to vector<2x8x1xf32>
    %cst_124 = arith.constant dense<0.000000e+00> : vector<2x1xf32>
    %490 = vector.multi_reduction <add>, %489, %cst_124 [1] : vector<2x8x1xf32> to vector<2x1xf32>
    %cst_125 = arith.constant 1.000000e+00 : f32
    %491 = vector.broadcast %cst_125 : f32 to vector<2x1xf32>
    %492 = arith.maximumf %490, %491 : vector<2x1xf32>
    %493 = vector.broadcast %489 : vector<2x8x1xf32> to vector<2x8x32xf32>
    %494 = arith.mulf %488, %493 : vector<2x8x32xf32>
    %cst_126 = arith.constant dense<0.000000e+00> : vector<2x32xf32>
    %495 = vector.multi_reduction <add>, %494, %cst_126 [1] : vector<2x8x32xf32> to vector<2x32xf32>
    %496 = tpu.reciprocal %492 {approx = true} : vector<2x1xf32> -> vector<2x1xf32>
    %497 = vector.broadcast %496 : vector<2x1xf32> to vector<2x32xf32>
    %498 = arith.mulf %495, %497 : vector<2x32xf32>
    %cst_127 = arith.constant 0.000000e+00 : f32
    %499 = vector.broadcast %cst_127 : f32 to vector<2x8x1xf32>
    %500 = arith.cmpf oeq, %489, %499 : vector<2x8x1xf32>
    %cst_128 = arith.constant -1.000000e+30 : f32
    %501 = vector.shape_cast %500 : vector<2x8x1xi1> to vector<2x8x1xi1>
    %502 = vector.broadcast %501 : vector<2x8x1xi1> to vector<2x8x32xi1>
    %503 = vector.broadcast %cst_128 : f32 to vector<2x8x32xf32>
    %504 = arith.select %502, %503, %488 : vector<2x8x32xi1>, vector<2x8x32xf32>
    %cst_129 = arith.constant dense<0xFF800000> : vector<2x32xf32>
    %505 = vector.multi_reduction <maximumf>, %504, %cst_129 [1] : vector<2x8x32xf32> to vector<2x32xf32>
    %c0_130 = arith.constant 0 : index
    %c0_131 = arith.constant 0 : index
    %c0_132 = arith.constant 0 : index
    %506 = vector.load %arg8[%c0_130, %c0_131, %c0_132] : memref<2x32x32xbf16, #tpu.memory_space<vmem>>, vector<1x32x32xbf16>
    %507 = vector.shape_cast %506 : vector<1x32x32xbf16> to vector<32x32xbf16>
    %508 = arith.truncf %498 : vector<2x32xf32> to vector<2x32xbf16>
    %cst_133 = arith.constant dense<0.000000e+00> : vector<2x32xf32>
    %509 = tpu.matmul %508, %507, %cst_133 {dimension_numbers = #tpu.dot_dimension_numbers<[1], [0], [0], [1], [0, 0, 1, 1], [], []>} : vector<2x32xbf16>, vector<32x32xbf16>, vector<2x32xf32> -> vector<2x32xf32>
    %c1_134 = arith.constant 1 : index
    %c0_135 = arith.constant 0 : index
    %c0_136 = arith.constant 0 : index
    %510 = vector.load %arg8[%c1_134, %c0_135, %c0_136] : memref<2x32x32xbf16, #tpu.memory_space<vmem>>, vector<1x32x32xbf16>
    %511 = vector.shape_cast %510 : vector<1x32x32xbf16> to vector<32x32xbf16>
    %512 = arith.truncf %505 : vector<2x32xf32> to vector<2x32xbf16>
    %cst_137 = arith.constant dense<0.000000e+00> : vector<2x32xf32>
    %513 = tpu.matmul %512, %511, %cst_137 {dimension_numbers = #tpu.dot_dimension_numbers<[1], [0], [0], [1], [0, 0, 1, 1], [], []>} : vector<2x32xbf16>, vector<32x32xbf16>, vector<2x32xf32> -> vector<2x32xf32>
    %514 = arith.addf %509, %513 : vector<2x32xf32>
    %515 = vector.broadcast %5 : vector<1x32xf32> to vector<2x32xf32>
    %516 = arith.addf %514, %515 : vector<2x32xf32>
    %cst_138 = arith.constant 0.000000e+00 : f32
    %517 = vector.broadcast %cst_138 : f32 to vector<2x32xf32>
    %518 = arith.maximumf %516, %517 : vector<2x32xf32>
    %c0_139 = arith.constant 0 : index
    %c0_140 = arith.constant 0 : index
    %519 = vector.load %arg9[%c0_139, %c0_140] : memref<32x3xbf16, #tpu.memory_space<vmem>>, vector<32x3xbf16>
    %520 = arith.truncf %518 : vector<2x32xf32> to vector<2x32xbf16>
    %cst_141 = arith.constant dense<0.000000e+00> : vector<2x3xf32>
    %521 = tpu.matmul %520, %519, %cst_141 {dimension_numbers = #tpu.dot_dimension_numbers<[1], [0], [0], [1], [0, 0, 1, 1], [], []>} : vector<2x32xbf16>, vector<32x3xbf16>, vector<2x3xf32> -> vector<2x3xf32>
    %522 = vector.broadcast %6 : vector<1x3xf32> to vector<2x3xf32>
    %523 = arith.addf %521, %522 : vector<2x3xf32>
    %c0_142 = arith.constant 0 : index
    %c0_143 = arith.constant 0 : index
    %524 = vector.load %arg10[%c0_142, %c0_143] : memref<2x3xf32, #tpu.memory_space<vmem>>, vector<2x3xf32>
    tpu.vector_store %arg10[%c0_142, %c0_143], %523 {strides = array<i32>} : memref<2x3xf32, #tpu.memory_space<vmem>>, vector<2x3xf32>,
    return
  }
}

</mosaic_0001>

<bundles_post_ra>
// kernel: bert_classifier_forward.1
= control target key start
LH: loop header
LB: loop body
LE: loop exit
PB: predicated region body
PF: predicated region fallthrough
CT: control target
= control target key end

     0   :  { %vm66_vm0 = vcmask 261120   ;;  %s12856_s0 = inlined_call_operand.vmem [shape: f32[2,8,32], index: 0, kind: input, shape index: {}]   ;;  %s12857_s1 = inlined_call_operand.vmem [shape: f32[2,8], index: 1, kind: input, shape index: {}]   ;;  %s12858_s2 = inlined_call_operand.vmem [shape: bf16[3,32,96], index: 2, kind: input, shape index: {}]   ;;  %s12859_s3 = inlined_call_operand.vmem [shape: bf16[3,32,32], index: 3, kind: input, shape index: {}]   ;;  %s12860_s4 = inlined_call_operand.vmem [shape: bf16[3,32,64], index: 4, kind: input, shape index: {}]   ;;  %s12861_s5 = inlined_call_operand.vmem [shape: bf16[3,64,32], index: 5, kind: input, shape index: {}]   ;;  %s12862_s6 = inlined_call_operand.vmem [shape: f32[3,8,128], index: 6, kind: input, shape index: {}]   ;;  %s12863_s7 = inlined_call_operand.vmem [shape: f32[8,128], index: 7, kind: input, shape index: {}]   ;;  %s12864_s8 = inlined_call_operand.vmem [shape: bf16[2,32,32], index: 8, kind: input, shape index: {}]   ;;  %s12865_s9 = inlined_call_operand.vmem [shape: bf16[32,3], index: 9, kind: input, shape index: {}]   ;;  %s12866_s10 = inlined_call_operand.hbm [shape: f32[2,3], index: 10, kind: output, shape index: {}]  }
   0x1   :  { %v37_v0 = vld [vmem:[%s12856_s0] sm:$0xff]  ;;  %v38_v1 = vld [vmem:[%s12856_s0 + $0x8] sm:$0xff] }
   0x2   :  { %v67_v2 = vsel %vm66_vm0, %v37_v0, 0.0  ;;  %v70_v3 = vsel %vm66_vm0, %v38_v1, 0.0 }
   0x3   :  { %68 = vadd.xlane.f32.xlu0 %v67_v2 }
   0x7   :  { %71 = vadd.xlane.f32.xlu0 %v70_v3 }
   0x8   :  { %15 = vsyncpa [#allocation3], 0  ;;  %v9297_v14 = vld [vmem:[%s12858_s2 + $0x8] sm:$0xff]   ;;  %v12873_v15 = vmov 0.0   ;;  %vm9501_vm1 = vmmov 0   ;;  %v9298_v16 = vld [vmem:[%s12858_s2] sm:$0xff]   ;;  %v47_v23 = vlaneseq }
   0x9   :  { %8812 = vmatprep.subr.bf16.mxu0 %v12873_v15  ;;  %8816 = vmatprep.mubr.msk.bf16.mxu0 %vm9501_vm1, %v12873_v15  ;;  %v40_v26 = vld [vmem:[%s12863_s7] sm:$0xff]  ;;  %s9502_s24 = smov 112   ;;  %s9503_s25 = smov 120   ;;  %v9511_v49 = vmov 1983009808   ;;  %vm1017_vm2 = vcmask 1041409  }
   0xa   :  { %8813 = vmatpush3.bf16.msra.mxu0 %v9297_v14  ;;  %8820 = vmatprep.subr.bf16.mxu1 %v12873_v15  ;;  %v9599_v24 = vshrl.u32 %v47_v23, 7  ;;  %v106_v39 = vld [vmem:[%s12862_s6] sm:$0xff]  ;;  %s9504_s26 = smov 104   ;;  %s9505_s27 = smov 96   ;;  %v243_v50 = vunpack.c.l.s4 %v9511_v49  ;;  %v9512_v56 = vmov 1934713408  }
   0xb   :  { %8814 = vmatprep.subr.bf16.mxu0 %v12873_v15  ;;  %8822 = vmatprep.mubr.msk.bf16.mxu1 %vm9501_vm1, %v12873_v15  ;;  %s9506_s28 = smov 88   ;;  %s9507_s29 = smov 80   ;;  %v307_v57 = vunpack.c.l.s4 %v9512_v56  ;;  %vm1020_vm3 = vcmask 1042434   ;;  %vm1023_vm4 = vcmask 1043459   ;;  %vm1026_vm5 = vcmask 1044484  }
   0xc   :  { %12958 = vst [vmem:[#allocation5_spill] sm:$0xff] %v9599_v24  ;;  %v9602_v25 = vsub.s32 0, %v9599_v24  ;;  %v9609_v30 = vsub.s32 1, %v9599_v24  ;;  %s9508_s30 = smov 72   ;;  %s9509_s11 = smov 64   ;;  %v244_v53 = vunpack.c.0.s8 %v243_v50  ;;  %vm1029_vm6 = vcmask 1045509  }
   0xd   :  { %s9510_s12 = smov 56   ;;  %vm1032_vm7 = vcmask 1046534   ;;  %vm1035_vm8 = vcmask 1047559   ;;  %vm1053_vm9 = vcmask 64512   ;;  %s9514_s15 = smov 48   ;;  %vm1900_vm10 = vcmask 1043456  }
   0xe   :  { %8815 = vmatpush3.bf16.msra.mxu0 %v9298_v16  ;;  %12959 = vst [vmem:[#allocation6_spill] sm:$0xff] %v9602_v25  ;;  %v97_v29 = vrot.slane %v40_v26, %v9602_v25  ;;  %12960 = vst [vmem:[#allocation7_spill] sm:$0xff] %v9609_v30  ;;  %v103_v34 = vrot.slane %v40_v26, %v9609_v30  ;;  %v115_v40 = vrot.slane %v106_v39, %v9602_v25  ;;  %s9515_s16 = smov 40   ;;  %s9516_s18 = smov 8   ;;  %vm2509_vm11 = vcmask 130048  }
   0xf   :  { %8826 = vmatprep.subr.bf16.mxu0 %v12873_v15  ;;  %v9666_v59 = vsub.s32 %v244_v53, %v9599_v24  ;;  %s12938_s19 = smov 16   ;;  %s12901_s22 = smov 24   ;;  %vm2512_vm12 = vcmask 195584   ;;  %vm2740_vm13 = vcmask 523264  }
  0x10   :  { %s13142_s23 = smov 24  }
  0x11   :  { %12965 = vst [vmem:[#allocation12_spill] sm:$0xff] %v9666_v59 }
  0x8c   :  { %v69_v4 = vpop.xlane.xlu0 %68 }
  0x8d   :  { %v74_v5 = vmul.f32 0.03125, %v69_v4 }
  0x8f   :  { %v76_v6 = vsub.f32 %v37_v0, %v74_v5  ;;  %v308_v0 = vunpack.c.0.s8 %v307_v57 }
  0x90   :  { %v72_v7 = vpop.xlane.xlu0 %71 }
  0x91   :  { %v75_v8 = vmul.f32 0.03125, %v72_v7  ;;  %v78_v9 = vmul.f32 %v76_v6, %v76_v6 }
  0x93   :  { %v77_v10 = vsub.f32 %v38_v1, %v75_v8  ;;  %v80_v11 = vsel %vm66_vm0, %v78_v9, 0.0  ;;  %v9674_v9 = vsub.s32 %v308_v0, %v9599_v24 }
  0x94   :  { %81 = vadd.xlane.f32.xlu1 %v80_v11 }
  0x95   :  { %v79_v12 = vmul.f32 %v77_v10, %v77_v10  ;;  %12966 = vst [vmem:[#allocation13_spill] sm:$0xff] %v9674_v9 }
  0x97   :  { %v83_v13 = vsel %vm66_vm0, %v79_v12, 0.0 }
  0x98   :  { %84 = vadd.xlane.f32.xlu1 %v83_v13 }
 0x11d   :  { %v82_v17 = vpop.xlane.xlu1 %81 }
 0x11e   :  { %v86_v18 = vmul.f32 0.03125, %v82_v17 }
 0x120   :  { %v88_v19 = vadd.f32 1e-12, %v86_v18 }
 0x121   :  { %v85_v20 = vpop.xlane.xlu1 %84 }
 0x122   :  { %9333 = vrsqrt.f32 %v88_v19  ;;  %v87_v21 = vmul.f32 0.03125, %v85_v20 }
 0x124   :  { %v89_v22 = vadd.f32 1e-12, %v87_v21 }
 0x126   :  { %9335 = vrsqrt.f32 %v89_v22 }
 0x12f   :  { %v9334_v27 = vpop.eup %9333 }
 0x130   :  { %v92_v28 = vmul.f32 %v9334_v27, %v76_v6 }
 0x132   :  { %v98_v33 = vmul.f32 %v97_v29, %v92_v28 }
 0x133   :  { %v9336_v31 = vpop.eup %9335 }
 0x134   :  { %v93_v32 = vmul.f32 %v9336_v31, %v77_v10  ;;  %v9612_v36 = vadd.f32 %v103_v34, %v98_v33 }
 0x136   :  { %v99_v35 = vmul.f32 %v97_v29, %v93_v32  ;;  %12961 = vst [vmem:[#allocation8_spill] sm:$0xff] %v9612_v36 }
 0x138   :  { %v9614_v37 = vadd.f32 %v103_v34, %v99_v35 }
 0x13a   :  { %12962 = vst [vmem:[#allocation9_spill] sm:$0xff] %v9614_v37  ;;  %v111_v38 = vpack.c.bf16 %v9614_v37, %v9612_v36 }
 0x13c   :  { %8817 = vmatmul.mubr.msk.bf16.vlgmr.msra.gmra.mxu0 %vm66_vm0, %v111_v38 }
 0x13d   :  { %8828 = vmatprep.mubr.msk.bf16.mxu0 %vm9501_vm1, %v12873_v15 }
 0x1fc   :  { %v165_v41 = vpop.f32.mrf.mxu0 }
 0x1fd   :  { %v9625_v42 = vadd.f32 %v165_v41, %v115_v40 }
 0x1fe   :  { %v8818_v43 = vpop.f32.mrf.mxu0 }
 0x1ff   :  { %12963 = vst [vmem:[#allocation10_spill] sm:$0xff] %v9625_v42  ;;  %180 = vrot.lane.b32.xlu1 %v9625_v42, %s9502_s24  ;;  %174 = vrot.lane.b32.xlu0 %v9625_v42, %s9503_s25 }
 0x200   :  { %v168_v44 = vpop.f32.mrf.mxu0 }
 0x201   :  { %v9631_v45 = vadd.f32 %v168_v44, %v115_v40 }
 0x202   :  { %v8819_v46 = vpop.f32.mrf.mxu0 }
 0x203   :  { %12964 = vst [vmem:[#allocation11_spill] sm:$0xff] %v9631_v45  ;;  %186 = vrot.lane.b32.xlu0 %v9625_v42, %s9504_s26  ;;  %176 = vrot.lane.b32.xlu1 %v9631_v45, %s9503_s25 }
 0x207   :  { %192 = vrot.lane.b32.xlu0 %v9625_v42, %s9505_s27  ;;  %182 = vrot.lane.b32.xlu1 %v9631_v45, %s9502_s24 }
 0x20b   :  { %198 = vrot.lane.b32.xlu0 %v9625_v42, %s9506_s28  ;;  %188 = vrot.lane.b32.xlu1 %v9631_v45, %s9504_s26 }
 0x20f   :  { %204 = vrot.lane.b32.xlu0 %v9625_v42, %s9507_s29  ;;  %194 = vrot.lane.b32.xlu1 %v9631_v45, %s9505_s27 }
 0x213   :  { %210 = vrot.lane.b32.xlu0 %v9625_v42, %s9508_s30  ;;  %200 = vrot.lane.b32.xlu1 %v9631_v45, %s9506_s28 }
 0x217   :  { %216 = vrot.lane.b32.xlu0 %v9625_v42, %s9509_s11  ;;  %206 = vrot.lane.b32.xlu1 %v9631_v45, %s9507_s29 }
 0x21b   :  { %212 = vrot.lane.b32.xlu1 %v9631_v45, %s9508_s30 }
 0x21f   :  { %222 = vrot.lane.b32.xlu1 %v9625_v42, %s9510_s12 }
 0x223   :  { %218 = vrot.lane.b32.xlu1 %v9631_v45, %s9509_s11 }
 0x227   :  { %224 = vrot.lane.b32.xlu1 %v9631_v45, %s9510_s12 }
 0x271   :  { %v181_v47 = vpop.permute.xlu1 %180  ;;  %v175_v48 = vpop.permute.xlu0 %174 }
 0x272   :  { %v240_v60 = vcombine.low %v9625_v42, %v181_v47  ;;  %v241_v2 = vcombine.high %v9625_v42, %v181_v47 }
 0x274   :  { %v248_v3 = vrot.slane %v240_v60, %v9666_v59  ;;  %v255_v13 = vrot.slane %v241_v2, %v9666_v59 }
 0x275   :  { %v187_v51 = vpop.permute.xlu0 %186  ;;  %v177_v52 = vpop.permute.xlu1 %176 }
 0x276   :  { %v256_v58 = vcombine.low %v175_v48, %v187_v51  ;;  %v257_v63 = vcombine.high %v175_v48, %v187_v51 }
 0x278   :  { %v264_v1 = vrot.slane %v256_v58, %v9666_v59  ;;  %v271_v8 = vrot.slane %v257_v63, %v9666_v59 }
 0x279   :  { %v193_v54 = vpop.permute.xlu0 %192  ;;  %v183_v55 = vpop.permute.xlu1 %182 }
 0x27a   :  { %v304_v10 = vcombine.low %v248_v3, %v264_v1  ;;  %v444_v11 = vcombine.low %v9631_v45, %v183_v55  ;;  %v445_v12 = vcombine.high %v9631_v45, %v183_v55  ;;  %v305_v17 = vcombine.high %v248_v3, %v264_v1 }
 0x27b   :  { %v320_v22 = vcombine.low %v255_v13, %v271_v8  ;;  %v321_v28 = vcombine.high %v255_v13, %v271_v8 }
 0x27c   :  { %v312_v27 = vrot.slane %v304_v10, %v9674_v9  ;;  %v452_v29 = vrot.slane %v444_v11, %v9666_v59  ;;  %v459_v31 = vrot.slane %v445_v12, %v9666_v59  ;;  %v319_v38 = vrot.slane %v305_v17, %v9674_v9 }
 0x27d   :  { %v199_v61 = vpop.permute.xlu0 %198  ;;  %v189_v62 = vpop.permute.xlu1 %188  ;;  %v328_v49 = vrot.slane %v320_v22, %v9674_v9  ;;  %v335_v53 = vrot.slane %v321_v28, %v9674_v9 }
 0x27e   :  { %v460_v4 = vcombine.low %v177_v52, %v189_v62  ;;  %v461_v5 = vcombine.high %v177_v52, %v189_v62 }
 0x280   :  { %v468_v18 = vrot.slane %v460_v4, %v9666_v59  ;;  %v475_v19 = vrot.slane %v461_v5, %v9666_v59 }
 0x281   :  { %v205_v6 = vpop.permute.xlu0 %204  ;;  %v195_v7 = vpop.permute.xlu1 %194 }
 0x282   :  { %v272_v14 = vcombine.low %v193_v54, %v205_v6  ;;  %v273_v16 = vcombine.high %v193_v54, %v205_v6  ;;  %v508_v39 = vcombine.low %v452_v29, %v468_v18  ;;  %v509_v40 = vcombine.high %v452_v29, %v468_v18 }
 0x283   :  { %v524_v41 = vcombine.low %v459_v31, %v475_v19  ;;  %v525_v50 = vcombine.high %v459_v31, %v475_v19 }
 0x284   :  { %v280_v32 = vrot.slane %v272_v14, %v9666_v59  ;;  %v287_v33 = vrot.slane %v273_v16, %v9666_v59  ;;  %v9697_v57 = vrot.slane %v508_v39, %v9674_v9  ;;  %v9700_v58 = vrot.slane %v509_v40, %v9674_v9 }
 0x285   :  { %v211_v20 = vpop.permute.xlu0 %210  ;;  %v9681_v21 = vpop.permute.xlu1 %200  ;;  %v9703_v60 = vrot.slane %v524_v41, %v9674_v9  ;;  %v9709_v2 = vrot.slane %v525_v50, %v9674_v9 }
 0x286   :  { %v288_v23 = vcombine.low %v199_v61, %v211_v20  ;;  %v289_v26 = vcombine.high %v199_v61, %v211_v20 }
 0x288   :  { %v296_v34 = vrot.slane %v288_v23, %v9666_v59  ;;  %v303_v35 = vrot.slane %v289_v26, %v9666_v59 }
 0x289   :  { %v207_v43 = vpop.permute.xlu1 %206 }
 0x28a   :  { %v336_v44 = vcombine.low %v280_v32, %v296_v34  ;;  %v337_v46 = vcombine.high %v280_v32, %v296_v34  ;;  %v352_v47 = vcombine.low %v287_v33, %v303_v35  ;;  %v353_v48 = vcombine.high %v287_v33, %v303_v35 }
 0x28b   :  { %v476_v51 = vcombine.low %v195_v7, %v207_v43  ;;  %v477_v52 = vcombine.high %v195_v7, %v207_v43 }
 0x28c   :  { %v344_v54 = vrot.slane %v336_v44, %v9674_v9  ;;  %v351_v55 = vrot.slane %v337_v46, %v9674_v9  ;;  %v360_v56 = vrot.slane %v352_v47, %v9674_v9  ;;  %v367_v61 = vrot.slane %v353_v48, %v9674_v9 }
 0x28d   :  { %v9714_v4 = vrot.slane %v476_v51, %v9666_v59  ;;  %v9717_v5 = vrot.slane %v477_v52, %v9666_v59 }
 0x28e   :  { %v368_v62 = vcombine.low %v312_v27, %v344_v54  ;;  %v369_v63 = vcombine.high %v312_v27, %v344_v54  ;;  %v370_v0 = vcombine.low %v319_v38, %v351_v55  ;;  %v9706_v1 = vcombine.high %v319_v38, %v351_v55 }
 0x28f   :  { %v9711_v3 = vcombine.low %v328_v49, %v360_v56  ;;  %v9720_v11 = vcombine.high %v328_v49, %v360_v56  ;;  %v9722_v12 = vcombine.low %v335_v53, %v367_v61  ;;  %v9725_v20 = vcombine.high %v335_v53, %v367_v61 }
 0x290   :  { %v664_v6 = vrot.slane %v368_v62, 1  ;;  %v665_v7 = vrot.slane %v369_v63, 1  ;;  %v666_v8 = vrot.slane %v370_v0, 1  ;;  %v667_v10 = vrot.slane %v9706_v1, 1 }
 0x291   :  { %v696_v13 = vrot.slane %v368_v62, 2  ;;  %v697_v14 = vrot.slane %v369_v63, 2  ;;  %v698_v16 = vrot.slane %v370_v0, 2  ;;  %v699_v17 = vrot.slane %v9706_v1, 2 }
 0x292   :  { %v728_v18 = vrot.slane %v368_v62, 3  ;;  %v729_v19 = vrot.slane %v369_v63, 3  ;;  %v761_v22 = vpack.c.bf16 %v369_v63, %v369_v63  ;;  %v762_v23 = vpack.c.bf16 %v370_v0, %v370_v0 }
 0x293   :  { %v776_v26 = vpack.c.bf16 %v664_v6, %v664_v6  ;;  %v730_v27 = vrot.slane %v370_v0, 3  ;;  %v777_v28 = vpack.c.bf16 %v665_v7, %v665_v7  ;;  %v9727_v29 = vpack.c.bf16 %v666_v8, %v666_v8 }
 0x294   :  { %v9729_v31 = vpack.c.bf16 %v667_v10, %v667_v10  ;;  %v731_v32 = vrot.slane %v9706_v1, 3  ;;  %v760_v33 = vpack.c.bf16 %v368_v62, %v368_v62  ;;  %v792_v34 = vpack.c.bf16 %v696_v13, %v696_v13  ;;  %v213_v10 = vpop.permute.xlu1 %212 }
 0x295   :  { %v793_v35 = vpack.c.bf16 %v697_v14, %v697_v14  ;;  %v9732_v38 = vpack.c.bf16 %v698_v16, %v698_v16  ;;  %v9734_v39 = vpack.c.bf16 %v699_v17, %v699_v17  ;;  %v808_v40 = vpack.c.bf16 %v728_v18, %v728_v18 }
 0x296   :  { %v809_v41 = vpack.c.bf16 %v729_v19, %v729_v19  ;;  %v9736_v43 = vunpack.c.l.b16 %v761_v22  ;;  %v9738_v44 = vunpack.c.l.b16 %v762_v23  ;;  %v1200_v46 = vunpack.c.l.b16 %v776_v26 }
 0x297   :  { %v1201_v47 = vunpack.c.l.b16 %v777_v28  ;;  %v9740_v48 = vpack.c.bf16 %v730_v27, %v730_v27  ;;  %v12871_v49 = vunpack.c.l.b16 %v9727_v29  ;;  %v12869_v50 = vunpack.c.l.b16 %v9729_v31 }
 0x298   :  { %v1385_v51 = vunpack.c.l.b16 %v793_v35  ;;  %v9744_v52 = vpack.c.bf16 %v731_v32, %v731_v32  ;;  %v9746_v53 = vunpack.c.l.b16 %v760_v33  ;;  %v1384_v55 = vunpack.c.l.b16 %v792_v34 }
 0x299   :  { %12967 = vst [vmem:[#allocation14_spill] sm:$0xff] %v9740_v48  ;;  %v1208_v54 = vrot.slane %v1201_v47, 7  ;;  %v9750_v62 = vrot.slane %v1200_v46, 4  ;;  %v12868_v63 = vunpack.c.l.b16 %v9732_v38  ;;  %v9755_v0 = vrot.slane %v12871_v49, 6 }
 0x29a   :  { %12968 = vst [vmem:[#allocation15_spill] sm:$0xff] %v9744_v52  ;;  %v9759_v6 = vrot.slane %v12869_v50, 5  ;;  %v12867_v7 = vunpack.c.l.b16 %v9734_v39  ;;  %v1392_v8 = vrot.slane %v1385_v51, 7  ;;  %v9765_v14 = vrot.slane %v1201_v47, 3 }
 0x29b   :  { %v9763_v13 = vsel %vm1017_vm2, %v1208_v54, %v1200_v46  ;;  %v1568_v16 = vunpack.c.l.b16 %v808_v40  ;;  %v1569_v17 = vunpack.c.l.b16 %v809_v41  ;;  %v9772_v19 = vrot.slane %v12868_v63, 6 }
 0x29c   :  { %v9768_v18 = vsel %vm1017_vm2, %v1392_v8, %v1384_v55  ;;  %v9774_v22 = vrot.slane %v1384_v55, 4  ;;  %v9776_v23 = vrot.slane %v1385_v51, 3  ;;  %v9780_v26 = vrot.slane %v12867_v7, 5 }
 0x29d   :  { %v12870_v27 = vunpack.c.l.b16 %v9740_v48  ;;  %v12872_v28 = vunpack.c.l.b16 %v9744_v52  ;;  %v492_v32 = vcombine.low %v9681_v21, %v213_v10  ;;  %v1576_v33 = vrot.slane %v1569_v17, 7 }
 0x29e   :  { %v9785_v34 = vrot.slane %v1568_v16, 4  ;;  %v493_v35 = vcombine.high %v9681_v21, %v213_v10  ;;  %v763_v40 = vpack.c.bf16 %v9706_v1, %v9706_v1  ;;  %v9790_v41 = vrot.slane %v1569_v17, 3 }
 0x29f   :  { %v500_v46 = vrot.slane %v492_v32, %v9666_v59  ;;  %v764_v47 = vpack.c.bf16 %v9711_v3, %v9711_v3  ;;  %v765_v51 = vpack.c.bf16 %v9720_v11, %v9720_v11  ;;  %v766_v55 = vpack.c.bf16 %v9722_v12, %v9722_v12 }
 0x2a0   :  { %12969 = vst [vmem:[#allocation16_spill] sm:$0xff] %v9785_v34  ;;  %12970 = vst [vmem:[#allocation17_spill] sm:$0xff] %v9790_v41  ;;  %v507_v54 = vrot.slane %v493_v35, %v9666_v59  ;;  %v767_v21 = vpack.c.bf16 %v9725_v20, %v9725_v20  ;;  %v9802_v8 = vunpack.c.l.b16 %v763_v40  ;;  %v9806_v1 = vrot.slane %v12870_v27, 6 }
 0x2a1   :  { %v540_v10 = vcombine.low %v9714_v4, %v500_v46  ;;  %v541_v17 = vcombine.high %v9714_v4, %v500_v46  ;;  %v9810_v32 = vunpack.c.l.b16 %v764_v47  ;;  %v9814_v63 = vunpack.c.l.b16 %v765_v51 }
 0x2a2   :  { %12971 = vst [vmem:[#allocation18_spill] sm:$0xff] %v9806_v1  ;;  %v556_v35 = vcombine.low %v9717_v5, %v507_v54  ;;  %v557_v7 = vcombine.high %v9717_v5, %v507_v54  ;;  %v9816_v50 = vunpack.c.l.b16 %v766_v55  ;;  %v9819_v40 = vsel %vm1017_vm2, %v1576_v33, %v1568_v16 }
 0x2a3   :  { %12972 = vst [vmem:[#allocation19_spill] sm:$0xff] %v9819_v40  ;;  %v9823_v27 = vrot.slane %v12872_v28, 5  ;;  %v548_v49 = vrot.slane %v540_v10, %v9674_v9  ;;  %v555_v4 = vrot.slane %v541_v17, %v9674_v9  ;;  %v9829_v5 = vunpack.c.l.b16 %v767_v21 }
 0x2a4   :  { %v564_v46 = vrot.slane %v556_v35, %v9674_v9  ;;  %v571_v47 = vrot.slane %v557_v7, %v9674_v9 }
 0x2a5   :  { %12973 = vst [vmem:[#allocation20_spill] sm:$0xff] %v9823_v27  ;;  %v572_v54 = vcombine.low %v9697_v57, %v548_v49  ;;  %v573_v16 = vcombine.high %v9697_v57, %v548_v49  ;;  %v574_v33 = vcombine.low %v9700_v58, %v555_v4  ;;  %v575_v55 = vcombine.high %v9700_v58, %v555_v4 }
 0x2a6   :  { %v9837_v10 = vcombine.low %v9703_v60, %v564_v46  ;;  %v9843_v21 = vcombine.high %v9703_v60, %v564_v46  ;;  %v9846_v57 = vcombine.low %v9709_v2, %v571_v47  ;;  %v9849_v58 = vcombine.high %v9709_v2, %v571_v47 }
 0x2a7   :  { %v673_v28 = vrot.slane %v573_v16, 1  ;;  %v674_v15 = vrot.slane %v574_v33, 1  ;;  %v675_v51 = vrot.slane %v575_v55, 1  ;;  %v672_v49 = vrot.slane %v572_v54, 1 }
 0x2a8   :  { %v704_v4 = vrot.slane %v572_v54, 2  ;;  %v705_v61 = vrot.slane %v573_v16, 2  ;;  %v706_v17 = vrot.slane %v574_v33, 2  ;;  %v707_v56 = vrot.slane %v575_v55, 2 }
 0x2a9   :  { %v736_v35 = vrot.slane %v572_v54, 3  ;;  %v768_v37 = vpack.c.bf16 %v572_v54, %v572_v54  ;;  %v769_v7 = vpack.c.bf16 %v573_v16, %v573_v16  ;;  %v770_v36 = vpack.c.bf16 %v574_v33, %v574_v33 }
 0x2aa   :  { %v771_v60 = vpack.c.bf16 %v575_v55, %v575_v55  ;;  %v737_v46 = vrot.slane %v573_v16, 3  ;;  %v785_v30 = vpack.c.bf16 %v673_v28, %v673_v28  ;;  %v9851_v9 = vpack.c.bf16 %v674_v15, %v674_v15 }
 0x2ab   :  { %v9853_v59 = vpack.c.bf16 %v675_v51, %v675_v51  ;;  %v738_v45 = vrot.slane %v574_v33, 3  ;;  %v739_v42 = vrot.slane %v575_v55, 3  ;;  %v784_v2 = vpack.c.bf16 %v672_v49, %v672_v49 }
 0x2ac   :  { %v800_v47 = vpack.c.bf16 %v704_v4, %v704_v4  ;;  %v801_v25 = vpack.c.bf16 %v705_v61, %v705_v61  ;;  %v9855_v24 = vpack.c.bf16 %v706_v17, %v706_v17  ;;  %v9857_v27 = vpack.c.bf16 %v707_v56, %v707_v56 }
 0x2ad   :  { %v9859_v1 = vpack.c.bf16 %v736_v35, %v736_v35  ;;  %v9861_v54 = vunpack.c.l.b16 %v768_v37  ;;  %v9863_v40 = vunpack.c.l.b16 %v769_v7  ;;  %v9865_v28 = vunpack.c.l.b16 %v770_v36 }
 0x2ae   :  { %12974 = vst [vmem:[#allocation21_spill] sm:$0xff] %v9857_v27  ;;  %v9867_v15 = vunpack.c.l.b16 %v771_v60  ;;  %v9869_v51 = vpack.c.bf16 %v737_v46, %v737_v46  ;;  %v1293_v16 = vunpack.c.l.b16 %v785_v30  ;;  %v12891_v33 = vunpack.c.l.b16 %v9851_v9 }
 0x2af   :  { %12975 = vst [vmem:[#allocation22_spill] sm:$0xff] %v9859_v1  ;;  %v12892_v61 = vunpack.c.l.b16 %v9853_v59  ;;  %v9873_v55 = vpack.c.bf16 %v738_v45, %v738_v45  ;;  %v9875_v56 = vpack.c.bf16 %v739_v42, %v739_v42  ;;  %v1116_v37 = vrot.slane %v9863_v40, 7 }
 0x2b0   :  { %v1292_v17 = vunpack.c.l.b16 %v784_v2  ;;  %v1300_v49 = vrot.slane %v1293_v16, 7  ;;  %v9884_v45 = vrot.slane %v12891_v33, 6  ;;  %v1476_v4 = vunpack.c.l.b16 %v800_v47 }
 0x2b1   :  { %12976 = vst [vmem:[#allocation23_spill] sm:$0xff] %v9873_v55  ;;  %12977 = vst [vmem:[#allocation24_spill] sm:$0xff] %v9875_v56  ;;  %v9888_v42 = vrot.slane %v12892_v61, 5  ;;  %v9892_v60 = vsel %vm1017_vm2, %v1116_v37, %v9861_v54  ;;  %v1477_v46 = vunpack.c.l.b16 %v801_v25  ;;  %v12895_v2 = vunpack.c.l.b16 %v9855_v24 }
 0x2b2   :  { %v9896_v36 = vrot.slane %v1292_v17, 4  ;;  %v9902_v47 = vsel %vm1017_vm2, %v1300_v49, %v1292_v17  ;;  %v9904_v37 = vrot.slane %v1293_v16, 3  ;;  %v9906_v7 = vrot.slane %v1476_v4, 4 }
 0x2b3   :  { %v1484_v25 = vrot.slane %v1477_v46, 7  ;;  %v9910_v35 = vrot.slane %v12895_v2, 6  ;;  %v12979_v33 = vunpack.c.l.b16 %v9857_v27  ;;  %v9916_v30 = vrot.slane %v1477_v46, 3 }
 0x2b4   :  { %v12981_v17 = vunpack.c.l.b16 %v9869_v51  ;;  %v12983_v49 = vunpack.c.l.b16 %v9873_v55  ;;  %v12985_v41 = vunpack.c.l.b16 %v9859_v1  ;;  %v1034_v46 = vrot.slane %v9829_v5, 1 }
 0x2b5   :  { %12978 = vst [vmem:[#allocation25_spill] sm:$0xff] %v9910_v35  ;;  %v9914_v52 = vrot.slane %v12979_v33, 5  ;;  %v1038_v35 = vrot.slane %v9746_v53, 4  ;;  %v9933_v33 = vsel %vm1017_vm2, %v1484_v25, %v1476_v4  ;;  %v1039_v61 = vrot.slane %v9736_v43, 3 }
 0x2b6   :  { %v9921_v16 = vrot.slane %v12981_v17, 7  ;;  %v9925_v48 = vrot.slane %v12983_v49, 6  ;;  %v9929_v2 = vrot.slane %v12985_v41, 4  ;;  %12987 = vst [vmem:[#allocation30_spill] sm:$0xff] %v9933_v33  ;;  %v1041_v17 = vrot.slane %v9738_v44, 2 }
 0x2b7   :  { %12980 = vst [vmem:[#allocation26_spill] sm:$0xff] %v9914_v52  ;;  %v1043_v56 = vrot.slane %v9802_v8, 1  ;;  %v1046_v49 = vrot.slane %v9814_v63, 7  ;;  %v1050_v41 = vrot.slane %v9829_v5, 5  ;;  %v1040_v55 = vsel %vm1017_vm2, %v1039_v61, %v1038_v35 }
 0x2b8   :  { %12982 = vst [vmem:[#allocation27_spill] sm:$0xff] %v9921_v16  ;;  %12984 = vst [vmem:[#allocation28_spill] sm:$0xff] %v9925_v48  ;;  %v1048_v48 = vrot.slane %v9816_v50, 6  ;;  %v12988_v4 = vrot.slane %v9736_v43, 7  ;;  %v773_v16 = vpack.c.bf16 %v9843_v21, %v9843_v21  ;;  %v1042_v1 = vsel %vm1020_vm3, %v1041_v17, %v1040_v55 }
 0x2b9   :  { %12986 = vst [vmem:[#allocation29_spill] sm:$0xff] %v9929_v2  ;;  %v772_v2 = vpack.c.bf16 %v9837_v10, %v9837_v10  ;;  %v12989_v52 = vrot.slane %v9738_v44, 6  ;;  %v774_v5 = vpack.c.bf16 %v9846_v57, %v9846_v57  ;;  %v775_v43 = vpack.c.bf16 %v9849_v58, %v9849_v58 }
 0x2ba   :  { %v1018_v25 = vsel %vm1017_vm2, %v12988_v4, %v9746_v53  ;;  %v1044_v53 = vsel %vm1023_vm4, %v1043_v56, %v1042_v1  ;;  %v12990_v61 = vrot.slane %v9802_v8, 5  ;;  %v9965_v34 = vunpack.c.l.b16 %v773_v16 }
 0x2bb   :  { %v1021_v33 = vsel %vm1020_vm3, %v12989_v52, %v1018_v25  ;;  %v9963_v4 = vunpack.c.l.b16 %v772_v2  ;;  %v1045_v44 = vsel %vm1026_vm5, %v9810_v32, %v1044_v53  ;;  %v12991_v52 = vrot.slane %v9810_v32, 4 }
 0x2bc   :  { %v1024_v35 = vsel %vm1023_vm4, %v12990_v61, %v1021_v33  ;;  %v9972_v17 = vunpack.c.l.b16 %v774_v5  ;;  %v9974_v25 = vunpack.c.l.b16 %v775_v43  ;;  %v1047_v1 = vsel %vm1029_vm6, %v1046_v49, %v1045_v44 }
 0x2bd   :  { %v1027_v55 = vsel %vm1026_vm5, %v12991_v52, %v1024_v35  ;;  %v12992_v8 = vrot.slane %v9814_v63, 3  ;;  %v1049_v33 = vsel %vm1032_vm7, %v1048_v48, %v1047_v1  ;;  %v12993_v32 = vrot.slane %v9816_v50, 2 }
 0x2be   :  { %v1051_v49 = vsel %vm1035_vm8, %v1050_v41, %v1049_v33  ;;  %v12994_v61 = vrot.slane %v9861_v54, 4  ;;  %v12995_v35 = vrot.slane %v9863_v40, 3  ;;  %v1134_v48 = vrot.slane %v9865_v28, 2 }
 0x2bf   :  { %v1030_v56 = vsel %vm1029_vm6, %v12992_v8, %v1027_v55  ;;  %v1052_v52 = vpack.c.b16 %v1051_v49, %v1051_v49  ;;  %v1136_v55 = vrot.slane %v9867_v15, 1  ;;  %v1139_v1 = vrot.slane %v9965_v34, 7 }
 0x2c0   :  { %v1033_v53 = vsel %vm1032_vm7, %v12993_v32, %v1030_v56  ;;  %v1133_v44 = vsel %vm1017_vm2, %v12995_v35, %v12994_v61  ;;  %v1141_v41 = vrot.slane %v9972_v17, 6  ;;  %v668_v54 = vrot.slane %v9711_v3, 1 }
 0x2c1   :  { %v1036_v63 = vsel %vm1035_vm8, %v1034_v46, %v1033_v53  ;;  %v1135_v8 = vsel %vm1020_vm3, %v1134_v48, %v1133_v44  ;;  %v1143_v46 = vrot.slane %v9974_v25, 5  ;;  %v1058_v40 = vsel %vm1053_vm9, %v1052_v52, 0 }
 0x2c2   :  { %v1037_v50 = vpack.c.b16 %v1036_v63, %v1036_v63  ;;  %v1137_v56 = vsel %vm1023_vm4, %v1136_v55, %v1135_v8  ;;  %v669_v33 = vrot.slane %v9720_v11, 1  ;;  %v670_v32 = vrot.slane %v9722_v12, 1  ;;  %8821 = vmatpush3.bf16.xpose.msra.mxu1 %v1058_v40 }
 0x2c3   :  { %v1138_v53 = vsel %vm1026_vm5, %v9963_v4, %v1137_v56  ;;  %v671_v49 = vrot.slane %v9725_v20, 1  ;;  %v780_v63 = vpack.c.bf16 %v668_v54, %v668_v54  ;;  %v1225_v61 = vsel %vm1017_vm2, %v9765_v14, %v9750_v62 }
 0x2c4   :  { %v12996_v35 = vmov 0.0   ;;  %v1140_v44 = vsel %vm1029_vm6, %v1139_v1, %v1138_v53  ;;  %v781_v48 = vpack.c.bf16 %v669_v33, %v669_v33  ;;  %v782_v52 = vpack.c.bf16 %v670_v32, %v670_v32 }
 0x2c5   :  { %8832 = vmatprep.subr.bf16.mxu1 %v12996_v35  ;;  %v12997_v55 = vunpack.c.l.b16 %v9727_v29  ;;  %v1142_v40 = vsel %vm1032_vm7, %v1141_v41, %v1140_v44  ;;  %v783_v43 = vpack.c.bf16 %v671_v49, %v671_v49  ;;  %v1204_v56 = vunpack.c.l.b16 %v780_v63 }
 0x2c6   :  { %v12998_v5 = vunpack.c.l.b16 %v9729_v31  ;;  %v1144_v16 = vsel %vm1035_vm8, %v1143_v46, %v1142_v40  ;;  %v1205_v2 = vunpack.c.l.b16 %v781_v48  ;;  %v1206_v62 = vunpack.c.l.b16 %v782_v52 }
 0x2c7   :  { %v1226_v8 = vrot.slane %v12997_v55, 2  ;;  %v1145_v27 = vpack.c.b16 %v1144_v16, %v1144_v16  ;;  %v1207_v1 = vunpack.c.l.b16 %v783_v43  ;;  %v1214_v33 = vrot.slane %v1204_v56, 4 }
 0x2c8   :  { %v1228_v54 = vrot.slane %v12998_v5, 1  ;;  %v1216_v29 = vrot.slane %v1205_v2, 3  ;;  %v1218_v53 = vrot.slane %v1206_v62, 2  ;;  %v1231_v49 = vrot.slane %v1205_v2, 7 }
 0x2c9   :  { %v1227_v14 = vsel %vm1020_vm3, %v1226_v8, %v1225_v61  ;;  %v1150_v63 = vsel %vm1053_vm9, %v1145_v27, 0  ;;  %v1220_v31 = vrot.slane %v1207_v1, 1  ;;  %v1233_v5 = vrot.slane %v1206_v62, 6  ;;  %8823 = vmatmul.mubr.msk.bf16.vlgmr.msra.gmra.mxu1 %vm1053_vm9, %v1037_v50 }
 0x2ca   :  { %v1229_v32 = vsel %vm1023_vm4, %v1228_v54, %v1227_v14  ;;  %v1235_v44 = vrot.slane %v1207_v1, 5  ;;  %8827 = vmatpush3.bf16.xpose.msra.mxu0 %v1150_v63  ;;  %v12999_v16 = vrot.slane %v9865_v28, 6  ;;  %v1211_v61 = vsel %vm1020_vm3, %v9755_v0, %v9763_v13  ;;  %8834 = vmatprep.mubr.msk.bf16.mxu1 %vm9501_vm1, %v12996_v35 }
 0x2cb   :  { %v1230_v41 = vsel %vm1026_vm5, %v1204_v56, %v1229_v32  ;;  %v676_v2 = vrot.slane %v9837_v10, 1  ;;  %v13000_v50 = vrot.slane %v9867_v15, 5  ;;  %v1213_v28 = vsel %vm1023_vm4, %v9759_v6, %v1211_v61  ;;  %8838 = vmatprep.subr.bf16.mxu0 %v12996_v35 }
 0x2cc   :  { %v1232_v46 = vsel %vm1029_vm6, %v1231_v49, %v1230_v41  ;;  %v1119_v43 = vsel %vm1020_vm3, %v12999_v16, %v9892_v60  ;;  %v677_v60 = vrot.slane %v9843_v21, 1  ;;  %v13001_v13 = vrot.slane %v9963_v4, 4 }
 0x2cd   :  { %v1234_v27 = vsel %vm1032_vm7, %v1233_v5, %v1232_v46  ;;  %v1121_v48 = vsel %vm1023_vm4, %v13000_v50, %v1119_v43  ;;  %v1215_v55 = vsel %vm1026_vm5, %v1214_v33, %v1213_v28  ;;  %v678_v8 = vrot.slane %v9846_v57, 1 }
 0x2ce   :  { %v1236_v0 = vsel %vm1035_vm8, %v1235_v44, %v1234_v27  ;;  %v1123_v52 = vsel %vm1026_vm5, %v13001_v13, %v1121_v48  ;;  %v13002_v40 = vrot.slane %v9965_v34, 3  ;;  %v1217_v6 = vsel %vm1029_vm6, %v1216_v29, %v1215_v55 }
 0x2cf   :  { %v1237_v15 = vpack.c.b16 %v1236_v0, %v1236_v0  ;;  %v679_v54 = vrot.slane %v9849_v58, 1  ;;  %v13003_v62 = vrot.slane %v9972_v17, 2  ;;  %v1219_v4 = vsel %vm1032_vm7, %v1218_v53, %v1217_v6 }
 0x2d0   :  { %v1125_v56 = vsel %vm1029_vm6, %v13002_v40, %v1123_v52  ;;  %v788_v1 = vpack.c.bf16 %v676_v2, %v676_v2  ;;  %v789_v32 = vpack.c.bf16 %v677_v60, %v677_v60  ;;  %v13004_v41 = vrot.slane %v9974_v25, 1 }
 0x2d1   :  { %v1127_v14 = vsel %vm1032_vm7, %v13003_v62, %v1125_v56  ;;  %v1242_v33 = vsel %vm1053_vm9, %v1237_v15, 0  ;;  %v1221_v49 = vsel %vm1035_vm8, %v1220_v31, %v1219_v4  ;;  %v790_v63 = vpack.c.bf16 %v678_v8, %v678_v8 }
 0x2d2   :  { %v1129_v34 = vsel %vm1035_vm8, %v13004_v41, %v1127_v14  ;;  %8833 = vmatpush3.bf16.xpose.msra.mxu1 %v1242_v33  ;;  %v1222_v5 = vpack.c.b16 %v1221_v49, %v1221_v49  ;;  %v791_v44 = vpack.c.bf16 %v679_v54, %v679_v54  ;;  %v1296_v17 = vunpack.c.l.b16 %v788_v1 }
 0x2d3   :  { %v1130_v29 = vpack.c.b16 %v1129_v34, %v1129_v34  ;;  %8844 = vmatprep.subr.bf16.mxu1 %v12996_v35  ;;  %v1297_v46 = vunpack.c.l.b16 %v789_v32  ;;  %v1298_v53 = vunpack.c.l.b16 %v790_v63  ;;  %v1317_v16 = vsel %vm1017_vm2, %v9904_v37, %v9896_v36 }
 0x2d4   :  { %v13005_v25 = vunpack.c.l.b16 %v9851_v9  ;;  %v1299_v31 = vunpack.c.l.b16 %v791_v44  ;;  %v1306_v61 = vrot.slane %v1296_v17, 4  ;;  %v13006_v2 = vunpack.c.l.b16 %v9853_v59 }
 0x2d5   :  { %8829 = vmatmul.mubr.msk.bf16.vlgmr.msra.gmra.mxu0 %vm1053_vm9, %v1130_v29  ;;  %v700_v50 = vrot.slane %v9711_v3, 2  ;;  %v1308_v48 = vrot.slane %v1297_v46, 3  ;;  %v1310_v28 = vrot.slane %v1298_v53, 2  ;;  %v1323_v0 = vrot.slane %v1297_v46, 7 }
 0x2d6   :  { %v1318_v43 = vrot.slane %v13005_v25, 2  ;;  %v1320_v27 = vrot.slane %v13006_v2, 1  ;;  %8840 = vmatprep.mubr.msk.bf16.mxu0 %vm9501_vm1, %v12996_v35  ;;  %v1312_v36 = vrot.slane %v1299_v31, 1  ;;  %v1325_v37 = vrot.slane %v1298_v53, 6 }
 0x2d7   :  { %v1327_v13 = vrot.slane %v1299_v31, 5  ;;  %v701_v59 = vrot.slane %v9720_v11, 2  ;;  %v702_v55 = vrot.slane %v9722_v12, 2  ;;  %v703_v8 = vrot.slane %v9725_v20, 2 }
 0x2d8   :  { %v1319_v60 = vsel %vm1020_vm3, %v1318_v43, %v1317_v16  ;;  %v796_v40 = vpack.c.bf16 %v700_v50, %v700_v50  ;;  %v1409_v56 = vsel %vm1017_vm2, %v9776_v23, %v9774_v22  ;;  %v13007_v6 = vunpack.c.l.b16 %v9732_v38 }
 0x2d9   :  { %v1321_v9 = vsel %vm1023_vm4, %v1320_v27, %v1319_v60  ;;  %8835 = vmatmul.mubr.msk.bf16.vlgmr.msra.gmra.mxu1 %vm1053_vm9, %v1222_v5  ;;  %v797_v14 = vpack.c.bf16 %v701_v59, %v701_v59  ;;  %v798_v4 = vpack.c.bf16 %v702_v55, %v702_v55  ;;  %v799_v1 = vpack.c.bf16 %v703_v8, %v703_v8 }
 0x2da   :  { %v1322_v52 = vsel %vm1026_vm5, %v1296_v17, %v1321_v9  ;;  %v1410_v54 = vrot.slane %v13007_v6, 2  ;;  %v1388_v33 = vunpack.c.l.b16 %v796_v40  ;;  %v13008_v34 = vunpack.c.l.b16 %v9734_v39  ;;  %8846 = vmatprep.mubr.msk.bf16.mxu1 %vm9501_vm1, %v12996_v35 }
 0x2db   :  { %v1324_v15 = vsel %vm1029_vm6, %v1323_v0, %v1322_v52  ;;  %v1389_v22 = vunpack.c.l.b16 %v797_v14  ;;  %v1390_v23 = vunpack.c.l.b16 %v798_v4  ;;  %v1391_v63 = vunpack.c.l.b16 %v799_v1 }
 0x2dc   :  { %v1326_v62 = vsel %vm1032_vm7, %v1325_v37, %v1324_v15  ;;  %v1411_v41 = vsel %vm1020_vm3, %v1410_v54, %v1409_v56  ;;  %v1412_v49 = vrot.slane %v13008_v34, 1  ;;  %v1398_v29 = vrot.slane %v1388_v33, 4 }
 0x2dd   :  { %v1328_v32 = vsel %vm1035_vm8, %v1327_v13, %v1326_v62  ;;  %v1303_v44 = vsel %vm1020_vm3, %v9884_v45, %v9902_v47  ;;  %v1395_v17 = vsel %vm1020_vm3, %v9772_v19, %v9768_v18  ;;  %v1400_v46 = vrot.slane %v1389_v22, 3 }
 0x2de   :  { %v1329_v38 = vpack.c.b16 %v1328_v32, %v1328_v32  ;;  %v1413_v5 = vsel %vm1023_vm4, %v1412_v49, %v1411_v41  ;;  %v1402_v53 = vrot.slane %v1390_v23, 2  ;;  %v1404_v16 = vrot.slane %v1391_v63, 1 }
 0x2df   :  { %v1414_v25 = vsel %vm1026_vm5, %v1388_v33, %v1413_v5  ;;  %v1415_v43 = vrot.slane %v1389_v22, 7  ;;  %v1417_v31 = vrot.slane %v1390_v23, 6  ;;  %v1419_v2 = vrot.slane %v1391_v63, 5 }
 0x2e0   :  { %v1334_v39 = vsel %vm1053_vm9, %v1329_v38, 0  ;;  %v1305_v27 = vsel %vm1023_vm4, %v9888_v42, %v1303_v44  ;;  %v1397_v45 = vsel %vm1023_vm4, %v9780_v26, %v1395_v17  ;;  %v708_v18 = vrot.slane %v9837_v10, 2  ;;  %v13011_v38 = vld [vmem:[#allocation21_spill] sm:$0xff] }
 0x2e1   :  { %8839 = vmatpush3.bf16.xpose.msra.mxu0 %v1334_v39  ;;  %v709_v19 = vrot.slane %v9843_v21, 2  ;;  %v1416_v47 = vsel %vm1029_vm6, %v1415_v43, %v1414_v25  ;;  %v1307_v50 = vsel %vm1026_vm5, %v1306_v61, %v1305_v27  ;;  %v1399_v60 = vsel %vm1026_vm5, %v1398_v29, %v1397_v45  ;;  %v13014_v25 = vld [vmem:[#allocation17_spill] sm:$0xff]  ;;  %v13015_v45 = vld [vmem:[#allocation14_spill] sm:$0xff] }
 0x2e2   :  { %8850 = vmatprep.subr.bf16.mxu0 %v12996_v35  ;;  %v710_v0 = vrot.slane %v9846_v57, 2  ;;  %v1418_v9 = vsel %vm1032_vm7, %v1417_v31, %v1416_v47  ;;  %v1309_v42 = vsel %vm1029_vm6, %v1308_v48, %v1307_v50  ;;  %v1401_v26 = vsel %vm1029_vm6, %v1400_v46, %v1399_v60  ;;  %v13017_v50 = vld [vmem:[#allocation15_spill] sm:$0xff] }
 0x2e3   :  { %v711_v37 = vrot.slane %v9849_v58, 2  ;;  %v1420_v13 = vsel %vm1035_vm8, %v1419_v2, %v1418_v9  ;;  %v1311_v52 = vsel %vm1032_vm7, %v1310_v28, %v1309_v42  ;;  %v1403_v59 = vsel %vm1032_vm7, %v1402_v53, %v1401_v26 }
 0x2e4   :  { %v804_v55 = vpack.c.bf16 %v708_v18, %v708_v18  ;;  %v1421_v61 = vpack.c.b16 %v1420_v13, %v1420_v13  ;;  %v1313_v8 = vsel %vm1035_vm8, %v1312_v36, %v1311_v52  ;;  %v1405_v15 = vsel %vm1035_vm8, %v1404_v16, %v1403_v59  ;;  %v13013_v16 = vld [vmem:[#allocation16_spill] sm:$0xff] }
 0x2e5   :  { %v805_v40 = vpack.c.bf16 %v709_v19, %v709_v19  ;;  %v13009_v56 = vunpack.c.l.b16 %v9869_v51  ;;  %v1314_v6 = vpack.c.b16 %v1313_v8, %v1313_v8  ;;  %v806_v54 = vpack.c.bf16 %v710_v0, %v710_v0 }
 0x2e6   :  { %v807_v62 = vpack.c.bf16 %v711_v37, %v711_v37  ;;  %v1426_v14 = vsel %vm1053_vm9, %v1421_v61, 0  ;;  %v1480_v4 = vunpack.c.l.b16 %v804_v55  ;;  %v1501_v1 = vsel %vm1017_vm2, %v9916_v30, %v9906_v7 }
 0x2e7   :  { %v10127_v48 = vrot.slane %v13009_v56, 3  ;;  %v1481_v28 = vunpack.c.l.b16 %v805_v40  ;;  %8845 = vmatpush3.bf16.xpose.msra.mxu1 %v1426_v14  ;;  %v1406_v36 = vpack.c.b16 %v1405_v15, %v1405_v15  ;;  %v1482_v32 = vunpack.c.l.b16 %v806_v54  ;;  %v13019_v14 = vld [vmem:[#allocation30_spill] sm:$0xff] }
 0x2e8   :  { %8841 = vmatmul.mubr.msk.bf16.vlgmr.msra.gmra.mxu0 %vm1053_vm9, %v1314_v6  ;;  %v1483_v33 = vunpack.c.l.b16 %v807_v62  ;;  %v13010_v51 = vunpack.c.l.b16 %v9855_v24  ;;  %8856 = vmatprep.subr.bf16.mxu1 %v12996_v35  ;;  %v1490_v34 = vrot.slane %v1480_v4, 4  ;;  %v13012_v22 = vunpack.c.l.b16 %v13011_v38 }
 0x2e9   :  { %v1492_v49 = vrot.slane %v1481_v28, 3  ;;  %v732_v63 = vrot.slane %v9711_v3, 3  ;;  %8852 = vmatprep.mubr.msk.bf16.mxu0 %vm9501_vm1, %v12996_v35  ;;  %v1494_v7 = vrot.slane %v1482_v32, 2  ;;  %v1507_v29 = vrot.slane %v1481_v28, 7 }
 0x2ea   :  { %v1502_v41 = vrot.slane %v13010_v51, 2  ;;  %v1504_v23 = vrot.slane %v13012_v22, 1  ;;  %v1509_v5 = vrot.slane %v1482_v32, 6  ;;  %v1511_v44 = vrot.slane %v1483_v33, 5  ;;  %v13024_v22 = vld [vmem:[#allocation20_spill] sm:$0xff] }
 0x2eb   :  { %v733_v17 = vrot.slane %v9720_v11, 3  ;;  %v734_v39 = vrot.slane %v9722_v12, 3  ;;  %v735_v53 = vrot.slane %v9725_v20, 3  ;;  %v812_v3 = vpack.c.bf16 %v732_v63, %v732_v63 }
 0x2ec   :  { %v1503_v30 = vsel %vm1020_vm3, %v1502_v41, %v1501_v1  ;;  %v1593_v43 = vsel %vm1017_vm2, %v13014_v25, %v13013_v16  ;;  %v13016_v18 = vunpack.c.l.b16 %v13015_v45  ;;  %v13018_v60 = vunpack.c.l.b16 %v13017_v50  ;;  %v13021_v1 = vld [vmem:[#allocation19_spill] sm:$0xff]  ;;  %v13023_v41 = vld [vmem:[#allocation26_spill] sm:$0xff] }
 0x2ed   :  { %v1505_v24 = vsel %vm1023_vm4, %v1504_v23, %v1503_v30  ;;  %v813_v2 = vpack.c.bf16 %v733_v17, %v733_v17  ;;  %v814_v27 = vpack.c.bf16 %v734_v39, %v734_v39  ;;  %v815_v47 = vpack.c.bf16 %v735_v53, %v735_v53 }
 0x2ee   :  { %v1506_v46 = vsel %vm1026_vm5, %v1480_v4, %v1505_v24  ;;  %v1594_v19 = vrot.slane %v13016_v18, 2  ;;  %v1572_v12 = vunpack.c.l.b16 %v812_v3  ;;  %v1596_v0 = vrot.slane %v13018_v60, 1  ;;  %8847 = vmatmul.mubr.msk.bf16.vlgmr.msra.gmra.mxu1 %vm1053_vm9, %v1406_v36  ;;  %v13020_v4 = vld [vmem:[#allocation25_spill] sm:$0xff]  ;;  %v13022_v36 = vld [vmem:[#allocation18_spill] sm:$0xff]  ;;  %v13027_v3 = vld [vmem:[#allocation27_spill] sm:$0xff] }
 0x2ef   :  { %v1508_v31 = vsel %vm1029_vm6, %v1507_v29, %v1506_v46  ;;  %v1573_v9 = vunpack.c.l.b16 %v813_v2  ;;  %v1574_v42 = vunpack.c.l.b16 %v814_v27  ;;  %v1496_v37 = vrot.slane %v1483_v33, 1  ;;  %8858 = vmatprep.mubr.msk.bf16.mxu1 %vm9501_vm1, %v12996_v35  ;;  %v13025_v46 = vld [vmem:[#allocation22_spill] sm:$0xff] }
 0x2f0   :  { %v1510_v11 = vsel %vm1032_vm7, %v1509_v5, %v1508_v31  ;;  %v1595_v26 = vsel %vm1020_vm3, %v1594_v19, %v1593_v43  ;;  %v1575_v52 = vunpack.c.l.b16 %v815_v47  ;;  %v1582_v55 = vrot.slane %v1572_v12, 4  ;;  %v13029_v47 = vld [vmem:[#allocation23_spill] sm:$0xff] }
 0x2f1   :  { %v1512_v20 = vsel %vm1035_vm8, %v1511_v44, %v1510_v11  ;;  %v1597_v59 = vsel %vm1023_vm4, %v1596_v0, %v1595_v26  ;;  %v1584_v61 = vrot.slane %v1573_v9, 3  ;;  %v1599_v15 = vrot.slane %v1573_v9, 7  ;;  %v13028_v11 = vld [vmem:[#allocation29_spill] sm:$0xff]  ;;  %v13033_v26 = vld [vmem:[#allocation28_spill] sm:$0xff] }
 0x2f2   :  { %v1513_v13 = vpack.c.b16 %v1512_v20, %v1512_v20  ;;  %v1598_v8 = vsel %vm1026_vm5, %v1572_v12, %v1597_v59  ;;  %v1586_v56 = vrot.slane %v1574_v42, 2  ;;  %v1601_v6 = vrot.slane %v1574_v42, 6  ;;  %v13031_v20 = vld [vmem:[#allocation24_spill] sm:$0xff] }
 0x2f3   :  { %v1603_v54 = vrot.slane %v1575_v52, 5  ;;  %v1600_v62 = vsel %vm1029_vm6, %v1599_v15, %v1598_v8  ;;  %v1487_v28 = vsel %vm1020_vm3, %v13020_v4, %v13019_v14  ;;  %v1579_v32 = vsel %vm1020_vm3, %v13022_v36, %v13021_v1 }
 0x2f4   :  { %v1518_v40 = vsel %vm1053_vm9, %v1513_v13, 0  ;;  %v740_v33 = vrot.slane %v9837_v10, 3  ;;  %v1602_v51 = vsel %vm1032_vm7, %v1601_v6, %v1600_v62  ;;  %v1489_v38 = vsel %vm1023_vm4, %v13023_v41, %v1487_v28 }
 0x2f5   :  { %8851 = vmatpush3.bf16.xpose.msra.mxu0 %v1518_v40  ;;  %v1581_v23 = vsel %vm1023_vm4, %v13024_v22, %v1579_v32  ;;  %v741_v63 = vrot.slane %v9843_v21, 3  ;;  %v1604_v30 = vsel %vm1035_vm8, %v1603_v54, %v1602_v51  ;;  %v1491_v29 = vsel %vm1026_vm5, %v1490_v34, %v1489_v38 }
 0x2f6   :  { %8862 = vmatprep.subr.bf16.mxu0 %v12996_v35  ;;  %v1583_v5 = vsel %vm1026_vm5, %v1582_v55, %v1581_v23  ;;  %v742_v10 = vrot.slane %v9846_v57, 3  ;;  %v1605_v24 = vpack.c.b16 %v1604_v30, %v1604_v30  ;;  %v1493_v44 = vsel %vm1029_vm6, %v1492_v49, %v1491_v29  ;;  %v39_v30 = vld [vmem:[%s12857_s1] sm:$0x3] }
 0x2f7   :  { %v1585_v17 = vsel %vm1029_vm6, %v1584_v61, %v1583_v5  ;;  %v743_v39 = vrot.slane %v9849_v58, 3  ;;  %v13026_v53 = vunpack.c.l.b16 %v13025_v46  ;;  %v1495_v16 = vsel %vm1032_vm7, %v1494_v7, %v1493_v44 }
 0x2f8   :  { %v820_v25 = vpack.c.bf16 %v740_v33, %v740_v33  ;;  %v821_v34 = vpack.c.bf16 %v741_v63, %v741_v63  ;;  %v1610_v43 = vsel %vm1053_vm9, %v1605_v24, 0  ;;  %v1497_v57 = vsel %vm1035_vm8, %v1496_v37, %v1495_v16  ;;  %v13035_v24 = vld [vmem:[#allocation5_spill] sm:$0xff] }
 0x2f9   :  { %v1669_v21 = vsel %vm1017_vm2, %v13027_v3, %v13026_v53  ;;  %v1587_v31 = vsel %vm1032_vm7, %v1586_v56, %v1585_v17  ;;  %v822_v49 = vpack.c.bf16 %v742_v10, %v742_v10  ;;  %v1588_v2 = vrot.slane %v1575_v52, 1  ;;  %8857 = vmatpush3.bf16.xpose.msra.mxu1 %v1610_v43  ;;  %v13036_v53 = vld [vmem:[#allocation6_spill] sm:$0xff] }
 0x2fa   :  { %v1498_v27 = vpack.c.b16 %v1497_v57, %v1497_v57  ;;  %v823_v58 = vpack.c.bf16 %v743_v39, %v743_v39  ;;  %v1664_v45 = vunpack.c.l.b16 %v820_v25  ;;  %v1665_v18 = vunpack.c.l.b16 %v821_v34  ;;  %8868 = vmatprep.subr.bf16.mxu1 %v12996_v35 }
 0x2fb   :  { %v1666_v19 = vunpack.c.l.b16 %v822_v49  ;;  %v1685_v7 = vsel %vm1017_vm2, %v10127_v48, %v13028_v11  ;;  %v13030_v12 = vunpack.c.l.b16 %v13029_v47  ;;  %v1589_v60 = vsel %vm1035_vm8, %v1588_v2, %v1587_v31 }
 0x2fc   :  { %8853 = vmatmul.mubr.msk.bf16.vlgmr.msra.gmra.mxu0 %vm1053_vm9, %v1498_v27  ;;  %v1667_v0 = vunpack.c.l.b16 %v823_v58  ;;  %v13032_v9 = vunpack.c.l.b16 %v13031_v20  ;;  %v1671_v37 = vsel %vm1020_vm3, %v13033_v26, %v1669_v21  ;;  %v1674_v59 = vrot.slane %v1664_v45, 4 }
 0x2fd   :  { %v1686_v50 = vrot.slane %v13030_v12, 2  ;;  %8864 = vmatprep.mubr.msk.bf16.mxu0 %vm9501_vm1, %v12996_v35  ;;  %v1691_v61 = vrot.slane %v1665_v18, 7  ;;  %v1590_v8 = vpack.c.b16 %v1589_v60, %v1589_v60  ;;  %v1693_v40 = vrot.slane %v1666_v19, 6 }
 0x2fe   :  { %v1688_v42 = vrot.slane %v13032_v9, 1  ;;  %v13034_v13 = vmov %v13032_v9  ;;  %v1676_v6 = vrot.slane %v1665_v18, 3  ;;  %v1695_v62 = vrot.slane %v1667_v0, 5 }
 0x2ff   :  { %v1672_v52 = vrot.slane %v13034_v13, 5  ;;  %v1687_v48 = vsel %vm1020_vm3, %v1686_v50, %v1685_v7  ;;  %v1678_v36 = vrot.slane %v1666_v19, 2  ;;  %v1680_v41 = vrot.slane %v1667_v0, 1 }
 0x300   :  { %v1689_v55 = vsel %vm1023_vm4, %v1688_v42, %v1687_v48  ;;  %8859 = vmatmul.mubr.msk.bf16.vlgmr.msra.gmra.mxu1 %vm1053_vm9, %v1590_v8  ;;  %v9513_v23 = vmov 1966171168   ;;  %v41_v29 = vsub.f32 1.0, %v39_v30 }
 0x301   :  { %v1690_v15 = vsel %vm1026_vm5, %v1664_v45, %v1689_v55  ;;  %v1673_v56 = vsel %vm1023_vm4, %v1672_v52, %v1671_v37  ;;  %8870 = vmatprep.mubr.msk.bf16.mxu1 %vm9501_vm1, %v12996_v35  ;;  %v45_v63 = vunpack.c.l.s4 %v9513_v23 }
 0x302   :  { %v1692_v54 = vsel %vm1029_vm6, %v1691_v61, %v1690_v15  ;;  %v1675_v14 = vsel %vm1026_vm5, %v1674_v59, %v1673_v56  ;;  %v42_v10 = vmul.f32 -1e+09, %v41_v29 }
 0x303   :  { %v1694_v4 = vsel %vm1032_vm7, %v1693_v40, %v1692_v54  ;;  %v1677_v1 = vsel %vm1029_vm6, %v1676_v6, %v1675_v14  ;;  %v46_v5 = vunpack.c.0.s8 %v45_v63 }
 0x304   :  { %v1696_v28 = vsel %vm1035_vm8, %v1695_v62, %v1694_v4  ;;  %v1679_v51 = vsel %vm1032_vm7, %v1678_v36, %v1677_v1 }
 0x305   :  { %v1697_v32 = vpack.c.b16 %v1696_v28, %v1696_v28  ;;  %v1681_v38 = vsel %vm1035_vm8, %v1680_v41, %v1679_v51  ;;  %v49_v44 = vsub.s32 %v46_v5, %v13035_v24 }
 0x306   :  { %v1682_v22 = vpack.c.b16 %v1681_v38, %v1681_v38 }
 0x307   :  { %v1702_v33 = vsel %vm1053_vm9, %v1697_v32, 0  ;;  %v50_v17 = vrot.slane %v42_v10, %v49_v44 }
 0x308   :  { %8863 = vmatpush3.bf16.xpose.msra.mxu0 %v1702_v33 }
 0x309   :  { %8874 = vmatprep.subr.bf16.mxu0 %v12996_v35  ;;  %v58_v39 = vrot.slane %v50_v17, %v49_v44  ;;  %v51_v46 = vcombine.high %v50_v17, %v50_v17 }
 0x30b   :  { %v10235_v3 = vrot.slane %v58_v39, %v13036_v53  ;;  %v65_v34 = vrot.slane %v51_v46, %v49_v44  ;;  %v13039_v39 = vld [vmem:[#allocation10_spill] sm:$0xff]  ;;  %v13040_v46 = vld [vmem:[#allocation11_spill] sm:$0xff] }
 0x30d   :  { %13037 = vst [vmem:[#allocation21_spill] sm:$0xff] %v10235_v3  ;;  %v10243_v2 = vrot.slane %v65_v34, %v13036_v53 }
 0x30f   :  { %8865 = vmatmul.mubr.msk.bf16.vlgmr.msra.gmra.mxu0 %vm1053_vm9, %v1682_v22  ;;  %13038 = vst [vmem:[#allocation16_spill] sm:$0xff] %v10243_v2 }
 0x310   :  { %8876 = vmatprep.mubr.msk.bf16.mxu0 %vm9501_vm1, %v12996_v35 }
 0x389   :  { %v1094_v21 = vpop.f32.mrf.mxu1 }
 0x38a   :  { %v1744_v16 = vmul.f32 0.35355338, %v1094_v21  ;;  %v10272_v21 = vpop.permute.xlu1 %222 }
 0x38b   :  { %v8824_v25 = vpop.f32.mrf.mxu1 }
 0x38c   :  { %v10238_v43 = vadd.f32 %v10235_v3, %v1744_v16  ;;  %v10274_v16 = vpop.permute.xlu0 %216 }
 0x38d   :  { %v1097_v57 = vpop.f32.mrf.mxu1 }
 0x38e   :  { %v1770_v31 = vsel %vm1053_vm9, %v10238_v43, -inf  ;;  %v10276_v25 = vpop.permute.xlu1 %218 }
 0x38f   :  { %1771 = vmax.xlane.f32.xlu0 %v1770_v31  ;;  %v8825_v49 = vpop.f32.mrf.mxu1 }
 0x392   :  { %v10279_v49 = vpop.permute.xlu1 %224 }
 0x395   :  { %v1186_v27 = vpop.f32.mrf.mxu0 }
 0x396   :  { %v1745_v58 = vmul.f32 0.35355338, %v1186_v27 }
 0x397   :  { %v8830_v45 = vpop.f32.mrf.mxu0 }
 0x398   :  { %v10246_v18 = vadd.f32 %v10243_v2, %v1745_v58 }
 0x399   :  { %v1189_v19 = vpop.f32.mrf.mxu0  ;;  %v1278_v11 = vpop.f32.mrf.mxu1 }
 0x39a   :  { %v1773_v7 = vsel %vm1053_vm9, %v10246_v18, -inf  ;;  %v1746_v47 = vmul.f32 0.35355338, %v1278_v11 }
 0x39b   :  { %1774 = vmax.xlane.f32.xlu1 %v1773_v7  ;;  %v8831_v12 = vpop.f32.mrf.mxu0  ;;  %v8836_v50 = vpop.f32.mrf.mxu1 }
 0x39c   :  { %v10251_v60 = vadd.f32 %v10235_v3, %v1746_v47 }
 0x39d   :  { %v1281_v0 = vpop.f32.mrf.mxu1 }
 0x39e   :  { %v1776_v20 = vsel %vm1053_vm9, %v10251_v60, -inf }
 0x39f   :  { %1777 = vmax.xlane.f32.xlu0 %v1776_v20  ;;  %v8837_v9 = vpop.f32.mrf.mxu1 }
 0x3a8   :  { %v1370_v42 = vpop.f32.mrf.mxu0 }
 0x3a9   :  { %v1747_v26 = vmul.f32 0.35355338, %v1370_v42 }
 0x3aa   :  { %v8842_v37 = vpop.f32.mrf.mxu0 }
 0x3ab   :  { %v10256_v13 = vadd.f32 %v10243_v2, %v1747_v26 }
 0x3ac   :  { %v1373_v52 = vpop.f32.mrf.mxu0 }
 0x3ad   :  { %v1779_v48 = vsel %vm1053_vm9, %v10256_v13, -inf }
 0x3ae   :  { %1780 = vmax.xlane.f32.xlu0 %v1779_v48  ;;  %v8843_v59 = vpop.f32.mrf.mxu0  ;;  %v1462_v55 = vpop.f32.mrf.mxu1 }
 0x3af   :  { %v1748_v61 = vmul.f32 0.35355338, %v1462_v55 }
 0x3b0   :  { %v8848_v8 = vpop.f32.mrf.mxu1 }
 0x3b1   :  { %v1766_v15 = vadd.f32 %v10235_v3, %v1748_v61 }
 0x3b2   :  { %v1465_v40 = vpop.f32.mrf.mxu1 }
 0x3b3   :  { %v1782_v56 = vsel %vm1053_vm9, %v1766_v15, -inf }
 0x3b4   :  { %v8849_v6 = vpop.f32.mrf.mxu1  ;;  %1783 = vmax.xlane.f32.xlu0 %v1782_v56 }
 0x3bc   :  { %v1554_v54 = vpop.f32.mrf.mxu0 }
 0x3bd   :  { %v1749_v62 = vmul.f32 0.35355338, %v1554_v54 }
 0x3be   :  { %v8854_v14 = vpop.f32.mrf.mxu0 }
 0x3bf   :  { %v1767_v4 = vadd.f32 %v10243_v2, %v1749_v62 }
 0x3c0   :  { %v1557_v28 = vpop.f32.mrf.mxu0  ;;  %v1646_v1 = vpop.f32.mrf.mxu1 }
 0x3c1   :  { %v1785_v36 = vsel %vm1053_vm9, %v1767_v4, -inf  ;;  %v1750_v32 = vmul.f32 0.35355338, %v1646_v1 }
 0x3c2   :  { %1786 = vmax.xlane.f32.xlu1 %v1785_v36  ;;  %v8855_v33 = vpop.f32.mrf.mxu0  ;;  %v8860_v51 = vpop.f32.mrf.mxu1 }
 0x3c3   :  { %v1768_v41 = vadd.f32 %v10235_v3, %v1750_v32 }
 0x3c4   :  { %v1649_v38 = vpop.f32.mrf.mxu1 }
 0x3c5   :  { %v1788_v22 = vsel %vm1053_vm9, %v1768_v41, -inf }
 0x3c6   :  { %v8861_v23 = vpop.f32.mrf.mxu1  ;;  %1789 = vmax.xlane.f32.xlu0 %v1788_v22 }
 0x3cf   :  { %v1738_v63 = vpop.f32.mrf.mxu0 }
 0x3d0   :  { %v1751_v30 = vmul.f32 0.35355338, %v1738_v63 }
 0x3d1   :  { %v8866_v29 = vpop.f32.mrf.mxu0 }
 0x3d2   :  { %v1769_v5 = vadd.f32 %v10243_v2, %v1751_v30  ;;  %v13041_v29 = vld [vmem:[#allocation12_spill] sm:$0xff] }
 0x3d3   :  { %v1741_v10 = vpop.f32.mrf.mxu0 }
 0x3d4   :  { %v1791_v44 = vsel %vm1053_vm9, %v1769_v5, -inf }
 0x3d5   :  { %1792 = vmax.xlane.f32.xlu1 %v1791_v44  ;;  %v8867_v17 = vpop.f32.mrf.mxu0 }
 0x3dc   :  { %228 = vrot.lane.b32.xlu0 %v13039_v39, %s9514_s15 }
 0x3e6   :  { %230 = vrot.lane.b32.xlu1 %v13040_v46, %s9514_s15 }
 0x418   :  { %v1772_v34 = vpop.xlane.xlu0 %1771 }
 0x419   :  { %v1794_v57 = vsub.f32 %v10238_v43, %v1772_v34 }
 0x41b   :  { %v1802_v31 = vmul.f32 1.442695, %v1794_v57 }
 0x41d   :  { %9337 = vpow2.f32 %v1802_v31 }
 0x424   :  { %v1775_v27 = vpop.xlane.xlu1 %1774 }
 0x425   :  { %v1795_v58 = vsub.f32 %v10246_v18, %v1775_v27 }
 0x427   :  { %v1804_v45 = vmul.f32 1.442695, %v1795_v58  ;;  %v13042_v58 = vld [vmem:[#allocation13_spill] sm:$0xff] }
 0x428   :  { %v1778_v47 = vpop.xlane.xlu0 %1777 }
 0x429   :  { %9339 = vpow2.f32 %v1804_v45  ;;  %v1796_v12 = vsub.f32 %v10251_v60, %v1778_v47 }
 0x42a   :  { %v10282_v19 = vpop.eup %9337 }
 0x42b   :  { %v1818_v11 = vsel %vm1053_vm9, %v10282_v19, 0.0  ;;  %v1806_v0 = vmul.f32 1.442695, %v1796_v12 }
 0x42c   :  { %1819 = vadd.xlane.f32.xlu0 %v1818_v11 }
 0x42d   :  { %9341 = vpow2.f32 %v1806_v0 }
 0x436   :  { %v10286_v7 = vpop.eup %9339 }
 0x437   :  { %v1821_v43 = vsel %vm1053_vm9, %v10286_v7, 0.0  ;;  %v1781_v18 = vpop.xlane.xlu0 %1780 }
 0x438   :  { %1822 = vadd.xlane.f32.xlu1 %v1821_v43  ;;  %v1797_v42 = vsub.f32 %v10256_v13, %v1781_v18 }
 0x43a   :  { %v1808_v48 = vmul.f32 1.442695, %v1797_v42 }
 0x43d   :  { %v1784_v50 = vpop.xlane.xlu0 %1783 }
 0x43e   :  { %v1798_v20 = vsub.f32 %v1766_v15, %v1784_v50  ;;  %v10296_v15 = vpop.eup %9341 }
 0x43f   :  { %v1824_v13 = vsel %vm1053_vm9, %v10296_v15, 0.0 }
 0x440   :  { %v1810_v26 = vmul.f32 1.442695, %v1798_v20 }
 0x442   :  { %234 = vrot.lane.b32.xlu0 %v13039_v39, %s9515_s16  ;;  %9343 = vpow2.f32 %v1810_v26 }
 0x443   :  { %9345 = vpow2.f32 %v1808_v48 }
 0x449   :  { %236 = vrot.lane.b32.xlu1 %v13040_v46, %s9515_s16 }
 0x44b   :  { %v1787_v9 = vpop.xlane.xlu1 %1786 }
 0x44c   :  { %v1799_v52 = vsub.f32 %v1767_v4, %v1787_v9 }
 0x44e   :  { %v1812_v55 = vmul.f32 1.442695, %v1799_v52 }
 0x44f   :  { %v1790_v37 = vpop.xlane.xlu0 %1789  ;;  %v10300_v56 = vpop.eup %9343 }
 0x450   :  { %v1800_v59 = vsub.f32 %v1768_v41, %v1790_v37  ;;  %9347 = vpow2.f32 %v1812_v55  ;;  %v10302_v6 = vpop.eup %9345  ;;  %v1830_v54 = vsel %vm1053_vm9, %v10300_v56, 0.0 }
 0x451   :  { %v1827_v28 = vsel %vm1053_vm9, %v10302_v6, 0.0 }
 0x452   :  { %v1814_v8 = vmul.f32 1.442695, %v1800_v59 }
 0x453   :  { %v229_v33 = vpop.permute.xlu0 %228 }
 0x454   :  { %9349 = vpow2.f32 %v1814_v8  ;;  %v376_v41 = vcombine.low %v10274_v16, %v229_v33  ;;  %v377_v38 = vcombine.high %v10274_v16, %v229_v33 }
 0x456   :  { %v391_v10 = vrot.slane %v377_v38, %v13041_v29 }
 0x45d   :  { %v10306_v62 = vpop.eup %9347 }
 0x45e   :  { %v1793_v61 = vpop.xlane.xlu1 %1792  ;;  %v1833_v4 = vsel %vm1053_vm9, %v10306_v62, 0.0 }
 0x45f   :  { %v1801_v40 = vsub.f32 %v1769_v5, %v1793_v61  ;;  %v384_v5 = vrot.slane %v376_v41, %v13041_v29 }
 0x461   :  { %v1816_v60 = vmul.f32 1.442695, %v1801_v40  ;;  %1825 = vadd.xlane.f32.xlu0 %v1824_v13  ;;  %v10308_v14 = vpop.eup %9349 }
 0x462   :  { %v1836_v36 = vsel %vm1053_vm9, %v10308_v14, 0.0  ;;  %v231_v22 = vpop.permute.xlu1 %230 }
 0x463   :  { %9351 = vpow2.f32 %v1816_v60  ;;  %v580_v39 = vcombine.low %v10276_v25, %v231_v22  ;;  %v581_v46 = vcombine.high %v10276_v25, %v231_v22 }
 0x465   :  { %1831 = vadd.xlane.f32.xlu0 %v1830_v54  ;;  %v588_v43 = vrot.slane %v580_v39, %v13041_v29  ;;  %v595_v47 = vrot.slane %v581_v46, %v13041_v29 }
 0x469   :  { %1834 = vadd.xlane.f32.xlu0 %v1833_v4 }
 0x46d   :  { %1828 = vadd.xlane.f32.xlu1 %v1827_v28  ;;  %1837 = vadd.xlane.f32.xlu0 %v1836_v36 }
 0x470   :  { %v10314_v1 = vpop.eup %9351 }
 0x471   :  { %v1839_v32 = vsel %vm1053_vm9, %v10314_v1, 0.0 }
 0x472   :  { %1840 = vadd.xlane.f32.xlu1 %v1839_v32 }
 0x4b5   :  { %v1820_v51 = vpop.xlane.xlu0 %1819 }
 0x4b6   :  { %9353 = vrcp.f32 %v1820_v51 }
 0x4b9   :  { %v235_v23 = vpop.permute.xlu0 %234 }
 0x4ba   :  { %v392_v63 = vcombine.low %v10272_v21, %v235_v23  ;;  %v393_v30 = vcombine.high %v10272_v21, %v235_v23 }
 0x4bc   :  { %v400_v44 = vrot.slane %v392_v63, %v13041_v29  ;;  %v407_v17 = vrot.slane %v393_v30, %v13041_v29 }
 0x4be   :  { %v408_v16 = vcombine.low %v384_v5, %v400_v44  ;;  %v409_v57 = vcombine.high %v384_v5, %v400_v44  ;;  %v424_v31 = vcombine.low %v391_v10, %v407_v17  ;;  %v425_v27 = vcombine.high %v391_v10, %v407_v17 }
 0x4c0   :  { %v416_v45 = vrot.slane %v408_v16, %v13042_v58  ;;  %v10332_v21 = vrot.slane %v409_v57, %v13042_v58  ;;  %v10335_v11 = vrot.slane %v424_v31, %v13042_v58  ;;  %v10340_v25 = vrot.slane %v425_v27, %v13042_v58 }
 0x4c1   :  { %v1823_v34 = vpop.xlane.xlu1 %1822 }
 0x4c2   :  { %v10343_v18 = vcombine.high %v416_v45, %v12996_v35  ;;  %v840_v12 = vrot.slane %v416_v45, 1  ;;  %9355 = vrcp.f32 %v1823_v34  ;;  %v10347_v0 = vcombine.high %v10332_v21, %v12996_v35 }
 0x4c3   :  { %v10351_v20 = vcombine.high %v10335_v11, %v12996_v35  ;;  %v872_v9 = vrot.slane %v416_v45, 2  ;;  %v904_v42 = vrot.slane %v416_v45, 3  ;;  %v842_v26 = vrot.slane %v10332_v21, 1 }
 0x4c4   :  { %v936_v52 = vpack.c.bf16 %v416_v45, %v416_v45  ;;  %v10355_v48 = vpack.c.bf16 %v840_v12, %v840_v12  ;;  %v938_v55 = vpack.c.bf16 %v10332_v21, %v10332_v21  ;;  %v10368_v13 = vcombine.high %v10340_v25, %v12996_v35 }
 0x4c5   :  { %v237_v50 = vpop.permute.xlu1 %236  ;;  %v10362_v40 = vpack.c.bf16 %v872_v9, %v872_v9  ;;  %v10364_v60 = vpack.c.bf16 %v904_v42, %v904_v42  ;;  %v937_v54 = vpack.c.bf16 %v10343_v18, %v10343_v18  ;;  %v940_v33 = vpack.c.bf16 %v10335_v11, %v10335_v11 }
 0x4c6   :  { %v596_v61 = vcombine.low %v10279_v49, %v237_v50  ;;  %v597_v8 = vcombine.high %v10279_v49, %v237_v50  ;;  %v1874_v4 = vunpack.c.l.b16 %v936_v52  ;;  %v939_v49 = vpack.c.bf16 %v10347_v0, %v10347_v0  ;;  %v9354_v50 = vpop.eup %9353 }
 0x4c7   :  { %v941_v51 = vpack.c.bf16 %v10351_v20, %v10351_v20  ;;  %v942_v41 = vpack.c.bf16 %v10340_v25, %v10340_v25  ;;  %v943_v10 = vpack.c.bf16 %v10368_v13, %v10368_v13  ;;  %v1875_v44 = vunpack.c.l.b16 %v937_v54 }
 0x4c8   :  { %v604_v36 = vrot.slane %v596_v61, %v13041_v29  ;;  %v611_v32 = vrot.slane %v597_v8, %v13041_v29  ;;  %v1876_v34 = vunpack.c.l.b16 %v938_v55  ;;  %v1877_v57 = vunpack.c.l.b16 %v939_v49 }
 0x4c9   :  { %v1878_v31 = vunpack.c.l.b16 %v940_v33  ;;  %v1879_v27 = vunpack.c.l.b16 %v941_v51  ;;  %v1881_v12 = vunpack.c.l.b16 %v943_v10  ;;  %v844_v30 = vrot.slane %v10335_v11, 1 }
 0x4ca   :  { %v612_v38 = vcombine.low %v588_v43, %v604_v36  ;;  %v613_v22 = vcombine.high %v588_v43, %v604_v36  ;;  %v628_v23 = vcombine.low %v595_v47, %v611_v32  ;;  %v629_v63 = vcombine.high %v595_v47, %v611_v32 }
 0x4cb   :  { %v1880_v47 = vunpack.c.l.b16 %v942_v41  ;;  %v1882_v41 = vrot.slane %v1875_v44, 7  ;;  %v1890_v5 = vrot.slane %v1879_v27, 3  ;;  %v1894_v54 = vrot.slane %v1881_v12, 1 }
 0x4cc   :  { %v620_v17 = vrot.slane %v612_v38, %v13042_v58  ;;  %v10389_v39 = vrot.slane %v613_v22, %v13042_v58  ;;  %v10392_v46 = vrot.slane %v628_v23, %v13042_v58  ;;  %v10395_v16 = vrot.slane %v629_v63, %v13042_v58 }
 0x4cd   :  { %v1884_v63 = vrot.slane %v1876_v34, 6  ;;  %v1883_v10 = vsel %vm1017_vm2, %v1882_v41, %v1874_v4  ;;  %v1892_v59 = vrot.slane %v1880_v47, 2  ;;  %v847_v47 = vrot.slane %v10368_v13, 1 }
 0x4ce   :  { %v10398_v45 = vcombine.high %v620_v17, %v12996_v35  ;;  %v848_v43 = vrot.slane %v620_v17, 1  ;;  %v10402_v9 = vcombine.high %v10389_v39, %v12996_v35  ;;  %v10406_v42 = vcombine.high %v10392_v46, %v12996_v35 }
 0x4cf   :  { %v880_v52 = vrot.slane %v620_v17, 2  ;;  %v912_v55 = vrot.slane %v620_v17, 3  ;;  %v10408_v61 = vpop.eup %9355  ;;  %v944_v36 = vpack.c.bf16 %v620_v17, %v620_v17  ;;  %v1886_v17 = vrot.slane %v1877_v57, 5 }
 0x4d0   :  { %v10412_v32 = vpack.c.bf16 %v848_v43, %v848_v43  ;;  %v1888_v43 = vrot.slane %v1878_v31, 4  ;;  %v1885_v49 = vsel %vm1020_vm3, %v1884_v63, %v1883_v10  ;;  %v845_v57 = vrot.slane %v10351_v20, 1 }
 0x4d1   :  { %v10417_v51 = vpack.c.bf16 %v880_v52, %v880_v52  ;;  %v10419_v38 = vpack.c.bf16 %v912_v55, %v912_v55  ;;  %v10421_v22 = vunpack.c.l.b16 %v944_v36  ;;  %v1850_v52 = vmul.f32 %v9354_v50, %v10282_v19 }
 0x4d2   :  { %v1887_v44 = vsel %vm1023_vm4, %v1886_v17, %v1885_v49  ;;  %v841_v55 = vrot.slane %v10343_v18, 1  ;;  %v843_v36 = vrot.slane %v10347_v0, 1  ;;  %v846_v31 = vrot.slane %v10340_v25, 1 }
 0x4d3   :  { %v1889_v34 = vsel %vm1026_vm5, %v1888_v43, %v1887_v44  ;;  %v1858_v4 = vpack.c.bf16 %v1850_v52, %v1850_v52  ;;  %v954_v12 = vpack.c.bf16 %v842_v26, %v842_v26  ;;  %v956_v41 = vpack.c.bf16 %v844_v30, %v844_v30 }
 0x4d4   :  { %v1891_v27 = vsel %vm1029_vm6, %v1890_v5, %v1889_v34  ;;  %v953_v19 = vpack.c.bf16 %v841_v55, %v841_v55  ;;  %v955_v49 = vpack.c.bf16 %v843_v36, %v843_v36  ;;  %v957_v63 = vpack.c.bf16 %v845_v57, %v845_v57 }
 0x4d5   :  { %v1893_v50 = vsel %vm1032_vm7, %v1892_v59, %v1891_v27  ;;  %v958_v17 = vpack.c.bf16 %v846_v31, %v846_v31  ;;  %v959_v43 = vpack.c.bf16 %v847_v47, %v847_v47  ;;  %v2031_v37 = vunpack.c.l.b16 %v954_v12 }
 0x4d6   :  { %v1895_v10 = vsel %vm1035_vm8, %v1894_v54, %v1893_v50  ;;  %v2030_v52 = vunpack.c.l.b16 %v953_v19  ;;  %v2032_v5 = vunpack.c.l.b16 %v955_v49  ;;  %v2033_v34 = vunpack.c.l.b16 %v956_v41 }
 0x4d7   :  { %v1896_v44 = vpack.c.b16 %v1895_v10, %v1895_v10  ;;  %v2034_v23 = vunpack.c.l.b16 %v957_v63  ;;  %v2035_v55 = vunpack.c.l.b16 %v958_v17  ;;  %v2036_v8 = vunpack.c.l.b16 %v959_v43 }
 0x4d8   :  { %v2037_v33 = vrot.slane %v2030_v52, 7  ;;  %v2039_v28 = vrot.slane %v2031_v37, 6  ;;  %v2041_v59 = vrot.slane %v2032_v5, 5  ;;  %v2043_v36 = vrot.slane %v2033_v34, 4 }
 0x4d9   :  { %v1902_v26 = vsel %vm1900_vm10, %v1896_v44, 0  ;;  %v13043_v30 = vunpack.c.l.b16 %v10355_v48  ;;  %v2045_v57 = vrot.slane %v2034_v23, 3  ;;  %v2047_v31 = vrot.slane %v2035_v55, 2 }
 0x4da   :  { %8869 = vmatpush3.bf16.msra.mxu1 %v1902_v26  ;;  %v2049_v27 = vrot.slane %v2036_v8, 1  ;;  %v10449_v19 = vcombine.high %v10395_v16, %v12996_v35  ;;  %v945_v37 = vpack.c.bf16 %v10398_v45, %v10398_v45  ;;  %v947_v12 = vpack.c.bf16 %v10402_v9, %v10402_v9 }
 0x4db   :  { %v2038_v54 = vsel %vm1017_vm2, %v2037_v33, %v13043_v30  ;;  %8880 = vmatprep.subr.bf16.mxu1 %v12996_v35  ;;  %v948_v33 = vpack.c.bf16 %v10392_v46, %v10392_v46  ;;  %v949_v8 = vpack.c.bf16 %v10406_v42, %v10406_v42  ;;  %v13044_v41 = vpack.c.bf16 %v10389_v39, %v10389_v39 }
 0x4dc   :  { %v2040_v47 = vsel %vm1020_vm3, %v2039_v28, %v2038_v54  ;;  %v950_v28 = vpack.c.bf16 %v10395_v16, %v10395_v16  ;;  %v951_v50 = vpack.c.bf16 %v10449_v19, %v10449_v19  ;;  %v1953_v49 = vunpack.c.l.b16 %v945_v37 }
 0x4dd   :  { %v2042_v48 = vsel %vm1023_vm4, %v2041_v59, %v2040_v47  ;;  %8871 = vmatmul.mubr.msk.bf16.vlgmr.msra.gmra.mxu1 %vm1053_vm9, %v1858_v4  ;;  %v1954_v63 = vunpack.c.l.b16 %v13044_v41  ;;  %v1955_v17 = vunpack.c.l.b16 %v947_v12  ;;  %v1956_v43 = vunpack.c.l.b16 %v948_v33 }
 0x4de   :  { %v2044_v23 = vsel %vm1026_vm5, %v2043_v36, %v2042_v48  ;;  %v1957_v52 = vunpack.c.l.b16 %v949_v8  ;;  %8882 = vmatprep.mubr.msk.bf16.mxu1 %vm9501_vm1, %v12996_v35  ;;  %v1958_v44 = vunpack.c.l.b16 %v950_v28  ;;  %v1959_v5 = vunpack.c.l.b16 %v951_v50 }
 0x4df   :  { %v2046_v10 = vsel %vm1029_vm6, %v2045_v57, %v2044_v23  ;;  %v1960_v34 = vrot.slane %v1953_v49, 7  ;;  %v1962_v26 = vrot.slane %v1954_v63, 6  ;;  %v1964_v59 = vrot.slane %v1955_v17, 5 }
 0x4e0   :  { %v2048_v4 = vsel %vm1032_vm7, %v2047_v31, %v2046_v10  ;;  %v1966_v36 = vrot.slane %v1956_v43, 4  ;;  %v1968_v57 = vrot.slane %v1957_v52, 3  ;;  %v1970_v47 = vrot.slane %v1958_v44, 2 }
 0x4e1   :  { %v2050_v55 = vsel %vm1035_vm8, %v2049_v27, %v2048_v4  ;;  %v1961_v54 = vsel %vm1017_vm2, %v1960_v34, %v10421_v22  ;;  %v1972_v12 = vrot.slane %v1959_v5, 1  ;;  %v1851_v31 = vmul.f32 %v10408_v61, %v10286_v7 }
 0x4e2   :  { %v2051_v30 = vpack.c.b16 %v2050_v55, %v2050_v55  ;;  %v1963_v37 = vsel %vm1020_vm3, %v1962_v26, %v1961_v54  ;;  %v849_v48 = vrot.slane %v10398_v45, 1  ;;  %v851_v8 = vrot.slane %v10402_v9, 1 }
 0x4e3   :  { %v1965_v27 = vsel %vm1023_vm4, %v1964_v59, %v1963_v37  ;;  %v852_v28 = vrot.slane %v10392_v46, 1  ;;  %v1859_v23 = vpack.c.bf16 %v1851_v31, %v1851_v31  ;;  %v853_v50 = vrot.slane %v10406_v42, 1 }
 0x4e4   :  { %v2056_v33 = vsel %vm1900_vm10, %v2051_v30, 0  ;;  %v1967_v22 = vsel %vm1026_vm5, %v1966_v36, %v1965_v27  ;;  %v854_v49 = vrot.slane %v10395_v16, 1  ;;  %v855_v61 = vrot.slane %v10449_v19, 1 }
 0x4e5   :  { %8881 = vmatpush3.bf16.msra.mxu1 %v2056_v33  ;;  %v1969_v7 = vsel %vm1029_vm6, %v1968_v57, %v1967_v22  ;;  %v961_v41 = vpack.c.bf16 %v849_v48, %v849_v48  ;;  %v13045_v63 = vrot.slane %v10389_v39, 1  ;;  %v963_v43 = vpack.c.bf16 %v851_v8, %v851_v8 }
 0x4e6   :  { %8892 = vmatprep.subr.bf16.mxu1 %v12996_v35  ;;  %v1971_v17 = vsel %vm1032_vm7, %v1970_v47, %v1969_v7  ;;  %v964_v52 = vpack.c.bf16 %v852_v28, %v852_v28  ;;  %v965_v4 = vpack.c.bf16 %v853_v50, %v853_v50  ;;  %v966_v5 = vpack.c.bf16 %v854_v49, %v854_v49 }
 0x4e7   :  { %v962_v10 = vpack.c.bf16 %v13045_v63, %v13045_v63  ;;  %v1973_v44 = vsel %vm1035_vm8, %v1972_v12, %v1971_v17  ;;  %v967_v34 = vpack.c.bf16 %v855_v61, %v855_v61  ;;  %v2107_v55 = vunpack.c.l.b16 %v961_v41 }
 0x4e8   :  { %v1974_v26 = vpack.c.b16 %v1973_v44, %v1973_v44  ;;  %v2109_v36 = vunpack.c.l.b16 %v963_v43  ;;  %v2110_v30 = vunpack.c.l.b16 %v964_v52  ;;  %v2111_v57 = vunpack.c.l.b16 %v965_v4 }
 0x4e9   :  { %v2108_v59 = vunpack.c.l.b16 %v962_v10  ;;  %v2112_v37 = vunpack.c.l.b16 %v966_v5  ;;  %v2113_v31 = vunpack.c.l.b16 %v967_v34  ;;  %v2114_v48 = vrot.slane %v2107_v55, 7 }
 0x4ea   :  { %v1826_v54 = vpop.xlane.xlu0 %1825  ;;  %v1979_v33 = vsel %vm1900_vm10, %v1974_v26, 0  ;;  %v2118_v27 = vrot.slane %v2109_v36, 5  ;;  %v2120_v8 = vrot.slane %v2110_v30, 4  ;;  %v13046_v12 = vunpack.c.l.b16 %v10412_v32 }
 0x4eb   :  { %v2116_v47 = vrot.slane %v2108_v59, 6  ;;  %8875 = vmatpush3.bf16.msra.mxu0 %v1979_v33  ;;  %v2122_v22 = vrot.slane %v2111_v57, 3  ;;  %v2124_v50 = vrot.slane %v2112_v37, 2  ;;  %v2126_v49 = vrot.slane %v2113_v31, 1 }
 0x4ec   :  { %v2115_v28 = vsel %vm1017_vm2, %v2114_v48, %v13046_v12  ;;  %8886 = vmatprep.subr.bf16.mxu0 %v12996_v35  ;;  %9357 = vrcp.f32 %v1826_v54  ;;  %v873_v41 = vrot.slane %v10343_v18, 2  ;;  %v875_v63 = vrot.slane %v10347_v0, 2 }
 0x4ed   :  { %v2117_v7 = vsel %vm1020_vm3, %v2116_v47, %v2115_v28  ;;  %v876_v32 = vrot.slane %v10335_v11, 2  ;;  %v877_v17 = vrot.slane %v10351_v20, 2  ;;  %v878_v52 = vrot.slane %v10340_v25, 2 }
 0x4ee   :  { %v1832_v61 = vpop.xlane.xlu0 %1831  ;;  %v2119_v10 = vsel %vm1023_vm4, %v2118_v27, %v2117_v7  ;;  %8877 = vmatmul.mubr.msk.bf16.vlgmr.msra.gmra.mxu0 %vm1053_vm9, %v1859_v23  ;;  %v879_v4 = vrot.slane %v10368_v13, 2  ;;  %v969_v44 = vpack.c.bf16 %v873_v41, %v873_v41  ;;  %v13047_v34 = vrot.slane %v10332_v21, 2 }
 0x4ef   :  { %9359 = vrcp.f32 %v1832_v61  ;;  %v2121_v43 = vsel %vm1026_vm5, %v2120_v8, %v2119_v10  ;;  %v971_v26 = vpack.c.bf16 %v875_v63, %v875_v63  ;;  %v972_v59 = vpack.c.bf16 %v876_v32, %v876_v32  ;;  %8888 = vmatprep.mubr.msk.bf16.mxu0 %vm9501_vm1, %v12996_v35 }
 0x4f0   :  { %v2123_v5 = vsel %vm1029_vm6, %v2122_v22, %v2121_v43  ;;  %v970_v55 = vpack.c.bf16 %v13047_v34, %v13047_v34  ;;  %v973_v54 = vpack.c.bf16 %v877_v17, %v877_v17  ;;  %v974_v57 = vpack.c.bf16 %v878_v52, %v878_v52 }
 0x4f1   :  { %v2125_v23 = vsel %vm1032_vm7, %v2124_v50, %v2123_v5  ;;  %v975_v37 = vpack.c.bf16 %v879_v4, %v879_v4  ;;  %v2260_v31 = vunpack.c.l.b16 %v10417_v51  ;;  %v2184_v33 = vunpack.c.l.b16 %v969_v44 }
 0x4f2   :  { %v1835_v36 = vpop.xlane.xlu0 %1834  ;;  %v2127_v48 = vsel %vm1035_vm8, %v2126_v49, %v2125_v23  ;;  %v2185_v47 = vunpack.c.l.b16 %v970_v55  ;;  %v2186_v8 = vunpack.c.l.b16 %v971_v26  ;;  %v2187_v12 = vunpack.c.l.b16 %v972_v59 }
 0x4f3   :  { %v2128_v27 = vpack.c.b16 %v2127_v48, %v2127_v48  ;;  %v2188_v28 = vunpack.c.l.b16 %v973_v54  ;;  %v2189_v22 = vunpack.c.l.b16 %v974_v57  ;;  %v2190_v7 = vunpack.c.l.b16 %v975_v37 }
 0x4f4   :  { %v2191_v61 = vrot.slane %v2184_v33, 7  ;;  %v2193_v63 = vrot.slane %v2185_v47, 6  ;;  %v2195_v10 = vrot.slane %v2186_v8, 5  ;;  %v13048_v49 = vunpack.c.l.b16 %v10362_v40 }
 0x4f5   :  { %v2133_v50 = vsel %vm1900_vm10, %v2128_v27, 0  ;;  %v2197_v17 = vrot.slane %v2187_v12, 4  ;;  %v2199_v43 = vrot.slane %v2188_v28, 3  ;;  %v2201_v4 = vrot.slane %v2189_v22, 2 }
 0x4f6   :  { %v1829_v30 = vpop.xlane.xlu1 %1828  ;;  %v1838_v41 = vpop.xlane.xlu0 %1837  ;;  %8887 = vmatpush3.bf16.msra.mxu0 %v2133_v50  ;;  %v2192_v32 = vsel %vm1017_vm2, %v2191_v61, %v13048_v49  ;;  %v2203_v44 = vrot.slane %v2190_v7, 1  ;;  %v881_v5 = vrot.slane %v10398_v45, 2  ;;  %v883_v55 = vrot.slane %v10402_v9, 2 }
 0x4f7   :  { %9361 = vrcp.f32 %v1829_v30  ;;  %v2194_v52 = vsel %vm1020_vm3, %v2193_v63, %v2192_v32  ;;  %8898 = vmatprep.subr.bf16.mxu0 %v12996_v35  ;;  %v884_v26 = vrot.slane %v10392_v46, 2  ;;  %v885_v40 = vrot.slane %v10406_v42, 2 }
 0x4f8   :  { %9363 = vrcp.f32 %v1835_v36  ;;  %v2196_v34 = vsel %vm1023_vm4, %v2195_v10, %v2194_v52  ;;  %v886_v23 = vrot.slane %v10395_v16, 2  ;;  %v887_v36 = vrot.slane %v10449_v19, 2 }
 0x4f9   :  { %9365 = vrcp.f32 %v1838_v41  ;;  %v2198_v59 = vsel %vm1026_vm5, %v2197_v17, %v2196_v34  ;;  %v977_v30 = vpack.c.bf16 %v881_v5, %v881_v5  ;;  %v9358_v54 = vpop.eup %9357  ;;  %v13049_v37 = vrot.slane %v10389_v39, 2 }
 0x4fa   :  { %v2200_v57 = vsel %vm1029_vm6, %v2199_v43, %v2198_v59  ;;  %v979_v33 = vpack.c.bf16 %v883_v55, %v883_v55  ;;  %v980_v47 = vpack.c.bf16 %v884_v26, %v884_v26  ;;  %v1852_v8 = vmul.f32 %v9358_v54, %v10296_v15 }
 0x4fb   :  { %v978_v48 = vpack.c.bf16 %v13049_v37, %v13049_v37  ;;  %v2202_v12 = vsel %vm1032_vm7, %v2201_v4, %v2200_v57  ;;  %v981_v28 = vpack.c.bf16 %v885_v40, %v885_v40  ;;  %v982_v22 = vpack.c.bf16 %v886_v23, %v886_v23 }
 0x4fc   :  { %v9360_v27 = vpop.eup %9359  ;;  %v2204_v7 = vsel %vm1035_vm8, %v2203_v44, %v2202_v12  ;;  %v983_v50 = vpack.c.bf16 %v887_v36, %v887_v36  ;;  %v2261_v41 = vunpack.c.l.b16 %v977_v30  ;;  %v1860_v63 = vpack.c.bf16 %v1852_v8, %v1852_v8 }
 0x4fd   :  { %v1854_v61 = vmul.f32 %v9360_v27, %v10300_v56  ;;  %v2205_v10 = vpack.c.b16 %v2204_v7, %v2204_v7  ;;  %v2262_v49 = vunpack.c.l.b16 %v978_v48  ;;  %v2263_v32 = vunpack.c.l.b16 %v979_v33 }
 0x4fe   :  { %v2264_v43 = vunpack.c.l.b16 %v980_v47  ;;  %v2265_v52 = vunpack.c.l.b16 %v981_v28  ;;  %v2266_v5 = vunpack.c.l.b16 %v982_v22  ;;  %8883 = vmatmul.mubr.msk.bf16.vlgmr.msra.gmra.mxu1 %vm1053_vm9, %v1860_v63  ;;  %v2267_v4 = vunpack.c.l.b16 %v983_v50  ;;  %v1841_v50 = vpop.xlane.xlu1 %1840 }
 0x4ff   :  { %v1862_v17 = vpack.c.bf16 %v1854_v61, %v1854_v61  ;;  %v2210_v15 = vsel %vm1900_vm10, %v2205_v10, 0  ;;  %v2268_v34 = vrot.slane %v2261_v41, 7  ;;  %v2270_v55 = vrot.slane %v2262_v49, 6  ;;  %8894 = vmatprep.mubr.msk.bf16.mxu1 %vm9501_vm1, %v12996_v35 }
 0x500   :  { %8893 = vmatpush3.bf16.msra.mxu1 %v2210_v15  ;;  %v2272_v56 = vrot.slane %v2263_v32, 5  ;;  %v2274_v26 = vrot.slane %v2264_v43, 4  ;;  %v2276_v40 = vrot.slane %v2265_v52, 3  ;;  %v2278_v59 = vrot.slane %v2266_v5, 2 }
 0x501   :  { %8904 = vmatprep.subr.bf16.mxu1 %v12996_v35  ;;  %v2269_v36 = vsel %vm1017_vm2, %v2268_v34, %v2260_v31  ;;  %v2280_v30 = vrot.slane %v2267_v4, 1  ;;  %v905_v54 = vrot.slane %v10343_v18, 3  ;;  %v907_v48 = vrot.slane %v10347_v0, 3 }
 0x502   :  { %v2271_v37 = vsel %vm1020_vm3, %v2270_v55, %v2269_v36  ;;  %v908_v33 = vrot.slane %v10335_v11, 3  ;;  %v909_v47 = vrot.slane %v10351_v20, 3  ;;  %v910_v51 = vrot.slane %v10340_v25, 3 }
 0x503   :  { %v911_v31 = vrot.slane %v10368_v13, 3  ;;  %v985_v18 = vpack.c.bf16 %v905_v54, %v905_v54  ;;  %v13050_v28 = vrot.slane %v10332_v21, 3  ;;  %v987_v0 = vpack.c.bf16 %v907_v48, %v907_v48 }
 0x504   :  { %v9362_v44 = vpop.eup %9361  ;;  %v988_v20 = vpack.c.bf16 %v908_v33, %v908_v33  ;;  %v989_v7 = vpack.c.bf16 %v909_v47, %v909_v47  ;;  %v990_v61 = vpack.c.bf16 %v910_v51, %v910_v51  ;;  %9367 = vrcp.f32 %v1841_v50 }
 0x505   :  { %v1853_v23 = vmul.f32 %v9362_v44, %v10302_v6  ;;  %v9364_v57 = vpop.eup %9363  ;;  %v2273_v6 = vsel %vm1023_vm4, %v2272_v56, %v2271_v37  ;;  %v986_v22 = vpack.c.bf16 %v13050_v28, %v13050_v28  ;;  %v991_v41 = vpack.c.bf16 %v911_v31, %v911_v31 }
 0x506   :  { %v9366_v27 = vpop.eup %9365  ;;  %v2275_v12 = vsel %vm1026_vm5, %v2274_v26, %v2273_v6  ;;  %v2338_v13 = vunpack.c.l.b16 %v985_v18  ;;  %8895 = vmatmul.mubr.msk.bf16.vlgmr.msra.gmra.mxu1 %vm1053_vm9, %v1862_v17  ;;  %v2340_v10 = vunpack.c.l.b16 %v987_v0  ;;  %v2341_v49 = vunpack.c.l.b16 %v988_v20 }
 0x507   :  { %v1861_v8 = vpack.c.bf16 %v1853_v23, %v1853_v23  ;;  %v2277_v11 = vsel %vm1029_vm6, %v2276_v40, %v2275_v12  ;;  %v2339_v63 = vunpack.c.l.b16 %v986_v22  ;;  %v2342_v32 = vunpack.c.l.b16 %v989_v7  ;;  %8906 = vmatprep.mubr.msk.bf16.mxu1 %vm9501_vm1, %v12996_v35 }
 0x508   :  { %v2279_v25 = vsel %vm1032_vm7, %v2278_v59, %v2277_v11  ;;  %v2343_v52 = vunpack.c.l.b16 %v990_v61  ;;  %v2344_v5 = vunpack.c.l.b16 %v991_v41  ;;  %v2345_v15 = vrot.slane %v2338_v13, 7 }
 0x509   :  { %8889 = vmatmul.mubr.msk.bf16.vlgmr.msra.gmra.mxu0 %vm1053_vm9, %v1861_v8  ;;  %v2281_v21 = vsel %vm1035_vm8, %v2280_v30, %v2279_v25  ;;  %v2347_v4 = vrot.slane %v2339_v63, 6  ;;  %v2349_v34 = vrot.slane %v2340_v10, 5  ;;  %v2351_v55 = vrot.slane %v2341_v49, 4 }
 0x50a   :  { %8900 = vmatprep.mubr.msk.bf16.mxu0 %vm9501_vm1, %v12996_v35  ;;  %v2282_v43 = vpack.c.b16 %v2281_v21, %v2281_v21  ;;  %v13051_v17 = vunpack.c.l.b16 %v10364_v60  ;;  %v2353_v26 = vrot.slane %v2342_v32, 3  ;;  %v2355_v40 = vrot.slane %v2343_v52, 2 }
 0x50b   :  { %v2357_v23 = vrot.slane %v2344_v5, 1  ;;  %v1855_v36 = vmul.f32 %v9364_v57, %v10306_v62  ;;  %v913_v30 = vrot.slane %v10398_v45, 3  ;;  %v915_v37 = vrot.slane %v10402_v9, 3 }
 0x50c   :  { %v2287_v44 = vsel %vm1900_vm10, %v2282_v43, 0  ;;  %v2346_v56 = vsel %vm1017_vm2, %v2345_v15, %v13051_v17  ;;  %v916_v60 = vrot.slane %v10392_v46, 3  ;;  %v917_v48 = vrot.slane %v10406_v42, 3 }
 0x50d   :  { %8899 = vmatpush3.bf16.msra.mxu0 %v2287_v44  ;;  %v2348_v59 = vsel %vm1020_vm3, %v2347_v4, %v2346_v56  ;;  %v1863_v47 = vpack.c.bf16 %v1855_v36, %v1855_v36  ;;  %v1856_v8 = vmul.f32 %v9366_v27, %v10308_v14  ;;  %v918_v6 = vrot.slane %v10395_v16, 3 }
 0x50e   :  { %v2350_v54 = vsel %vm1023_vm4, %v2349_v34, %v2348_v59  ;;  %8910 = vmatprep.subr.bf16.mxu0 %v12996_v35  ;;  %v919_v45 = vrot.slane %v10449_v19, 3  ;;  %v993_v57 = vpack.c.bf16 %v913_v30, %v913_v30  ;;  %v13052_v51 = vrot.slane %v10389_v39, 3 }
 0x50f   :  { %v2352_v33 = vsel %vm1026_vm5, %v2351_v55, %v2350_v54  ;;  %v995_v42 = vpack.c.bf16 %v915_v37, %v915_v37  ;;  %v996_v31 = vpack.c.bf16 %v916_v60, %v916_v60  ;;  %v997_v12 = vpack.c.bf16 %v917_v48, %v917_v48 }
 0x510   :  { %v2354_v62 = vsel %vm1029_vm6, %v2353_v26, %v2352_v33  ;;  %v994_v9 = vpack.c.bf16 %v13052_v51, %v13052_v51  ;;  %v998_v27 = vpack.c.bf16 %v918_v6, %v918_v6  ;;  %v999_v16 = vpack.c.bf16 %v919_v45, %v919_v45  ;;  %v9299_v45 = vld [vmem:[%s12859_s3 + $0x8] sm:$0xff]  }
 0x511   :  { %v2356_v46 = vsel %vm1032_vm7, %v2355_v40, %v2354_v62  ;;  %8901 = vmatmul.mubr.msk.bf16.vlgmr.msra.gmra.mxu0 %vm1053_vm9, %v1863_v47  ;;  %v2415_v18 = vunpack.c.l.b16 %v993_v57  ;;  %v2417_v39 = vunpack.c.l.b16 %v995_v42  ;;  %v2418_v22 = vunpack.c.l.b16 %v996_v31  ;;  %v9368_v49 = vpop.eup %9367 }
 0x512   :  { %v2358_v14 = vsel %vm1035_vm8, %v2357_v23, %v2356_v46  ;;  %8912 = vmatprep.mubr.msk.bf16.mxu0 %vm9501_vm1, %v12996_v35  ;;  %v2416_v28 = vunpack.c.l.b16 %v994_v9  ;;  %v2414_v0 = vunpack.c.l.b16 %v10419_v38  ;;  %v2419_v11 = vunpack.c.l.b16 %v997_v12 }
 0x513   :  { %v2359_v19 = vpack.c.b16 %v2358_v14, %v2358_v14  ;;  %v2422_v20 = vrot.slane %v2415_v18, 7  ;;  %v2420_v61 = vunpack.c.l.b16 %v998_v27  ;;  %v2421_v25 = vunpack.c.l.b16 %v999_v16 }
 0x514   :  { %v2424_v50 = vrot.slane %v2416_v28, 6  ;;  %v2426_v13 = vrot.slane %v2417_v39, 5  ;;  %v1864_v63 = vpack.c.bf16 %v1856_v8, %v1856_v8  ;;  %v2428_v10 = vrot.slane %v2418_v22, 4  ;;  %v9300_v28 = vld [vmem:[%s12859_s3] sm:$0xff]  }
 0x515   :  { %v2364_v7 = vsel %vm1900_vm10, %v2359_v19, 0  ;;  %v2423_v41 = vsel %vm1017_vm2, %v2422_v20, %v2414_v0  ;;  %v2430_v32 = vrot.slane %v2419_v11, 3  ;;  %v2432_v52 = vrot.slane %v2420_v61, 2 }
 0x516   :  { %8905 = vmatpush3.bf16.msra.mxu1 %v2364_v7  ;;  %v2425_v21 = vsel %vm1020_vm3, %v2424_v50, %v2423_v41  ;;  %v2434_v15 = vrot.slane %v2421_v25, 1  ;;  %v1857_v44 = vmul.f32 %v9368_v49, %v10314_v1 }
 0x517   :  { %8916 = vmatprep.subr.bf16.mxu1 %v12996_v35  ;;  %v2427_v38 = vsel %vm1023_vm4, %v2426_v13, %v2425_v21 }
 0x518   :  { %v2429_v43 = vsel %vm1026_vm5, %v2428_v10, %v2427_v38  ;;  %v1865_v56 = vpack.c.bf16 %v1857_v44, %v1857_v44  ;;  %v13053_v44 = vld [vmem:[#allocation7_spill] sm:$0xff] }
 0x519   :  { %8907 = vmatmul.mubr.msk.bf16.vlgmr.msra.gmra.mxu1 %vm1053_vm9, %v1864_v63  ;;  %v2431_v5 = vsel %vm1029_vm6, %v2430_v32, %v2429_v43 }
 0x51a   :  { %8920 = vmatprep.mubr.msk.bf16.mxu1 %vm9501_vm1, %v12996_v35  ;;  %v2433_v4 = vsel %vm1032_vm7, %v2432_v52, %v2431_v5  ;;  %8917 = vmatpush3.bf16.msra.mxu1 %v9299_v45 }
 0x51b   :  { %v2435_v34 = vsel %vm1035_vm8, %v2434_v15, %v2433_v4  ;;  %8918 = vmatprep.subr.bf16.mxu1 %v12996_v35 }
 0x51c   :  { %v2436_v55 = vpack.c.b16 %v2435_v34, %v2435_v34 }
 0x51e   :  { %v2441_v17 = vsel %vm1900_vm10, %v2436_v55, 0  ;;  %8919 = vmatpush3.bf16.msra.mxu1 %v9300_v28  ;;  %v10638_v55 = vld [vmem:[%s12862_s6] sm:$0xff]  ;;  %v10657_v28 = vsub.s32 2, %v13035_v24 }
 0x51f   :  { %8911 = vmatpush3.bf16.msra.mxu0 %v2441_v17  ;;  %8932 = vmatprep.subr.bf16.mxu1 %v12996_v35  ;;  %v2523_v17 = vrot.slane %v10638_v55, %v13053_v44 }
 0x520   :  { %8924 = vmatprep.subr.bf16.mxu0 %v12996_v35  ;;  %13056 = vst [vmem:[#allocation17_spill] sm:$0xff] %v10657_v28 }
 0x522   :  { %8913 = vmatmul.mubr.msk.bf16.vlgmr.msra.gmra.mxu0 %vm1053_vm9, %v1865_v56 }
 0x523   :  { %8928 = vmatprep.mubr.msk.bf16.mxu0 %vm9501_vm1, %v12996_v35 }
 0x59d   :  { %v1938_v26 = vpop.f32.mrf.mxu1 }
 0x59f   :  { %v8872_v40 = vpop.f32.mrf.mxu1 }
 0x5a1   :  { %v1941_v59 = vpop.f32.mrf.mxu1 }
 0x5a2   :  { %v13054_v59 = vld [vmem:[#allocation8_spill] sm:$0xff] }
 0x5a3   :  { %v8873_v23 = vpop.f32.mrf.mxu1 }
 0x5ae   :  { %v2015_v36 = vpop.f32.mrf.mxu0 }
 0x5b0   :  { %v8878_v30 = vpop.f32.mrf.mxu0 }
 0x5b2   :  { %v2018_v54 = vpop.f32.mrf.mxu0 }
 0x5b4   :  { %v8879_v37 = vpop.f32.mrf.mxu0 }
 0x5be   :  { %v2092_v1 = vpop.f32.mrf.mxu1 }
 0x5c0   :  { %v8884_v60 = vpop.f32.mrf.mxu1 }
 0x5c2   :  { %v2095_v48 = vpop.f32.mrf.mxu1 }
 0x5c4   :  { %v8885_v33 = vpop.f32.mrf.mxu1 }
 0x5c6   :  { %v2246_v6 = vpop.f32.mrf.mxu1 }
 0x5c8   :  { %v8896_v57 = vpop.f32.mrf.mxu1 }
 0x5c9   :  { %v2169_v47 = vpop.f32.mrf.mxu0 }
 0x5ca   :  { %v9252_v8 = vpack.i.bf16 %v2169_v47, %v2092_v1  ;;  %v2249_v9 = vpop.f32.mrf.mxu1  ;;  %v13055_v1 = vld [vmem:[#allocation9_spill] sm:$0xff] }
 0x5cb   :  { %v8890_v62 = vpop.f32.mrf.mxu0 }
 0x5cc   :  { %9253 = vrot.lane.b32.xlu0 %v9252_v8, %s9516_s18  ;;  %v8897_v42 = vpop.f32.mrf.mxu1 }
 0x5cd   :  { %v2172_v51 = vpop.f32.mrf.mxu0  ;;  %v9301_v42 = vld [vmem:[%s12860_s4 + $0x8] sm:$0xff]  }
 0x5ce   :  { %8925 = vmatpush3.bf16.msra.mxu0 %v9301_v42 }
 0x5cf   :  { %v8891_v46 = vpop.f32.mrf.mxu0  ;;  %8926 = vmatprep.subr.bf16.mxu0 %v12996_v35 }
 0x5d1   :  { %v2323_v31 = vpop.f32.mrf.mxu0 }
 0x5d2   :  { %v9257_v12 = vpack.i.bf16 %v2323_v31, %v2246_v6  ;;  %v9302_v31 = vld [vmem:[%s12860_s4] sm:$0xff]  }
 0x5d3   :  { %v8902_v14 = vpop.f32.mrf.mxu0  ;;  %8927 = vmatpush3.bf16.msra.mxu0 %v9302_v31 }
 0x5d4   :  { %9258 = vrot.lane.b32.xlu1 %v9257_v12, %s12938_s19  ;;  %8944 = vmatprep.subr.bf16.mxu0 %v12996_v35 }
 0x5d5   :  { %v2326_v27 = vpop.f32.mrf.mxu0 }
 0x5d7   :  { %v8903_v16 = vpop.f32.mrf.mxu0 }
 0x5d9   :  { %v2400_v18 = vpop.f32.mrf.mxu1 }
 0x5db   :  { %v8908_v19 = vpop.f32.mrf.mxu1 }
 0x5dd   :  { %v2403_v39 = vpop.f32.mrf.mxu1 }
 0x5df   :  { %v8909_v22 = vpop.f32.mrf.mxu1 }
 0x5e2   :  { %v2477_v0 = vpop.f32.mrf.mxu0 }
 0x5e3   :  { %v9262_v11 = vpack.i.bf16 %v2477_v0, %v2400_v18  ;;  %v2611_v0 = vrot.slane %v10638_v55, %v10657_v28 }
 0x5e4   :  { %v8914_v20 = vpop.f32.mrf.mxu0 }
 0x5e5   :  { %9263 = vrot.lane.b32.xlu1 %v9262_v11, %s12901_s22  ;;  %v10662_v11 = vsub.s32 3, %v13035_v24 }
 0x5e6   :  { %v2480_v7 = vpop.f32.mrf.mxu0 }
 0x5e7   :  { %13057 = vst [vmem:[#allocation14_spill] sm:$0xff] %v10662_v11 }
 0x5e8   :  { %v8915_v61 = vpop.f32.mrf.mxu0 }
 0x63e   :  { %v9254_v50 = vpop.permute.xlu0 %9253 }
 0x63f   :  { %v9256_v41 = vunpack.i.h.bf16 %v9254_v50  ;;  %v9255_v13 = vunpack.i.l.bf16 %v9254_v50  ;;  %v2617_v50 = vrot.slane %v10638_v55, %v10662_v11 }
 0x641   :  { %v2508_v49 = vsel %vm1053_vm9, %v2015_v36, %v9256_v41  ;;  %v2507_v38 = vsel %vm1053_vm9, %v1938_v26, %v9255_v13 }
 0x646   :  { %v9259_v25 = vpop.permute.xlu1 %9258 }
 0x647   :  { %v9261_v63 = vunpack.i.h.bf16 %v9259_v25  ;;  %v9260_v21 = vunpack.i.l.bf16 %v9259_v25 }
 0x649   :  { %v2511_v52 = vsel %vm2509_vm11, %v2508_v49, %v9261_v63  ;;  %v2510_v5 = vsel %vm2509_vm11, %v2507_v38, %v9260_v21  ;;  %v9303_v21 = vld [vmem:[%s12861_s5 + $0x18] sm:$0xff]   ;;  %v9305_v49 = vld [vmem:[%s12861_s5 + $0x8] sm:$0xff]   ;;  %v9306_v38 = vld [vmem:[%s12861_s5] sm:$0xff]  }
 0x657   :  { %v9264_v10 = vpop.permute.xlu1 %9263 }
 0x658   :  { %v9266_v32 = vunpack.i.h.bf16 %v9264_v10  ;;  %v9265_v43 = vunpack.i.l.bf16 %v9264_v10  ;;  %v9304_v10 = vld [vmem:[%s12861_s5 + $0x10] sm:$0xff]  }
 0x65a   :  { %v2514_v15 = vsel %vm2512_vm12, %v2511_v52, %v9266_v32  ;;  %v2513_v4 = vsel %vm2512_vm12, %v2510_v5, %v9265_v43  ;;  %v10686_v32 = vsub.s32 4, %v13035_v24 }
 0x65b   :  { %v2519_v34 = vpack.c.bf16 %v2514_v15, %v2513_v4 }
 0x65c   :  { %13058 = vst [vmem:[#allocation15_spill] sm:$0xff] %v10686_v32  ;;  %v2628_v43 = vrot.slane %v10638_v55, %v10686_v32 }
 0x65d   :  { %8921 = vmatmul.mubr.msk.bf16.vlgmr.msra.gmra.mxu1 %vm66_vm0, %v2519_v34 }
 0x65e   :  { %8940 = vmatprep.mubr.msk.bf16.mxu1 %vm9501_vm1, %v12996_v35  ;;  %8933 = vmatpush3.bf16.msra.mxu1 %v9303_v21 }
 0x65f   :  { %8934 = vmatprep.subr.bf16.mxu1 %v12996_v35 }
 0x662   :  { %8935 = vmatpush3.bf16.msra.mxu1 %v9304_v10  ;;  %v9308_v10 = vld [vmem:[%s12858_s2 + $0x10] sm:$0xff]  }
 0x663   :  { %8936 = vmatprep.subr.bf16.mxu1 %v12996_v35 }
 0x666   :  { %8937 = vmatpush3.bf16.msra.mxu1 %v9305_v49 }
 0x667   :  { %8938 = vmatprep.subr.bf16.mxu1 %v12996_v35 }
 0x66a   :  { %8939 = vmatpush3.bf16.msra.mxu1 %v9306_v38 }
 0x66b   :  { %8958 = vmatprep.subr.bf16.mxu1 %v12996_v35 }
 0x71d   :  { %v2573_v56 = vpop.f32.mrf.mxu1 }
 0x71e   :  { %v2574_v26 = vadd.f32 %v2573_v56, %v2523_v17 }
 0x71f   :  { %v8922_v40 = vpop.f32.mrf.mxu1 }
 0x720   :  { %v2580_v23 = vadd.f32 %v2574_v26, %v13054_v59 }
 0x721   :  { %v2576_v36 = vpop.f32.mrf.mxu1 }
 0x722   :  { %v2577_v30 = vadd.f32 %v2576_v36, %v2523_v17  ;;  %v2582_v54 = vsel %vm66_vm0, %v2580_v23, 0.0 }
 0x723   :  { %2583 = vadd.xlane.f32.xlu1 %v2582_v54  ;;  %v8923_v37 = vpop.f32.mrf.mxu1 }
 0x724   :  { %v2581_v60 = vadd.f32 %v2577_v30, %v13055_v1 }
 0x726   :  { %v2585_v48 = vsel %vm66_vm0, %v2581_v60, 0.0 }
 0x727   :  { %2586 = vadd.xlane.f32.xlu0 %v2585_v48 }
 0x7ac   :  { %v2584_v33 = vpop.xlane.xlu1 %2583 }
 0x7ad   :  { %v2588_v47 = vmul.f32 0.03125, %v2584_v33 }
 0x7af   :  { %v2590_v8 = vsub.f32 %v2580_v23, %v2588_v47 }
 0x7b0   :  { %v2587_v6 = vpop.xlane.xlu0 %2586 }
 0x7b1   :  { %v2589_v62 = vmul.f32 0.03125, %v2587_v6  ;;  %v2592_v45 = vmul.f32 %v2590_v8, %v2590_v8 }
 0x7b3   :  { %v2591_v57 = vsub.f32 %v2581_v60, %v2589_v62  ;;  %v2594_v51 = vsel %vm66_vm0, %v2592_v45, 0.0 }
 0x7b4   :  { %2595 = vadd.xlane.f32.xlu0 %v2594_v51  ;;  %v10694_v51 = vsub.s32 5, %v13035_v24 }
 0x7b5   :  { %v2593_v9 = vmul.f32 %v2591_v57, %v2591_v57 }
 0x7b6   :  { %13059 = vst [vmem:[#allocation30_spill] sm:$0xff] %v10694_v51 }
 0x7b7   :  { %v2597_v46 = vsel %vm66_vm0, %v2593_v9, 0.0  ;;  %v2715_v9 = vrot.slane %v10638_v55, %v10694_v51 }
 0x7b8   :  { %2598 = vadd.xlane.f32.xlu0 %v2597_v46 }
 0x83d   :  { %v2596_v12 = vpop.xlane.xlu0 %2595 }
 0x83e   :  { %v2600_v14 = vmul.f32 0.03125, %v2596_v12 }
 0x840   :  { %v2602_v27 = vadd.f32 1e-12, %v2600_v14 }
 0x841   :  { %v2599_v16 = vpop.xlane.xlu0 %2598 }
 0x842   :  { %9369 = vrsqrt.f32 %v2602_v27  ;;  %v2601_v18 = vmul.f32 0.03125, %v2599_v16 }
 0x844   :  { %v2603_v19 = vadd.f32 1e-12, %v2601_v18 }
 0x846   :  { %9371 = vrsqrt.f32 %v2603_v19 }
 0x84f   :  { %v9370_v39 = vpop.eup %9369 }
 0x850   :  { %v2606_v22 = vmul.f32 %v9370_v39, %v2590_v8 }
 0x852   :  { %v2612_v61 = vmul.f32 %v2611_v0, %v2606_v22 }
 0x853   :  { %v9372_v20 = vpop.eup %9371 }
 0x854   :  { %v2607_v7 = vmul.f32 %v9372_v20, %v2591_v57  ;;  %v2618_v41 = vadd.f32 %v2617_v50, %v2612_v61 }
 0x856   :  { %v2613_v25 = vmul.f32 %v2611_v0, %v2607_v7 }
 0x858   :  { %v2619_v13 = vadd.f32 %v2617_v50, %v2613_v25 }
 0x85a   :  { %v2624_v63 = vpack.c.bf16 %v2619_v13, %v2618_v41 }
 0x85c   :  { %8929 = vmatmul.mubr.msk.bf16.vlgmr.msra.gmra.mxu0 %vm66_vm0, %v2624_v63 }
 0x85d   :  { %8948 = vmatprep.mubr.msk.bf16.mxu0 %vm9501_vm1, %v12996_v35 }
 0x91c   :  { %v2678_v52 = vpop.f32.mrf.mxu0 }
 0x91d   :  { %v2679_v5 = vadd.f32 %v2678_v52, %v2628_v43 }
 0x91e   :  { %v8930_v15 = vpop.f32.mrf.mxu0 }
 0x91f   :  { %v2685_v4 = vmul.f32 %v2679_v5, %v2679_v5 }
 0x920   :  { %v2681_v34 = vpop.f32.mrf.mxu0 }
 0x921   :  { %v2687_v17 = vmul.f32 %v2685_v4, %v2679_v5  ;;  %v2682_v56 = vadd.f32 %v2681_v34, %v2628_v43  ;;  %v10711_v4 = vsub.s32 6, %v13035_v24 }
 0x922   :  { %v8931_v26 = vpop.f32.mrf.mxu0 }
 0x923   :  { %v2689_v40 = vmul.f32 0.044715, %v2687_v17  ;;  %v2686_v59 = vmul.f32 %v2682_v56, %v2682_v56  ;;  %13060 = vst [vmem:[#allocation25_spill] sm:$0xff] %v10711_v4  ;;  %v10716_v26 = vsub.s32 7, %v13035_v24  ;;  %v8550_v24 = vld [vmem:[%s12862_s6 + $0x8] sm:$0xff] }
 0x925   :  { %v2691_v23 = vadd.f32 %v2689_v40, %v2679_v5  ;;  %v2688_v36 = vmul.f32 %v2686_v59, %v2682_v56  ;;  %13061 = vst [vmem:[#allocation19_spill] sm:$0xff] %v10716_v26 }
 0x927   :  { %v2693_v30 = vmul.f32 0.7978846, %v2691_v23  ;;  %v2690_v54 = vmul.f32 0.044715, %v2688_v36  ;;  %v2822_v36 = vrot.slane %v10638_v55, %v10716_v26 }
 0x929   :  { %9373 = vtanh.f32 %v2693_v30  ;;  %v2692_v37 = vadd.f32 %v2690_v54, %v2682_v56 }
 0x92b   :  { %v2694_v1 = vmul.f32 0.7978846, %v2692_v37 }
 0x92d   :  { %9375 = vtanh.f32 %v2694_v1 }
 0x936   :  { %v9374_v60 = vpop.eup %9373 }
 0x937   :  { %v2697_v48 = vadd.f32 1.0, %v9374_v60  ;;  %v2836_v60 = vrot.slane %v8550_v24, %v13036_v53 }
 0x939   :  { %v2699_v47 = vmul.f32 0.5, %v2697_v48 }
 0x93a   :  { %v9376_v33 = vpop.eup %9375 }
 0x93b   :  { %v2698_v8 = vadd.f32 1.0, %v9376_v33  ;;  %v2701_v62 = vmul.f32 %v2699_v47, %v2679_v5 }
 0x93d   :  { %v2700_v6 = vmul.f32 0.5, %v2698_v8 }
 0x93f   :  { %v2702_v45 = vmul.f32 %v2700_v6, %v2682_v56  ;;  %v2816_v56 = vrot.slane %v10638_v55, %v10711_v4 }
 0x941   :  { %v2711_v57 = vpack.c.bf16 %v2702_v45, %v2701_v62 }
 0x943   :  { %8941 = vmatmul.mubr.msk.bf16.vlgmr.msra.gmra.mxu1 %vm2740_vm13, %v2711_v57 }
 0x944   :  { %8960 = vmatprep.mubr.msk.bf16.mxu1 %vm9501_vm1, %v12996_v35 }
 0xa03   :  { %v2778_v46 = vpop.f32.mrf.mxu1 }
 0xa04   :  { %v2779_v42 = vadd.f32 %v2778_v46, %v2715_v9 }
 0xa05   :  { %v8942_v31 = vpop.f32.mrf.mxu1 }
 0xa06   :  { %v2785_v12 = vadd.f32 %v2779_v42, %v2618_v41 }
 0xa07   :  { %v2781_v14 = vpop.f32.mrf.mxu1 }
 0xa08   :  { %v2782_v27 = vadd.f32 %v2781_v14, %v2715_v9  ;;  %v2787_v16 = vsel %vm66_vm0, %v2785_v12, 0.0 }
 0xa09   :  { %2788 = vadd.xlane.f32.xlu1 %v2787_v16  ;;  %v8943_v18 = vpop.f32.mrf.mxu1 }
 0xa0a   :  { %v2786_v19 = vadd.f32 %v2782_v27, %v2619_v13  ;;  %v9307_v13 = vld [vmem:[%s12858_s2 + $0x18] sm:$0xff]  }
 0xa0b   :  { %8945 = vmatpush3.bf16.msra.mxu0 %v9307_v13 }
 0xa0c   :  { %v2790_v39 = vsel %vm66_vm0, %v2786_v19, 0.0  ;;  %8946 = vmatprep.subr.bf16.mxu0 %v12996_v35 }
 0xa0d   :  { %2791 = vadd.xlane.f32.xlu0 %v2790_v39 }
 0xa0f   :  { %8947 = vmatpush3.bf16.msra.mxu0 %v9308_v10 }
 0xa10   :  { %8952 = vmatprep.subr.bf16.mxu0 %v12996_v35 }
 0xa92   :  { %v2789_v22 = vpop.xlane.xlu1 %2788 }
 0xa93   :  { %v2793_v0 = vmul.f32 0.03125, %v2789_v22 }
 0xa95   :  { %v2795_v20 = vsub.f32 %v2785_v12, %v2793_v0 }
 0xa96   :  { %v2792_v7 = vpop.xlane.xlu0 %2791 }
 0xa97   :  { %v2794_v61 = vmul.f32 0.03125, %v2792_v7  ;;  %v2797_v50 = vmul.f32 %v2795_v20, %v2795_v20 }
 0xa99   :  { %v2796_v25 = vsub.f32 %v2786_v19, %v2794_v61  ;;  %v2799_v63 = vsel %vm66_vm0, %v2797_v50, 0.0 }
 0xa9a   :  { %2800 = vadd.xlane.f32.xlu1 %v2799_v63 }
 0xa9b   :  { %v2798_v41 = vmul.f32 %v2796_v25, %v2796_v25 }
 0xa9d   :  { %v2802_v21 = vsel %vm66_vm0, %v2798_v41, 0.0 }
 0xa9e   :  { %2803 = vadd.xlane.f32.xlu0 %v2802_v21 }
 0xb23   :  { %v2801_v49 = vpop.xlane.xlu1 %2800 }
 0xb24   :  { %v2805_v38 = vmul.f32 0.03125, %v2801_v49 }
 0xb26   :  { %v2807_v43 = vadd.f32 1e-12, %v2805_v38 }
 0xb27   :  { %v2804_v52 = vpop.xlane.xlu0 %2803 }
 0xb28   :  { %9377 = vrsqrt.f32 %v2807_v43  ;;  %v2806_v5 = vmul.f32 0.03125, %v2804_v52 }
 0xb2a   :  { %v2808_v15 = vadd.f32 1e-12, %v2806_v5 }
 0xb2c   :  { %9379 = vrsqrt.f32 %v2808_v15 }
 0xb35   :  { %v9378_v34 = vpop.eup %9377 }
 0xb36   :  { %v2811_v17 = vmul.f32 %v9378_v34, %v2795_v20 }
 0xb38   :  { %v2817_v23 = vmul.f32 %v2816_v56, %v2811_v17 }
 0xb39   :  { %v9380_v40 = vpop.eup %9379 }
 0xb3a   :  { %v2812_v59 = vmul.f32 %v9380_v40, %v2796_v25  ;;  %v10720_v54 = vadd.f32 %v2822_v36, %v2817_v23 }
 0xb3c   :  { %v2818_v30 = vmul.f32 %v2816_v56, %v2812_v59  ;;  %13062 = vst [vmem:[#allocation18_spill] sm:$0xff] %v10720_v54 }
 0xb3e   :  { %v10722_v37 = vadd.f32 %v2822_v36, %v2818_v30 }
 0xb40   :  { %13063 = vst [vmem:[#allocation26_spill] sm:$0xff] %v10722_v37  ;;  %v2832_v1 = vpack.c.bf16 %v10722_v37, %v10720_v54 }
 0xb42   :  { %8949 = vmatmul.mubr.msk.bf16.vlgmr.msra.gmra.mxu0 %vm66_vm0, %v2832_v1 }
 0xb43   :  { %8954 = vmatprep.mubr.msk.bf16.mxu0 %vm9501_vm1, %v12996_v35 }
 0xc02   :  { %v2886_v55 = vpop.f32.mrf.mxu0 }
 0xc03   :  { %v10733_v48 = vadd.f32 %v2886_v55, %v2836_v60 }
 0xc04   :  { %v8950_v33 = vpop.f32.mrf.mxu0 }
 0xc05   :  { %13064 = vst [vmem:[#allocation20_spill] sm:$0xff] %v10733_v48  ;;  %2895 = vrot.lane.b32.xlu1 %v10733_v48, %s9503_s25 }
 0xc06   :  { %v2889_v47 = vpop.f32.mrf.mxu0 }
 0xc07   :  { %v10737_v8 = vadd.f32 %v2889_v47, %v2836_v60 }
 0xc08   :  { %v8951_v6 = vpop.f32.mrf.mxu0 }
 0xc09   :  { %13065 = vst [vmem:[#allocation22_spill] sm:$0xff] %v10737_v8  ;;  %2901 = vrot.lane.b32.xlu1 %v10733_v48, %s9502_s24  ;;  %2897 = vrot.lane.b32.xlu0 %v10737_v8, %s9503_s25 }
 0xc0d   :  { %2907 = vrot.lane.b32.xlu1 %v10733_v48, %s9504_s26  ;;  %2909 = vrot.lane.b32.xlu0 %v10737_v8, %s9504_s26 }
 0xc11   :  { %2913 = vrot.lane.b32.xlu1 %v10733_v48, %s9505_s27  ;;  %2915 = vrot.lane.b32.xlu0 %v10737_v8, %s9505_s27 }
 0xc15   :  { %2919 = vrot.lane.b32.xlu1 %v10733_v48, %s9506_s28  ;;  %2921 = vrot.lane.b32.xlu0 %v10737_v8, %s9506_s28 }
 0xc19   :  { %2925 = vrot.lane.b32.xlu1 %v10733_v48, %s9507_s29  ;;  %2927 = vrot.lane.b32.xlu0 %v10737_v8, %s9507_s29 }
 0xc1d   :  { %2903 = vrot.lane.b32.xlu1 %v10737_v8, %s9502_s24  ;;  %2933 = vrot.lane.b32.xlu0 %v10737_v8, %s9508_s30 }
 0xc21   :  { %2931 = vrot.lane.b32.xlu1 %v10733_v48, %s9508_s30  ;;  %2939 = vrot.lane.b32.xlu0 %v10737_v8, %s9509_s11 }
 0xc25   :  { %2937 = vrot.lane.b32.xlu1 %v10733_v48, %s9509_s11 }
 0xc29   :  { %2943 = vrot.lane.b32.xlu1 %v10733_v48, %s9510_s12 }
 0xc2d   :  { %2945 = vrot.lane.b32.xlu1 %v10737_v8, %s9510_s12 }
 0xc77   :  { %v2896_v62 = vpop.permute.xlu1 %2895 }
 0xc7b   :  { %v2902_v45 = vpop.permute.xlu1 %2901  ;;  %v2898_v57 = vpop.permute.xlu0 %2897 }
 0xc7c   :  { %v2961_v16 = vcombine.low %v10733_v48, %v2902_v45  ;;  %v2962_v18 = vcombine.high %v10733_v48, %v2902_v45 }
 0xc7e   :  { %v2969_v61 = vrot.slane %v2961_v16, %v13041_v29  ;;  %v2976_v50 = vrot.slane %v2962_v18, %v13041_v29 }
 0xc7f   :  { %v2908_v9 = vpop.permute.xlu1 %2907  ;;  %v2910_v46 = vpop.permute.xlu0 %2909 }
 0xc80   :  { %v2977_v27 = vcombine.low %v2896_v62, %v2908_v9  ;;  %v2978_v19 = vcombine.high %v2896_v62, %v2908_v9  ;;  %v3181_v20 = vcombine.low %v2898_v57, %v2910_v46  ;;  %v3182_v7 = vcombine.high %v2898_v57, %v2910_v46 }
 0xc82   :  { %v2985_v0 = vrot.slane %v2977_v27, %v13041_v29  ;;  %v2992_v25 = vrot.slane %v2978_v19, %v13041_v29  ;;  %v3189_v15 = vrot.slane %v3181_v20, %v13041_v29  ;;  %v3196_v34 = vrot.slane %v3182_v7, %v13041_v29 }
 0xc83   :  { %v10773_v42 = vpop.permute.xlu1 %2913  ;;  %v2916_v31 = vpop.permute.xlu0 %2915 }
 0xc84   :  { %v3025_v52 = vcombine.low %v2969_v61, %v2985_v0  ;;  %v3026_v5 = vcombine.high %v2969_v61, %v2985_v0  ;;  %v3041_v23 = vcombine.low %v2976_v50, %v2992_v25  ;;  %v3042_v36 = vcombine.high %v2976_v50, %v2992_v25 }
 0xc86   :  { %v10802_v19 = vrot.slane %v3025_v52, %v13042_v58 }
 0xc87   :  { %v10775_v12 = vpop.permute.xlu1 %2919  ;;  %v2922_v14 = vpop.permute.xlu0 %2921 }
 0xc8b   :  { %v2926_v39 = vpop.permute.xlu1 %2925  ;;  %v2928_v22 = vpop.permute.xlu0 %2927 }
 0xc8c   :  { %v3197_v63 = vcombine.low %v2916_v31, %v2928_v22  ;;  %v3198_v41 = vcombine.high %v2916_v31, %v2928_v22  ;;  %v2993_v57 = vcombine.low %v10773_v42, %v2926_v39 }
 0xc8e   :  { %v3205_v30 = vrot.slane %v3197_v63, %v13041_v29  ;;  %v3212_v1 = vrot.slane %v3198_v41, %v13041_v29  ;;  %v10815_v63 = vrot.slane %v3042_v36, %v13042_v58 }
 0xc8f   :  { %v2904_v21 = vpop.permute.xlu1 %2903  ;;  %v2934_v13 = vpop.permute.xlu0 %2933 }
 0xc90   :  { %v3165_v10 = vcombine.low %v10737_v8, %v2904_v21  ;;  %v3166_v49 = vcombine.high %v10737_v8, %v2904_v21  ;;  %v3213_v38 = vcombine.low %v2922_v14, %v2934_v13  ;;  %v3214_v43 = vcombine.high %v2922_v14, %v2934_v13 }
 0xc91   :  { %v2994_v14 = vcombine.high %v10773_v42, %v2926_v39  ;;  %v10809_v42 = vrot.slane %v3026_v5, %v13042_v58  ;;  %v10812_v39 = vrot.slane %v3041_v23, %v13042_v58  ;;  %v10820_v21 = vrot.slane %v2993_v57, %v13041_v29 }
 0xc92   :  { %v3173_v17 = vrot.slane %v3165_v10, %v13041_v29  ;;  %v3180_v56 = vrot.slane %v3166_v49, %v13041_v29  ;;  %v3221_v40 = vrot.slane %v3213_v38, %v13041_v29  ;;  %v3228_v59 = vrot.slane %v3214_v43, %v13041_v29 }
 0xc93   :  { %v10806_v20 = vpop.permute.xlu1 %2931  ;;  %v10823_v13 = vrot.slane %v2994_v14, %v13041_v29 }
 0xc94   :  { %v3229_v24 = vcombine.low %v3173_v17, %v3189_v15  ;;  %v3230_v60 = vcombine.high %v3173_v17, %v3189_v15  ;;  %v3245_v55 = vcombine.low %v3180_v56, %v3196_v34  ;;  %v3246_v33 = vcombine.high %v3180_v56, %v3196_v34 }
 0xc95   :  { %v3261_v47 = vcombine.low %v3205_v30, %v3221_v40  ;;  %v3262_v6 = vcombine.high %v3205_v30, %v3221_v40  ;;  %v3277_v62 = vcombine.low %v3212_v1, %v3228_v59  ;;  %v3278_v45 = vcombine.high %v3212_v1, %v3228_v59 }
 0xc96   :  { %v3237_v9 = vrot.slane %v3229_v24, %v13042_v58  ;;  %v3244_v46 = vrot.slane %v3230_v60, %v13042_v58  ;;  %v3253_v31 = vrot.slane %v3245_v55, %v13042_v58  ;;  %v3260_v22 = vrot.slane %v3246_v33, %v13042_v58 }
 0xc97   :  { %v3269_v27 = vrot.slane %v3261_v47, %v13042_v58  ;;  %v3276_v16 = vrot.slane %v3262_v6, %v13042_v58  ;;  %v3285_v18 = vrot.slane %v3277_v62, %v13042_v58  ;;  %v3292_v0 = vrot.slane %v3278_v45, %v13042_v58 }
 0xc98   :  { %v3009_v10 = vcombine.low %v10775_v12, %v10806_v20  ;;  %v3010_v49 = vcombine.high %v10775_v12, %v10806_v20 }
 0xc99   :  { %v3293_v7 = vcombine.low %v3237_v9, %v3269_v27  ;;  %v3294_v61 = vcombine.high %v3237_v9, %v3269_v27  ;;  %v3295_v50 = vcombine.low %v3244_v46, %v3276_v16  ;;  %v3296_v25 = vcombine.high %v3244_v46, %v3276_v16 }
 0xc9a   :  { %v10817_v41 = vcombine.low %v3253_v31, %v3285_v18  ;;  %v10829_v38 = vcombine.high %v3253_v31, %v3285_v18  ;;  %v10831_v43 = vcombine.low %v3260_v22, %v3292_v0  ;;  %v10833_v52 = vcombine.high %v3260_v22, %v3292_v0 }
 0xc9b   :  { %v3394_v5 = vrot.slane %v3294_v61, 1  ;;  %v3393_v15 = vrot.slane %v3293_v7, 1  ;;  %v3395_v34 = vrot.slane %v3295_v50, 1  ;;  %v3396_v17 = vrot.slane %v3296_v25, 1 }
 0xc9c   :  { %v3425_v40 = vrot.slane %v3293_v7, 2  ;;  %v3426_v59 = vrot.slane %v3294_v61, 2  ;;  %v3427_v23 = vrot.slane %v3295_v50, 2  ;;  %v3489_v36 = vpack.c.bf16 %v3293_v7, %v3293_v7 }
 0xc9d   :  { %v3428_v30 = vrot.slane %v3296_v25, 2  ;;  %v3490_v1 = vpack.c.bf16 %v3294_v61, %v3294_v61  ;;  %v3491_v24 = vpack.c.bf16 %v3295_v50, %v3295_v50  ;;  %v3492_v60 = vpack.c.bf16 %v3296_v25, %v3296_v25 }
 0xc9e   :  { %v3457_v33 = vrot.slane %v3293_v7, 3  ;;  %v3458_v47 = vrot.slane %v3294_v61, 3  ;;  %v3506_v6 = vpack.c.bf16 %v3394_v5, %v3394_v5  ;;  %v3459_v62 = vrot.slane %v3295_v50, 3 }
 0xc9f   :  { %v3460_v45 = vrot.slane %v3296_v25, 3  ;;  %v3507_v57 = vpack.c.bf16 %v3395_v34, %v3395_v34  ;;  %v10837_v9 = vpack.c.bf16 %v3396_v17, %v3396_v17  ;;  %v3505_v31 = vpack.c.bf16 %v3393_v15, %v3393_v15 }
 0xca0   :  { %v3521_v14 = vpack.c.bf16 %v3425_v40, %v3425_v40  ;;  %v10840_v27 = vunpack.c.l.b16 %v3489_v36  ;;  %v3522_v16 = vpack.c.bf16 %v3426_v59, %v3426_v59  ;;  %v10842_v18 = vunpack.c.l.b16 %v3490_v1 }
 0xca1   :  { %v10844_v22 = vunpack.c.l.b16 %v3491_v24  ;;  %v10846_v0 = vunpack.c.l.b16 %v3492_v60  ;;  %v3523_v7 = vpack.c.bf16 %v3427_v23, %v3427_v23  ;;  %v10848_v61 = vpack.c.bf16 %v3428_v30, %v3428_v30 }
 0xca2   :  { %v3537_v50 = vpack.c.bf16 %v3457_v33, %v3457_v33  ;;  %v4006_v25 = vunpack.c.l.b16 %v3506_v6  ;;  %v3538_v5 = vpack.c.bf16 %v3458_v47, %v3458_v47  ;;  %v3539_v34 = vpack.c.bf16 %v3459_v62, %v3459_v62 }
 0xca3   :  { %v4007_v17 = vunpack.c.l.b16 %v3507_v57  ;;  %v12903_v15 = vunpack.c.l.b16 %v10837_v9  ;;  %v10851_v40 = vpack.c.bf16 %v3460_v45, %v3460_v45  ;;  %v3829_v59 = vrot.slane %v10842_v18, 7 }
 0xca4   :  { %v3844_v36 = vrot.slane %v10840_v27, 4  ;;  %v4005_v1 = vunpack.c.l.b16 %v3505_v31  ;;  %v3845_v30 = vrot.slane %v10842_v18, 3  ;;  %v4013_v60 = vrot.slane %v4006_v25, 7 }
 0xca5   :  { %13066 = vst [vmem:[#allocation27_spill] sm:$0xff] %v10851_v40  ;;  %v4189_v47 = vunpack.c.l.b16 %v3521_v14  ;;  %v4190_v6 = vunpack.c.l.b16 %v3522_v16  ;;  %v4191_v62 = vunpack.c.l.b16 %v3523_v7  ;;  %v10859_v57 = vrot.slane %v4007_v17, 6 }
 0xca6   :  { %v10863_v45 = vrot.slane %v12903_v15, 5  ;;  %v12904_v31 = vunpack.c.l.b16 %v10848_v61  ;;  %v4374_v46 = vunpack.c.l.b16 %v3538_v5  ;;  %v10868_v55 = vsel %vm1017_vm2, %v3829_v59, %v10840_v27 }
 0xca7   :  { %v10870_v18 = vrot.slane %v4005_v1, 4  ;;  %v10872_v56 = vrot.slane %v4006_v25, 3  ;;  %v4197_v14 = vrot.slane %v4190_v6, 7  ;;  %v10875_v16 = vsel %vm1017_vm2, %v4013_v60, %v4005_v1 }
 0xca8   :  { %v10877_v7 = vrot.slane %v4007_v17, 2  ;;  %v4373_v23 = vunpack.c.l.b16 %v3537_v50  ;;  %v4375_v15 = vunpack.c.l.b16 %v3539_v34  ;;  %v10879_v24 = vrot.slane %v4191_v62, 6 }
 0xca9   :  { %v10883_v5 = vrot.slane %v12904_v31, 5  ;;  %v10885_v27 = vrot.slane %v4189_v47, 4  ;;  %v10887_v59 = vrot.slane %v4190_v6, 3  ;;  %v10889_v25 = vrot.slane %v4191_v62, 2 }
 0xcaa   :  { %13067 = vst [vmem:[#allocation29_spill] sm:$0xff] %v10879_v24  ;;  %v4381_v1 = vrot.slane %v4374_v46, 7  ;;  %v3017_v50 = vrot.slane %v3009_v10, %v13041_v29  ;;  %v10897_v34 = vsel %vm1017_vm2, %v4197_v14, %v4189_v47  ;;  %v3024_v17 = vrot.slane %v3010_v49, %v13041_v29 }
 0xcab   :  { %13068 = vst [vmem:[#allocation23_spill] sm:$0xff] %v10883_v5  ;;  %v3493_v60 = vpack.c.bf16 %v10817_v41, %v10817_v41  ;;  %v3494_v6 = vpack.c.bf16 %v10829_v38, %v10829_v38  ;;  %v10907_v62 = vrot.slane %v4375_v15, 6  ;;  %v10909_v31 = vrot.slane %v4373_v23, 4 }
 0xcac   :  { %v3057_v10 = vcombine.low %v10820_v21, %v3017_v50  ;;  %v3058_v47 = vcombine.high %v10820_v21, %v3017_v50  ;;  %v3073_v14 = vcombine.low %v10823_v13, %v3024_v17  ;;  %v3074_v33 = vcombine.high %v10823_v13, %v3024_v17 }
 0xcad   :  { %13069 = vst [vmem:[#allocation24_spill] sm:$0xff] %v10907_v62  ;;  %13070 = vst [vmem:[#allocation28_spill] sm:$0xff] %v10909_v31  ;;  %v3495_v12 = vpack.c.bf16 %v10831_v43, %v10831_v43  ;;  %v3496_v20 = vpack.c.bf16 %v10833_v52, %v10833_v52  ;;  %v10921_v26 = vunpack.c.l.b16 %v3493_v60  ;;  %v10923_v4 = vunpack.c.l.b16 %v3494_v6 }
 0xcae   :  { %v3065_v49 = vrot.slane %v3057_v10, %v13042_v58  ;;  %v3072_v53 = vrot.slane %v3058_v47, %v13042_v58  ;;  %v10926_v21 = vsel %vm1017_vm2, %v4381_v1, %v4373_v23  ;;  %v10928_v50 = vrot.slane %v4374_v46, 3 }
 0xcaf   :  { %13071 = vst [vmem:[#allocation5_spill] sm:$0xff] %v10926_v21  ;;  %v3081_v13 = vrot.slane %v3073_v14, %v13042_v58  ;;  %v3088_v17 = vrot.slane %v3074_v33, %v13042_v58  ;;  %v13073_v6 = vunpack.c.l.b16 %v10851_v40  ;;  %v10940_v23 = vrot.slane %v4375_v15, 2 }
 0xcb0   :  { %13072 = vst [vmem:[#allocation10_spill] sm:$0xff] %v10928_v50  ;;  %v3089_v51 = vcombine.low %v10802_v19, %v3065_v49  ;;  %v3090_v32 = vcombine.high %v10802_v19, %v3065_v49  ;;  %v3091_v10 = vcombine.low %v10809_v42, %v3072_v53  ;;  %v3092_v60 = vcombine.high %v10809_v42, %v3072_v53 }
 0xcb1   :  { %v10938_v47 = vrot.slane %v13073_v6, 5  ;;  %13075 = vst [vmem:[#allocation8_spill] sm:$0xff] %v10940_v23  ;;  %v10943_v46 = vcombine.low %v10812_v39, %v3081_v13  ;;  %v10946_v1 = vsel %vm1017_vm2, %v3845_v30, %v3844_v36  ;;  %v10948_v33 = vunpack.c.l.b16 %v3495_v12 }
 0xcb2   :  { %v10950_v14 = vunpack.c.l.b16 %v3496_v20  ;;  %v10955_v42 = vcombine.high %v10812_v39, %v3081_v13  ;;  %v10958_v15 = vcombine.low %v10815_v63, %v3088_v17  ;;  %v10961_v49 = vcombine.high %v10815_v63, %v3088_v17 }
 0xcb3   :  { %13074 = vst [vmem:[#allocation11_spill] sm:$0xff] %v10938_v47  ;;  %v3386_v6 = vrot.slane %v3090_v32, 1  ;;  %v3385_v36 = vrot.slane %v3089_v51, 1  ;;  %v3387_v30 = vrot.slane %v3091_v10, 1  ;;  %v3388_v12 = vrot.slane %v3092_v60, 1 }
 0xcb4   :  { %v3417_v11 = vrot.slane %v3089_v51, 2  ;;  %v3418_v28 = vrot.slane %v3090_v32, 2  ;;  %v3419_v19 = vrot.slane %v3091_v10, 2  ;;  %v3481_v37 = vpack.c.bf16 %v3089_v51, %v3089_v51 }
 0xcb5   :  { %v3420_v53 = vrot.slane %v3092_v60, 2  ;;  %v3482_v54 = vpack.c.bf16 %v3090_v32, %v3090_v32  ;;  %v3483_v39 = vpack.c.bf16 %v3091_v10, %v3091_v10  ;;  %v3484_v13 = vpack.c.bf16 %v3092_v60, %v3092_v60 }
 0xcb6   :  { %v3449_v58 = vrot.slane %v3089_v51, 3  ;;  %v3450_v29 = vrot.slane %v3090_v32, 3  ;;  %v3498_v63 = vpack.c.bf16 %v3386_v6, %v3386_v6  ;;  %v3451_v17 = vrot.slane %v3091_v10, 3 }
 0xcb7   :  { %v3452_v48 = vrot.slane %v3092_v60, 3  ;;  %v3499_v8 = vpack.c.bf16 %v3387_v30, %v3387_v30  ;;  %v10965_v3 = vpack.c.bf16 %v3388_v12, %v3388_v12  ;;  %v3497_v2 = vpack.c.bf16 %v3385_v36, %v3385_v36 }
 0xcb8   :  { %v3513_v47 = vpack.c.bf16 %v3417_v11, %v3417_v11  ;;  %v3729_v62 = vunpack.c.l.b16 %v3481_v37  ;;  %v3514_v21 = vpack.c.bf16 %v3418_v28, %v3418_v28  ;;  %v3730_v23 = vunpack.c.l.b16 %v3482_v54 }
 0xcb9   :  { %v10968_v40 = vunpack.c.l.b16 %v3483_v39  ;;  %v10970_v50 = vunpack.c.l.b16 %v3484_v13  ;;  %v3515_v44 = vpack.c.bf16 %v3419_v19, %v3419_v19  ;;  %v10972_v51 = vpack.c.bf16 %v3420_v53, %v3420_v53 }
 0xcba   :  { %v10974_v32 = vpack.c.bf16 %v3449_v58, %v3449_v58  ;;  %v3914_v10 = vunpack.c.l.b16 %v3498_v63  ;;  %v3530_v60 = vpack.c.bf16 %v3450_v29, %v3450_v29  ;;  %v10976_v6 = vpack.c.bf16 %v3451_v17, %v3451_v17 }
 0xcbb   :  { %v3915_v30 = vunpack.c.l.b16 %v3499_v8  ;;  %v12931_v36 = vunpack.c.l.b16 %v10965_v3  ;;  %v10979_v11 = vpack.c.bf16 %v3452_v48, %v3452_v48  ;;  %v3737_v28 = vrot.slane %v3730_v23, 7 }
 0xcbc   :  { %13076 = vst [vmem:[#allocation9_spill] sm:$0xff] %v10974_v32  ;;  %v3752_v54 = vrot.slane %v3729_v62, 4  ;;  %v3913_v37 = vunpack.c.l.b16 %v3497_v2  ;;  %v3753_v53 = vrot.slane %v3730_v23, 3  ;;  %v3921_v39 = vrot.slane %v3914_v10, 7 }
 0xcbd   :  { %13077 = vst [vmem:[#allocation31_spill] sm:$0xff] %v10979_v11  ;;  %v3755_v58 = vrot.slane %v10968_v40, 2  ;;  %v4097_v13 = vunpack.c.l.b16 %v3513_v47  ;;  %v4098_v29 = vunpack.c.l.b16 %v3514_v21  ;;  %v4099_v63 = vunpack.c.l.b16 %v3515_v44 }
 0xcbe   :  { %v10984_v17 = vrot.slane %v3915_v30, 6  ;;  %v10988_v48 = vrot.slane %v12931_v36, 5  ;;  %v12932_v8 = vunpack.c.l.b16 %v10972_v51  ;;  %v4282_v2 = vunpack.c.l.b16 %v3530_v60 }
 0xcbf   :  { %v10992_v20 = vsel %vm1017_vm2, %v3737_v28, %v3729_v62  ;;  %v10994_v19 = vrot.slane %v3913_v37, 4  ;;  %v4105_v23 = vrot.slane %v4098_v29, 7  ;;  %v10998_v21 = vsel %vm1017_vm2, %v3921_v39, %v3913_v37 }
 0xcc0   :  { %v11000_v44 = vrot.slane %v3914_v10, 3  ;;  %v11002_v47 = vrot.slane %v3915_v30, 2  ;;  %v11005_v31 = vrot.slane %v4099_v63, 6  ;;  %v11009_v62 = vrot.slane %v12932_v8, 5 }
 0xcc1   :  { %v11011_v60 = vrot.slane %v4097_v13, 4  ;;  %v11013_v28 = vrot.slane %v4098_v29, 3  ;;  %v11016_v12 = vsel %vm1017_vm2, %v4105_v23, %v4097_v13  ;;  %v11018_v37 = vrot.slane %v4099_v63, 2 }
 0xcc2   :  { %13078 = vst [vmem:[#allocation32_spill] sm:$0xff] %v11005_v31  ;;  %13079 = vst [vmem:[#allocation33_spill] sm:$0xff] %v11009_v62  ;;  %v11021_v30 = vrot.slane %v4282_v2, 7  ;;  %v13082_v39 = vunpack.c.l.b16 %v10974_v32  ;;  %v11027_v31 = vrot.slane %v4282_v2, 3  ;;  %v13085_v8 = vrot.slane %v10844_v22, 2 }
 0xcc3   :  { %13080 = vst [vmem:[#allocation34_spill] sm:$0xff] %v11016_v12  ;;  %v3849_v13 = vrot.slane %v10846_v0, 1  ;;  %v3852_v63 = vrot.slane %v10923_v4, 7  ;;  %v3854_v23 = vrot.slane %v10948_v33, 6  ;;  %v3485_v10 = vpack.c.bf16 %v10943_v46, %v10943_v46 }
 0xcc4   :  { %13081 = vst [vmem:[#allocation35_spill] sm:$0xff] %v11021_v30  ;;  %v11025_v36 = vrot.slane %v13082_v39, 4  ;;  %13084 = vst [vmem:[#allocation37_spill] sm:$0xff] %v11027_v31  ;;  %v3848_v29 = vsel %vm1020_vm3, %v13085_v8, %v10946_v1  ;;  %v3486_v39 = vpack.c.bf16 %v10955_v42, %v10955_v42  ;;  %v3487_v31 = vpack.c.bf16 %v10958_v15, %v10958_v15 }
 0xcc5   :  { %v3850_v2 = vsel %vm1023_vm4, %v3849_v13, %v3848_v29  ;;  %v3488_v1 = vpack.c.bf16 %v10961_v49, %v10961_v49  ;;  %v3754_v8 = vsel %vm1017_vm2, %v3753_v53, %v3752_v54  ;;  %v3856_v11 = vrot.slane %v10950_v14, 5 }
 0xcc6   :  { %13083 = vst [vmem:[#allocation36_spill] sm:$0xff] %v11025_v36  ;;  %v3851_v36 = vsel %vm1026_vm5, %v10921_v26, %v3850_v2  ;;  %v11049_v30 = vunpack.c.l.b16 %v3486_v39  ;;  %v3756_v32 = vsel %vm1020_vm3, %v3755_v58, %v3754_v8  ;;  %v11053_v29 = vunpack.c.l.b16 %v3487_v31 }
 0xcc7   :  { %v3853_v62 = vsel %vm1029_vm6, %v3852_v63, %v3851_v36  ;;  %v11055_v13 = vunpack.c.l.b16 %v3488_v1  ;;  %v3757_v12 = vrot.slane %v10970_v50, 1  ;;  %v13086_v5 = vunpack.c.l.b16 %v10976_v6 }
 0xcc8   :  { %v3839_v53 = vrot.slane %v10948_v33, 2  ;;  %v3855_v2 = vsel %vm1032_vm7, %v3854_v23, %v3853_v62  ;;  %v3733_v39 = vunpack.c.l.b16 %v3485_v10  ;;  %v3841_v24 = vrot.slane %v10950_v14, 1 }
 0xcc9   :  { %v11060_v54 = vrot.slane %v13086_v5, 2  ;;  %v3857_v58 = vsel %vm1035_vm8, %v3856_v11, %v3855_v2  ;;  %v3758_v31 = vsel %vm1023_vm4, %v3757_v12, %v3756_v32  ;;  %v3760_v36 = vrot.slane %v11049_v30, 7 }
 0xcca   :  { %v3858_v63 = vpack.c.b16 %v3857_v58, %v3857_v58  ;;  %v3759_v1 = vsel %vm1026_vm5, %v3733_v39, %v3758_v31  ;;  %v3762_v8 = vrot.slane %v11053_v29, 6  ;;  %v3764_v5 = vrot.slane %v11055_v13, 5 }
 0xccb   :  { %v3761_v33 = vsel %vm1029_vm6, %v3760_v36, %v3759_v1  ;;  %v13087_v62 = vrot.slane %v10844_v22, 6  ;;  %v3398_v11 = vrot.slane %v10829_v38, 1  ;;  %v3399_v32 = vrot.slane %v10831_v43, 1 }
 0xccc   :  { %v3863_v12 = vsel %vm1053_vm9, %v3858_v63, 0  ;;  %v3763_v10 = vsel %vm1032_vm7, %v3762_v8, %v3761_v33  ;;  %v13088_v23 = vrot.slane %v10846_v0, 5  ;;  %v3400_v58 = vrot.slane %v10833_v52, 1 }
 0xccd   :  { %v3832_v14 = vsel %vm1020_vm3, %v13087_v62, %v10868_v55  ;;  %8959 = vmatpush3.bf16.xpose.msra.mxu1 %v3863_v12  ;;  %v3765_v31 = vsel %vm1035_vm8, %v3764_v5, %v3763_v10  ;;  %v13089_v22 = vrot.slane %v10921_v26, 4  ;;  %v13090_v36 = vrot.slane %v10817_v41, 1 }
 0xcce   :  { %v3834_v2 = vsel %vm1023_vm4, %v13088_v23, %v3832_v14  ;;  %v3510_v63 = vpack.c.bf16 %v3398_v11, %v3398_v11  ;;  %v3766_v62 = vpack.c.b16 %v3765_v31, %v3765_v31  ;;  %v13091_v8 = vrot.slane %v10923_v4, 3  ;;  %8970 = vmatprep.subr.bf16.mxu1 %v12996_v35 }
 0xccf   :  { %v3836_v55 = vsel %vm1026_vm5, %v13089_v22, %v3834_v2  ;;  %v3509_v1 = vpack.c.bf16 %v13090_v36, %v13090_v36  ;;  %v3511_v33 = vpack.c.bf16 %v3399_v32, %v3399_v32  ;;  %v3512_v14 = vpack.c.bf16 %v3400_v58, %v3400_v58 }
 0xcd0   :  { %v3838_v0 = vsel %vm1029_vm6, %v13091_v8, %v3836_v55  ;;  %v3743_v12 = vrot.slane %v3733_v39, 4  ;;  %v4010_v26 = vunpack.c.l.b16 %v3510_v63  ;;  %v4030_v10 = vsel %vm1017_vm2, %v10872_v56, %v10870_v18 }
 0xcd1   :  { %v3840_v5 = vsel %vm1032_vm7, %v3839_v53, %v3838_v0  ;;  %v3771_v23 = vsel %vm1053_vm9, %v3766_v62, 0  ;;  %v4011_v2 = vunpack.c.l.b16 %v3511_v33  ;;  %v4012_v4 = vunpack.c.l.b16 %v3512_v14 }
 0xcd2   :  { %v3842_v11 = vsel %vm1035_vm8, %v3841_v24, %v3840_v5  ;;  %v3745_v31 = vrot.slane %v11049_v30, 3  ;;  %v3747_v22 = vrot.slane %v11053_v29, 2  ;;  %v3749_v32 = vrot.slane %v11055_v13, 1  ;;  %8953 = vmatpush3.bf16.xpose.msra.mxu0 %v3771_v23 }
 0xcd3   :  { %v4032_v53 = vsel %vm1020_vm3, %v10877_v7, %v4030_v10  ;;  %v3843_v39 = vpack.c.b16 %v3842_v11, %v3842_v11  ;;  %v4009_v58 = vunpack.c.l.b16 %v3509_v1  ;;  %v13092_v56 = vunpack.c.l.b16 %v10837_v9  ;;  %8964 = vmatprep.subr.bf16.mxu0 %v12996_v35 }
 0xcd4   :  { %v4036_v55 = vrot.slane %v4010_v26, 7  ;;  %v4038_v24 = vrot.slane %v4011_v2, 6  ;;  %v4040_v36 = vrot.slane %v4012_v4, 5  ;;  %v13093_v30 = vrot.slane %v10968_v40, 6 }
 0xcd5   :  { %v4033_v18 = vrot.slane %v13092_v56, 1  ;;  %v3390_v13 = vrot.slane %v10955_v42, 1  ;;  %8961 = vmatmul.mubr.msk.bf16.vlgmr.msra.gmra.mxu1 %vm1053_vm9, %v3843_v39  ;;  %v13094_v1 = vrot.slane %v10970_v50, 5  ;;  %v3391_v63 = vrot.slane %v10958_v15, 1 }
 0xcd6   :  { %v3740_v29 = vsel %vm1020_vm3, %v13093_v30, %v10992_v20  ;;  %v3392_v62 = vrot.slane %v10961_v49, 1  ;;  %v13095_v20 = vrot.slane %v10943_v46, 1  ;;  %8972 = vmatprep.mubr.msk.bf16.mxu1 %vm9501_vm1, %v12996_v35  ;;  %v4019_v23 = vrot.slane %v4009_v58, 4 }
 0xcd7   :  { %v4034_v7 = vsel %vm1023_vm4, %v4033_v18, %v4032_v53  ;;  %v3742_v9 = vsel %vm1023_vm4, %v13094_v1, %v3740_v29  ;;  %v3502_v33 = vpack.c.bf16 %v3390_v13, %v3390_v13  ;;  %v3503_v5 = vpack.c.bf16 %v3391_v63, %v3391_v63 }
 0xcd8   :  { %v4035_v8 = vsel %vm1026_vm5, %v4009_v58, %v4034_v7  ;;  %v3744_v40 = vsel %vm1026_vm5, %v3743_v12, %v3742_v9  ;;  %v3501_v0 = vpack.c.bf16 %v13095_v20, %v13095_v20  ;;  %v3504_v10 = vpack.c.bf16 %v3392_v62, %v3392_v62 }
 0xcd9   :  { %v4037_v50 = vsel %vm1029_vm6, %v4036_v55, %v4035_v8  ;;  %v3746_v14 = vsel %vm1029_vm6, %v3745_v31, %v3744_v40  ;;  %v3918_v12 = vunpack.c.l.b16 %v3502_v33  ;;  %v3919_v18 = vunpack.c.l.b16 %v3503_v5 }
 0xcda   :  { %v4039_v11 = vsel %vm1032_vm7, %v4038_v24, %v4037_v50  ;;  %v3748_v53 = vsel %vm1032_vm7, %v3747_v22, %v3746_v14  ;;  %v3920_v30 = vunpack.c.l.b16 %v3504_v10  ;;  %v4021_v29 = vrot.slane %v4010_v26, 3 }
 0xcdb   :  { %v4041_v39 = vsel %vm1035_vm8, %v4040_v36, %v4039_v11  ;;  %v3750_v56 = vsel %vm1035_vm8, %v3749_v32, %v3748_v53  ;;  %v4023_v13 = vrot.slane %v4011_v2, 2  ;;  %v4025_v1 = vrot.slane %v4012_v4, 1 }
 0xcdc   :  { %v4042_v7 = vpack.c.b16 %v4041_v39, %v4041_v39  ;;  %v3751_v55 = vpack.c.b16 %v3750_v56, %v3750_v56  ;;  %v3917_v31 = vunpack.c.l.b16 %v3501_v0  ;;  %v3938_v58 = vsel %vm1017_vm2, %v11000_v44, %v10994_v19 }
 0xcdd   :  { %v13096_v24 = vunpack.c.l.b16 %v10965_v3  ;;  %v3940_v32 = vsel %vm1020_vm3, %v11002_v47, %v3938_v58  ;;  %v3944_v26 = vrot.slane %v3918_v12, 7  ;;  %v3946_v2 = vrot.slane %v3919_v18, 6 }
 0xcde   :  { %v4047_v9 = vsel %vm1053_vm9, %v4042_v7, 0  ;;  %8955 = vmatmul.mubr.msk.bf16.vlgmr.msra.gmra.mxu0 %vm1053_vm9, %v3751_v55  ;;  %v3948_v36 = vrot.slane %v3920_v30, 5  ;;  %v4016_v19 = vsel %vm1020_vm3, %v10859_v57, %v10875_v16  ;;  %v3430_v3 = vrot.slane %v10829_v38, 2 }
 0xcdf   :  { %v3941_v22 = vrot.slane %v13096_v24, 1  ;;  %8971 = vmatpush3.bf16.xpose.msra.mxu1 %v4047_v9  ;;  %8966 = vmatprep.mubr.msk.bf16.mxu0 %vm9501_vm1, %v12996_v35  ;;  %v4018_v47 = vsel %vm1023_vm4, %v10863_v45, %v4016_v19  ;;  %v3431_v63 = vrot.slane %v10831_v43, 2  ;;  %v3432_v62 = vrot.slane %v10833_v52, 2 }
 0xce0   :  { %8982 = vmatprep.subr.bf16.mxu1 %v12996_v35  ;;  %v4020_v57 = vsel %vm1026_vm5, %v4019_v23, %v4018_v47  ;;  %v13097_v16 = vrot.slane %v10817_v41, 2  ;;  %v3526_v20 = vpack.c.bf16 %v3430_v3, %v3430_v3  ;;  %v3927_v14 = vrot.slane %v3917_v31, 4 }
 0xce1   :  { %v3942_v4 = vsel %vm1023_vm4, %v3941_v22, %v3940_v32  ;;  %v4022_v33 = vsel %vm1029_vm6, %v4021_v29, %v4020_v57  ;;  %v3527_v45 = vpack.c.bf16 %v3431_v63, %v3431_v63  ;;  %v3528_v50 = vpack.c.bf16 %v3432_v62, %v3432_v62 }
 0xce2   :  { %v3943_v44 = vsel %vm1026_vm5, %v3917_v31, %v3942_v4  ;;  %v3525_v40 = vpack.c.bf16 %v13097_v16, %v13097_v16  ;;  %v4024_v10 = vsel %vm1032_vm7, %v4023_v13, %v4022_v33  ;;  %v4194_v11 = vunpack.c.l.b16 %v3526_v20 }
 0xce3   :  { %v3945_v8 = vsel %vm1029_vm6, %v3944_v26, %v3943_v44  ;;  %v4026_v23 = vsel %vm1035_vm8, %v4025_v1, %v4024_v10  ;;  %v4195_v39 = vunpack.c.l.b16 %v3527_v45  ;;  %v4196_v56 = vunpack.c.l.b16 %v3528_v50 }
 0xce4   :  { %v3947_v0 = vsel %vm1032_vm7, %v3946_v2, %v3945_v8  ;;  %v3929_v7 = vrot.slane %v3918_v12, 3  ;;  %v3931_v55 = vrot.slane %v3919_v18, 2  ;;  %v4027_v58 = vpack.c.b16 %v4026_v23, %v4026_v23 }
 0xce5   :  { %v3949_v5 = vsel %vm1035_vm8, %v3948_v36, %v3947_v0  ;;  %v4214_v29 = vsel %vm1017_vm2, %v10887_v59, %v10885_v27  ;;  %v3933_v24 = vrot.slane %v3920_v30, 1  ;;  %v4193_v22 = vunpack.c.l.b16 %v3525_v40 }
 0xce6   :  { %v3950_v53 = vpack.c.b16 %v3949_v5, %v3949_v5  ;;  %v4216_v13 = vsel %vm1020_vm3, %v10889_v25, %v4214_v29  ;;  %8973 = vmatmul.mubr.msk.bf16.vlgmr.msra.gmra.mxu1 %vm1053_vm9, %v4027_v58  ;;  %v13098_v1 = vunpack.c.l.b16 %v10848_v61  ;;  %v4220_v12 = vrot.slane %v4194_v11, 7  ;;  %v13101_v58 = vld [vmem:[#allocation29_spill] sm:$0xff]  ;;  %v13102_v29 = vld [vmem:[#allocation23_spill] sm:$0xff] }
 0xce7   :  { %v4222_v18 = vrot.slane %v4195_v39, 6  ;;  %v4224_v32 = vrot.slane %v4196_v56, 5  ;;  %v3924_v27 = vsel %vm1020_vm3, %v10984_v17, %v10998_v21  ;;  %v3422_v59 = vrot.slane %v10955_v42, 2  ;;  %8984 = vmatprep.mubr.msk.bf16.mxu1 %vm9501_vm1, %v12996_v35 }
 0xce8   :  { %v3955_v31 = vsel %vm1053_vm9, %v3950_v53, 0  ;;  %v4217_v9 = vrot.slane %v13098_v1, 1  ;;  %v3423_v30 = vrot.slane %v10958_v15, 2  ;;  %v3424_v25 = vrot.slane %v10961_v49, 2 }
 0xce9   :  { %8965 = vmatpush3.bf16.xpose.msra.mxu0 %v3955_v31  ;;  %v3926_v26 = vsel %vm1023_vm4, %v10988_v48, %v3924_v27  ;;  %v13099_v2 = vrot.slane %v10943_v46, 2  ;;  %v4122_v21 = vsel %vm1017_vm2, %v11013_v28, %v11011_v60  ;;  %v3518_v19 = vpack.c.bf16 %v3422_v59, %v3422_v59 }
 0xcea   :  { %8976 = vmatprep.subr.bf16.mxu0 %v12996_v35  ;;  %v4218_v61 = vsel %vm1023_vm4, %v4217_v9, %v4216_v13  ;;  %v3928_v36 = vsel %vm1026_vm5, %v3927_v14, %v3926_v26  ;;  %v3519_v3 = vpack.c.bf16 %v3423_v30, %v3423_v30  ;;  %v3520_v63 = vpack.c.bf16 %v3424_v25, %v3424_v25 }
 0xceb   :  { %v3517_v17 = vpack.c.bf16 %v13099_v2, %v13099_v2  ;;  %v4219_v4 = vsel %vm1026_vm5, %v4193_v22, %v4218_v61  ;;  %v3930_v47 = vsel %vm1029_vm6, %v3929_v7, %v3928_v36  ;;  %v4102_v57 = vunpack.c.l.b16 %v3518_v19  ;;  %v13104_v19 = vld [vmem:[#allocation28_spill] sm:$0xff] }
 0xcec   :  { %v4221_v44 = vsel %vm1029_vm6, %v4220_v12, %v4219_v4  ;;  %v3932_v8 = vsel %vm1032_vm7, %v3931_v55, %v3930_v47  ;;  %v4103_v16 = vunpack.c.l.b16 %v3519_v3  ;;  %v4203_v40 = vrot.slane %v4193_v22, 4  ;;  %v13105_v3 = vld [vmem:[#allocation10_spill] sm:$0xff] }
 0xced   :  { %v4101_v48 = vunpack.c.l.b16 %v3517_v17  ;;  %v4223_v62 = vsel %vm1032_vm7, %v4222_v18, %v4221_v44  ;;  %v4205_v60 = vrot.slane %v4194_v11, 3  ;;  %v3934_v20 = vsel %vm1035_vm8, %v3933_v24, %v3932_v8  ;;  %v13108_v8 = vld [vmem:[#allocation8_spill] sm:$0xff] }
 0xcee   :  { %v4225_v28 = vsel %vm1035_vm8, %v4224_v32, %v4223_v62  ;;  %v4207_v0 = vrot.slane %v4195_v39, 2  ;;  %v3935_v45 = vpack.c.b16 %v3934_v20, %v3934_v20  ;;  %v4104_v50 = vunpack.c.l.b16 %v3520_v63  ;;  %v13109_v20 = vld [vmem:[#allocation34_spill] sm:$0xff] }
 0xcef   :  { %v4226_v33 = vpack.c.b16 %v4225_v28, %v4225_v28  ;;  %v4209_v14 = vrot.slane %v4196_v56, 1  ;;  %v4111_v5 = vrot.slane %v4101_v48, 4  ;;  %v4124_v10 = vsel %vm1020_vm3, %v11018_v37, %v4122_v21 }
 0xcf0   :  { %v13100_v53 = vunpack.c.l.b16 %v10972_v51  ;;  %8967 = vmatmul.mubr.msk.bf16.vlgmr.msra.gmra.mxu0 %vm1053_vm9, %v3935_v45  ;;  %v4128_v11 = vrot.slane %v4102_v57, 7  ;;  %v4130_v55 = vrot.slane %v4103_v16, 6  ;;  %v4200_v39 = vsel %vm1020_vm3, %v13101_v58, %v10897_v34 }
 0xcf1   :  { %v4231_v7 = vsel %vm1053_vm9, %v4226_v33, 0  ;;  %v4202_v24 = vsel %vm1023_vm4, %v13102_v29, %v4200_v39  ;;  %v3462_v37 = vrot.slane %v10829_v38, 3  ;;  %v3463_v51 = vrot.slane %v10831_v43, 3  ;;  %8978 = vmatprep.mubr.msk.bf16.mxu0 %vm9501_vm1, %v12996_v35 }
 0xcf2   :  { %v4125_v23 = vrot.slane %v13100_v53, 1  ;;  %8983 = vmatpush3.bf16.xpose.msra.mxu1 %v4231_v7  ;;  %v4132_v22 = vrot.slane %v4104_v50, 5  ;;  %v4204_v13 = vsel %vm1026_vm5, %v4203_v40, %v4202_v24  ;;  %v3464_v34 = vrot.slane %v10833_v52, 3 }
 0xcf3   :  { %8994 = vmatprep.subr.bf16.mxu1 %v12996_v35  ;;  %v4206_v9 = vsel %vm1029_vm6, %v4205_v60, %v4204_v13  ;;  %v3542_v12 = vpack.c.bf16 %v3462_v37, %v3462_v37  ;;  %v3543_v38 = vpack.c.bf16 %v3463_v51, %v3463_v51  ;;  %v13103_v32 = vrot.slane %v10817_v41, 3  ;;  %v13106_v41 = vld [vmem:[#allocation27_spill] sm:$0xff] }
 0xcf4   :  { %v4126_v56 = vsel %vm1023_vm4, %v4125_v23, %v4124_v10  ;;  %v4208_v18 = vsel %vm1032_vm7, %v4207_v0, %v4206_v9  ;;  %v3544_v59 = vpack.c.bf16 %v3464_v34, %v3464_v34  ;;  %v4113_v26 = vrot.slane %v4102_v57, 3  ;;  %v13110_v0 = vld [vmem:[#allocation32_spill] sm:$0xff]  ;;  %v13117_v9 = vld [vmem:[#allocation31_spill] sm:$0xff] }
 0xcf5   :  { %v4127_v31 = vsel %vm1026_vm5, %v4101_v48, %v4126_v56  ;;  %v3541_v27 = vpack.c.bf16 %v13103_v32, %v13103_v32  ;;  %v4210_v25 = vsel %vm1035_vm8, %v4209_v14, %v4208_v18  ;;  %v4378_v52 = vunpack.c.l.b16 %v3542_v12  ;;  %v13119_v18 = vld [vmem:[#allocation36_spill] sm:$0xff]  ;;  %v13120_v32 = vld [vmem:[#allocation37_spill] sm:$0xff] }
 0xcf6   :  { %v4129_v1 = vsel %vm1029_vm6, %v4128_v11, %v4127_v31  ;;  %v4379_v61 = vunpack.c.l.b16 %v3543_v38  ;;  %v4211_v17 = vpack.c.b16 %v4210_v25, %v4210_v25  ;;  %v4380_v21 = vunpack.c.l.b16 %v3544_v59  ;;  %v13114_v31 = vld [vmem:[#allocation9_spill] sm:$0xff] }
 0xcf7   :  { %v4131_v43 = vsel %vm1032_vm7, %v4130_v55, %v4129_v1  ;;  %v4115_v4 = vrot.slane %v4103_v16, 2  ;;  %v4117_v36 = vrot.slane %v4104_v50, 1  ;;  %v4398_v44 = vsel %vm1017_vm2, %v13105_v3, %v13104_v19  ;;  %v13111_v50 = vld [vmem:[#allocation33_spill] sm:$0xff] }
 0xcf8   :  { %v4133_v30 = vsel %vm1035_vm8, %v4132_v22, %v4131_v43  ;;  %v13107_v47 = vunpack.c.l.b16 %v13106_v41  ;;  %v4377_v62 = vunpack.c.l.b16 %v3541_v27  ;;  %v4400_v57 = vsel %vm1020_vm3, %v13108_v8, %v4398_v44  ;;  %v13116_v22 = vld [vmem:[#allocation35_spill] sm:$0xff]  ;;  %v13122_v41 = vld [vmem:[#allocation5_spill] sm:$0xff] }
 0xcf9   :  { %v4134_v2 = vpack.c.b16 %v4133_v30, %v4133_v30  ;;  %8985 = vmatmul.mubr.msk.bf16.vlgmr.msra.gmra.mxu1 %vm1053_vm9, %v4211_v17  ;;  %v4404_v40 = vrot.slane %v4378_v52, 7  ;;  %v4406_v60 = vrot.slane %v4379_v61, 6  ;;  %v4408_v28 = vrot.slane %v4380_v21, 5 }
 0xcfa   :  { %v4401_v63 = vrot.slane %v13107_v47, 1  ;;  %v4108_v33 = vsel %vm1020_vm3, %v13110_v0, %v13109_v20  ;;  %8996 = vmatprep.mubr.msk.bf16.mxu1 %vm9501_vm1, %v12996_v35  ;;  %v3454_v10 = vrot.slane %v10955_v42, 3  ;;  %v3455_v53 = vrot.slane %v10958_v15, 3  ;;  %v13123_v47 = vld [vmem:[#allocation24_spill] sm:$0xff] }
 0xcfb   :  { %v4139_v48 = vsel %vm1053_vm9, %v4134_v2, 0  ;;  %v4110_v14 = vsel %vm1023_vm4, %v13111_v50, %v4108_v33  ;;  %v3456_v11 = vrot.slane %v10961_v49, 3  ;;  %v13112_v55 = vrot.slane %v10943_v46, 3 }
 0xcfc   :  { %8977 = vmatpush3.bf16.xpose.msra.mxu0 %v4139_v48  ;;  %v4402_v16 = vsel %vm1023_vm4, %v4401_v63, %v4400_v57  ;;  %v4112_v7 = vsel %vm1026_vm5, %v4111_v5, %v4110_v14  ;;  %v3534_v29 = vpack.c.bf16 %v3454_v10, %v3454_v10  ;;  %v3535_v24 = vpack.c.bf16 %v3455_v53, %v3455_v53  ;;  %v13124_v48 = vld [vmem:[#allocation11_spill] sm:$0xff] }
 0xcfd   :  { %v4403_v45 = vsel %vm1026_vm5, %v4377_v62, %v4402_v16  ;;  %8988 = vmatprep.subr.bf16.mxu0 %v12996_v35  ;;  %v3533_v58 = vpack.c.bf16 %v13112_v55, %v13112_v55  ;;  %v4114_v56 = vsel %vm1029_vm6, %v4113_v26, %v4112_v7  ;;  %v13113_v42 = vunpack.c.l.b16 %v10976_v6 }
 0xcfe   :  { %v4405_v23 = vsel %vm1029_vm6, %v4404_v40, %v4403_v45  ;;  %v4116_v51 = vsel %vm1032_vm7, %v4115_v4, %v4114_v56  ;;  %v3536_v5 = vpack.c.bf16 %v3456_v11, %v3456_v11  ;;  %v13115_v49 = vunpack.c.l.b16 %v13114_v31 }
 0xcff   :  { %v4407_v39 = vsel %vm1032_vm7, %v4406_v60, %v4405_v23  ;;  %v4291_v37 = vrot.slane %v13113_v42, 6  ;;  %v4118_v34 = vsel %vm1035_vm8, %v4117_v36, %v4116_v51  ;;  %v4285_v1 = vunpack.c.l.b16 %v3533_v58 }
 0xd00   :  { %v4409_v15 = vsel %vm1035_vm8, %v4408_v28, %v4407_v39  ;;  %v4290_v46 = vsel %vm1017_vm2, %v13116_v22, %v13115_v49  ;;  %v13118_v12 = vunpack.c.l.b16 %v13117_v9  ;;  %v4119_v43 = vpack.c.b16 %v4118_v34, %v4118_v34 }
 0xd01   :  { %v4410_v13 = vpack.c.b16 %v4409_v15, %v4409_v15  ;;  %v4286_v6 = vunpack.c.l.b16 %v3534_v29  ;;  %v4306_v27 = vsel %vm1017_vm2, %v13120_v32, %v13119_v18  ;;  %v4387_v59 = vrot.slane %v4377_v62, 4 }
 0xd02   :  { %v4293_v38 = vrot.slane %v13118_v12, 5  ;;  %v4287_v25 = vunpack.c.l.b16 %v3535_v24  ;;  %v4308_v26 = vsel %vm1020_vm3, %v11060_v54, %v4306_v27  ;;  %v4389_v2 = vrot.slane %v4378_v52, 3 }
 0xd03   :  { %v4415_v30 = vsel %vm1053_vm9, %v4410_v13, 0  ;;  %v4391_v17 = vrot.slane %v4379_v61, 2  ;;  %8979 = vmatmul.mubr.msk.bf16.vlgmr.msra.gmra.mxu0 %vm1053_vm9, %v4119_v43  ;;  %v4288_v4 = vunpack.c.l.b16 %v3536_v5  ;;  %v13121_v36 = vmov %v13118_v12  ;;  %v13126_v13 = vld [vmem:[#allocation21_spill] sm:$0xff] }
 0xd04   :  { %8995 = vmatpush3.bf16.xpose.msra.mxu1 %v4415_v30  ;;  %v4309_v19 = vrot.slane %v13121_v36, 1  ;;  %v4393_v3 = vrot.slane %v4380_v21, 1  ;;  %v4295_v44 = vrot.slane %v4285_v1, 4  ;;  %v4384_v63 = vsel %vm1020_vm3, %v13123_v47, %v13122_v41  ;;  %8990 = vmatprep.mubr.msk.bf16.mxu0 %vm9501_vm1, %v12996_v35 }
 0xd05   :  { %v4292_v54 = vsel %vm1020_vm3, %v4291_v37, %v4290_v46  ;;  %9006 = vmatprep.subr.bf16.mxu1 %v12996_v35  ;;  %v4312_v61 = vrot.slane %v4286_v6, 7  ;;  %v4386_v62 = vsel %vm1023_vm4, %v13124_v48, %v4384_v63  ;;  %v4314_v57 = vrot.slane %v4287_v25, 6  ;;  %v13125_v37 = vld [vmem:[#allocation16_spill] sm:$0xff] }
 0xd06   :  { %v4310_v52 = vsel %vm1023_vm4, %v4309_v19, %v4308_v26  ;;  %v4294_v21 = vsel %vm1023_vm4, %v4293_v38, %v4292_v54  ;;  %v4388_v40 = vsel %vm1026_vm5, %v4387_v59, %v4386_v62  ;;  %v4297_v60 = vrot.slane %v4286_v6, 3 }
 0xd07   :  { %v4311_v8 = vsel %vm1026_vm5, %v4285_v1, %v4310_v52  ;;  %v4296_v16 = vsel %vm1026_vm5, %v4295_v44, %v4294_v21  ;;  %v4316_v20 = vrot.slane %v4288_v4, 5  ;;  %v4390_v0 = vsel %vm1029_vm6, %v4389_v2, %v4388_v40 }
 0xd08   :  { %v4313_v28 = vsel %vm1029_vm6, %v4312_v61, %v4311_v8  ;;  %v4392_v45 = vsel %vm1032_vm7, %v4391_v17, %v4390_v0  ;;  %v4298_v10 = vsel %vm1029_vm6, %v4297_v60, %v4296_v16  ;;  %v4299_v53 = vrot.slane %v4287_v25, 2 }
 0xd09   :  { %v4315_v33 = vsel %vm1032_vm7, %v4314_v57, %v4313_v28  ;;  %v4394_v14 = vsel %vm1035_vm8, %v4393_v3, %v4392_v45  ;;  %v4301_v58 = vrot.slane %v4288_v4, 1 }
 0xd0a   :  { %v4317_v50 = vsel %vm1035_vm8, %v4316_v20, %v4315_v33  ;;  %v4395_v7 = vpack.c.b16 %v4394_v14, %v4394_v14  ;;  %v4300_v55 = vsel %vm1032_vm7, %v4299_v53, %v4298_v10 }
 0xd0b   :  { %v4318_v23 = vpack.c.b16 %v4317_v50, %v4317_v50  ;;  %v4302_v39 = vsel %vm1035_vm8, %v4301_v58, %v4300_v55  ;;  %v13128_v55 = vld [vmem:[#allocation20_spill] sm:$0xff]  ;;  %v11345_v58 = vpop.permute.xlu1 %2937 }
 0xd0c   :  { %8997 = vmatmul.mubr.msk.bf16.vlgmr.msra.gmra.mxu1 %vm1053_vm9, %v4395_v7  ;;  %v4303_v56 = vpack.c.b16 %v4302_v39, %v4302_v39  ;;  %v11347_v39 = vpop.permute.xlu0 %2939 }
 0xd0d   :  { %v4323_v11 = vsel %vm1053_vm9, %v4318_v23, 0  ;;  %9008 = vmatprep.mubr.msk.bf16.mxu1 %vm9501_vm1, %v12996_v35 }
 0xd0e   :  { %8989 = vmatpush3.bf16.xpose.msra.mxu0 %v4323_v11  ;;  %v13127_v11 = vld [vmem:[#allocation22_spill] sm:$0xff] }
 0xd0f   :  { %9000 = vmatprep.subr.bf16.mxu0 %v12996_v35 }
 0xd15   :  { %8991 = vmatmul.mubr.msk.bf16.vlgmr.msra.gmra.mxu0 %vm1053_vm9, %v4303_v56  ;;  %v11349_v56 = vpop.permute.xlu1 %2943 }
 0xd16   :  { %9002 = vmatprep.mubr.msk.bf16.mxu0 %vm9501_vm1, %v12996_v35 }
 0xd95   :  { %v3899_v29 = vpop.f32.mrf.mxu1 }
 0xd96   :  { %v4458_v24 = vmul.f32 0.35355338, %v3899_v29 }
 0xd97   :  { %v8962_v42 = vpop.f32.mrf.mxu1 }
 0xd98   :  { %v11311_v15 = vadd.f32 %v4458_v24, %v13125_v37  ;;  %v11352_v42 = vpop.permute.xlu1 %2945 }
 0xd99   :  { %v3902_v51 = vpop.f32.mrf.mxu1 }
 0xd9a   :  { %v4476_v5 = vsel %vm1053_vm9, %v11311_v15, -inf }
 0xd9b   :  { %4477 = vmax.xlane.f32.xlu0 %v4476_v5  ;;  %v8963_v31 = vpop.f32.mrf.mxu1 }
 0xd9e   :  { %v3807_v49 = vpop.f32.mrf.mxu0 }
 0xd9f   :  { %v4457_v22 = vmul.f32 0.35355338, %v3807_v49 }
 0xda0   :  { %v8956_v46 = vpop.f32.mrf.mxu0 }
 0xda1   :  { %v11316_v34 = vadd.f32 %v4457_v22, %v13126_v13 }
 0xda2   :  { %v3810_v1 = vpop.f32.mrf.mxu0 }
 0xda3   :  { %v4473_v9 = vsel %vm1053_vm9, %v11316_v34, -inf }
 0xda4   :  { %4474 = vmax.xlane.f32.xlu1 %v4473_v9  ;;  %v8957_v12 = vpop.f32.mrf.mxu0 }
 0xda6   :  { %v4083_v38 = vpop.f32.mrf.mxu1 }
 0xda7   :  { %v4460_v27 = vmul.f32 0.35355338, %v4083_v38 }
 0xda8   :  { %v8974_v43 = vpop.f32.mrf.mxu1 }
 0xda9   :  { %v11326_v17 = vadd.f32 %v4460_v27, %v13125_v37 }
 0xdaa   :  { %v4086_v6 = vpop.f32.mrf.mxu1 }
 0xdab   :  { %v4482_v3 = vsel %vm1053_vm9, %v11326_v17, -inf }
 0xdac   :  { %v8975_v18 = vpop.f32.mrf.mxu1 }
 0xdb0   :  { %v3991_v32 = vpop.f32.mrf.mxu0 }
 0xdb1   :  { %v4459_v59 = vmul.f32 0.35355338, %v3991_v32 }
 0xdb2   :  { %v8968_v30 = vpop.f32.mrf.mxu0 }
 0xdb3   :  { %v11321_v25 = vadd.f32 %v4459_v59, %v13126_v13 }
 0xdb4   :  { %v3994_v26 = vpop.f32.mrf.mxu0 }
 0xdb5   :  { %v4479_v2 = vsel %vm1053_vm9, %v11321_v25, -inf }
 0xdb6   :  { %4480 = vmax.xlane.f32.xlu0 %v4479_v2  ;;  %v8969_v4 = vpop.f32.mrf.mxu0 }
 0xdb9   :  { %v4267_v36 = vpop.f32.mrf.mxu1 }
 0xdba   :  { %v4462_v19 = vmul.f32 0.35355338, %v4267_v36  ;;  %4483 = vmax.xlane.f32.xlu0 %v4482_v3 }
 0xdbb   :  { %v8986_v44 = vpop.f32.mrf.mxu1 }
 0xdbc   :  { %v11331_v41 = vadd.f32 %v4462_v19, %v13125_v37 }
 0xdbd   :  { %v4270_v47 = vpop.f32.mrf.mxu1 }
 0xdbe   :  { %v4488_v63 = vsel %vm1053_vm9, %v11331_v41, -inf }
 0xdbf   :  { %v8987_v54 = vpop.f32.mrf.mxu1  ;;  %4489 = vmax.xlane.f32.xlu0 %v4488_v63 }
 0xdc3   :  { %v4175_v52 = vpop.f32.mrf.mxu0 }
 0xdc4   :  { %v4461_v61 = vmul.f32 0.35355338, %v4175_v52 }
 0xdc5   :  { %v8980_v48 = vpop.f32.mrf.mxu0 }
 0xdc6   :  { %v4469_v62 = vadd.f32 %v4461_v61, %v13126_v13 }
 0xdc7   :  { %v4178_v21 = vpop.f32.mrf.mxu0 }
 0xdc8   :  { %v4485_v8 = vsel %vm1053_vm9, %v4469_v62, -inf }
 0xdc9   :  { %4486 = vmax.xlane.f32.xlu1 %v4485_v8  ;;  %v8981_v57 = vpop.f32.mrf.mxu0 }
 0xdcc   :  { %v4451_v40 = vpop.f32.mrf.mxu1 }
 0xdcd   :  { %v4464_v16 = vmul.f32 0.35355338, %v4451_v40 }
 0xdce   :  { %v8998_v60 = vpop.f32.mrf.mxu1 }
 0xdcf   :  { %v4472_v28 = vadd.f32 %v4464_v16, %v13125_v37 }
 0xdd0   :  { %v4454_v20 = vpop.f32.mrf.mxu1 }
 0xdd1   :  { %v4494_v0 = vsel %vm1053_vm9, %v4472_v28, -inf }
 0xdd2   :  { %v8999_v33 = vpop.f32.mrf.mxu1  ;;  %4495 = vmax.xlane.f32.xlu0 %v4494_v0 }
 0xdd5   :  { %v4359_v45 = vpop.f32.mrf.mxu0 }
 0xdd6   :  { %v4463_v50 = vmul.f32 0.35355338, %v4359_v45  ;;  %v13129_v45 = vld [vmem:[#allocation12_spill] sm:$0xff] }
 0xdd7   :  { %v8992_v14 = vpop.f32.mrf.mxu0 }
 0xdd8   :  { %v4471_v10 = vadd.f32 %v4463_v50, %v13126_v13 }
 0xdd9   :  { %v4362_v53 = vpop.f32.mrf.mxu0 }
 0xdda   :  { %v4491_v23 = vsel %vm1053_vm9, %v4471_v10, -inf }
 0xddb   :  { %4492 = vmax.xlane.f32.xlu1 %v4491_v23  ;;  %v8993_v7 = vpop.f32.mrf.mxu0 }
 0xde8   :  { %2951 = vrot.lane.b32.xlu0 %v13127_v11, %s9514_s15 }
 0xdec   :  { %2949 = vrot.lane.b32.xlu1 %v13128_v55, %s9514_s15 }
 0xe24   :  { %v4478_v29 = vpop.xlane.xlu0 %4477 }
 0xe25   :  { %v4498_v24 = vsub.f32 %v11311_v15, %v4478_v29 }
 0xe27   :  { %v4507_v51 = vmul.f32 1.442695, %v4498_v24 }
 0xe29   :  { %9381 = vpow2.f32 %v4507_v51 }
 0xe2d   :  { %v4475_v5 = vpop.xlane.xlu1 %4474 }
 0xe2e   :  { %v4497_v31 = vsub.f32 %v11316_v34, %v4475_v5  ;;  %v13130_v5 = vld [vmem:[#allocation13_spill] sm:$0xff] }
 0xe30   :  { %v4505_v49 = vmul.f32 1.442695, %v4497_v31 }
 0xe32   :  { %9383 = vpow2.f32 %v4505_v49 }
 0xe36   :  { %v11355_v22 = vpop.eup %9381 }
 0xe37   :  { %v4524_v46 = vsel %vm1053_vm9, %v11355_v22, 0.0 }
 0xe38   :  { %4525 = vadd.xlane.f32.xlu0 %v4524_v46 }
 0xe3f   :  { %v11359_v1 = vpop.eup %9383  ;;  %v4481_v9 = vpop.xlane.xlu0 %4480 }
 0xe40   :  { %v4521_v15 = vsel %vm1053_vm9, %v11359_v1, 0.0  ;;  %v4499_v32 = vsub.f32 %v11321_v25, %v4481_v9 }
 0xe41   :  { %4522 = vadd.xlane.f32.xlu1 %v4521_v15 }
 0xe42   :  { %v4509_v26 = vmul.f32 1.442695, %v4499_v32 }
 0xe43   :  { %v4484_v34 = vpop.xlane.xlu0 %4483 }
 0xe44   :  { %v4500_v12 = vsub.f32 %v11326_v17, %v4484_v34 }
 0xe46   :  { %v4511_v6 = vmul.f32 1.442695, %v4500_v12 }
 0xe48   :  { %v4490_v43 = vpop.xlane.xlu0 %4489  ;;  %9385 = vpow2.f32 %v4511_v6 }
 0xe49   :  { %v4502_v27 = vsub.f32 %v11331_v41, %v4490_v43 }
 0xe4b   :  { %v4515_v4 = vmul.f32 1.442695, %v4502_v27 }
 0xe4e   :  { %2957 = vrot.lane.b32.xlu0 %v13127_v11, %s9515_s16 }
 0xe52   :  { %2955 = vrot.lane.b32.xlu1 %v13128_v55, %s9515_s16  ;;  %v4487_v38 = vpop.xlane.xlu1 %4486 }
 0xe53   :  { %v4501_v18 = vsub.f32 %v4469_v62, %v4487_v38 }
 0xe55   :  { %v4513_v59 = vmul.f32 1.442695, %v4501_v18  ;;  %v11370_v44 = vpop.eup %9385 }
 0xe56   :  { %v4530_v25 = vsel %vm1053_vm9, %v11370_v44, 0.0 }
 0xe57   :  { %9387 = vpow2.f32 %v4513_v59 }
 0xe58   :  { %9389 = vpow2.f32 %v4509_v26 }
 0xe59   :  { %9391 = vpow2.f32 %v4515_v4 }
 0xe5b   :  { %v4496_v30 = vpop.xlane.xlu0 %4495 }
 0xe5c   :  { %v4504_v36 = vsub.f32 %v4472_v28, %v4496_v30 }
 0xe5e   :  { %v4519_v17 = vmul.f32 1.442695, %v4504_v36 }
 0xe5f   :  { %v2952_v57 = vpop.permute.xlu0 %2951 }
 0xe60   :  { %v3301_v16 = vcombine.low %v11347_v39, %v2952_v57  ;;  %v3302_v60 = vcombine.high %v11347_v39, %v2952_v57 }
 0xe62   :  { %v3309_v50 = vrot.slane %v3301_v16, %v13129_v45 }
 0xe64   :  { %v4493_v2 = vpop.xlane.xlu1 %4492  ;;  %v11374_v41 = vpop.eup %9387 }
 0xe65   :  { %v4503_v19 = vsub.f32 %v4471_v10, %v4493_v2  ;;  %v11376_v47 = vpop.eup %9389  ;;  %v4533_v63 = vsel %vm1053_vm9, %v11374_v41, 0.0  ;;  %v3316_v10 = vrot.slane %v3302_v60, %v13129_v45 }
 0xe66   :  { %v11380_v54 = vpop.eup %9391  ;;  %v4527_v52 = vsel %vm1053_vm9, %v11376_v47, 0.0 }
 0xe67   :  { %v4517_v3 = vmul.f32 1.442695, %v4503_v19  ;;  %v4536_v48 = vsel %vm1053_vm9, %v11380_v54, 0.0 }
 0xe68   :  { %v2950_v28 = vpop.permute.xlu1 %2949 }
 0xe69   :  { %9393 = vpow2.f32 %v4517_v3  ;;  %v3097_v14 = vcombine.low %v11345_v58, %v2950_v28  ;;  %v3098_v53 = vcombine.high %v11345_v58, %v2950_v28 }
 0xe6a   :  { %9395 = vpow2.f32 %v4519_v17 }
 0xe6b   :  { %v3105_v51 = vrot.slane %v3097_v14, %v13129_v45 }
 0xe6d   :  { %4531 = vadd.xlane.f32.xlu0 %v4530_v25 }
 0xe71   :  { %4534 = vadd.xlane.f32.xlu0 %v4533_v63 }
 0xe75   :  { %4537 = vadd.xlane.f32.xlu0 %v4536_v48 }
 0xe76   :  { %v11384_v61 = vpop.eup %9393  ;;  %4528 = vadd.xlane.f32.xlu1 %v4527_v52 }
 0xe77   :  { %v11388_v62 = vpop.eup %9395  ;;  %v4539_v21 = vsel %vm1053_vm9, %v11384_v61, 0.0 }
 0xe78   :  { %v4542_v8 = vsel %vm1053_vm9, %v11388_v62, 0.0 }
 0xe79   :  { %4543 = vadd.xlane.f32.xlu0 %v4542_v8 }
 0xe7a   :  { %4540 = vadd.xlane.f32.xlu1 %v4539_v21 }
 0xec1   :  { %v4526_v40 = vpop.xlane.xlu0 %4525 }
 0xec2   :  { %9397 = vrcp.f32 %v4526_v40 }
 0xec5   :  { %v2958_v20 = vpop.permute.xlu0 %2957 }
 0xec6   :  { %v3317_v0 = vcombine.low %v11352_v42, %v2958_v20  ;;  %v3318_v33 = vcombine.high %v11352_v42, %v2958_v20  ;;  %v3112_v42 = vrot.slane %v3098_v53, %v13129_v45 }
 0xec8   :  { %v3325_v23 = vrot.slane %v3317_v0, %v13129_v45  ;;  %v3332_v7 = vrot.slane %v3318_v33, %v13129_v45 }
 0xeca   :  { %v4523_v11 = vpop.xlane.xlu1 %4522  ;;  %v3333_v55 = vcombine.low %v3309_v50, %v3325_v23  ;;  %v3334_v39 = vcombine.high %v3309_v50, %v3325_v23  ;;  %v3349_v29 = vcombine.low %v3316_v10, %v3332_v7  ;;  %v3350_v24 = vcombine.high %v3316_v10, %v3332_v7 }
 0xecb   :  { %9399 = vrcp.f32 %v4523_v11 }
 0xecc   :  { %v3341_v31 = vrot.slane %v3333_v55, %v13130_v5  ;;  %v3348_v49 = vrot.slane %v3334_v39, %v13130_v5  ;;  %v11409_v58 = vrot.slane %v3349_v29, %v13130_v5  ;;  %v11412_v15 = vrot.slane %v3350_v24, %v13130_v5 }
 0xece   :  { %v2956_v46 = vpop.permute.xlu1 %2955  ;;  %v11416_v34 = vcombine.high %v3341_v31, %v12996_v35  ;;  %v11419_v12 = vcombine.high %v3348_v49, %v12996_v35  ;;  %v3569_v38 = vrot.slane %v3341_v31, 1  ;;  %v3571_v6 = vrot.slane %v3348_v49, 1 }
 0xecf   :  { %v3113_v9 = vcombine.low %v11349_v56, %v2956_v46  ;;  %v3114_v43 = vcombine.high %v11349_v56, %v2956_v46  ;;  %v3601_v18 = vrot.slane %v3341_v31, 2  ;;  %v3603_v32 = vrot.slane %v3348_v49, 2 }
 0xed0   :  { %v3633_v27 = vrot.slane %v3341_v31, 3  ;;  %v3635_v59 = vrot.slane %v3348_v49, 3  ;;  %v3665_v30 = vpack.c.bf16 %v3341_v31, %v3341_v31  ;;  %v3667_v26 = vpack.c.bf16 %v3348_v49, %v3348_v49 }
 0xed1   :  { %v11422_v2 = vpack.c.bf16 %v3569_v38, %v3569_v38  ;;  %v11424_v4 = vpack.c.bf16 %v3571_v6, %v3571_v6  ;;  %v11426_v36 = vpack.c.bf16 %v3601_v18, %v3601_v18  ;;  %v11428_v19 = vpack.c.bf16 %v3603_v32, %v3603_v32 }
 0xed2   :  { %v11430_v3 = vpack.c.bf16 %v3633_v27, %v3633_v27  ;;  %v11434_v56 = vcombine.high %v11409_v58, %v12996_v35  ;;  %v11436_v17 = vpack.c.bf16 %v3635_v59, %v3635_v59  ;;  %v11438_v25 = vunpack.c.l.b16 %v3665_v30 }
 0xed3   :  { %v11440_v63 = vunpack.c.l.b16 %v3667_v26  ;;  %v3121_v16 = vrot.slane %v3113_v9, %v13129_v45  ;;  %v3128_v60 = vrot.slane %v3114_v43, %v13129_v45  ;;  %v11452_v28 = vcombine.high %v11412_v15, %v12996_v35 }
 0xed4   :  { %v3666_v20 = vpack.c.bf16 %v11416_v34, %v11416_v34  ;;  %v3668_v0 = vpack.c.bf16 %v11419_v12, %v11419_v12  ;;  %v3669_v33 = vpack.c.bf16 %v11409_v58, %v11409_v58  ;;  %v3670_v7 = vpack.c.bf16 %v11434_v56, %v11434_v56 }
 0xed5   :  { %v4664_v57 = vrot.slane %v11440_v63, 6  ;;  %v3129_v50 = vcombine.low %v3105_v51, %v3121_v16  ;;  %v3130_v14 = vcombine.high %v3105_v51, %v3121_v16  ;;  %v3145_v10 = vcombine.low %v3112_v42, %v3128_v60 }
 0xed6   :  { %v3146_v53 = vcombine.high %v3112_v42, %v3128_v60  ;;  %v3671_v11 = vpack.c.bf16 %v11412_v15, %v11412_v15  ;;  %v3672_v55 = vpack.c.bf16 %v11452_v28, %v11452_v28  ;;  %v4655_v51 = vunpack.c.l.b16 %v3666_v20  ;;  %v9398_v42 = vpop.eup %9397 }
 0xed7   :  { %v3137_v39 = vrot.slane %v3129_v50, %v13130_v5  ;;  %v3144_v29 = vrot.slane %v3130_v14, %v13130_v5  ;;  %v11470_v24 = vrot.slane %v3145_v10, %v13130_v5  ;;  %v4657_v49 = vunpack.c.l.b16 %v3668_v0 }
 0xed8   :  { %v11473_v31 = vrot.slane %v3146_v53, %v13130_v5  ;;  %v4658_v46 = vunpack.c.l.b16 %v3669_v33  ;;  %v4659_v9 = vunpack.c.l.b16 %v3670_v7  ;;  %v11475_v38 = vpop.eup %9399  ;;  %v4660_v32 = vunpack.c.l.b16 %v3671_v11 }
 0xed9   :  { %v11478_v43 = vcombine.high %v3137_v39, %v12996_v35  ;;  %v11481_v6 = vcombine.high %v3144_v29, %v12996_v35  ;;  %v3561_v18 = vrot.slane %v3137_v39, 1  ;;  %v3563_v27 = vrot.slane %v3144_v29, 1 }
 0xeda   :  { %v3593_v59 = vrot.slane %v3137_v39, 2  ;;  %v3595_v30 = vrot.slane %v3144_v29, 2  ;;  %v3625_v26 = vrot.slane %v3137_v39, 3  ;;  %v3627_v16 = vrot.slane %v3144_v29, 3 }
 0xedb   :  { %v3657_v60 = vpack.c.bf16 %v3137_v39, %v3137_v39  ;;  %v3659_v20 = vpack.c.bf16 %v3144_v29, %v3144_v29  ;;  %v11483_v0 = vpack.c.bf16 %v3561_v18, %v3561_v18  ;;  %v11487_v33 = vcombine.high %v11470_v24, %v12996_v35 }
 0xedc   :  { %v11489_v50 = vpack.c.bf16 %v3563_v27, %v3563_v27  ;;  %v11491_v14 = vpack.c.bf16 %v3593_v59, %v3593_v59  ;;  %v11493_v10 = vpack.c.bf16 %v3595_v30, %v3595_v30  ;;  %v11495_v53 = vpack.c.bf16 %v3625_v26, %v3625_v26 }
 0xedd   :  { %v11497_v7 = vpack.c.bf16 %v3627_v16, %v3627_v16  ;;  %v4577_v11 = vunpack.c.l.b16 %v3657_v60  ;;  %v4579_v40 = vunpack.c.l.b16 %v3659_v20  ;;  %v4661_v21 = vunpack.c.l.b16 %v3672_v55 }
 0xede   :  { %v4662_v30 = vrot.slane %v4655_v51, 7  ;;  %v4666_v8 = vrot.slane %v4657_v49, 5  ;;  %v4668_v26 = vrot.slane %v4658_v46, 4  ;;  %v4670_v52 = vrot.slane %v4659_v9, 3 }
 0xedf   :  { %v4587_v27 = vrot.slane %v4579_v40, 6  ;;  %v4672_v16 = vrot.slane %v4660_v32, 2  ;;  %v4674_v20 = vrot.slane %v4661_v21, 1  ;;  %v4554_v39 = vmul.f32 %v9398_v42, %v11355_v22 }
 0xee0   :  { %v4663_v60 = vsel %vm1017_vm2, %v4662_v30, %v11438_v25  ;;  %v11509_v18 = vcombine.high %v11473_v31, %v12996_v35  ;;  %v3658_v55 = vpack.c.bf16 %v11478_v43, %v11478_v43  ;;  %v3660_v51 = vpack.c.bf16 %v11481_v6, %v11481_v6 }
 0xee1   :  { %v4665_v40 = vsel %vm1020_vm3, %v4664_v57, %v4663_v60  ;;  %v3661_v25 = vpack.c.bf16 %v11470_v24, %v11470_v24  ;;  %v4562_v22 = vpack.c.bf16 %v4554_v39, %v4554_v39  ;;  %v3662_v42 = vpack.c.bf16 %v11487_v33, %v11487_v33 }
 0xee2   :  { %v4667_v21 = vsel %vm1023_vm4, %v4666_v8, %v4665_v40  ;;  %v3663_v63 = vpack.c.bf16 %v11473_v31, %v11473_v31  ;;  %v3664_v49 = vpack.c.bf16 %v11509_v18, %v11509_v18  ;;  %v4578_v46 = vunpack.c.l.b16 %v3658_v55 }
 0xee3   :  { %v4669_v57 = vsel %vm1026_vm5, %v4668_v26, %v4667_v21  ;;  %v4580_v9 = vunpack.c.l.b16 %v3660_v51  ;;  %v4581_v30 = vunpack.c.l.b16 %v3661_v25  ;;  %v4582_v60 = vunpack.c.l.b16 %v3662_v42 }
 0xee4   :  { %v4671_v32 = vsel %vm1029_vm6, %v4670_v52, %v4669_v57  ;;  %v4583_v59 = vunpack.c.l.b16 %v3663_v63  ;;  %v4584_v39 = vunpack.c.l.b16 %v3664_v49  ;;  %v4585_v40 = vrot.slane %v4578_v46, 7 }
 0xee5   :  { %v4673_v8 = vsel %vm1032_vm7, %v4672_v16, %v4671_v32  ;;  %v4589_v23 = vrot.slane %v4580_v9, 5  ;;  %v4591_v48 = vrot.slane %v4581_v30, 4  ;;  %v4593_v37 = vrot.slane %v4582_v60, 3 }
 0xee6   :  { %v4675_v29 = vsel %vm1035_vm8, %v4674_v20, %v4673_v8  ;;  %v4595_v26 = vrot.slane %v4583_v59, 2  ;;  %v4586_v13 = vsel %vm1017_vm2, %v4585_v40, %v4577_v11  ;;  %v4597_v55 = vrot.slane %v4584_v39, 1 }
 0xee7   :  { %v4676_v21 = vpack.c.b16 %v4675_v29, %v4675_v29  ;;  %v3570_v51 = vrot.slane %v11416_v34, 1  ;;  %v4588_v52 = vsel %vm1020_vm3, %v4587_v27, %v4586_v13  ;;  %v3572_v25 = vrot.slane %v11419_v12, 1 }
 0xee8   :  { %v3573_v16 = vrot.slane %v11409_v58, 1  ;;  %v3574_v42 = vrot.slane %v11434_v56, 1  ;;  %v4590_v20 = vsel %vm1023_vm4, %v4589_v23, %v4588_v52  ;;  %v3575_v59 = vrot.slane %v11412_v15, 1 }
 0xee9   :  { %v4681_v63 = vsel %vm1900_vm10, %v4676_v21, 0  ;;  %v3576_v29 = vrot.slane %v11452_v28, 1  ;;  %v4592_v11 = vsel %vm1026_vm5, %v4591_v48, %v4590_v20  ;;  %v3682_v57 = vpack.c.bf16 %v3570_v51, %v3570_v51 }
 0xeea   :  { %9007 = vmatpush3.bf16.msra.mxu1 %v4681_v63  ;;  %v3684_v49 = vpack.c.bf16 %v3572_v25, %v3572_v25  ;;  %v3685_v13 = vpack.c.bf16 %v3573_v16, %v3573_v16  ;;  %v4594_v27 = vsel %vm1029_vm6, %v4593_v37, %v4592_v11  ;;  %v3686_v46 = vpack.c.bf16 %v3574_v42, %v3574_v42 }
 0xeeb   :  { %9018 = vmatprep.subr.bf16.mxu1 %v12996_v35  ;;  %v3687_v9 = vpack.c.bf16 %v3575_v59, %v3575_v59  ;;  %v3688_v32 = vpack.c.bf16 %v3576_v29, %v3576_v29  ;;  %v4596_v30 = vsel %vm1032_vm7, %v4595_v26, %v4594_v27  ;;  %v4809_v23 = vunpack.c.l.b16 %v3682_v57 }
 0xeec   :  { %v4811_v60 = vunpack.c.l.b16 %v3684_v49  ;;  %v4812_v8 = vunpack.c.l.b16 %v3685_v13  ;;  %v4598_v39 = vsel %vm1035_vm8, %v4597_v55, %v4596_v30  ;;  %v4813_v48 = vunpack.c.l.b16 %v3686_v46 }
 0xeed   :  { %9009 = vmatmul.mubr.msk.bf16.vlgmr.msra.gmra.mxu1 %vm1053_vm9, %v4562_v22  ;;  %v4814_v40 = vunpack.c.l.b16 %v3687_v9  ;;  %v4815_v21 = vunpack.c.l.b16 %v3688_v32  ;;  %v4599_v51 = vpack.c.b16 %v4598_v39, %v4598_v39  ;;  %v4816_v52 = vrot.slane %v4809_v23, 7 }
 0xeee   :  { %v13131_v25 = vunpack.c.l.b16 %v11424_v4  ;;  %v4820_v16 = vrot.slane %v4811_v60, 5  ;;  %9020 = vmatprep.mubr.msk.bf16.mxu1 %vm9501_vm1, %v12996_v35  ;;  %v4822_v26 = vrot.slane %v4812_v8, 4  ;;  %v4824_v42 = vrot.slane %v4813_v48, 3 }
 0xeef   :  { %v4826_v63 = vrot.slane %v4814_v40, 2  ;;  %v4828_v20 = vrot.slane %v4815_v21, 1  ;;  %v4604_v22 = vsel %vm1900_vm10, %v4599_v51, 0  ;;  %v13132_v55 = vunpack.c.l.b16 %v11422_v2 }
 0xef0   :  { %v4818_v37 = vrot.slane %v13131_v25, 6  ;;  %v4553_v29 = vmul.f32 %v11475_v38, %v11359_v1  ;;  %v3562_v4 = vrot.slane %v11478_v43, 1  ;;  %9001 = vmatpush3.bf16.msra.mxu0 %v4604_v22  ;;  %v3564_v57 = vrot.slane %v11481_v6, 1 }
 0xef1   :  { %v4817_v59 = vsel %vm1017_vm2, %v4816_v52, %v13132_v55  ;;  %v3565_v49 = vrot.slane %v11470_v24, 1  ;;  %v3566_v13 = vrot.slane %v11487_v33, 1  ;;  %9012 = vmatprep.subr.bf16.mxu0 %v12996_v35  ;;  %v3567_v2 = vrot.slane %v11473_v31, 1 }
 0xef2   :  { %v4819_v11 = vsel %vm1020_vm3, %v4818_v37, %v4817_v59  ;;  %v4561_v46 = vpack.c.bf16 %v4553_v29, %v4553_v29  ;;  %v3568_v1 = vrot.slane %v11509_v18, 1  ;;  %v3674_v9 = vpack.c.bf16 %v3562_v4, %v3562_v4 }
 0xef3   :  { %v4821_v27 = vsel %vm1023_vm4, %v4820_v16, %v4819_v11  ;;  %v3676_v32 = vpack.c.bf16 %v3564_v57, %v3564_v57  ;;  %v3677_v30 = vpack.c.bf16 %v3565_v49, %v3565_v49  ;;  %v3678_v60 = vpack.c.bf16 %v3566_v13, %v3566_v13 }
 0xef4   :  { %v4823_v38 = vsel %vm1026_vm5, %v4822_v26, %v4821_v27  ;;  %9003 = vmatmul.mubr.msk.bf16.vlgmr.msra.gmra.mxu0 %vm1053_vm9, %v4561_v46  ;;  %v3679_v8 = vpack.c.bf16 %v3567_v2, %v3567_v2  ;;  %v3680_v39 = vpack.c.bf16 %v3568_v1, %v3568_v1  ;;  %v4732_v21 = vunpack.c.l.b16 %v3674_v9 }
 0xef5   :  { %v4825_v23 = vsel %vm1029_vm6, %v4824_v42, %v4823_v38  ;;  %v4734_v51 = vunpack.c.l.b16 %v3676_v32  ;;  %v4735_v52 = vunpack.c.l.b16 %v3677_v30  ;;  %9014 = vmatprep.mubr.msk.bf16.mxu0 %vm9501_vm1, %v12996_v35  ;;  %v4736_v37 = vunpack.c.l.b16 %v3678_v60 }
 0xef6   :  { %v4532_v48 = vpop.xlane.xlu0 %4531  ;;  %v4827_v40 = vsel %vm1032_vm7, %v4826_v63, %v4825_v23  ;;  %v4737_v16 = vunpack.c.l.b16 %v3679_v8  ;;  %v4738_v26 = vunpack.c.l.b16 %v3680_v39  ;;  %v4739_v22 = vrot.slane %v4732_v21, 7 }
 0xef7   :  { %v4829_v25 = vsel %vm1035_vm8, %v4828_v20, %v4827_v40  ;;  %v13133_v55 = vunpack.c.l.b16 %v11489_v50  ;;  %v4743_v29 = vrot.slane %v4734_v51, 5  ;;  %v4745_v4 = vrot.slane %v4735_v52, 4 }
 0xef8   :  { %v4830_v42 = vpack.c.b16 %v4829_v25, %v4829_v25  ;;  %v4747_v11 = vrot.slane %v4736_v37, 3  ;;  %v4749_v63 = vrot.slane %v4737_v16, 2  ;;  %v4751_v57 = vrot.slane %v4738_v26, 1 }
 0xef9   :  { %v4741_v59 = vrot.slane %v13133_v55, 6  ;;  %v13134_v27 = vunpack.c.l.b16 %v11483_v0  ;;  %9401 = vrcp.f32 %v4532_v48  ;;  %v3602_v46 = vrot.slane %v11416_v34, 2 }
 0xefa   :  { %v4535_v49 = vpop.xlane.xlu0 %4534  ;;  %v4835_v13 = vsel %vm1900_vm10, %v4830_v42, 0  ;;  %v3604_v50 = vrot.slane %v11419_v12, 2  ;;  %v3605_v1 = vrot.slane %v11409_v58, 2  ;;  %v3606_v0 = vrot.slane %v11434_v56, 2 }
 0xefb   :  { %v4740_v20 = vsel %vm1017_vm2, %v4739_v22, %v13134_v27  ;;  %9019 = vmatpush3.bf16.msra.mxu1 %v4835_v13  ;;  %9403 = vrcp.f32 %v4535_v49  ;;  %v3607_v32 = vrot.slane %v11412_v15, 2  ;;  %v3608_v30 = vrot.slane %v11452_v28, 2 }
 0xefc   :  { %v4742_v2 = vsel %vm1020_vm3, %v4741_v59, %v4740_v20  ;;  %9030 = vmatprep.subr.bf16.mxu1 %v12996_v35  ;;  %v3698_v8 = vpack.c.bf16 %v3602_v46, %v3602_v46  ;;  %v3700_v39 = vpack.c.bf16 %v3604_v50, %v3604_v50  ;;  %v3701_v40 = vpack.c.bf16 %v3605_v1, %v3605_v1 }
 0xefd   :  { %v4744_v38 = vsel %vm1023_vm4, %v4743_v29, %v4742_v2  ;;  %v3702_v21 = vpack.c.bf16 %v3606_v0, %v3606_v0  ;;  %v3703_v52 = vpack.c.bf16 %v3607_v32, %v3607_v32  ;;  %v3704_v25 = vpack.c.bf16 %v3608_v30, %v3608_v30 }
 0xefe   :  { %v4746_v23 = vsel %vm1026_vm5, %v4745_v4, %v4744_v38  ;;  %v4538_v60 = vpop.xlane.xlu0 %4537  ;;  %v4963_v37 = vunpack.c.l.b16 %v3698_v8  ;;  %v4965_v42 = vunpack.c.l.b16 %v3700_v39  ;;  %v4966_v22 = vunpack.c.l.b16 %v3701_v40 }
 0xeff   :  { %v4529_v9 = vpop.xlane.xlu1 %4528  ;;  %v4748_v48 = vsel %vm1029_vm6, %v4747_v11, %v4746_v23  ;;  %v4967_v55 = vunpack.c.l.b16 %v3702_v21  ;;  %v4968_v4 = vunpack.c.l.b16 %v3703_v52  ;;  %v4969_v49 = vunpack.c.l.b16 %v3704_v25 }
 0xf00   :  { %9405 = vrcp.f32 %v4529_v9  ;;  %v4750_v51 = vsel %vm1032_vm7, %v4749_v63, %v4748_v48  ;;  %v4970_v11 = vrot.slane %v4963_v37, 7  ;;  %v13135_v13 = vunpack.c.l.b16 %v11428_v19 }
 0xf01   :  { %9407 = vrcp.f32 %v4538_v60  ;;  %v4752_v16 = vsel %vm1035_vm8, %v4751_v57, %v4750_v51  ;;  %v4974_v63 = vrot.slane %v4965_v42, 5  ;;  %v4976_v46 = vrot.slane %v4966_v22, 4 }
 0xf02   :  { %v4753_v59 = vpack.c.b16 %v4752_v16, %v4752_v16  ;;  %v4544_v29 = vpop.xlane.xlu0 %4543  ;;  %v4972_v27 = vrot.slane %v13135_v13, 6  ;;  %v4978_v2 = vrot.slane %v4967_v55, 3  ;;  %v4980_v57 = vrot.slane %v4968_v4, 2 }
 0xf03   :  { %v4541_v26 = vpop.xlane.xlu1 %4540  ;;  %v13136_v50 = vunpack.c.l.b16 %v11426_v36  ;;  %v4982_v38 = vrot.slane %v4969_v49, 1  ;;  %v3594_v9 = vrot.slane %v11478_v43, 2  ;;  %v3596_v0 = vrot.slane %v11481_v6, 2 }
 0xf04   :  { %9409 = vrcp.f32 %v4541_v26  ;;  %v4758_v20 = vsel %vm1900_vm10, %v4753_v59, 0  ;;  %v3597_v19 = vrot.slane %v11470_v24, 2  ;;  %v3598_v30 = vrot.slane %v11487_v33, 2 }
 0xf05   :  { %9411 = vrcp.f32 %v4544_v29  ;;  %9013 = vmatpush3.bf16.msra.mxu0 %v4758_v20  ;;  %v4971_v1 = vsel %vm1017_vm2, %v4970_v11, %v13136_v50  ;;  %v3599_v23 = vrot.slane %v11473_v31, 2  ;;  %v3600_v36 = vrot.slane %v11509_v18, 2 }
 0xf06   :  { %v4973_v32 = vsel %vm1020_vm3, %v4972_v27, %v4971_v1  ;;  %9024 = vmatprep.subr.bf16.mxu0 %v12996_v35  ;;  %v3690_v8 = vpack.c.bf16 %v3594_v9, %v3594_v9  ;;  %v3692_v39 = vpack.c.bf16 %v3596_v0, %v3596_v0  ;;  %v9402_v48 = vpop.eup %9401  ;;  %v3693_v21 = vpack.c.bf16 %v3597_v19, %v3597_v19 }
 0xf07   :  { %v4975_v60 = vsel %vm1023_vm4, %v4974_v63, %v4973_v32  ;;  %v3694_v51 = vpack.c.bf16 %v3598_v30, %v3598_v30  ;;  %v3695_v52 = vpack.c.bf16 %v3599_v23, %v3599_v23  ;;  %v4556_v37 = vmul.f32 %v9402_v48, %v11370_v44 }
 0xf08   :  { %v4977_v40 = vsel %vm1026_vm5, %v4976_v46, %v4975_v60  ;;  %v11608_v25 = vpop.eup %9403  ;;  %v3696_v26 = vpack.c.bf16 %v3600_v36, %v3600_v36  ;;  %v4886_v42 = vunpack.c.l.b16 %v3690_v8  ;;  %v4888_v55 = vunpack.c.l.b16 %v3692_v39 }
 0xf09   :  { %v4979_v16 = vsel %vm1029_vm6, %v4978_v2, %v4977_v40  ;;  %v4889_v59 = vunpack.c.l.b16 %v3693_v21  ;;  %v4890_v29 = vunpack.c.l.b16 %v3694_v51  ;;  %v4564_v49 = vpack.c.bf16 %v4556_v37, %v4556_v37 }
 0xf0a   :  { %v4981_v22 = vsel %vm1032_vm7, %v4980_v57, %v4979_v16  ;;  %v4891_v13 = vunpack.c.l.b16 %v3695_v52  ;;  %v4892_v27 = vunpack.c.l.b16 %v3696_v26  ;;  %v4893_v44 = vrot.slane %v4886_v42, 7 }
 0xf0b   :  { %v4983_v11 = vsel %vm1035_vm8, %v4982_v38, %v4981_v22  ;;  %v13137_v2 = vunpack.c.l.b16 %v11493_v10  ;;  %9021 = vmatmul.mubr.msk.bf16.vlgmr.msra.gmra.mxu1 %vm1053_vm9, %v4564_v49  ;;  %v4897_v57 = vrot.slane %v4888_v55, 5  ;;  %v4899_v1 = vrot.slane %v4889_v59, 4 }
 0xf0c   :  { %v4984_v20 = vpack.c.b16 %v4983_v11, %v4983_v11  ;;  %v4901_v9 = vrot.slane %v4890_v29, 3  ;;  %v4903_v0 = vrot.slane %v4891_v13, 2  ;;  %v13138_v38 = vunpack.c.l.b16 %v11491_v14  ;;  %9032 = vmatprep.mubr.msk.bf16.mxu1 %vm9501_vm1, %v12996_v35 }
 0xf0d   :  { %v9406_v4 = vpop.eup %9405  ;;  %v4895_v50 = vrot.slane %v13137_v2, 6  ;;  %v4905_v23 = vrot.slane %v4892_v27, 1  ;;  %v3634_v36 = vrot.slane %v11416_v34, 3  ;;  %v3636_v8 = vrot.slane %v11419_v12, 3 }
 0xf0e   :  { %v9408_v63 = vpop.eup %9407  ;;  %v4555_v46 = vmul.f32 %v9406_v4, %v11376_v47  ;;  %v4989_v32 = vsel %vm1900_vm10, %v4984_v20, 0  ;;  %v4894_v30 = vsel %vm1017_vm2, %v4893_v44, %v13138_v38  ;;  %v3637_v48 = vrot.slane %v11409_v58, 3 }
 0xf0f   :  { %9031 = vmatpush3.bf16.msra.mxu1 %v4989_v32  ;;  %v4896_v10 = vsel %vm1020_vm3, %v4895_v50, %v4894_v30  ;;  %v4558_v60 = vmul.f32 %v9408_v63, %v11380_v54  ;;  %v3638_v40 = vrot.slane %v11434_v56, 3  ;;  %v3639_v21 = vrot.slane %v11412_v15, 3 }
 0xf10   :  { %v4563_v19 = vpack.c.bf16 %v4555_v46, %v4555_v46  ;;  %v4898_v14 = vsel %vm1023_vm4, %v4897_v57, %v4896_v10  ;;  %9042 = vmatprep.subr.bf16.mxu1 %v12996_v35  ;;  %v3640_v34 = vrot.slane %v11452_v28, 3  ;;  %v3714_v12 = vpack.c.bf16 %v3634_v36, %v3634_v36 }
 0xf11   :  { %v11624_v47 = vpop.eup %9409  ;;  %v4900_v54 = vsel %vm1026_vm5, %v4899_v1, %v4898_v14  ;;  %v4566_v51 = vpack.c.bf16 %v4558_v60, %v4558_v60  ;;  %v3716_v37 = vpack.c.bf16 %v3636_v8, %v3636_v8  ;;  %v3717_v16 = vpack.c.bf16 %v3637_v48, %v3637_v48 }
 0xf12   :  { %v11630_v39 = vpop.eup %9411  ;;  %9015 = vmatmul.mubr.msk.bf16.vlgmr.msra.gmra.mxu0 %vm1053_vm9, %v4563_v19  ;;  %v4902_v52 = vsel %vm1029_vm6, %v4901_v9, %v4900_v54  ;;  %v3718_v26 = vpack.c.bf16 %v3638_v40, %v3638_v40  ;;  %v3719_v42 = vpack.c.bf16 %v3639_v21, %v3639_v21  ;;  %v3720_v56 = vpack.c.bf16 %v3640_v34, %v3640_v34 }
 0xf13   :  { %9026 = vmatprep.mubr.msk.bf16.mxu0 %vm9501_vm1, %v12996_v35  ;;  %v4904_v58 = vsel %vm1032_vm7, %v4903_v0, %v4902_v52  ;;  %v5117_v22 = vunpack.c.l.b16 %v3714_v12  ;;  %v5119_v55 = vunpack.c.l.b16 %v3716_v37  ;;  %v5120_v59 = vunpack.c.l.b16 %v3717_v16  ;;  %9033 = vmatmul.mubr.msk.bf16.vlgmr.msra.gmra.mxu1 %vm1053_vm9, %v4566_v51 }
 0xf14   :  { %v4906_v15 = vsel %vm1035_vm8, %v4905_v23, %v4904_v58  ;;  %v5121_v29 = vunpack.c.l.b16 %v3718_v26  ;;  %v5122_v4 = vunpack.c.l.b16 %v3719_v42  ;;  %v5123_v49 = vunpack.c.l.b16 %v3720_v56  ;;  %9044 = vmatprep.mubr.msk.bf16.mxu1 %vm9501_vm1, %v12996_v35 }
 0xf15   :  { %v4907_v28 = vpack.c.b16 %v4906_v15, %v4906_v15  ;;  %v5124_v11 = vrot.slane %v5117_v22, 7  ;;  %v13139_v13 = vunpack.c.l.b16 %v11436_v17  ;;  %v5128_v63 = vrot.slane %v5119_v55, 5 }
 0xf16   :  { %v5130_v20 = vrot.slane %v5120_v59, 4  ;;  %v5132_v46 = vrot.slane %v5121_v29, 3  ;;  %v13140_v2 = vunpack.c.l.b16 %v11430_v3  ;;  %v5134_v57 = vrot.slane %v5122_v4, 2 }
 0xf17   :  { %v5126_v27 = vrot.slane %v13139_v13, 6  ;;  %v4912_v44 = vsel %vm1900_vm10, %v4907_v28, 0  ;;  %v5136_v1 = vrot.slane %v5123_v49, 1  ;;  %v4557_v17 = vmul.f32 %v11608_v25, %v11374_v41 }
 0xf18   :  { %v5125_v50 = vsel %vm1017_vm2, %v5124_v11, %v13140_v2  ;;  %9025 = vmatpush3.bf16.msra.mxu0 %v4912_v44  ;;  %v3626_v0 = vrot.slane %v11478_v43, 3  ;;  %v3628_v32 = vrot.slane %v11481_v6, 3  ;;  %v3629_v3 = vrot.slane %v11470_v24, 3 }
 0xf19   :  { %v5127_v9 = vsel %vm1020_vm3, %v5126_v27, %v5125_v50  ;;  %9036 = vmatprep.subr.bf16.mxu0 %v12996_v35  ;;  %v3630_v38 = vrot.slane %v11487_v33, 3  ;;  %v3631_v30 = vrot.slane %v11473_v31, 3  ;;  %v4565_v10 = vpack.c.bf16 %v4557_v17, %v4557_v17 }
 0xf1a   :  { %v5129_v19 = vsel %vm1023_vm4, %v5128_v63, %v5127_v9  ;;  %v3632_v60 = vrot.slane %v11509_v18, 3  ;;  %v3706_v41 = vpack.c.bf16 %v3626_v0, %v3626_v0  ;;  %v3708_v25 = vpack.c.bf16 %v3628_v32, %v3628_v32 }
 0xf1b   :  { %v5131_v23 = vsel %vm1026_vm5, %v5130_v20, %v5129_v19  ;;  %v3709_v6 = vpack.c.bf16 %v3629_v3, %v3629_v3  ;;  %v3710_v36 = vpack.c.bf16 %v3630_v38, %v3630_v38  ;;  %9027 = vmatmul.mubr.msk.bf16.vlgmr.msra.gmra.mxu0 %vm1053_vm9, %v4565_v10  ;;  %v3711_v24 = vpack.c.bf16 %v3631_v30, %v3631_v30  ;;  %v9309_v3 = vld [vmem:[%s12859_s3 + $0x18] sm:$0xff]  }
 0xf1c   :  { %v5133_v43 = vsel %vm1029_vm6, %v5132_v46, %v5131_v23  ;;  %v3712_v14 = vpack.c.bf16 %v3632_v60, %v3632_v60  ;;  %v5040_v33 = vunpack.c.l.b16 %v3706_v41  ;;  %v5042_v48 = vunpack.c.l.b16 %v3708_v25  ;;  %9038 = vmatprep.mubr.msk.bf16.mxu0 %vm9501_vm1, %v12996_v35 }
 0xf1d   :  { %v5135_v8 = vsel %vm1032_vm7, %v5134_v57, %v5133_v43  ;;  %v5043_v40 = vunpack.c.l.b16 %v3709_v6  ;;  %v5039_v18 = vunpack.c.l.b16 %v11495_v53  ;;  %v5044_v54 = vunpack.c.l.b16 %v3710_v36 }
 0xf1e   :  { %v5137_v31 = vsel %vm1035_vm8, %v5136_v1, %v5135_v8  ;;  %v5047_v51 = vrot.slane %v5040_v33, 7  ;;  %v5045_v34 = vunpack.c.l.b16 %v3711_v24  ;;  %v13141_v12 = vunpack.c.l.b16 %v11497_v7  ;;  %v9310_v24 = vld [vmem:[%s12859_s3 + $0x10] sm:$0xff]  }
 0xf1f   :  { %v5138_v21 = vpack.c.b16 %v5137_v31, %v5137_v31  ;;  %v5046_v16 = vunpack.c.l.b16 %v3712_v14  ;;  %v5051_v58 = vrot.slane %v5042_v48, 5  ;;  %v5053_v56 = vrot.slane %v5043_v40, 4 }
 0xf20   :  { %v5049_v52 = vrot.slane %v13141_v12, 6  ;;  %v5048_v26 = vsel %vm1017_vm2, %v5047_v51, %v5039_v18  ;;  %v4560_v53 = vmul.f32 %v11630_v39, %v11388_v62  ;;  %v5055_v15 = vrot.slane %v5044_v54, 3 }
 0xf21   :  { %v5143_v37 = vsel %vm1900_vm10, %v5138_v21, 0  ;;  %v5057_v55 = vrot.slane %v5045_v34, 2  ;;  %v5059_v28 = vrot.slane %v5046_v16, 1  ;;  %v4559_v39 = vmul.f32 %v11624_v47, %v11384_v61 }
 0xf22   :  { %9043 = vmatpush3.bf16.msra.mxu1 %v5143_v37  ;;  %v5050_v42 = vsel %vm1020_vm3, %v5049_v52, %v5048_v26  ;;  %v4568_v59 = vpack.c.bf16 %v4560_v53, %v4560_v53 }
 0xf23   :  { %v5052_v22 = vsel %vm1023_vm4, %v5051_v58, %v5050_v42  ;;  %9056 = vmatprep.subr.bf16.mxu1 %v12996_v35  ;;  %v4567_v13 = vpack.c.bf16 %v4559_v39, %v4559_v39 }
 0xf24   :  { %v5054_v7 = vsel %vm1026_vm5, %v5053_v56, %v5052_v22 }
 0xf25   :  { %v5056_v29 = vsel %vm1029_vm6, %v5055_v15, %v5054_v7  ;;  %9045 = vmatmul.mubr.msk.bf16.vlgmr.msra.gmra.mxu1 %vm1053_vm9, %v4568_v59 }
 0xf26   :  { %v5058_v4 = vsel %vm1032_vm7, %v5057_v55, %v5056_v29  ;;  %9060 = vmatprep.mubr.msk.bf16.mxu1 %vm9501_vm1, %v12996_v35  ;;  %v11719_v29 = vld [vmem:[%s12862_s6 + $0x8] sm:$0xff] }
 0xf27   :  { %v5060_v49 = vsel %vm1035_vm8, %v5059_v28, %v5058_v4  ;;  %v13143_v28 = vld [vmem:[#allocation7_spill] sm:$0xff] }
 0xf28   :  { %v5061_v62 = vpack.c.b16 %v5060_v49, %v5060_v49  ;;  %v5224_v4 = vrot.slane %v11719_v29, %v13143_v28 }
 0xf2a   :  { %v5066_v11 = vsel %vm1900_vm10, %v5061_v62, 0 }
 0xf2b   :  { %9037 = vmatpush3.bf16.msra.mxu0 %v5066_v11  ;;  %v13144_v11 = vld [vmem:[#allocation18_spill] sm:$0xff] }
 0xf2c   :  { %9048 = vmatprep.subr.bf16.mxu0 %v12996_v35 }
 0xf2e   :  { %9039 = vmatmul.mubr.msk.bf16.vlgmr.msra.gmra.mxu0 %vm1053_vm9, %v4567_v13 }
 0xf2f   :  { %9052 = vmatprep.mubr.msk.bf16.mxu0 %vm9501_vm1, %v12996_v35  ;;  %9049 = vmatpush3.bf16.msra.mxu0 %v9309_v3 }
 0xf30   :  { %9050 = vmatprep.subr.bf16.mxu0 %v12996_v35 }
 0xf33   :  { %9051 = vmatpush3.bf16.msra.mxu0 %v9310_v24 }
 0xf34   :  { %9064 = vmatprep.subr.bf16.mxu0 %v12996_v35 }
 0xfad   :  { %v4717_v27 = vpop.f32.mrf.mxu1 }
 0xfaf   :  { %v9010_v63 = vpop.f32.mrf.mxu1 }
 0xfb1   :  { %v4720_v20 = vpop.f32.mrf.mxu1 }
 0xfb3   :  { %v9011_v46 = vpop.f32.mrf.mxu1 }
 0xfb4   :  { %v4640_v44 = vpop.f32.mrf.mxu0 }
 0xfb6   :  { %v9004_v2 = vpop.f32.mrf.mxu0 }
 0xfb8   :  { %v4643_v50 = vpop.f32.mrf.mxu0 }
 0xfba   :  { %v9005_v57 = vpop.f32.mrf.mxu0 }
 0xfcb   :  { %v4871_v61 = vpop.f32.mrf.mxu1 }
 0xfcd   :  { %v9022_v47 = vpop.f32.mrf.mxu1 }
 0xfcf   :  { %v4874_v17 = vpop.f32.mrf.mxu1 }
 0xfd1   :  { %v9023_v32 = vpop.f32.mrf.mxu1 }
 0xfd2   :  { %v4794_v1 = vpop.f32.mrf.mxu0 }
 0xfd3   :  { %v9267_v9 = vpack.i.bf16 %v4871_v61, %v4794_v1  ;;  %v5025_v38 = vpop.f32.mrf.mxu1 }
 0xfd4   :  { %v9016_v0 = vpop.f32.mrf.mxu0 }
 0xfd5   :  { %9268 = vrot.lane.b32.xlu1 %v9267_v9, %s9516_s18  ;;  %v9034_v23 = vpop.f32.mrf.mxu1 }
 0xfd6   :  { %v4797_v19 = vpop.f32.mrf.mxu0 }
 0xfd7   :  { %v5028_v10 = vpop.f32.mrf.mxu1 }
 0xfd8   :  { %v9017_v30 = vpop.f32.mrf.mxu0 }
 0xfd9   :  { %v9035_v60 = vpop.f32.mrf.mxu1  ;;  %v9312_v30 = vld [vmem:[%s12860_s4 + $0x10] sm:$0xff]  }
 0xfdb   :  { %v4948_v41 = vpop.f32.mrf.mxu0 }
 0xfdc   :  { %v9272_v43 = vpack.i.bf16 %v5025_v38, %v4948_v41  ;;  %v9311_v38 = vld [vmem:[%s12860_s4 + $0x18] sm:$0xff]  }
 0xfdd   :  { %v9028_v25 = vpop.f32.mrf.mxu0  ;;  %9057 = vmatpush3.bf16.msra.mxu1 %v9311_v38 }
 0xfde   :  { %9273 = vrot.lane.b32.xlu0 %v9272_v43, %s12938_s19  ;;  %9058 = vmatprep.subr.bf16.mxu1 %v12996_v35 }
 0xfdf   :  { %v4951_v6 = vpop.f32.mrf.mxu0 }
 0xfe1   :  { %v9029_v36 = vpop.f32.mrf.mxu0  ;;  %9059 = vmatpush3.bf16.msra.mxu1 %v9312_v30 }
 0xfe2   :  { %9076 = vmatprep.subr.bf16.mxu1 %v12996_v35 }
 0xfe5   :  { %v5179_v8 = vpop.f32.mrf.mxu1 }
 0xfe7   :  { %v9046_v14 = vpop.f32.mrf.mxu1 }
 0xfe9   :  { %v5182_v33 = vpop.f32.mrf.mxu1 }
 0xfeb   :  { %v9047_v31 = vpop.f32.mrf.mxu1 }
 0xfee   :  { %v5102_v48 = vpop.f32.mrf.mxu0 }
 0xfef   :  { %v9277_v40 = vpack.i.bf16 %v5179_v8, %v5102_v48  ;;  %v13146_v8 = vld [vmem:[#allocation17_spill] sm:$0xff]  ;;  %v13147_v48 = vld [vmem:[#allocation14_spill] sm:$0xff] }
 0xff0   :  { %v9040_v18 = vpop.f32.mrf.mxu0  ;;  %v5312_v24 = vrot.slane %v11719_v29, %v13146_v8 }
 0xff1   :  { %9278 = vrot.lane.b32.xlu1 %v9277_v40, %s13142_s23  ;;  %v5318_v40 = vrot.slane %v11719_v29, %v13147_v48 }
 0xff2   :  { %v5105_v21 = vpop.f32.mrf.mxu0 }
 0xff4   :  { %v9041_v54 = vpop.f32.mrf.mxu0 }
0x1047   :  { %v9269_v51 = vpop.permute.xlu1 %9268 }
0x1048   :  { %v9271_v12 = vunpack.i.h.bf16 %v9269_v51  ;;  %v9270_v52 = vunpack.i.l.bf16 %v9269_v51 }
0x104a   :  { %v5210_v58 = vsel %vm1053_vm9, %v4717_v27, %v9271_v12  ;;  %v5209_v42 = vsel %vm1053_vm9, %v4640_v44, %v9270_v52  ;;  %v13145_v44 = vld [vmem:[#allocation26_spill] sm:$0xff] }
0x104b   :  { %v9314_v12 = vld [vmem:[%s12861_s5 + $0x30] sm:$0xff]   ;;  %v9315_v52 = vld [vmem:[%s12861_s5 + $0x28] sm:$0xff]  }
0x1050   :  { %v9274_v34 = vpop.permute.xlu0 %9273 }
0x1051   :  { %v9276_v37 = vunpack.i.h.bf16 %v9274_v34  ;;  %v9275_v16 = vunpack.i.l.bf16 %v9274_v34  ;;  %v9313_v34 = vld [vmem:[%s12861_s5 + $0x38] sm:$0xff]  }
0x1053   :  { %v5212_v22 = vsel %vm2509_vm11, %v5210_v58, %v9276_v37  ;;  %v5211_v15 = vsel %vm2509_vm11, %v5209_v42, %v9275_v16  ;;  %v9316_v37 = vld [vmem:[%s12861_s5 + $0x20] sm:$0xff]   ;;  %v13148_v16 = vld [vmem:[#allocation15_spill] sm:$0xff] }
0x1063   :  { %v9279_v26 = vpop.permute.xlu1 %9278 }
0x1064   :  { %v9281_v56 = vunpack.i.h.bf16 %v9279_v26  ;;  %v9280_v53 = vunpack.i.l.bf16 %v9279_v26  ;;  %v5330_v26 = vrot.slane %v11719_v29, %v13148_v16 }
0x1066   :  { %v5214_v7 = vsel %vm2512_vm12, %v5212_v22, %v9281_v56  ;;  %v5213_v55 = vsel %vm2512_vm12, %v5211_v15, %v9280_v53 }
0x1067   :  { %v5220_v59 = vpack.c.bf16 %v5214_v7, %v5213_v55 }
0x1069   :  { %9053 = vmatmul.mubr.msk.bf16.vlgmr.msra.gmra.mxu0 %vm66_vm0, %v5220_v59 }
0x106a   :  { %9072 = vmatprep.mubr.msk.bf16.mxu0 %vm9501_vm1, %v12996_v35  ;;  %9065 = vmatpush3.bf16.msra.mxu0 %v9313_v34 }
0x106b   :  { %9066 = vmatprep.subr.bf16.mxu0 %v12996_v35 }
0x106e   :  { %9067 = vmatpush3.bf16.msra.mxu0 %v9314_v12 }
0x106f   :  { %9068 = vmatprep.subr.bf16.mxu0 %v12996_v35 }
0x1072   :  { %9069 = vmatpush3.bf16.msra.mxu0 %v9315_v52 }
0x1073   :  { %9070 = vmatprep.subr.bf16.mxu0 %v12996_v35 }
0x1076   :  { %9071 = vmatpush3.bf16.msra.mxu0 %v9316_v37 }
0x1077   :  { %9090 = vmatprep.subr.bf16.mxu0 %v12996_v35 }
0x1129   :  { %v5274_v49 = vpop.f32.mrf.mxu0 }
0x112a   :  { %v5275_v62 = vadd.f32 %v5274_v49, %v5224_v4 }
0x112b   :  { %v9054_v39 = vpop.f32.mrf.mxu0 }
0x112c   :  { %v5281_v13 = vadd.f32 %v5275_v62, %v13144_v11 }
0x112d   :  { %v5277_v27 = vpop.f32.mrf.mxu0 }
0x112e   :  { %v5278_v63 = vadd.f32 %v5277_v27, %v5224_v4  ;;  %v5283_v20 = vsel %vm66_vm0, %v5281_v13, 0.0 }
0x112f   :  { %5284 = vadd.xlane.f32.xlu1 %v5283_v20  ;;  %v9055_v46 = vpop.f32.mrf.mxu0 }
0x1130   :  { %v5282_v2 = vadd.f32 %v5278_v63, %v13145_v44 }
0x1132   :  { %v5286_v50 = vsel %vm66_vm0, %v5282_v2, 0.0 }
0x1133   :  { %5287 = vadd.xlane.f32.xlu0 %v5286_v50 }
0x11b8   :  { %v5285_v57 = vpop.xlane.xlu1 %5284 }
0x11b9   :  { %v5289_v61 = vmul.f32 0.03125, %v5285_v57 }
0x11bb   :  { %v5291_v47 = vsub.f32 %v5281_v13, %v5289_v61 }
0x11bc   :  { %v5288_v1 = vpop.xlane.xlu0 %5287 }
0x11bd   :  { %v5290_v9 = vmul.f32 0.03125, %v5288_v1  ;;  %v5293_v17 = vmul.f32 %v5291_v47, %v5291_v47  ;;  %v13149_v1 = vld [vmem:[#allocation30_spill] sm:$0xff] }
0x11bf   :  { %v5292_v0 = vsub.f32 %v5282_v2, %v5290_v9  ;;  %v5295_v32 = vsel %vm66_vm0, %v5293_v17, 0.0  ;;  %v5418_v9 = vrot.slane %v11719_v29, %v13149_v1 }
0x11c0   :  { %5296 = vadd.xlane.f32.xlu0 %v5295_v32 }
0x11c1   :  { %v5294_v19 = vmul.f32 %v5292_v0, %v5292_v0 }
0x11c3   :  { %v5298_v3 = vsel %vm66_vm0, %v5294_v19, 0.0 }
0x11c4   :  { %5299 = vadd.xlane.f32.xlu1 %v5298_v3 }
0x1249   :  { %v5297_v23 = vpop.xlane.xlu0 %5296 }
0x124a   :  { %v5301_v10 = vmul.f32 0.03125, %v5297_v23 }
0x124c   :  { %v5303_v60 = vadd.f32 1e-12, %v5301_v10 }
0x124d   :  { %v5300_v41 = vpop.xlane.xlu1 %5299 }
0x124e   :  { %9413 = vrsqrt.f32 %v5303_v60  ;;  %v5302_v43 = vmul.f32 0.03125, %v5300_v41 }
0x1250   :  { %v5304_v25 = vadd.f32 1e-12, %v5302_v43 }
0x1252   :  { %9415 = vrsqrt.f32 %v5304_v25 }
0x125b   :  { %v9414_v6 = vpop.eup %9413 }
0x125c   :  { %v5307_v36 = vmul.f32 %v9414_v6, %v5291_v47 }
0x125e   :  { %v5313_v31 = vmul.f32 %v5312_v24, %v5307_v36 }
0x125f   :  { %v9416_v14 = vpop.eup %9415 }
0x1260   :  { %v5308_v33 = vmul.f32 %v9416_v14, %v5292_v0  ;;  %v5319_v21 = vadd.f32 %v5318_v40, %v5313_v31 }
0x1262   :  { %v5314_v18 = vmul.f32 %v5312_v24, %v5308_v33 }
0x1264   :  { %v5320_v54 = vadd.f32 %v5318_v40, %v5314_v18  ;;  %v9317_v18 = vld [vmem:[%s12858_s2 + $0x28] sm:$0xff]  }
0x1266   :  { %v5326_v51 = vpack.c.bf16 %v5320_v54, %v5319_v21 }
0x1268   :  { %9061 = vmatmul.mubr.msk.bf16.vlgmr.msra.gmra.mxu1 %vm66_vm0, %v5326_v51 }
0x1269   :  { %9080 = vmatprep.mubr.msk.bf16.mxu1 %vm9501_vm1, %v12996_v35  ;;  %9077 = vmatpush3.bf16.msra.mxu1 %v9317_v18 }
0x126a   :  { %9078 = vmatprep.subr.bf16.mxu1 %v12996_v35 }
0x1328   :  { %v5380_v58 = vpop.f32.mrf.mxu1 }
0x1329   :  { %v5381_v42 = vadd.f32 %v5380_v58, %v5330_v26 }
0x132a   :  { %v9062_v56 = vpop.f32.mrf.mxu1 }
0x132b   :  { %v5387_v53 = vmul.f32 %v5381_v42, %v5381_v42 }
0x132c   :  { %v5383_v22 = vpop.f32.mrf.mxu1 }
0x132d   :  { %v5389_v15 = vmul.f32 %v5387_v53, %v5381_v42  ;;  %v5384_v7 = vadd.f32 %v5383_v22, %v5330_v26 }
0x132e   :  { %v9063_v55 = vpop.f32.mrf.mxu1 }
0x132f   :  { %v5391_v59 = vmul.f32 0.044715, %v5389_v15  ;;  %v5388_v4 = vmul.f32 %v5384_v7, %v5384_v7 }
0x1331   :  { %v5393_v49 = vadd.f32 %v5391_v59, %v5381_v42  ;;  %v5390_v62 = vmul.f32 %v5388_v4, %v5384_v7 }
0x1333   :  { %v5395_v39 = vmul.f32 0.7978846, %v5393_v49  ;;  %v5392_v11 = vmul.f32 0.044715, %v5390_v62 }
0x1335   :  { %9417 = vtanh.f32 %v5395_v39  ;;  %v5394_v13 = vadd.f32 %v5392_v11, %v5384_v7  ;;  %v8601_v39 = vld [vmem:[%s12862_s6 + $0x10] sm:$0xff] }
0x1336   :  { %v13154_v11 = vld [vmem:[#allocation6_spill] sm:$0xff] }
0x1337   :  { %v5396_v27 = vmul.f32 0.7978846, %v5394_v13  ;;  %v5538_v13 = vrot.slane %v8601_v39, %v13154_v11 }
0x1339   :  { %9419 = vtanh.f32 %v5396_v27 }
0x1342   :  { %v9418_v63 = vpop.eup %9417 }
0x1343   :  { %v5399_v20 = vadd.f32 1.0, %v9418_v63 }
0x1345   :  { %v5401_v44 = vmul.f32 0.5, %v5399_v20 }
0x1346   :  { %v9420_v46 = vpop.eup %9419 }
0x1347   :  { %v5400_v2 = vadd.f32 1.0, %v9420_v46  ;;  %v5403_v57 = vmul.f32 %v5401_v44, %v5381_v42  ;;  %v13150_v42 = vld [vmem:[#allocation25_spill] sm:$0xff] }
0x1348   :  { %v5518_v56 = vrot.slane %v11719_v29, %v13150_v42 }
0x1349   :  { %v5402_v50 = vmul.f32 0.5, %v5400_v2 }
0x134b   :  { %v5404_v61 = vmul.f32 %v5402_v50, %v5384_v7  ;;  %v13151_v7 = vld [vmem:[#allocation19_spill] sm:$0xff] }
0x134c   :  { %v5524_v55 = vrot.slane %v11719_v29, %v13151_v7 }
0x134d   :  { %v5414_v47 = vpack.c.bf16 %v5404_v61, %v5403_v57 }
0x134f   :  { %9073 = vmatmul.mubr.msk.bf16.vlgmr.msra.gmra.mxu0 %vm2740_vm13, %v5414_v47 }
0x1350   :  { %9092 = vmatprep.mubr.msk.bf16.mxu0 %vm9501_vm1, %v12996_v35 }
0x140f   :  { %v5480_v17 = vpop.f32.mrf.mxu0 }
0x1410   :  { %v5481_v0 = vadd.f32 %v5480_v17, %v5418_v9 }
0x1411   :  { %v9074_v32 = vpop.f32.mrf.mxu0 }
0x1412   :  { %v5487_v19 = vadd.f32 %v5481_v0, %v5319_v21  ;;  %v9318_v21 = vld [vmem:[%s12858_s2 + $0x20] sm:$0xff]  }
0x1413   :  { %v5483_v3 = vpop.f32.mrf.mxu0  ;;  %9079 = vmatpush3.bf16.msra.mxu1 %v9318_v21 }
0x1414   :  { %v5484_v38 = vadd.f32 %v5483_v3, %v5418_v9  ;;  %v5489_v30 = vsel %vm66_vm0, %v5487_v19, 0.0  ;;  %9084 = vmatprep.subr.bf16.mxu1 %v12996_v35 }
0x1415   :  { %5490 = vadd.xlane.f32.xlu0 %v5489_v30  ;;  %v9075_v23 = vpop.f32.mrf.mxu0 }
0x1416   :  { %v5488_v10 = vadd.f32 %v5484_v38, %v5320_v54 }
0x1418   :  { %v5492_v60 = vsel %vm66_vm0, %v5488_v10, 0.0 }
0x1419   :  { %5493 = vadd.xlane.f32.xlu1 %v5492_v60 }
0x149e   :  { %v5491_v41 = vpop.xlane.xlu0 %5490 }
0x149f   :  { %v5495_v43 = vmul.f32 0.03125, %v5491_v41 }
0x14a1   :  { %v5497_v25 = vsub.f32 %v5487_v19, %v5495_v43 }
0x14a2   :  { %v5494_v6 = vpop.xlane.xlu1 %5493 }
0x14a3   :  { %v5496_v36 = vmul.f32 0.03125, %v5494_v6  ;;  %v5499_v24 = vmul.f32 %v5497_v25, %v5497_v25 }
0x14a5   :  { %v5498_v14 = vsub.f32 %v5488_v10, %v5496_v36  ;;  %v5501_v33 = vsel %vm66_vm0, %v5499_v24, 0.0 }
0x14a6   :  { %5502 = vadd.xlane.f32.xlu0 %v5501_v33 }
0x14a7   :  { %v5500_v31 = vmul.f32 %v5498_v14, %v5498_v14 }
0x14a9   :  { %v5504_v40 = vsel %vm66_vm0, %v5500_v31, 0.0 }
0x14aa   :  { %5505 = vadd.xlane.f32.xlu1 %v5504_v40 }
0x152f   :  { %v5503_v54 = vpop.xlane.xlu0 %5502 }
0x1530   :  { %v5507_v51 = vmul.f32 0.03125, %v5503_v54 }
0x1532   :  { %v5509_v34 = vadd.f32 1e-12, %v5507_v51 }
0x1533   :  { %v5506_v12 = vpop.xlane.xlu1 %5505 }
0x1534   :  { %9421 = vrsqrt.f32 %v5509_v34  ;;  %v5508_v52 = vmul.f32 0.03125, %v5506_v12 }
0x1536   :  { %v5510_v37 = vadd.f32 1e-12, %v5508_v52 }
0x1538   :  { %9423 = vrsqrt.f32 %v5510_v37 }
0x1541   :  { %v9422_v26 = vpop.eup %9421 }
0x1542   :  { %v5513_v58 = vmul.f32 %v9422_v26, %v5497_v25 }
0x1544   :  { %v5519_v15 = vmul.f32 %v5518_v56, %v5513_v58 }
0x1545   :  { %v9424_v53 = vpop.eup %9423 }
0x1546   :  { %v5514_v22 = vmul.f32 %v9424_v53, %v5498_v14  ;;  %v11783_v4 = vadd.f32 %v5524_v55, %v5519_v15 }
0x1548   :  { %v5520_v59 = vmul.f32 %v5518_v56, %v5514_v22  ;;  %13152 = vst [vmem:[#allocation29_spill] sm:$0xff] %v11783_v4 }
0x154a   :  { %v11785_v49 = vadd.f32 %v5524_v55, %v5520_v59 }
0x154c   :  { %13153 = vst [vmem:[#allocation23_spill] sm:$0xff] %v11785_v49  ;;  %v5534_v62 = vpack.c.bf16 %v11785_v49, %v11783_v4 }
0x154e   :  { %9081 = vmatmul.mubr.msk.bf16.vlgmr.msra.gmra.mxu1 %vm66_vm0, %v5534_v62 }
0x154f   :  { %9086 = vmatprep.mubr.msk.bf16.mxu1 %vm9501_vm1, %v12996_v35 }
0x160e   :  { %v5588_v29 = vpop.f32.mrf.mxu1 }
0x160f   :  { %v11796_v27 = vadd.f32 %v5588_v29, %v5538_v13 }
0x1610   :  { %v9082_v63 = vpop.f32.mrf.mxu1 }
0x1611   :  { %13155 = vst [vmem:[#allocation28_spill] sm:$0xff] %v11796_v27  ;;  %5603 = vrot.lane.b32.xlu1 %v11796_v27, %s9502_s24  ;;  %5597 = vrot.lane.b32.xlu0 %v11796_v27, %s9503_s25 }
0x1612   :  { %v5591_v20 = vpop.f32.mrf.mxu1 }
0x1613   :  { %v11802_v46 = vadd.f32 %v5591_v20, %v5538_v13 }
0x1614   :  { %v9083_v44 = vpop.f32.mrf.mxu1 }
0x1615   :  { %13156 = vst [vmem:[#allocation10_spill] sm:$0xff] %v11802_v46  ;;  %5609 = vrot.lane.b32.xlu0 %v11796_v27, %s9504_s26  ;;  %5599 = vrot.lane.b32.xlu1 %v11802_v46, %s9503_s25 }
0x1619   :  { %5615 = vrot.lane.b32.xlu0 %v11796_v27, %s9505_s27  ;;  %5605 = vrot.lane.b32.xlu1 %v11802_v46, %s9502_s24 }
0x161d   :  { %5621 = vrot.lane.b32.xlu0 %v11796_v27, %s9506_s28  ;;  %5611 = vrot.lane.b32.xlu1 %v11802_v46, %s9504_s26  ;;  %s13231_s26 = smov 16  }
0x1621   :  { %5627 = vrot.lane.b32.xlu0 %v11796_v27, %s9507_s29  ;;  %5617 = vrot.lane.b32.xlu1 %v11802_v46, %s9505_s27 }
0x1625   :  { %5633 = vrot.lane.b32.xlu0 %v11796_v27, %s9508_s30  ;;  %5623 = vrot.lane.b32.xlu1 %v11802_v46, %s9506_s28 }
0x1629   :  { %5639 = vrot.lane.b32.xlu0 %v11796_v27, %s9509_s11  ;;  %5629 = vrot.lane.b32.xlu1 %v11802_v46, %s9507_s29 }
0x162d   :  { %5635 = vrot.lane.b32.xlu1 %v11802_v46, %s9508_s30 }
0x1631   :  { %5645 = vrot.lane.b32.xlu1 %v11796_v27, %s9510_s12 }
0x1635   :  { %5641 = vrot.lane.b32.xlu1 %v11802_v46, %s9509_s11 }
0x1639   :  { %5647 = vrot.lane.b32.xlu1 %v11802_v46, %s9510_s12 }
0x1683   :  { %v5604_v2 = vpop.permute.xlu1 %5603  ;;  %v5598_v50 = vpop.permute.xlu0 %5597 }
0x1684   :  { %v5663_v0 = vcombine.low %v11796_v27, %v5604_v2  ;;  %v5664_v30 = vcombine.high %v11796_v27, %v5604_v2 }
0x1686   :  { %v5671_v23 = vrot.slane %v5663_v0, %v13129_v45  ;;  %v5678_v24 = vrot.slane %v5664_v30, %v13129_v45 }
0x1687   :  { %v5610_v57 = vpop.permute.xlu0 %5609  ;;  %v5600_v61 = vpop.permute.xlu1 %5599 }
0x1688   :  { %v5679_v17 = vcombine.low %v5598_v50, %v5610_v57  ;;  %v5680_v3 = vcombine.high %v5598_v50, %v5610_v57 }
0x168a   :  { %v5687_v38 = vrot.slane %v5679_v17, %v13129_v45  ;;  %v5694_v43 = vrot.slane %v5680_v3, %v13129_v45 }
0x168b   :  { %v5616_v47 = vpop.permute.xlu0 %5615  ;;  %v5606_v9 = vpop.permute.xlu1 %5605 }
0x168c   :  { %v5727_v25 = vcombine.low %v5671_v23, %v5687_v38  ;;  %v5867_v6 = vcombine.low %v11802_v46, %v5606_v9  ;;  %v5728_v31 = vcombine.high %v5671_v23, %v5687_v38  ;;  %v5868_v40 = vcombine.high %v11802_v46, %v5606_v9 }
0x168d   :  { %v5743_v51 = vcombine.low %v5678_v24, %v5694_v43  ;;  %v5744_v37 = vcombine.high %v5678_v24, %v5694_v43 }
0x168e   :  { %v5735_v52 = vrot.slane %v5727_v25, %v13130_v5  ;;  %v5875_v26 = vrot.slane %v5867_v6, %v13129_v45  ;;  %v5742_v55 = vrot.slane %v5728_v31, %v13130_v5  ;;  %v5882_v59 = vrot.slane %v5868_v40, %v13129_v45 }
0x168f   :  { %v5622_v32 = vpop.permute.xlu0 %5621  ;;  %v5612_v19 = vpop.permute.xlu1 %5611 }
0x1690   :  { %v5883_v10 = vcombine.low %v5600_v61, %v5612_v19  ;;  %v5884_v36 = vcombine.high %v5600_v61, %v5612_v19  ;;  %v5758_v19 = vrot.slane %v5744_v37, %v13130_v5 }
0x1692   :  { %v5891_v18 = vrot.slane %v5883_v10, %v13129_v45  ;;  %v5898_v58 = vrot.slane %v5884_v36, %v13129_v45 }
0x1693   :  { %v5628_v60 = vpop.permute.xlu0 %5627  ;;  %v5618_v41 = vpop.permute.xlu1 %5617 }
0x1694   :  { %v5695_v14 = vcombine.low %v5616_v47, %v5628_v60  ;;  %v5696_v33 = vcombine.high %v5616_v47, %v5628_v60  ;;  %v5931_v62 = vcombine.low %v5875_v26, %v5891_v18  ;;  %v5932_v39 = vcombine.high %v5875_v26, %v5891_v18 }
0x1695   :  { %v5947_v2 = vcombine.low %v5882_v59, %v5898_v58  ;;  %v5948_v50 = vcombine.high %v5882_v59, %v5898_v58 }
0x1696   :  { %v5703_v56 = vrot.slane %v5695_v14, %v13129_v45  ;;  %v5710_v53 = vrot.slane %v5696_v33, %v13129_v45  ;;  %v11863_v3 = vrot.slane %v5931_v62, %v13130_v5  ;;  %v11866_v60 = vrot.slane %v5932_v39, %v13130_v5 }
0x1697   :  { %v5634_v21 = vpop.permute.xlu0 %5633  ;;  %v11845_v54 = vpop.permute.xlu1 %5623  ;;  %v11872_v43 = vrot.slane %v5948_v50, %v13130_v5 }
0x1698   :  { %v5711_v34 = vcombine.low %v5622_v32, %v5634_v21  ;;  %v5712_v12 = vcombine.high %v5622_v32, %v5634_v21  ;;  %v5751_v32 = vrot.slane %v5743_v51, %v13130_v5 }
0x169a   :  { %v5719_v22 = vrot.slane %v5711_v34, %v13129_v45  ;;  %v5726_v15 = vrot.slane %v5712_v12, %v13129_v45 }
0x169b   :  { %v5630_v13 = vpop.permute.xlu1 %5629 }
0x169c   :  { %v5759_v29 = vcombine.low %v5703_v56, %v5719_v22  ;;  %v5760_v63 = vcombine.high %v5703_v56, %v5719_v22  ;;  %v5775_v20 = vcombine.low %v5710_v53, %v5726_v15  ;;  %v5776_v44 = vcombine.high %v5710_v53, %v5726_v15 }
0x169d   :  { %v5899_v57 = vcombine.low %v5618_v41, %v5630_v13  ;;  %v5900_v61 = vcombine.high %v5618_v41, %v5630_v13  ;;  %v11869_v41 = vrot.slane %v5947_v2, %v13130_v5 }
0x169e   :  { %v5767_v47 = vrot.slane %v5759_v29, %v13130_v5  ;;  %v5774_v9 = vrot.slane %v5760_v63, %v13130_v5  ;;  %v5783_v17 = vrot.slane %v5775_v20, %v13130_v5  ;;  %v5790_v0 = vrot.slane %v5776_v44, %v13130_v5 }
0x169f   :  { %v11881_v24 = vrot.slane %v5899_v57, %v13129_v45  ;;  %v11884_v14 = vrot.slane %v5900_v61, %v13129_v45  ;;  %v5636_v26 = vpop.permute.xlu1 %5635 }
0x16a0   :  { %v5791_v38 = vcombine.low %v5735_v52, %v5767_v47  ;;  %v5792_v30 = vcombine.high %v5735_v52, %v5767_v47  ;;  %v5793_v23 = vcombine.low %v5742_v55, %v5774_v9  ;;  %v5794_v10 = vcombine.high %v5742_v55, %v5774_v9 }
0x16a1   :  { %v11874_v25 = vcombine.low %v5751_v32, %v5783_v17  ;;  %v11876_v6 = vcombine.high %v5751_v32, %v5783_v17  ;;  %v11878_v36 = vcombine.low %v5758_v19, %v5790_v0  ;;  %v11886_v33 = vcombine.high %v5758_v19, %v5790_v0 }
0x16a2   :  { %v6088_v31 = vrot.slane %v5792_v30, 1  ;;  %v6089_v40 = vrot.slane %v5793_v23, 1  ;;  %v6090_v18 = vrot.slane %v5794_v10, 1  ;;  %v6087_v21 = vrot.slane %v5791_v38, 1 }
0x16a3   :  { %v6119_v34 = vrot.slane %v5791_v38, 2  ;;  %v6120_v12 = vrot.slane %v5792_v30, 2  ;;  %v6121_v52 = vrot.slane %v5793_v23, 2  ;;  %v6122_v37 = vrot.slane %v5794_v10, 2 }
0x16a4   :  { %v6183_v58 = vpack.c.bf16 %v5791_v38, %v5791_v38  ;;  %v6151_v56 = vrot.slane %v5791_v38, 3  ;;  %v6184_v53 = vpack.c.bf16 %v5792_v30, %v5792_v30  ;;  %v6185_v22 = vpack.c.bf16 %v5793_v23, %v5793_v23 }
0x16a5   :  { %v6186_v15 = vpack.c.bf16 %v5794_v10, %v5794_v10  ;;  %v6152_v55 = vrot.slane %v5792_v30, 3  ;;  %v6200_v59 = vpack.c.bf16 %v6088_v31, %v6088_v31  ;;  %v6201_v62 = vpack.c.bf16 %v6089_v40, %v6089_v40 }
0x16a6   :  { %v11890_v39 = vpack.c.bf16 %v6090_v18, %v6090_v18  ;;  %v6153_v13 = vrot.slane %v5793_v23, 3  ;;  %v6154_v29 = vrot.slane %v5794_v10, 3  ;;  %v6199_v20 = vpack.c.bf16 %v6087_v21, %v6087_v21 }
0x16a7   :  { %v6215_v44 = vpack.c.bf16 %v6119_v34, %v6119_v34  ;;  %v6216_v2 = vpack.c.bf16 %v6120_v12, %v6120_v12  ;;  %v6217_v50 = vpack.c.bf16 %v6121_v52, %v6121_v52  ;;  %v11893_v57 = vunpack.c.l.b16 %v6183_v58 }
0x16a8   :  { %v11895_v61 = vpack.c.bf16 %v6122_v37, %v6122_v37  ;;  %v6432_v47 = vunpack.c.l.b16 %v6184_v53  ;;  %v11897_v9 = vunpack.c.l.b16 %v6185_v22  ;;  %v11899_v17 = vunpack.c.l.b16 %v6186_v15 }
0x16a9   :  { %v6231_v0 = vpack.c.bf16 %v6151_v56, %v6151_v56  ;;  %v6616_v32 = vunpack.c.l.b16 %v6200_v59  ;;  %v6617_v19 = vunpack.c.l.b16 %v6201_v62  ;;  %v12939_v38 = vunpack.c.l.b16 %v11890_v39 }
0x16aa   :  { %v6232_v30 = vpack.c.bf16 %v6152_v55, %v6152_v55  ;;  %v6233_v23 = vpack.c.bf16 %v6153_v13, %v6153_v13  ;;  %v11902_v10 = vpack.c.bf16 %v6154_v29, %v6154_v29  ;;  %v6439_v31 = vrot.slane %v6432_v47, 7 }
0x16ab   :  { %v6454_v21 = vrot.slane %v11893_v57, 4  ;;  %v6615_v34 = vunpack.c.l.b16 %v6199_v20  ;;  %v6455_v12 = vrot.slane %v6432_v47, 3  ;;  %v6457_v52 = vrot.slane %v11897_v9, 2 }
0x16ac   :  { %13157 = vst [vmem:[#allocation27_spill] sm:$0xff] %v11902_v10  ;;  %v6623_v37 = vrot.slane %v6616_v32, 7  ;;  %v11908_v58 = vrot.slane %v6617_v19, 6  ;;  %v11912_v56 = vrot.slane %v12939_v38, 5  ;;  %v6799_v53 = vunpack.c.l.b16 %v6215_v44 }
0x16ad   :  { %v6800_v22 = vunpack.c.l.b16 %v6216_v2  ;;  %v6801_v15 = vunpack.c.l.b16 %v6217_v50  ;;  %v11916_v55 = vsel %vm1017_vm2, %v6439_v31, %v11893_v57  ;;  %v12940_v59 = vunpack.c.l.b16 %v11895_v61 }
0x16ae   :  { %v6984_v62 = vunpack.c.l.b16 %v6232_v30  ;;  %v6985_v13 = vunpack.c.l.b16 %v6233_v23  ;;  %v11919_v29 = vrot.slane %v6615_v34, 4  ;;  %v11921_v20 = vrot.slane %v6616_v32, 3 }
0x16af   :  { %v11923_v47 = vrot.slane %v6617_v19, 2  ;;  %v6807_v63 = vrot.slane %v6800_v22, 7  ;;  %v11926_v44 = vsel %vm1017_vm2, %v6623_v37, %v6615_v34  ;;  %v11928_v2 = vrot.slane %v6801_v15, 6 }
0x16b0   :  { %v11930_v50 = vrot.slane %v6799_v53, 4  ;;  %v6983_v57 = vunpack.c.l.b16 %v6231_v0  ;;  %v11934_v30 = vrot.slane %v12940_v59, 5  ;;  %v11936_v23 = vrot.slane %v6800_v22, 3 }
0x16b1   :  { %v12941_v32 = vunpack.c.l.b16 %v11902_v10  ;;  %v6991_v19 = vrot.slane %v6984_v62, 7  ;;  %v11940_v31 = vsel %vm1017_vm2, %v6807_v63, %v6799_v53  ;;  %v11942_v38 = vrot.slane %v6801_v15, 2 }
0x16b2   :  { %13158 = vst [vmem:[#allocation8_spill] sm:$0xff] %v11934_v30  ;;  %v11944_v34 = vrot.slane %v6985_v13, 6  ;;  %v5915_v37 = vcombine.low %v11845_v54, %v5636_v26  ;;  %v5916_v0 = vcombine.high %v11845_v54, %v5636_v26  ;;  %v6187_v59 = vpack.c.bf16 %v11874_v25, %v11874_v25 }
0x16b3   :  { %v6188_v22 = vpack.c.bf16 %v11876_v6, %v11876_v6  ;;  %v6189_v51 = vpack.c.bf16 %v11878_v36, %v11878_v36  ;;  %v11954_v18 = vrot.slane %v6983_v57, 4  ;;  %v11956_v63 = vrot.slane %v6984_v62, 3 }
0x16b4   :  { %13159 = vst [vmem:[#allocation34_spill] sm:$0xff] %v11944_v34  ;;  %v5923_v53 = vrot.slane %v5915_v37, %v13129_v45  ;;  %v6190_v15 = vpack.c.bf16 %v11886_v33, %v11886_v33  ;;  %v11962_v54 = vsel %vm1017_vm2, %v6991_v19, %v6983_v57  ;;  %v11966_v26 = vrot.slane %v12941_v32, 5 }
0x16b5   :  { %13160 = vst [vmem:[#allocation32_spill] sm:$0xff] %v11954_v18  ;;  %13161 = vst [vmem:[#allocation33_spill] sm:$0xff] %v11956_v63  ;;  %v5930_v40 = vrot.slane %v5916_v0, %v13129_v45  ;;  %v11969_v7 = vunpack.c.l.b16 %v6187_v59  ;;  %v11973_v11 = vunpack.c.l.b16 %v6188_v22  ;;  %v6456_v37 = vsel %vm1017_vm2, %v6455_v12, %v6454_v21 }
0x16b6   :  { %13162 = vst [vmem:[#allocation9_spill] sm:$0xff] %v11962_v54  ;;  %13163 = vst [vmem:[#allocation35_spill] sm:$0xff] %v11966_v26  ;;  %v5963_v42 = vcombine.low %v11881_v24, %v5923_v53  ;;  %v5964_v62 = vcombine.high %v11881_v24, %v5923_v53  ;;  %v11978_v19 = vunpack.c.l.b16 %v6189_v51  ;;  %v11980_v32 = vunpack.c.l.b16 %v6190_v15 }
0x16b7   :  { %v5979_v1 = vcombine.low %v11884_v14, %v5930_v40  ;;  %v5980_v57 = vcombine.high %v11884_v14, %v5930_v40  ;;  %v11982_v16 = vrot.slane %v6985_v13, 2  ;;  %v6459_v24 = vrot.slane %v11899_v17, 1 }
0x16b8   :  { %v5971_v59 = vrot.slane %v5963_v42, %v13130_v5  ;;  %v5978_v0 = vrot.slane %v5964_v62, %v13130_v5  ;;  %v6458_v14 = vsel %vm1020_vm3, %v6457_v52, %v6456_v37 }
0x16b9   :  { %13164 = vst [vmem:[#allocation31_spill] sm:$0xff] %v11982_v16  ;;  %v5987_v22 = vrot.slane %v5979_v1, %v13130_v5  ;;  %v5994_v21 = vrot.slane %v5980_v57, %v13130_v5 }
0x16ba   :  { %v5995_v51 = vcombine.low %v11863_v3, %v5971_v59  ;;  %v5996_v40 = vcombine.high %v11863_v3, %v5971_v59  ;;  %v5997_v13 = vcombine.low %v11866_v60, %v5978_v0  ;;  %v5998_v42 = vcombine.high %v11866_v60, %v5978_v0 }
0x16bb   :  { %v11996_v53 = vcombine.low %v11869_v41, %v5987_v22  ;;  %v12002_v57 = vcombine.high %v11869_v41, %v5987_v22  ;;  %v12005_v52 = vcombine.low %v11872_v43, %v5994_v21  ;;  %v12008_v3 = vsel %vm1023_vm4, %v6459_v24, %v6458_v14 }
0x16bc   :  { %v12012_v37 = vcombine.high %v11872_v43, %v5994_v21  ;;  %v6096_v59 = vrot.slane %v5996_v40, 1  ;;  %v6097_v0 = vrot.slane %v5997_v13, 1  ;;  %v6098_v15 = vrot.slane %v5998_v42, 1 }
0x16bd   :  { %v6095_v1 = vrot.slane %v5995_v51, 1  ;;  %v6127_v12 = vrot.slane %v5995_v51, 2  ;;  %v6128_v41 = vrot.slane %v5996_v40, 2  ;;  %v6129_v22 = vrot.slane %v5997_v13, 2 }
0x16be   :  { %v6130_v48 = vrot.slane %v5998_v42, 2  ;;  %v6191_v49 = vpack.c.bf16 %v5995_v51, %v5995_v51  ;;  %v6159_v24 = vrot.slane %v5995_v51, 3  ;;  %v6192_v14 = vpack.c.bf16 %v5996_v40, %v5996_v40 }
0x16bf   :  { %v6193_v4 = vpack.c.bf16 %v5997_v13, %v5997_v13  ;;  %v6194_v60 = vpack.c.bf16 %v5998_v42, %v5998_v42  ;;  %v6160_v28 = vrot.slane %v5996_v40, 3  ;;  %v6208_v43 = vpack.c.bf16 %v6096_v59, %v6096_v59 }
0x16c0   :  { %v6209_v21 = vpack.c.bf16 %v6097_v0, %v6097_v0  ;;  %v12016_v5 = vpack.c.bf16 %v6098_v15, %v6098_v15  ;;  %v6161_v45 = vrot.slane %v5997_v13, 3  ;;  %v6162_v46 = vrot.slane %v5998_v42, 3 }
0x16c1   :  { %v6207_v27 = vpack.c.bf16 %v6095_v1, %v6095_v1  ;;  %v6223_v26 = vpack.c.bf16 %v6127_v12, %v6127_v12  ;;  %v6224_v34 = vpack.c.bf16 %v6128_v41, %v6128_v41  ;;  %v6225_v54 = vpack.c.bf16 %v6129_v22, %v6129_v22 }
0x16c2   :  { %v6523_v16 = vunpack.c.l.b16 %v6191_v49  ;;  %v12019_v8 = vpack.c.bf16 %v6130_v48, %v6130_v48  ;;  %v6524_v51 = vunpack.c.l.b16 %v6192_v14  ;;  %v12021_v10 = vunpack.c.l.b16 %v6193_v4 }
0x16c3   :  { %v12023_v63 = vunpack.c.l.b16 %v6194_v60  ;;  %v12025_v40 = vpack.c.bf16 %v6159_v24, %v6159_v24  ;;  %v6708_v15 = vunpack.c.l.b16 %v6208_v43  ;;  %v6709_v59 = vunpack.c.l.b16 %v6209_v21 }
0x16c4   :  { %13165 = vst [vmem:[#allocation36_spill] sm:$0xff] %v12019_v8  ;;  %v12951_v13 = vunpack.c.l.b16 %v12016_v5  ;;  %v12028_v42 = vpack.c.bf16 %v6160_v28, %v6160_v28  ;;  %v12030_v1 = vpack.c.bf16 %v6161_v45, %v6161_v45  ;;  %v12032_v12 = vpack.c.bf16 %v6162_v46, %v6162_v46 }
0x16c5   :  { %13166 = vst [vmem:[#allocation37_spill] sm:$0xff] %v12025_v40  ;;  %v6531_v49 = vrot.slane %v6524_v51, 7  ;;  %v6546_v0 = vrot.slane %v6523_v16, 4  ;;  %v6707_v60 = vunpack.c.l.b16 %v6207_v27  ;;  %v6547_v41 = vrot.slane %v6524_v51, 3 }
0x16c6   :  { %13167 = vst [vmem:[#allocation5_spill] sm:$0xff] %v12032_v12  ;;  %v6549_v22 = vrot.slane %v12021_v10, 2  ;;  %v6715_v24 = vrot.slane %v6708_v15, 7  ;;  %v12037_v14 = vrot.slane %v6709_v59, 6  ;;  %v12041_v28 = vrot.slane %v12951_v13, 5 }
0x16c7   :  { %v6891_v45 = vunpack.c.l.b16 %v6223_v26  ;;  %v6892_v46 = vunpack.c.l.b16 %v6224_v34  ;;  %v6893_v43 = vunpack.c.l.b16 %v6225_v54  ;;  %v6532_v21 = vsel %vm1017_vm2, %v6531_v49, %v6523_v16 }
0x16c8   :  { %v12952_v62 = vunpack.c.l.b16 %v12019_v8  ;;  %v12953_v27 = vunpack.c.l.b16 %v12028_v42  ;;  %v12047_v51 = vrot.slane %v6707_v60, 4  ;;  %v12049_v48 = vrot.slane %v6708_v15, 3 }
0x16c9   :  { %v12051_v18 = vrot.slane %v6709_v59, 2  ;;  %v6899_v30 = vrot.slane %v6892_v46, 7  ;;  %v12054_v13 = vsel %vm1017_vm2, %v6715_v24, %v6707_v60  ;;  %v12056_v34 = vrot.slane %v6893_v43, 6 }
0x16ca   :  { %v12058_v54 = vrot.slane %v6891_v45, 4  ;;  %v12063_v26 = vrot.slane %v12952_v62, 5  ;;  %v12065_v49 = vrot.slane %v6892_v46, 3  ;;  %v12067_v15 = vrot.slane %v6893_v43, 2 }
0x16cb   :  { %13168 = vst [vmem:[#allocation24_spill] sm:$0xff] %v12056_v34  ;;  %v12071_v4 = vsel %vm1017_vm2, %v6899_v30, %v6891_v45  ;;  %v12075_v60 = vrot.slane %v12953_v27, 7  ;;  %v13172_v24 = vunpack.c.l.b16 %v12025_v40  ;;  %v6461_v46 = vsel %vm1026_vm5, %v11969_v7, %v12008_v3 }
0x16cc   :  { %13169 = vst [vmem:[#allocation11_spill] sm:$0xff] %v12063_v26  ;;  %13170 = vst [vmem:[#allocation22_spill] sm:$0xff] %v12071_v4  ;;  %v13174_v43 = vrot.slane %v11973_v11, 7  ;;  %v6464_v59 = vrot.slane %v11978_v19, 6  ;;  %v6466_v30 = vrot.slane %v11980_v32, 5  ;;  %v13175_v45 = vrot.slane %v11897_v9, 6 }
0x16cd   :  { %13171 = vst [vmem:[#allocation20_spill] sm:$0xff] %v12075_v60  ;;  %v12079_v16 = vrot.slane %v13172_v24, 4  ;;  %v13176_v24 = vrot.slane %v11899_v17, 5  ;;  %v6195_v3 = vpack.c.bf16 %v11996_v53, %v11996_v53  ;;  %v13177_v60 = vrot.slane %v11969_v7, 4 }
0x16ce   :  { %v6463_v62 = vsel %vm1029_vm6, %v13174_v43, %v6461_v46  ;;  %v6442_v27 = vsel %vm1020_vm3, %v13175_v45, %v11916_v55  ;;  %v6197_v46 = vpack.c.bf16 %v12005_v52, %v12005_v52  ;;  %v6198_v17 = vpack.c.bf16 %v12012_v37, %v12012_v37 }
0x16cf   :  { %13173 = vst [vmem:[#allocation18_spill] sm:$0xff] %v12079_v16  ;;  %v6444_v12 = vsel %vm1023_vm4, %v13176_v24, %v6442_v27  ;;  %v6196_v16 = vpack.c.bf16 %v12002_v57, %v12002_v57  ;;  %v6465_v43 = vsel %vm1032_vm7, %v6464_v59, %v6463_v62  ;;  %v6548_v55 = vsel %vm1017_vm2, %v6547_v41, %v6546_v0 }
0x16d0   :  { %v6446_v9 = vsel %vm1026_vm5, %v13177_v60, %v6444_v12  ;;  %v6467_v27 = vsel %vm1035_vm8, %v6466_v30, %v6465_v43  ;;  %v13178_v45 = vrot.slane %v11973_v11, 3  ;;  %v6527_v40 = vunpack.c.l.b16 %v6195_v3 }
0x16d1   :  { %v6528_v26 = vunpack.c.l.b16 %v6196_v16  ;;  %v6468_v34 = vpack.c.b16 %v6467_v27, %v6467_v27  ;;  %v13179_v62 = vrot.slane %v11978_v19, 2  ;;  %v6529_v59 = vunpack.c.l.b16 %v6197_v46 }
0x16d2   :  { %v6448_v24 = vsel %vm1029_vm6, %v13178_v45, %v6446_v9  ;;  %v6530_v12 = vunpack.c.l.b16 %v6198_v17  ;;  %v13180_v60 = vrot.slane %v11980_v32, 1  ;;  %v6537_v0 = vrot.slane %v6527_v40, 4 }
0x16d3   :  { %v6450_v7 = vsel %vm1032_vm7, %v13179_v62, %v6448_v24  ;;  %v6539_v41 = vrot.slane %v6528_v26, 3  ;;  %v6550_v30 = vsel %vm1020_vm3, %v6549_v22, %v6548_v55  ;;  %v6473_v11 = vsel %vm1053_vm9, %v6468_v34, 0 }
0x16d4   :  { %v6452_v4 = vsel %vm1035_vm8, %v13180_v60, %v6450_v7  ;;  %v6541_v3 = vrot.slane %v6529_v59, 2  ;;  %v6543_v16 = vrot.slane %v6530_v12, 1  ;;  %9085 = vmatpush3.bf16.xpose.msra.mxu1 %v6473_v11  ;;  %v6551_v19 = vrot.slane %v12023_v63, 1 }
0x16d5   :  { %v6453_v43 = vpack.c.b16 %v6452_v4, %v6452_v4  ;;  %v6554_v9 = vrot.slane %v6528_v26, 7  ;;  %v6556_v27 = vrot.slane %v6529_v59, 6  ;;  %v6558_v46 = vrot.slane %v6530_v12, 5  ;;  %9096 = vmatprep.subr.bf16.mxu1 %v12996_v35 }
0x16d6   :  { %v6092_v32 = vrot.slane %v11876_v6, 1  ;;  %v6093_v17 = vrot.slane %v11878_v36, 1  ;;  %v6094_v45 = vrot.slane %v11886_v33, 1  ;;  %v13181_v22 = vrot.slane %v11874_v25, 1 }
0x16d7   :  { %v6552_v34 = vsel %vm1023_vm4, %v6551_v19, %v6550_v30  ;;  %v6640_v26 = vsel %vm1017_vm2, %v11921_v20, %v11919_v29  ;;  %v13182_v55 = vunpack.c.l.b16 %v11890_v39  ;;  %v13183_v62 = vrot.slane %v12021_v10, 6 }
0x16d8   :  { %v6203_v4 = vpack.c.bf16 %v13181_v22, %v13181_v22  ;;  %v6553_v59 = vsel %vm1026_vm5, %v6527_v40, %v6552_v34  ;;  %v6204_v12 = vpack.c.bf16 %v6092_v32, %v6092_v32  ;;  %v6205_v60 = vpack.c.bf16 %v6093_v17, %v6093_v17 }
0x16d9   :  { %v6643_v24 = vrot.slane %v13182_v55, 1  ;;  %v6534_v7 = vsel %vm1020_vm3, %v13183_v62, %v6532_v21  ;;  %v6206_v11 = vpack.c.bf16 %v6094_v45, %v6094_v45  ;;  %v6555_v22 = vsel %vm1029_vm6, %v6554_v9, %v6553_v59 }
0x16da   :  { %v6619_v8 = vunpack.c.l.b16 %v6203_v4  ;;  %v6642_v30 = vsel %vm1020_vm3, %v11923_v47, %v6640_v26  ;;  %v13184_v29 = vrot.slane %v12023_v63, 5  ;;  %v6557_v20 = vsel %vm1032_vm7, %v6556_v27, %v6555_v22 }
0x16db   :  { %v6620_v10 = vunpack.c.l.b16 %v6204_v12  ;;  %v6621_v19 = vunpack.c.l.b16 %v6205_v60  ;;  %v6622_v21 = vunpack.c.l.b16 %v6206_v11  ;;  %v6559_v40 = vsel %vm1035_vm8, %v6558_v46, %v6557_v20  ;;  %9087 = vmatmul.mubr.msk.bf16.vlgmr.msra.gmra.mxu1 %vm1053_vm9, %v6453_v43 }
0x16dc   :  { %v6536_v39 = vsel %vm1023_vm4, %v13184_v29, %v6534_v7  ;;  %v6629_v32 = vrot.slane %v6619_v8, 4  ;;  %v6644_v17 = vsel %vm1023_vm4, %v6643_v24, %v6642_v30  ;;  %v6560_v45 = vpack.c.b16 %v6559_v40, %v6559_v40  ;;  %9098 = vmatprep.mubr.msk.bf16.mxu1 %vm9501_vm1, %v12996_v35 }
0x16dd   :  { %v6538_v9 = vsel %vm1026_vm5, %v6537_v0, %v6536_v39  ;;  %v6631_v47 = vrot.slane %v6620_v10, 3  ;;  %v6633_v4 = vrot.slane %v6621_v19, 2  ;;  %v6635_v63 = vrot.slane %v6622_v21, 1 }
0x16de   :  { %v6645_v34 = vsel %vm1026_vm5, %v6619_v8, %v6644_v17  ;;  %v6646_v26 = vrot.slane %v6620_v10, 7  ;;  %v6648_v27 = vrot.slane %v6621_v19, 6  ;;  %v6650_v55 = vrot.slane %v6622_v21, 5 }
0x16df   :  { %v6565_v46 = vsel %vm1053_vm9, %v6560_v45, 0  ;;  %v6540_v24 = vsel %vm1029_vm6, %v6539_v41, %v6538_v9  ;;  %v6626_v0 = vsel %vm1020_vm3, %v11908_v58, %v11926_v44  ;;  %v6100_v43 = vrot.slane %v12002_v57, 1 }
0x16e0   :  { %9091 = vmatpush3.bf16.xpose.msra.mxu0 %v6565_v46  ;;  %v6647_v62 = vsel %vm1029_vm6, %v6646_v26, %v6645_v34  ;;  %v6542_v8 = vsel %vm1032_vm7, %v6541_v3, %v6540_v24  ;;  %v6628_v7 = vsel %vm1023_vm4, %v11912_v56, %v6626_v0  ;;  %v6101_v59 = vrot.slane %v12005_v52, 1 }
0x16e1   :  { %v6649_v12 = vsel %vm1032_vm7, %v6648_v27, %v6647_v62  ;;  %v6544_v41 = vsel %vm1035_vm8, %v6543_v16, %v6542_v8  ;;  %v6630_v60 = vsel %vm1026_vm5, %v6629_v32, %v6628_v7  ;;  %9102 = vmatprep.subr.bf16.mxu0 %v12996_v35  ;;  %v6102_v58 = vrot.slane %v12012_v37, 1 }
0x16e2   :  { %v6651_v44 = vsel %vm1035_vm8, %v6650_v55, %v6649_v12  ;;  %v6545_v11 = vpack.c.b16 %v6544_v41, %v6544_v41  ;;  %v6632_v3 = vsel %vm1029_vm6, %v6631_v47, %v6630_v60  ;;  %v13185_v22 = vrot.slane %v11996_v53, 1 }
0x16e3   :  { %v6652_v30 = vpack.c.b16 %v6651_v44, %v6651_v44  ;;  %v6634_v29 = vsel %vm1032_vm7, %v6633_v4, %v6632_v3  ;;  %v6212_v39 = vpack.c.bf16 %v6100_v43, %v6100_v43  ;;  %v6213_v16 = vpack.c.bf16 %v6101_v59, %v6101_v59 }
0x16e4   :  { %v6211_v56 = vpack.c.bf16 %v13185_v22, %v13185_v22  ;;  %v6636_v20 = vsel %vm1035_vm8, %v6635_v63, %v6634_v29  ;;  %v6214_v10 = vpack.c.bf16 %v6102_v58, %v6102_v58  ;;  %v6732_v21 = vsel %vm1017_vm2, %v12049_v48, %v12047_v51 }
0x16e5   :  { %v6657_v40 = vsel %vm1053_vm9, %v6652_v30, 0  ;;  %v6637_v32 = vpack.c.b16 %v6636_v20, %v6636_v20  ;;  %v6712_v17 = vunpack.c.l.b16 %v6212_v39  ;;  %v6713_v9 = vunpack.c.l.b16 %v6213_v16 }
0x16e6   :  { %v6711_v19 = vunpack.c.l.b16 %v6211_v56  ;;  %9097 = vmatpush3.bf16.xpose.msra.mxu1 %v6657_v40  ;;  %v6714_v45 = vunpack.c.l.b16 %v6214_v10  ;;  %v6734_v4 = vsel %vm1020_vm3, %v12051_v18, %v6732_v21  ;;  %v13186_v34 = vunpack.c.l.b16 %v12016_v5 }
0x16e7   :  { %9093 = vmatmul.mubr.msk.bf16.vlgmr.msra.gmra.mxu0 %vm1053_vm9, %v6545_v11  ;;  %9108 = vmatprep.subr.bf16.mxu1 %v12996_v35  ;;  %v6723_v26 = vrot.slane %v6712_v17, 3  ;;  %v6725_v48 = vrot.slane %v6713_v9, 2  ;;  %v6738_v51 = vrot.slane %v6712_v17, 7  ;;  %v6740_v27 = vrot.slane %v6713_v9, 6 }
0x16e8   :  { %v6721_v47 = vrot.slane %v6711_v19, 4  ;;  %v6735_v63 = vrot.slane %v13186_v34, 1  ;;  %v6727_v55 = vrot.slane %v6714_v45, 1  ;;  %v6742_v24 = vrot.slane %v6714_v45, 5  ;;  %9104 = vmatprep.mubr.msk.bf16.mxu0 %vm9501_vm1, %v12996_v35 }
0x16e9   :  { %v6124_v0 = vrot.slane %v11876_v6, 2  ;;  %v6125_v18 = vrot.slane %v11878_v36, 2  ;;  %v6126_v43 = vrot.slane %v11886_v33, 2  ;;  %v13187_v62 = vrot.slane %v11874_v25, 2 }
0x16ea   :  { %v6736_v46 = vsel %vm1023_vm4, %v6735_v63, %v6734_v4  ;;  %v6824_v12 = vsel %vm1017_vm2, %v11936_v23, %v11930_v50  ;;  %v13188_v41 = vunpack.c.l.b16 %v11895_v61  ;;  %v6718_v29 = vsel %vm1020_vm3, %v12037_v14, %v12054_v13 }
0x16eb   :  { %v6737_v5 = vsel %vm1026_vm5, %v6711_v19, %v6736_v46  ;;  %v6219_v8 = vpack.c.bf16 %v13187_v62, %v13187_v62  ;;  %v6220_v59 = vpack.c.bf16 %v6124_v0, %v6124_v0  ;;  %v6221_v44 = vpack.c.bf16 %v6125_v18, %v6125_v18 }
0x16ec   :  { %v6739_v7 = vsel %vm1029_vm6, %v6738_v51, %v6737_v5  ;;  %v6827_v60 = vrot.slane %v13188_v41, 1  ;;  %v6222_v11 = vpack.c.bf16 %v6126_v43, %v6126_v43  ;;  %v6826_v30 = vsel %vm1020_vm3, %v11942_v38, %v6824_v12 }
0x16ed   :  { %v6741_v58 = vsel %vm1032_vm7, %v6740_v27, %v6739_v7  ;;  %v6803_v3 = vunpack.c.l.b16 %v6219_v8  ;;  %v6804_v56 = vunpack.c.l.b16 %v6220_v59  ;;  %9099 = vmatmul.mubr.msk.bf16.vlgmr.msra.gmra.mxu1 %vm1053_vm9, %v6637_v32  ;;  %v6805_v61 = vunpack.c.l.b16 %v6221_v44  ;;  %v13189_v27 = vld [vmem:[#allocation8_spill] sm:$0xff] }
0x16ee   :  { %v6743_v22 = vsel %vm1035_vm8, %v6742_v24, %v6741_v58  ;;  %v6806_v23 = vunpack.c.l.b16 %v6222_v11  ;;  %v6828_v20 = vsel %vm1023_vm4, %v6827_v60, %v6826_v30  ;;  %9110 = vmatprep.mubr.msk.bf16.mxu1 %vm9501_vm1, %v12996_v35  ;;  %v6720_v38 = vsel %vm1023_vm4, %v12041_v28, %v6718_v29 }
0x16ef   :  { %v6744_v50 = vpack.c.b16 %v6743_v22, %v6743_v22  ;;  %v6813_v39 = vrot.slane %v6803_v3, 4  ;;  %v6815_v16 = vrot.slane %v6804_v56, 3  ;;  %v6830_v10 = vrot.slane %v6804_v56, 7 }
0x16f0   :  { %v6817_v21 = vrot.slane %v6805_v61, 2  ;;  %v6819_v13 = vrot.slane %v6806_v23, 1  ;;  %v6829_v14 = vsel %vm1026_vm5, %v6803_v3, %v6828_v20  ;;  %v6832_v32 = vrot.slane %v6805_v61, 6 }
0x16f1   :  { %v6749_v19 = vsel %vm1053_vm9, %v6744_v50, 0  ;;  %v6831_v40 = vsel %vm1029_vm6, %v6830_v10, %v6829_v14  ;;  %v6834_v17 = vrot.slane %v6806_v23, 5  ;;  %v6722_v9 = vsel %vm1026_vm5, %v6721_v47, %v6720_v38  ;;  %v13196_v14 = vld [vmem:[#allocation32_spill] sm:$0xff] }
0x16f2   :  { %9103 = vmatpush3.bf16.xpose.msra.mxu0 %v6749_v19  ;;  %v6724_v45 = vsel %vm1029_vm6, %v6723_v26, %v6722_v9  ;;  %v6810_v4 = vsel %vm1020_vm3, %v11928_v2, %v11940_v31  ;;  %v6132_v28 = vrot.slane %v12002_v57, 2  ;;  %v6133_v34 = vrot.slane %v12005_v52, 2 }
0x16f3   :  { %9114 = vmatprep.subr.bf16.mxu0 %v12996_v35  ;;  %v6833_v63 = vsel %vm1032_vm7, %v6832_v32, %v6831_v40  ;;  %v6726_v51 = vsel %vm1032_vm7, %v6725_v48, %v6724_v45  ;;  %v6812_v46 = vsel %vm1023_vm4, %v13189_v27, %v6810_v4  ;;  %v6134_v47 = vrot.slane %v12012_v37, 2  ;;  %v13197_v40 = vld [vmem:[#allocation33_spill] sm:$0xff]  ;;  %v13202_v27 = vld [vmem:[#allocation24_spill] sm:$0xff] }
0x16f4   :  { %v6835_v26 = vsel %vm1035_vm8, %v6834_v17, %v6833_v63  ;;  %v6728_v24 = vsel %vm1035_vm8, %v6727_v55, %v6726_v51  ;;  %v6814_v2 = vsel %vm1026_vm5, %v6813_v39, %v6812_v46  ;;  %v13190_v31 = vrot.slane %v11996_v53, 2  ;;  %v13198_v17 = vld [vmem:[#allocation27_spill] sm:$0xff]  ;;  %v13201_v51 = vld [vmem:[#allocation22_spill] sm:$0xff] }
0x16f5   :  { %v6836_v5 = vpack.c.b16 %v6835_v26, %v6835_v26  ;;  %v6729_v18 = vpack.c.b16 %v6728_v24, %v6728_v24  ;;  %v6816_v43 = vsel %vm1029_vm6, %v6815_v16, %v6814_v2  ;;  %v6228_v48 = vpack.c.bf16 %v6132_v28, %v6132_v28  ;;  %v13200_v63 = vld [vmem:[#allocation31_spill] sm:$0xff] }
0x16f6   :  { %v6227_v0 = vpack.c.bf16 %v13190_v31, %v13190_v31  ;;  %v6818_v62 = vsel %vm1032_vm7, %v6817_v21, %v6816_v43  ;;  %v6229_v8 = vpack.c.bf16 %v6133_v34, %v6133_v34  ;;  %v6230_v7 = vpack.c.bf16 %v6134_v47, %v6134_v47 }
0x16f7   :  { %v6841_v12 = vsel %vm1053_vm9, %v6836_v5, 0  ;;  %v6820_v55 = vsel %vm1035_vm8, %v6819_v13, %v6818_v62  ;;  %v6896_v41 = vunpack.c.l.b16 %v6228_v48  ;;  %v6916_v60 = vsel %vm1017_vm2, %v12065_v49, %v12058_v54  ;;  %v13193_v49 = vld [vmem:[#allocation36_spill] sm:$0xff] }
0x16f8   :  { %v6895_v59 = vunpack.c.l.b16 %v6227_v0  ;;  %v13191_v58 = vunpack.c.l.b16 %v12028_v42  ;;  %v13192_v11 = vunpack.c.l.b16 %v12030_v1  ;;  %9109 = vmatpush3.bf16.xpose.msra.mxu1 %v6841_v12  ;;  %v6897_v22 = vunpack.c.l.b16 %v6229_v8 }
0x16f9   :  { %9105 = vmatmul.mubr.msk.bf16.vlgmr.msra.gmra.mxu0 %vm1053_vm9, %v6729_v18  ;;  %v6898_v56 = vunpack.c.l.b16 %v6230_v7  ;;  %v6821_v30 = vpack.c.b16 %v6820_v55, %v6820_v55  ;;  %9120 = vmatprep.subr.bf16.mxu1 %v12996_v35  ;;  %v6918_v54 = vsel %vm1020_vm3, %v12067_v15, %v6916_v60  ;;  %v13194_v42 = vunpack.c.l.b16 %v13193_v49  ;;  %v13203_v18 = vld [vmem:[#allocation11_spill] sm:$0xff] }
0x16fa   :  { %v12246_v44 = vrot.slane %v13191_v58, 3  ;;  %v12250_v3 = vrot.slane %v13192_v11, 2  ;;  %v6905_v29 = vrot.slane %v6895_v59, 4  ;;  %9116 = vmatprep.mubr.msk.bf16.mxu0 %vm9501_vm1, %v12996_v35  ;;  %v6907_v61 = vrot.slane %v6896_v41, 3  ;;  %v13204_v58 = vld [vmem:[#allocation9_spill] sm:$0xff]  ;;  %v13205_v11 = vld [vmem:[#allocation34_spill] sm:$0xff] }
0x16fb   :  { %v6919_v50 = vrot.slane %v13194_v42, 1  ;;  %v6922_v23 = vrot.slane %v6896_v41, 7  ;;  %v6924_v39 = vrot.slane %v6897_v22, 6  ;;  %v6926_v16 = vrot.slane %v6898_v56, 5  ;;  %v13206_v42 = vld [vmem:[#allocation35_spill] sm:$0xff] }
0x16fc   :  { %v6156_v10 = vrot.slane %v11876_v6, 3  ;;  %v6157_v38 = vrot.slane %v11878_v36, 3  ;;  %v6158_v19 = vrot.slane %v11886_v33, 3  ;;  %v13195_v21 = vrot.slane %v11874_v25, 3 }
0x16fd   :  { %v6920_v20 = vsel %vm1023_vm4, %v6919_v50, %v6918_v54  ;;  %v7008_v32 = vsel %vm1017_vm2, %v13197_v40, %v13196_v14  ;;  %v13199_v9 = vunpack.c.l.b16 %v13198_v17  ;;  %v6902_v46 = vsel %vm1020_vm3, %v13202_v27, %v13201_v51  ;;  %v13209_v14 = vld [vmem:[#allocation37_spill] sm:$0xff] }
0x16fe   :  { %v6921_v15 = vsel %vm1026_vm5, %v6895_v59, %v6920_v20  ;;  %v6235_v13 = vpack.c.bf16 %v13195_v21, %v13195_v21  ;;  %v6236_v6 = vpack.c.bf16 %v6156_v10, %v6156_v10  ;;  %v6237_v28 = vpack.c.bf16 %v6157_v38, %v6157_v38 }
0x16ff   :  { %v7011_v45 = vrot.slane %v13199_v9, 1  ;;  %v6923_v4 = vsel %vm1029_vm6, %v6922_v23, %v6921_v15  ;;  %v6238_v36 = vpack.c.bf16 %v6158_v19, %v6158_v19  ;;  %v7010_v25 = vsel %vm1020_vm3, %v13200_v63, %v7008_v32  ;;  %9111 = vmatmul.mubr.msk.bf16.vlgmr.msra.gmra.mxu1 %vm1053_vm9, %v6821_v30  ;;  %v13211_v32 = vld [vmem:[#allocation20_spill] sm:$0xff] }
0x1700   :  { %v6925_v33 = vsel %vm1032_vm7, %v6924_v39, %v6923_v4  ;;  %v6987_v34 = vunpack.c.l.b16 %v6235_v13  ;;  %v6988_v26 = vunpack.c.l.b16 %v6236_v6  ;;  %v6989_v24 = vunpack.c.l.b16 %v6237_v28  ;;  %9122 = vmatprep.mubr.msk.bf16.mxu1 %vm9501_vm1, %v12996_v35 }
0x1701   :  { %v6927_v47 = vsel %vm1035_vm8, %v6926_v16, %v6925_v33  ;;  %v6990_v2 = vunpack.c.l.b16 %v6238_v36  ;;  %v6909_v31 = vrot.slane %v6897_v22, 2  ;;  %v7012_v5 = vsel %vm1023_vm4, %v7011_v45, %v7010_v25  ;;  %v13212_v36 = vld [vmem:[#allocation18_spill] sm:$0xff]  ;;  %v13213_v25 = vld [vmem:[#allocation5_spill] sm:$0xff] }
0x1702   :  { %v6928_v0 = vpack.c.b16 %v6927_v47, %v6927_v47  ;;  %v6904_v43 = vsel %vm1023_vm4, %v13203_v18, %v6902_v46  ;;  %v6911_v48 = vrot.slane %v6898_v56, 1  ;;  %v6997_v62 = vrot.slane %v6987_v34, 4 }
0x1703   :  { %v6999_v8 = vrot.slane %v6988_v26, 3  ;;  %v7013_v7 = vsel %vm1026_vm5, %v6987_v34, %v7012_v5  ;;  %v7014_v12 = vrot.slane %v6988_v26, 7  ;;  %v7016_v55 = vrot.slane %v6989_v24, 6 }
0x1704   :  { %v6933_v59 = vsel %vm1053_vm9, %v6928_v0, 0  ;;  %v7018_v41 = vrot.slane %v6990_v2, 5  ;;  %v6906_v60 = vsel %vm1026_vm5, %v6905_v29, %v6904_v43  ;;  %v6994_v22 = vsel %vm1020_vm3, %v13205_v11, %v13204_v58 }
0x1705   :  { %9115 = vmatpush3.bf16.xpose.msra.mxu0 %v6933_v59  ;;  %v6164_v30 = vrot.slane %v12002_v57, 3  ;;  %v6165_v56 = vrot.slane %v12005_v52, 3  ;;  %v7015_v54 = vsel %vm1029_vm6, %v7014_v12, %v7013_v7  ;;  %v6908_v49 = vsel %vm1029_vm6, %v6907_v61, %v6906_v60 }
0x1706   :  { %v6996_v50 = vsel %vm1023_vm4, %v13206_v42, %v6994_v22  ;;  %9126 = vmatprep.subr.bf16.mxu0 %v12996_v35  ;;  %v6166_v23 = vrot.slane %v12012_v37, 3  ;;  %v7017_v29 = vsel %vm1032_vm7, %v7016_v55, %v7015_v54  ;;  %v6910_v39 = vsel %vm1032_vm7, %v6909_v31, %v6908_v49 }
0x1707   :  { %v6998_v16 = vsel %vm1026_vm5, %v6997_v62, %v6996_v50  ;;  %v13207_v57 = vrot.slane %v11996_v53, 3  ;;  %v7019_v20 = vsel %vm1035_vm8, %v7018_v41, %v7017_v29  ;;  %v6912_v61 = vsel %vm1035_vm8, %v6911_v48, %v6910_v39  ;;  %v13216_v50 = vld [vmem:[#allocation21_spill] sm:$0xff] }
0x1708   :  { %v7000_v10 = vsel %vm1029_vm6, %v6999_v8, %v6998_v16  ;;  %v6244_v38 = vpack.c.bf16 %v6164_v30, %v6164_v30  ;;  %v13208_v19 = vunpack.c.l.b16 %v12030_v1  ;;  %v7001_v15 = vrot.slane %v6989_v24, 2 }
0x1709   :  { %v6243_v52 = vpack.c.bf16 %v13207_v57, %v13207_v57  ;;  %v7020_v21 = vpack.c.b16 %v7019_v20, %v7019_v20  ;;  %v6245_v13 = vpack.c.bf16 %v6165_v56, %v6165_v56  ;;  %v13210_v40 = vunpack.c.l.b16 %v13209_v14 }
0x170a   :  { %v7085_v37 = vrot.slane %v13208_v19, 6  ;;  %v6913_v17 = vpack.c.b16 %v6912_v61, %v6912_v61  ;;  %v6246_v9 = vpack.c.bf16 %v6166_v23, %v6166_v23  ;;  %v7002_v6 = vsel %vm1032_vm7, %v7001_v15, %v7000_v10  ;;  %v13217_v61 = vld [vmem:[#allocation16_spill] sm:$0xff] }
0x170b   :  { %v7084_v53 = vsel %vm1017_vm2, %v13211_v32, %v13210_v40  ;;  %v7079_v45 = vunpack.c.l.b16 %v6243_v52  ;;  %v7025_v4 = vsel %vm1053_vm9, %v7020_v21, 0  ;;  %v7080_v28 = vunpack.c.l.b16 %v6244_v38 }
0x170c   :  { %v7100_v1 = vsel %vm1017_vm2, %v12246_v44, %v13212_v36  ;;  %v7003_v33 = vrot.slane %v6990_v2, 1  ;;  %9121 = vmatpush3.bf16.xpose.msra.mxu1 %v7025_v4  ;;  %9117 = vmatmul.mubr.msk.bf16.vlgmr.msra.gmra.mxu0 %vm1053_vm9, %v6913_v17  ;;  %v7081_v34 = vunpack.c.l.b16 %v6245_v13  ;;  %v13214_v51 = vunpack.c.l.b16 %v13213_v25 }
0x170d   :  { %v7102_v63 = vsel %vm1020_vm3, %v12250_v3, %v7100_v1  ;;  %v7082_v46 = vunpack.c.l.b16 %v6246_v9  ;;  %9128 = vmatprep.mubr.msk.bf16.mxu0 %vm9501_vm1, %v12996_v35  ;;  %9132 = vmatprep.subr.bf16.mxu1 %v12996_v35  ;;  %v7089_v24 = vrot.slane %v7079_v45, 4  ;;  %v7086_v2 = vsel %vm1020_vm3, %v7085_v37, %v7084_v53 }
0x170e   :  { %v7087_v27 = vrot.slane %v13214_v51, 5  ;;  %v13215_v47 = vmov %v13214_v51  ;;  %v7004_v44 = vsel %vm1035_vm8, %v7003_v33, %v7002_v6  ;;  %v7106_v3 = vrot.slane %v7080_v28, 7 }
0x170f   :  { %v7103_v26 = vrot.slane %v13215_v47, 1  ;;  %v7108_v18 = vrot.slane %v7081_v34, 6  ;;  %v7005_v48 = vpack.c.b16 %v7004_v44, %v7004_v44  ;;  %v7091_v62 = vrot.slane %v7080_v28, 3 }
0x1710   :  { %v7088_v0 = vsel %vm1023_vm4, %v7087_v27, %v7086_v2  ;;  %v7110_v7 = vrot.slane %v7082_v46, 5  ;;  %v7093_v41 = vrot.slane %v7081_v34, 2  ;;  %v7095_v22 = vrot.slane %v7082_v46, 1 }
0x1711   :  { %v7104_v31 = vsel %vm1023_vm4, %v7103_v26, %v7102_v63  ;;  %v7090_v43 = vsel %vm1026_vm5, %v7089_v24, %v7088_v0 }
0x1712   :  { %v7105_v5 = vsel %vm1026_vm5, %v7079_v45, %v7104_v31  ;;  %v7092_v55 = vsel %vm1029_vm6, %v7091_v62, %v7090_v43 }
0x1713   :  { %v7107_v8 = vsel %vm1029_vm6, %v7106_v3, %v7105_v5  ;;  %9123 = vmatmul.mubr.msk.bf16.vlgmr.msra.gmra.mxu1 %vm1053_vm9, %v7005_v48  ;;  %v7094_v11 = vsel %vm1032_vm7, %v7093_v41, %v7092_v55 }
0x1714   :  { %v7109_v59 = vsel %vm1032_vm7, %v7108_v18, %v7107_v8  ;;  %9134 = vmatprep.mubr.msk.bf16.mxu1 %vm9501_vm1, %v12996_v35  ;;  %v7096_v30 = vsel %vm1035_vm8, %v7095_v22, %v7094_v11  ;;  %v13219_v11 = vld [vmem:[#allocation10_spill] sm:$0xff]  ;;  %v12383_v22 = vpop.permute.xlu1 %5645 }
0x1715   :  { %v7111_v12 = vsel %vm1035_vm8, %v7110_v7, %v7109_v59  ;;  %v7097_v56 = vpack.c.b16 %v7096_v30, %v7096_v30  ;;  %v12385_v30 = vpop.permute.xlu0 %5639 }
0x1716   :  { %v7112_v60 = vpack.c.b16 %v7111_v12, %v7111_v12 }
0x1718   :  { %v7117_v58 = vsel %vm1053_vm9, %v7112_v60, 0 }
0x1719   :  { %9127 = vmatpush3.bf16.xpose.msra.mxu0 %v7117_v58  ;;  %v13218_v58 = vld [vmem:[#allocation28_spill] sm:$0xff] }
0x171a   :  { %9138 = vmatprep.subr.bf16.mxu0 %v12996_v35 }
0x1720   :  { %9129 = vmatmul.mubr.msk.bf16.vlgmr.msra.gmra.mxu0 %vm1053_vm9, %v7097_v56  ;;  %v12387_v56 = vpop.permute.xlu1 %5641 }
0x1721   :  { %9140 = vmatprep.mubr.msk.bf16.mxu0 %vm9501_vm1, %v12996_v35 }
0x179b   :  { %v6509_v54 = vpop.f32.mrf.mxu1 }
0x179c   :  { %v7159_v49 = vmul.f32 0.35355338, %v6509_v54 }
0x179d   :  { %v9088_v42 = vpop.f32.mrf.mxu1 }
0x179e   :  { %v12352_v23 = vadd.f32 %v7159_v49, %v13216_v50 }
0x179f   :  { %v6512_v29 = vpop.f32.mrf.mxu1 }
0x17a0   :  { %v7175_v39 = vsel %vm1053_vm9, %v12352_v23, -inf }
0x17a1   :  { %7176 = vmax.xlane.f32.xlu0 %v7175_v39  ;;  %v9089_v16 = vpop.f32.mrf.mxu1 }
0x17a7   :  { %v6601_v57 = vpop.f32.mrf.mxu0 }
0x17a8   :  { %v7160_v52 = vmul.f32 0.35355338, %v6601_v57 }
0x17a9   :  { %v9094_v20 = vpop.f32.mrf.mxu0 }
0x17aa   :  { %v12357_v10 = vadd.f32 %v7160_v52, %v13217_v61 }
0x17ab   :  { %v6604_v38 = vpop.f32.mrf.mxu0 }
0x17ac   :  { %v7178_v19 = vsel %vm1053_vm9, %v12357_v10, -inf }
0x17ad   :  { %v6693_v37 = vpop.f32.mrf.mxu1  ;;  %7179 = vmax.xlane.f32.xlu1 %v7178_v19  ;;  %v9095_v15 = vpop.f32.mrf.mxu0 }
0x17ae   :  { %v7161_v21 = vmul.f32 0.35355338, %v6693_v37 }
0x17af   :  { %v9100_v13 = vpop.f32.mrf.mxu1 }
0x17b0   :  { %v12362_v14 = vadd.f32 %v7161_v21, %v13216_v50 }
0x17b1   :  { %v6696_v40 = vpop.f32.mrf.mxu1 }
0x17b2   :  { %v7181_v32 = vsel %vm1053_vm9, %v12362_v14, -inf }
0x17b3   :  { %7182 = vmax.xlane.f32.xlu0 %v7181_v32  ;;  %v9101_v53 = vpop.f32.mrf.mxu1 }
0x17b9   :  { %v6785_v17 = vpop.f32.mrf.mxu0 }
0x17ba   :  { %v7162_v9 = vmul.f32 0.35355338, %v6785_v17 }
0x17bb   :  { %v9106_v45 = vpop.f32.mrf.mxu0 }
0x17bc   :  { %v12367_v4 = vadd.f32 %v7162_v9, %v13217_v61 }
0x17bd   :  { %v6788_v6 = vpop.f32.mrf.mxu0 }
0x17be   :  { %v7184_v28 = vsel %vm1053_vm9, %v12367_v4, -inf }
0x17bf   :  { %7185 = vmax.xlane.f32.xlu0 %v7184_v28  ;;  %v9107_v36 = vpop.f32.mrf.mxu0  ;;  %v6877_v1 = vpop.f32.mrf.mxu1 }
0x17c0   :  { %v7163_v33 = vmul.f32 0.35355338, %v6877_v1 }
0x17c1   :  { %v9112_v34 = vpop.f32.mrf.mxu1 }
0x17c2   :  { %v7171_v63 = vadd.f32 %v7163_v33, %v13216_v50 }
0x17c3   :  { %v6880_v25 = vpop.f32.mrf.mxu1 }
0x17c4   :  { %v7187_v51 = vsel %vm1053_vm9, %v7171_v63, -inf }
0x17c5   :  { %v9113_v27 = vpop.f32.mrf.mxu1  ;;  %7188 = vmax.xlane.f32.xlu0 %v7187_v51 }
0x17cc   :  { %v6969_v46 = vpop.f32.mrf.mxu0 }
0x17cd   :  { %v7164_v47 = vmul.f32 0.35355338, %v6969_v46 }
0x17ce   :  { %v9118_v26 = vpop.f32.mrf.mxu0 }
0x17cf   :  { %v7172_v44 = vadd.f32 %v7164_v47, %v13217_v61 }
0x17d0   :  { %v6972_v24 = vpop.f32.mrf.mxu0 }
0x17d1   :  { %v7190_v2 = vsel %vm1053_vm9, %v7172_v44, -inf }
0x17d2   :  { %7191 = vmax.xlane.f32.xlu1 %v7190_v2  ;;  %v9119_v31 = vpop.f32.mrf.mxu0 }
0x17d3   :  { %v7061_v3 = vpop.f32.mrf.mxu1 }
0x17d4   :  { %v7165_v0 = vmul.f32 0.35355338, %v7061_v3 }
0x17d5   :  { %v9124_v5 = vpop.f32.mrf.mxu1 }
0x17d6   :  { %v7173_v18 = vadd.f32 %v7165_v0, %v13216_v50  ;;  %v12390_v50 = vpop.permute.xlu1 %5647 }
0x17d7   :  { %v7064_v43 = vpop.f32.mrf.mxu1 }
0x17d8   :  { %v7193_v48 = vsel %vm1053_vm9, %v7173_v18, -inf }
0x17d9   :  { %v9125_v62 = vpop.f32.mrf.mxu1  ;;  %7194 = vmax.xlane.f32.xlu0 %v7193_v48  ;;  %v13220_v48 = vld [vmem:[#allocation12_spill] sm:$0xff] }
0x17e0   :  { %v7153_v8 = vpop.f32.mrf.mxu0 }
0x17e1   :  { %v7166_v7 = vmul.f32 0.35355338, %v7153_v8 }
0x17e2   :  { %v9130_v59 = vpop.f32.mrf.mxu0 }
0x17e3   :  { %v7174_v12 = vadd.f32 %v7166_v7, %v13217_v61 }
0x17e4   :  { %v7156_v55 = vpop.f32.mrf.mxu0 }
0x17e5   :  { %v7196_v41 = vsel %vm1053_vm9, %v7174_v12, -inf }
0x17e6   :  { %7197 = vmax.xlane.f32.xlu1 %v7196_v41  ;;  %v9131_v60 = vpop.f32.mrf.mxu0 }
0x17ef   :  { %5651 = vrot.lane.b32.xlu0 %v13218_v58, %s9514_s15 }
0x17f7   :  { %5653 = vrot.lane.b32.xlu1 %v13219_v11, %s9514_s15 }
0x182a   :  { %v7177_v54 = vpop.xlane.xlu0 %7176 }
0x182b   :  { %v7199_v49 = vsub.f32 %v12352_v23, %v7177_v54 }
0x182d   :  { %v7207_v42 = vmul.f32 1.442695, %v7199_v49 }
0x182f   :  { %9425 = vpow2.f32 %v7207_v42 }
0x1836   :  { %v7180_v29 = vpop.xlane.xlu1 %7179 }
0x1837   :  { %v7200_v39 = vsub.f32 %v12357_v10, %v7180_v29 }
0x1839   :  { %v7209_v16 = vmul.f32 1.442695, %v7200_v39 }
0x183b   :  { %9427 = vpow2.f32 %v7209_v16 }
0x183c   :  { %v12393_v57 = vpop.eup %9425  ;;  %v7183_v61 = vpop.xlane.xlu0 %7182 }
0x183d   :  { %v7223_v52 = vsel %vm1053_vm9, %v12393_v57, 0.0  ;;  %v7201_v10 = vsub.f32 %v12362_v14, %v7183_v61 }
0x183e   :  { %7224 = vadd.xlane.f32.xlu0 %v7223_v52 }
0x183f   :  { %v7211_v37 = vmul.f32 1.442695, %v7201_v10 }
0x1841   :  { %9429 = vpow2.f32 %v7211_v37 }
0x1848   :  { %v12397_v20 = vpop.eup %9427  ;;  %v7186_v38 = vpop.xlane.xlu0 %7185 }
0x1849   :  { %v7226_v23 = vsel %vm1053_vm9, %v12397_v20, 0.0  ;;  %v7202_v53 = vsub.f32 %v12367_v4, %v7186_v38 }
0x184a   :  { %7227 = vadd.xlane.f32.xlu1 %v7226_v23 }
0x184b   :  { %v7213_v45 = vmul.f32 1.442695, %v7202_v53 }
0x184e   :  { %v7189_v19 = vpop.xlane.xlu0 %7188  ;;  %v12407_v1 = vpop.eup %9429 }
0x184f   :  { %v7203_v15 = vsub.f32 %v7171_v63, %v7189_v19  ;;  %v7229_v33 = vsel %vm1053_vm9, %v12407_v1, 0.0 }
0x1851   :  { %v7215_v13 = vmul.f32 1.442695, %v7203_v15 }
0x1853   :  { %9431 = vpow2.f32 %v7215_v13 }
0x1854   :  { %5657 = vrot.lane.b32.xlu0 %v13218_v58, %s9515_s16 }
0x185b   :  { %5659 = vrot.lane.b32.xlu1 %v13219_v11, %s9515_s16  ;;  %v7192_v21 = vpop.xlane.xlu1 %7191 }
0x185c   :  { %v7204_v40 = vsub.f32 %v7172_v44, %v7192_v21 }
0x185e   :  { %v7217_v9 = vmul.f32 1.442695, %v7204_v40 }
0x1860   :  { %9433 = vpow2.f32 %v7217_v9  ;;  %v12411_v34 = vpop.eup %9431 }
0x1861   :  { %9435 = vpow2.f32 %v7213_v45  ;;  %v7235_v4 = vsel %vm1053_vm9, %v12411_v34, 0.0 }
0x1862   :  { %v7195_v32 = vpop.xlane.xlu0 %7194 }
0x1863   :  { %v7205_v17 = vsub.f32 %v7173_v18, %v7195_v32 }
0x1865   :  { %v7219_v36 = vmul.f32 1.442695, %v7205_v17 }
0x1866   :  { %v5652_v24 = vpop.permute.xlu0 %5651 }
0x1867   :  { %9437 = vpow2.f32 %v7219_v36  ;;  %v5799_v31 = vcombine.low %v12385_v30, %v5652_v24  ;;  %v5800_v3 = vcombine.high %v12385_v30, %v5652_v24  ;;  %v13221_v30 = vld [vmem:[#allocation13_spill] sm:$0xff] }
0x1869   :  { %v5807_v62 = vrot.slane %v5799_v31, %v13220_v48  ;;  %v5814_v8 = vrot.slane %v5800_v3, %v13220_v48 }
0x186d   :  { %v12415_v63 = vpop.eup %9433 }
0x186e   :  { %v12417_v25 = vpop.eup %9435  ;;  %v7238_v51 = vsel %vm1053_vm9, %v12415_v63, 0.0 }
0x186f   :  { %v7198_v6 = vpop.xlane.xlu1 %7197  ;;  %v7232_v46 = vsel %vm1053_vm9, %v12417_v25, 0.0 }
0x1870   :  { %v7206_v28 = vsub.f32 %v7174_v12, %v7198_v6 }
0x1872   :  { %v7221_v14 = vmul.f32 1.442695, %v7206_v28 }
0x1873   :  { %7230 = vadd.xlane.f32.xlu0 %v7229_v33  ;;  %v5654_v5 = vpop.permute.xlu1 %5653 }
0x1874   :  { %9439 = vpow2.f32 %v7221_v14  ;;  %v12421_v27 = vpop.eup %9437  ;;  %v6003_v12 = vcombine.low %v12387_v56, %v5654_v5  ;;  %v6004_v55 = vcombine.high %v12387_v56, %v5654_v5 }
0x1875   :  { %v7241_v26 = vsel %vm1053_vm9, %v12421_v27, 0.0 }
0x1876   :  { %v6011_v49 = vrot.slane %v6003_v12, %v13220_v48  ;;  %v6018_v29 = vrot.slane %v6004_v55, %v13220_v48 }
0x1877   :  { %7236 = vadd.xlane.f32.xlu0 %v7235_v4 }
0x187b   :  { %7239 = vadd.xlane.f32.xlu0 %v7238_v51 }
0x187f   :  { %7233 = vadd.xlane.f32.xlu1 %v7232_v46  ;;  %7242 = vadd.xlane.f32.xlu0 %v7241_v26 }
0x1881   :  { %v12425_v47 = vpop.eup %9439 }
0x1882   :  { %v7244_v44 = vsel %vm1053_vm9, %v12425_v47, 0.0 }
0x1883   :  { %7245 = vadd.xlane.f32.xlu1 %v7244_v44 }
0x18c7   :  { %v7225_v2 = vpop.xlane.xlu0 %7224 }
0x18c8   :  { %9441 = vrcp.f32 %v7225_v2 }
0x18cb   :  { %v5658_v0 = vpop.permute.xlu0 %5657 }
0x18cc   :  { %v5815_v18 = vcombine.low %v12383_v22, %v5658_v0  ;;  %v5816_v43 = vcombine.high %v12383_v22, %v5658_v0 }
0x18ce   :  { %v5823_v7 = vrot.slane %v5815_v18, %v13220_v48  ;;  %v5830_v59 = vrot.slane %v5816_v43, %v13220_v48 }
0x18d0   :  { %v5831_v41 = vcombine.low %v5807_v62, %v5823_v7  ;;  %v5832_v60 = vcombine.high %v5807_v62, %v5823_v7  ;;  %v5847_v58 = vcombine.low %v5814_v8, %v5830_v59  ;;  %v5848_v42 = vcombine.high %v5814_v8, %v5830_v59 }
0x18d2   :  { %v5839_v54 = vrot.slane %v5831_v41, %v13221_v30  ;;  %v5846_v22 = vrot.slane %v5832_v60, %v13221_v30  ;;  %v12446_v39 = vrot.slane %v5847_v58, %v13221_v30  ;;  %v12451_v15 = vrot.slane %v5848_v42, %v13221_v30 }
0x18d3   :  { %v7228_v11 = vpop.xlane.xlu1 %7227 }
0x18d4   :  { %v6263_v16 = vrot.slane %v5839_v54, 1  ;;  %v6265_v52 = vrot.slane %v5846_v22, 1  ;;  %v6295_v56 = vrot.slane %v5839_v54, 2  ;;  %v6297_v23 = vrot.slane %v5846_v22, 2 }
0x18d5   :  { %v6327_v61 = vrot.slane %v5839_v54, 3  ;;  %v6329_v38 = vrot.slane %v5846_v22, 3  ;;  %v6359_v10 = vpack.c.bf16 %v5839_v54, %v5839_v54  ;;  %v6361_v19 = vpack.c.bf16 %v5846_v22, %v5846_v22 }
0x18d6   :  { %v12448_v37 = vpack.c.bf16 %v6263_v16, %v6263_v16  ;;  %v12454_v21 = vcombine.high %v5839_v54, %v12996_v35  ;;  %v12457_v13 = vcombine.high %v5846_v22, %v12996_v35  ;;  %v12459_v40 = vpack.c.bf16 %v6265_v52, %v6265_v52  ;;  %v9442_v22 = vpop.eup %9441 }
0x18d7   :  { %v5660_v32 = vpop.permute.xlu1 %5659  ;;  %v12463_v53 = vcombine.high %v12446_v39, %v12996_v35  ;;  %v12465_v17 = vpack.c.bf16 %v6295_v56, %v6295_v56  ;;  %v12467_v9 = vpack.c.bf16 %v6297_v23, %v6297_v23  ;;  %9443 = vrcp.f32 %v7228_v11 }
0x18d8   :  { %v12469_v45 = vpack.c.bf16 %v6327_v61, %v6327_v61  ;;  %v12471_v6 = vpack.c.bf16 %v6329_v38, %v6329_v38  ;;  %v7279_v28 = vunpack.c.l.b16 %v6359_v10  ;;  %v12473_v36 = vunpack.c.l.b16 %v6361_v19 }
0x18d9   :  { %v7433_v14 = vunpack.c.l.b16 %v12448_v37  ;;  %v7435_v33 = vunpack.c.l.b16 %v12459_v40  ;;  %v6019_v4 = vcombine.low %v12390_v50, %v5660_v32  ;;  %v6020_v51 = vcombine.high %v12390_v50, %v5660_v32 }
0x18da   :  { %v12481_v46 = vcombine.high %v12451_v15, %v12996_v35  ;;  %v6360_v26 = vpack.c.bf16 %v12454_v21, %v12454_v21  ;;  %v6362_v44 = vpack.c.bf16 %v12457_v13, %v12457_v13  ;;  %v6363_v24 = vpack.c.bf16 %v12446_v39, %v12446_v39 }
0x18db   :  { %v6027_v31 = vrot.slane %v6019_v4, %v13220_v48  ;;  %v6034_v3 = vrot.slane %v6020_v51, %v13220_v48  ;;  %v6364_v50 = vpack.c.bf16 %v12463_v53, %v12463_v53  ;;  %v6365_v0 = vpack.c.bf16 %v12451_v15, %v12451_v15 }
0x18dc   :  { %v6366_v5 = vpack.c.bf16 %v12481_v46, %v12481_v46  ;;  %v7280_v18 = vunpack.c.l.b16 %v6360_v26  ;;  %v7282_v43 = vunpack.c.l.b16 %v6362_v44  ;;  %v7283_v48 = vunpack.c.l.b16 %v6363_v24 }
0x18dd   :  { %v6035_v62 = vcombine.low %v6011_v49, %v6027_v31  ;;  %v6036_v8 = vcombine.high %v6011_v49, %v6027_v31  ;;  %v6051_v7 = vcombine.low %v6018_v29, %v6034_v3  ;;  %v6052_v59 = vcombine.high %v6018_v29, %v6034_v3 }
0x18de   :  { %v7287_v41 = vrot.slane %v7280_v18, 7  ;;  %v7289_v60 = vrot.slane %v12473_v36, 6  ;;  %v7284_v42 = vunpack.c.l.b16 %v6364_v50  ;;  %v7285_v29 = vunpack.c.l.b16 %v6365_v0 }
0x18df   :  { %v12503_v11 = vrot.slane %v6035_v62, %v13221_v30  ;;  %v6050_v54 = vrot.slane %v6036_v8, %v13221_v30  ;;  %v12507_v49 = vrot.slane %v6051_v7, %v13221_v30  ;;  %v7286_v16 = vunpack.c.l.b16 %v6366_v5 }
0x18e0   :  { %v12510_v52 = vrot.slane %v6052_v59, %v13221_v30  ;;  %v7288_v23 = vsel %vm1017_vm2, %v7287_v41, %v7279_v28  ;;  %v7291_v61 = vrot.slane %v7282_v43, 5  ;;  %v7293_v32 = vrot.slane %v7283_v48, 4 }
0x18e1   :  { %v6271_v56 = vrot.slane %v12503_v11, 1  ;;  %v6273_v38 = vrot.slane %v6050_v54, 1  ;;  %v6303_v10 = vrot.slane %v12503_v11, 2  ;;  %v6305_v19 = vrot.slane %v6050_v54, 2 }
0x18e2   :  { %v6337_v36 = vrot.slane %v6050_v54, 3  ;;  %v6367_v4 = vpack.c.bf16 %v12503_v11, %v12503_v11  ;;  %v6369_v51 = vpack.c.bf16 %v6050_v54, %v6050_v54  ;;  %v12523_v30 = vcombine.high %v12503_v11, %v12996_v35 }
0x18e3   :  { %v12517_v26 = vpack.c.bf16 %v6271_v56, %v6271_v56  ;;  %v12525_v28 = vpack.c.bf16 %v6273_v38, %v6273_v38  ;;  %v12527_v24 = vpack.c.bf16 %v6303_v10, %v6303_v10  ;;  %v7295_v31 = vrot.slane %v7284_v42, 3 }
0x18e4   :  { %v12519_v44 = vpop.eup %9443  ;;  %v12530_v3 = vcombine.high %v6050_v54, %v12996_v35  ;;  %v12534_v50 = vcombine.high %v12507_v49, %v12996_v35  ;;  %v12537_v5 = vunpack.c.l.b16 %v6369_v51  ;;  %v12539_v18 = vpack.c.bf16 %v6305_v19, %v6305_v19 }
0x18e5   :  { %v12541_v43 = vpack.c.bf16 %v6337_v36, %v6337_v36  ;;  %v12543_v62 = vunpack.c.l.b16 %v6367_v4  ;;  %v7290_v41 = vsel %vm1020_vm3, %v7289_v60, %v7288_v23  ;;  %v7297_v42 = vrot.slane %v7285_v29, 2 }
0x18e6   :  { %v7292_v54 = vsel %vm1023_vm4, %v7291_v61, %v7290_v41  ;;  %v7299_v56 = vrot.slane %v7286_v16, 1  ;;  %v6264_v38 = vrot.slane %v12454_v21, 1  ;;  %v6266_v19 = vrot.slane %v12457_v13, 1 }
0x18e7   :  { %v7294_v10 = vsel %vm1026_vm5, %v7293_v32, %v7292_v54  ;;  %v6267_v36 = vrot.slane %v12446_v39, 1  ;;  %v6268_v4 = vrot.slane %v12463_v53, 1  ;;  %v7255_v55 = vmul.f32 %v9442_v22, %v12393_v57 }
0x18e8   :  { %v7296_v51 = vsel %vm1029_vm6, %v7295_v31, %v7294_v10  ;;  %v6269_v60 = vrot.slane %v12451_v15, 1  ;;  %v6270_v23 = vrot.slane %v12481_v46, 1  ;;  %v6376_v16 = vpack.c.bf16 %v6264_v38, %v6264_v38 }
0x18e9   :  { %v7298_v29 = vsel %vm1032_vm7, %v7297_v42, %v7296_v51  ;;  %v6378_v61 = vpack.c.bf16 %v6266_v19, %v6266_v19  ;;  %v6379_v41 = vpack.c.bf16 %v6267_v36, %v6267_v36  ;;  %v6380_v54 = vpack.c.bf16 %v6268_v4, %v6268_v4 }
0x18ea   :  { %v7300_v32 = vsel %vm1035_vm8, %v7299_v56, %v7298_v29  ;;  %v6381_v58 = vpack.c.bf16 %v6269_v60, %v6269_v60  ;;  %v6382_v0 = vpack.c.bf16 %v6270_v23, %v6270_v23  ;;  %v7434_v2 = vunpack.c.l.b16 %v6376_v16 }
0x18eb   :  { %v7301_v48 = vpack.c.b16 %v7300_v32, %v7300_v32  ;;  %v7436_v12 = vunpack.c.l.b16 %v6378_v61  ;;  %v7437_v31 = vunpack.c.l.b16 %v6379_v41  ;;  %v7263_v10 = vpack.c.bf16 %v7255_v55, %v7255_v55 }
0x18ec   :  { %v7438_v57 = vunpack.c.l.b16 %v6380_v54  ;;  %v7439_v22 = vunpack.c.l.b16 %v6381_v58  ;;  %v7440_v8 = vunpack.c.l.b16 %v6382_v0  ;;  %v7441_v7 = vrot.slane %v7434_v2, 7 }
0x18ed   :  { %v7306_v59 = vsel %vm1900_vm10, %v7301_v48, 0  ;;  %v7443_v42 = vrot.slane %v7435_v33, 6  ;;  %v7445_v38 = vrot.slane %v7436_v12, 5  ;;  %v7447_v56 = vrot.slane %v7437_v31, 4 }
0x18ee   :  { %9133 = vmatpush3.bf16.msra.mxu1 %v7306_v59  ;;  %v7449_v19 = vrot.slane %v7438_v57, 3  ;;  %v7451_v36 = vrot.slane %v7439_v22, 2  ;;  %v12567_v4 = vcombine.high %v12510_v52, %v12996_v35  ;;  %v7442_v55 = vsel %vm1017_vm2, %v7441_v7, %v7433_v14 }
0x18ef   :  { %9144 = vmatprep.subr.bf16.mxu1 %v12996_v35  ;;  %v6368_v2 = vpack.c.bf16 %v12523_v30, %v12523_v30  ;;  %v6370_v40 = vpack.c.bf16 %v12530_v3, %v12530_v3  ;;  %v6371_v33 = vpack.c.bf16 %v12507_v49, %v12507_v49  ;;  %v7444_v12 = vsel %vm1020_vm3, %v7443_v42, %v7442_v55 }
0x18f0   :  { %v6372_v58 = vpack.c.bf16 %v12534_v50, %v12534_v50  ;;  %v6373_v0 = vpack.c.bf16 %v12510_v52, %v12510_v52  ;;  %v6374_v37 = vpack.c.bf16 %v12567_v4, %v12567_v4  ;;  %v7446_v14 = vsel %vm1023_vm4, %v7445_v38, %v7444_v12 }
0x18f1   :  { %9135 = vmatmul.mubr.msk.bf16.vlgmr.msra.gmra.mxu1 %vm1053_vm9, %v7263_v10  ;;  %v7357_v7 = vunpack.c.l.b16 %v6368_v2  ;;  %v7359_v59 = vunpack.c.l.b16 %v6370_v40  ;;  %v7360_v48 = vunpack.c.l.b16 %v6371_v33  ;;  %v7448_v51 = vsel %vm1026_vm5, %v7447_v56, %v7446_v14 }
0x18f2   :  { %v7361_v60 = vunpack.c.l.b16 %v6372_v58  ;;  %v7362_v23 = vunpack.c.l.b16 %v6373_v0  ;;  %v7363_v29 = vunpack.c.l.b16 %v6374_v37  ;;  %9146 = vmatprep.mubr.msk.bf16.mxu1 %vm9501_vm1, %v12996_v35  ;;  %v7450_v16 = vsel %vm1029_vm6, %v7449_v19, %v7448_v51 }
0x18f3   :  { %v7453_v61 = vrot.slane %v7440_v8, 1  ;;  %v7364_v41 = vrot.slane %v7357_v7, 7  ;;  %v7368_v32 = vrot.slane %v7359_v59, 5  ;;  %v7452_v54 = vsel %vm1032_vm7, %v7451_v36, %v7450_v16 }
0x18f4   :  { %v7370_v31 = vrot.slane %v7360_v48, 4  ;;  %v7372_v10 = vrot.slane %v7361_v60, 3  ;;  %v7374_v57 = vrot.slane %v7362_v23, 2  ;;  %v7376_v38 = vrot.slane %v7363_v29, 1 }
0x18f5   :  { %v7454_v22 = vsel %vm1035_vm8, %v7453_v61, %v7452_v54  ;;  %v7365_v42 = vsel %vm1017_vm2, %v7364_v41, %v12543_v62  ;;  %v6272_v56 = vrot.slane %v12523_v30, 1  ;;  %v13222_v2 = vrot.slane %v12537_v5, 6 }
0x18f6   :  { %v7455_v55 = vpack.c.b16 %v7454_v22, %v7454_v22  ;;  %v6274_v19 = vrot.slane %v12530_v3, 1  ;;  %v6275_v36 = vrot.slane %v12507_v49, 1  ;;  %v7256_v33 = vmul.f32 %v12519_v44, %v12397_v20 }
0x18f7   :  { %v7367_v8 = vsel %vm1020_vm3, %v13222_v2, %v7365_v42  ;;  %v6276_v12 = vrot.slane %v12534_v50, 1  ;;  %v6277_v62 = vrot.slane %v12510_v52, 1  ;;  %v6278_v5 = vrot.slane %v12567_v4, 1 }
0x18f8   :  { %v7369_v40 = vsel %vm1023_vm4, %v7368_v32, %v7367_v8  ;;  %v7460_v58 = vsel %vm1900_vm10, %v7455_v55, 0  ;;  %v6384_v37 = vpack.c.bf16 %v6272_v56, %v6272_v56  ;;  %v6386_v7 = vpack.c.bf16 %v6274_v19, %v6274_v19 }
0x18f9   :  { %v7371_v0 = vsel %vm1026_vm5, %v7370_v31, %v7369_v40  ;;  %9145 = vmatpush3.bf16.msra.mxu1 %v7460_v58  ;;  %v6387_v59 = vpack.c.bf16 %v6275_v36, %v6275_v36  ;;  %v6388_v48 = vpack.c.bf16 %v6276_v12, %v6276_v12  ;;  %v6389_v44 = vpack.c.bf16 %v6277_v62, %v6277_v62 }
0x18fa   :  { %v7373_v14 = vsel %vm1029_vm6, %v7372_v10, %v7371_v0  ;;  %v6390_v60 = vpack.c.bf16 %v6278_v5, %v6278_v5  ;;  %v7511_v23 = vunpack.c.l.b16 %v6384_v37  ;;  %9156 = vmatprep.subr.bf16.mxu1 %v12996_v35  ;;  %v7513_v16 = vunpack.c.l.b16 %v6386_v7 }
0x18fb   :  { %v7375_v20 = vsel %vm1032_vm7, %v7374_v57, %v7373_v14  ;;  %v7514_v61 = vunpack.c.l.b16 %v6387_v59  ;;  %v7515_v41 = vunpack.c.l.b16 %v6388_v48  ;;  %v7264_v54 = vpack.c.bf16 %v7256_v33, %v7256_v33 }
0x18fc   :  { %v7231_v51 = vpop.xlane.xlu0 %7230  ;;  %v7377_v29 = vsel %vm1035_vm8, %v7376_v38, %v7375_v20  ;;  %v7516_v31 = vunpack.c.l.b16 %v6389_v44  ;;  %v7518_v10 = vrot.slane %v7511_v23, 7  ;;  %v7517_v22 = vunpack.c.l.b16 %v6390_v60 }
0x18fd   :  { %v7378_v32 = vpack.c.b16 %v7377_v29, %v7377_v29  ;;  %v13223_v42 = vunpack.c.l.b16 %v12525_v28  ;;  %v7522_v55 = vrot.slane %v7513_v16, 5  ;;  %v7524_v57 = vrot.slane %v7514_v61, 4 }
0x18fe   :  { %v13224_v19 = vunpack.c.l.b16 %v12517_v26  ;;  %v7526_v36 = vrot.slane %v7515_v41, 3  ;;  %v7528_v40 = vrot.slane %v7516_v31, 2  ;;  %9445 = vrcp.f32 %v7231_v51 }
0x18ff   :  { %v7520_v56 = vrot.slane %v13223_v42, 6  ;;  %v7383_v8 = vsel %vm1900_vm10, %v7378_v32, 0  ;;  %v6296_v12 = vrot.slane %v12454_v21, 2  ;;  %v6298_v28 = vrot.slane %v12457_v13, 2 }
0x1900   :  { %v7237_v2 = vpop.xlane.xlu0 %7236  ;;  %v7519_v38 = vsel %vm1017_vm2, %v7518_v10, %v13224_v19  ;;  %9139 = vmatpush3.bf16.msra.mxu0 %v7383_v8  ;;  %v6299_v58 = vrot.slane %v12446_v39, 2  ;;  %v6300_v26 = vrot.slane %v12463_v53, 2  ;;  %v6301_v5 = vrot.slane %v12451_v15, 2 }
0x1901   :  { %v7521_v33 = vsel %vm1020_vm3, %v7520_v56, %v7519_v38  ;;  %9150 = vmatprep.subr.bf16.mxu0 %v12996_v35  ;;  %9447 = vrcp.f32 %v7237_v2  ;;  %v6302_v37 = vrot.slane %v12481_v46, 2  ;;  %v6392_v14 = vpack.c.bf16 %v6296_v12, %v6296_v12 }
0x1902   :  { %v7523_v62 = vsel %vm1023_vm4, %v7522_v55, %v7521_v33  ;;  %v7530_v59 = vrot.slane %v7517_v22, 1  ;;  %v6394_v48 = vpack.c.bf16 %v6298_v28, %v6298_v28  ;;  %v6395_v51 = vpack.c.bf16 %v6299_v58, %v6299_v58 }
0x1903   :  { %v7525_v0 = vsel %vm1026_vm5, %v7524_v57, %v7523_v62  ;;  %9141 = vmatmul.mubr.msk.bf16.vlgmr.msra.gmra.mxu0 %vm1053_vm9, %v7264_v54  ;;  %v6396_v23 = vpack.c.bf16 %v6300_v26, %v6300_v26  ;;  %v6397_v29 = vpack.c.bf16 %v6301_v5, %v6301_v5  ;;  %v6398_v16 = vpack.c.bf16 %v6302_v37, %v6302_v37 }
0x1904   :  { %v7527_v7 = vsel %vm1029_vm6, %v7526_v36, %v7525_v0  ;;  %v7240_v44 = vpop.xlane.xlu0 %7239  ;;  %9152 = vmatprep.mubr.msk.bf16.mxu0 %vm9501_vm1, %v12996_v35  ;;  %v7588_v41 = vunpack.c.l.b16 %v6392_v14  ;;  %v7590_v32 = vunpack.c.l.b16 %v6394_v48  ;;  %v7591_v31 = vunpack.c.l.b16 %v6395_v51 }
0x1905   :  { %v7529_v20 = vsel %vm1032_vm7, %v7528_v40, %v7527_v7  ;;  %v7592_v10 = vunpack.c.l.b16 %v6396_v23  ;;  %v7593_v22 = vunpack.c.l.b16 %v6397_v29  ;;  %v7666_v42 = vunpack.c.l.b16 %v12539_v18 }
0x1906   :  { %v7531_v61 = vsel %vm1035_vm8, %v7530_v59, %v7529_v20  ;;  %v7594_v56 = vunpack.c.l.b16 %v6398_v16  ;;  %v7595_v55 = vrot.slane %v7588_v41, 7  ;;  %v13225_v2 = vunpack.c.l.b16 %v12467_v9 }
0x1907   :  { %v7532_v54 = vpack.c.b16 %v7531_v61, %v7531_v61  ;;  %v7599_v19 = vrot.slane %v7590_v32, 5  ;;  %v7601_v38 = vrot.slane %v7591_v31, 4  ;;  %v13226_v36 = vunpack.c.l.b16 %v12465_v17 }
0x1908   :  { %v7234_v60 = vpop.xlane.xlu1 %7233  ;;  %v7597_v8 = vrot.slane %v13225_v2, 6  ;;  %v7603_v33 = vrot.slane %v7592_v10, 3  ;;  %v7605_v12 = vrot.slane %v7593_v22, 2  ;;  %v7607_v28 = vrot.slane %v7594_v56, 1  ;;  %v7243_v51 = vpop.xlane.xlu0 %7242 }
0x1909   :  { %9449 = vrcp.f32 %v7234_v60  ;;  %v7537_v57 = vsel %vm1900_vm10, %v7532_v54, 0  ;;  %v7596_v40 = vsel %vm1017_vm2, %v7595_v55, %v13226_v36  ;;  %v6304_v62 = vrot.slane %v12523_v30, 2 }
0x190a   :  { %9451 = vrcp.f32 %v7240_v44  ;;  %9151 = vmatpush3.bf16.msra.mxu0 %v7537_v57  ;;  %v7598_v18 = vsel %vm1020_vm3, %v7597_v8, %v7596_v40  ;;  %v6306_v58 = vrot.slane %v12530_v3, 2  ;;  %v6307_v9 = vrot.slane %v12507_v49, 2 }
0x190b   :  { %9162 = vmatprep.subr.bf16.mxu0 %v12996_v35  ;;  %v7600_v26 = vsel %vm1023_vm4, %v7599_v19, %v7598_v18  ;;  %v6308_v0 = vrot.slane %v12534_v50, 2  ;;  %v6309_v17 = vrot.slane %v12510_v52, 2  ;;  %v6310_v5 = vrot.slane %v12567_v4, 2  ;;  %v9446_v48 = vpop.eup %9445 }
0x190c   :  { %v7602_v37 = vsel %vm1026_vm5, %v7601_v38, %v7600_v26  ;;  %v6400_v14 = vpack.c.bf16 %v6304_v62, %v6304_v62  ;;  %v6402_v7 = vpack.c.bf16 %v6306_v58, %v6306_v58  ;;  %v6403_v59 = vpack.c.bf16 %v6307_v9, %v6307_v9 }
0x190d   :  { %v7604_v20 = vsel %vm1029_vm6, %v7603_v33, %v7602_v37  ;;  %v6404_v44 = vpack.c.bf16 %v6308_v0, %v6308_v0  ;;  %v6405_v60 = vpack.c.bf16 %v6309_v17, %v6309_v17  ;;  %v6406_v23 = vpack.c.bf16 %v6310_v5, %v6310_v5 }
0x190e   :  { %v9448_v29 = vpop.eup %9447  ;;  %v7257_v16 = vmul.f32 %v9446_v48, %v12407_v1  ;;  %v7606_v61 = vsel %vm1032_vm7, %v7605_v12, %v7604_v20  ;;  %v7665_v41 = vunpack.c.l.b16 %v6400_v14  ;;  %v7667_v32 = vunpack.c.l.b16 %v6402_v7 }
0x190f   :  { %v7608_v54 = vsel %vm1035_vm8, %v7607_v28, %v7606_v61  ;;  %v7259_v31 = vmul.f32 %v9448_v29, %v12411_v34  ;;  %v7668_v10 = vunpack.c.l.b16 %v6403_v59  ;;  %v7669_v22 = vunpack.c.l.b16 %v6404_v44 }
0x1910   :  { %9453 = vrcp.f32 %v7243_v51  ;;  %v7265_v56 = vpack.c.bf16 %v7257_v16, %v7257_v16  ;;  %v7609_v55 = vpack.c.b16 %v7608_v54, %v7608_v54  ;;  %v7670_v57 = vunpack.c.l.b16 %v6405_v60 }
0x1911   :  { %v7267_v2 = vpack.c.bf16 %v7259_v31, %v7259_v31  ;;  %v7671_v8 = vunpack.c.l.b16 %v6406_v23  ;;  %v7672_v19 = vrot.slane %v7665_v41, 7  ;;  %v7674_v38 = vrot.slane %v7666_v42, 6 }
0x1912   :  { %9147 = vmatmul.mubr.msk.bf16.vlgmr.msra.gmra.mxu1 %vm1053_vm9, %v7265_v56  ;;  %v7614_v1 = vsel %vm1900_vm10, %v7609_v55, 0  ;;  %v7676_v40 = vrot.slane %v7667_v32, 5  ;;  %v7678_v33 = vrot.slane %v7668_v10, 4  ;;  %v7680_v12 = vrot.slane %v7669_v22, 3 }
0x1913   :  { %9157 = vmatpush3.bf16.msra.mxu1 %v7614_v1  ;;  %9158 = vmatprep.mubr.msk.bf16.mxu1 %vm9501_vm1, %v12996_v35  ;;  %v13227_v28 = vunpack.c.l.b16 %v12527_v24  ;;  %v7682_v62 = vrot.slane %v7670_v57, 2  ;;  %v6328_v42 = vrot.slane %v12454_v21, 3  ;;  %v6330_v26 = vrot.slane %v12457_v13, 3 }
0x1914   :  { %9168 = vmatprep.subr.bf16.mxu1 %v12996_v35  ;;  %v6331_v0 = vrot.slane %v12446_v39, 3  ;;  %v6332_v17 = vrot.slane %v12463_v53, 3  ;;  %v6333_v24 = vrot.slane %v12451_v15, 3  ;;  %v6334_v37 = vrot.slane %v12481_v46, 3  ;;  %v7246_v53 = vpop.xlane.xlu1 %7245 }
0x1915   :  { %v7673_v18 = vsel %vm1017_vm2, %v7672_v19, %v13227_v28  ;;  %v6408_v14 = vpack.c.bf16 %v6328_v42, %v6328_v42  ;;  %v6410_v7 = vpack.c.bf16 %v6330_v26, %v6330_v26  ;;  %v7684_v48 = vrot.slane %v7671_v8, 1 }
0x1916   :  { %v9450_v36 = vpop.eup %9449  ;;  %v7675_v9 = vsel %vm1020_vm3, %v7674_v38, %v7673_v18  ;;  %v6411_v59 = vpack.c.bf16 %v6331_v0, %v6331_v0  ;;  %v6412_v39 = vpack.c.bf16 %v6332_v17, %v6332_v17  ;;  %v6413_v51 = vpack.c.bf16 %v6333_v24, %v6333_v24 }
0x1917   :  { %v7258_v34 = vmul.f32 %v9450_v36, %v12417_v25  ;;  %v9452_v58 = vpop.eup %9451  ;;  %v7677_v25 = vsel %vm1023_vm4, %v7676_v40, %v7675_v9  ;;  %v6414_v44 = vpack.c.bf16 %v6334_v37, %v6334_v37  ;;  %v7742_v60 = vunpack.c.l.b16 %v6408_v14 }
0x1918   :  { %v7679_v21 = vsel %vm1026_vm5, %v7678_v33, %v7677_v25  ;;  %v7744_v15 = vunpack.c.l.b16 %v6410_v7  ;;  %v13228_v46 = vrot.slane %v12503_v11, 3  ;;  %v7745_v16 = vunpack.c.l.b16 %v6411_v59 }
0x1919   :  { %v7266_v5 = vpack.c.bf16 %v7258_v34, %v7258_v34  ;;  %v7681_v13 = vsel %vm1029_vm6, %v7680_v12, %v7679_v21  ;;  %v7746_v61 = vunpack.c.l.b16 %v6412_v39  ;;  %v7820_v41 = vunpack.c.l.b16 %v12541_v43 }
0x191a   :  { %v7683_v20 = vsel %vm1032_vm7, %v7682_v62, %v7681_v13  ;;  %v6415_v23 = vpack.c.bf16 %v13228_v46, %v13228_v46  ;;  %9159 = vmatmul.mubr.msk.bf16.vlgmr.msra.gmra.mxu1 %vm1053_vm9, %v7267_v2  ;;  %v7747_v54 = vunpack.c.l.b16 %v6413_v51  ;;  %v7749_v31 = vrot.slane %v7742_v60, 7 }
0x191b   :  { %9153 = vmatmul.mubr.msk.bf16.vlgmr.msra.gmra.mxu0 %vm1053_vm9, %v7266_v5  ;;  %v7685_v29 = vsel %vm1035_vm8, %v7684_v48, %v7683_v20  ;;  %9455 = vrcp.f32 %v7246_v53  ;;  %v7748_v10 = vunpack.c.l.b16 %v6414_v44  ;;  %v13229_v22 = vunpack.c.l.b16 %v12471_v6  ;;  %9170 = vmatprep.mubr.msk.bf16.mxu1 %vm9501_vm1, %v12996_v35 }
0x191c   :  { %9164 = vmatprep.mubr.msk.bf16.mxu0 %vm9501_vm1, %v12996_v35  ;;  %v7686_v32 = vpack.c.b16 %v7685_v29, %v7685_v29  ;;  %v7753_v55 = vrot.slane %v7744_v15, 5  ;;  %v13230_v57 = vunpack.c.l.b16 %v12469_v45  ;;  %v7755_v8 = vrot.slane %v7745_v16, 4 }
0x191d   :  { %v7751_v56 = vrot.slane %v13229_v22, 6  ;;  %v7757_v2 = vrot.slane %v7746_v61, 3  ;;  %v9454_v19 = vpop.eup %9453  ;;  %v7759_v36 = vrot.slane %v7747_v54, 2  ;;  %v7260_v6 = vmul.f32 %v9452_v58, %v12415_v63 }
0x191e   :  { %v7691_v11 = vsel %vm1900_vm10, %v7686_v32, 0  ;;  %v7750_v43 = vsel %vm1017_vm2, %v7749_v31, %v13230_v57  ;;  %v6336_v1 = vrot.slane %v12523_v30, 3  ;;  %v6338_v33 = vrot.slane %v12530_v3, 3 }
0x191f   :  { %9163 = vmatpush3.bf16.msra.mxu0 %v7691_v11  ;;  %v7752_v38 = vsel %vm1020_vm3, %v7751_v56, %v7750_v43  ;;  %v6339_v45 = vrot.slane %v12507_v49, 3  ;;  %v6340_v12 = vrot.slane %v12534_v50, 3  ;;  %v7761_v28 = vrot.slane %v7748_v10, 1 }
0x1920   :  { %v7754_v40 = vsel %vm1023_vm4, %v7753_v55, %v7752_v38  ;;  %9174 = vmatprep.subr.bf16.mxu0 %v12996_v35  ;;  %v7268_v18 = vpack.c.bf16 %v7260_v6, %v7260_v6  ;;  %v6341_v62 = vrot.slane %v12510_v52, 3  ;;  %v6342_v30 = vrot.slane %v12567_v4, 3 }
0x1921   :  { %v7756_v34 = vsel %vm1026_vm5, %v7755_v8, %v7754_v40  ;;  %v6416_v42 = vpack.c.bf16 %v6336_v1, %v6336_v1  ;;  %v6418_v58 = vpack.c.bf16 %v6338_v33, %v6338_v33  ;;  %v6419_v3 = vpack.c.bf16 %v6339_v45, %v6339_v45  ;;  %v9319_v40 = vld [vmem:[%s12859_s3 + $0x28] sm:$0xff]  }
0x1922   :  { %v7758_v63 = vsel %vm1029_vm6, %v7757_v2, %v7756_v34  ;;  %v6420_v49 = vpack.c.bf16 %v6340_v12, %v6340_v12  ;;  %v6421_v26 = vpack.c.bf16 %v6341_v62, %v6341_v62  ;;  %v6422_v0 = vpack.c.bf16 %v6342_v30, %v6342_v30 }
0x1923   :  { %v7760_v9 = vsel %vm1032_vm7, %v7759_v36, %v7758_v63  ;;  %9165 = vmatmul.mubr.msk.bf16.vlgmr.msra.gmra.mxu0 %vm1053_vm9, %v7268_v18  ;;  %v7819_v17 = vunpack.c.l.b16 %v6416_v42  ;;  %v7821_v5 = vunpack.c.l.b16 %v6418_v58  ;;  %v7261_v4 = vmul.f32 %v9454_v19, %v12421_v27 }
0x1924   :  { %v7762_v50 = vsel %vm1035_vm8, %v7761_v28, %v7760_v9  ;;  %9176 = vmatprep.mubr.msk.bf16.mxu0 %vm9501_vm1, %v12996_v35  ;;  %v7822_v25 = vunpack.c.l.b16 %v6419_v3  ;;  %v7818_v24 = vunpack.c.l.b16 %v6415_v23  ;;  %v7823_v37 = vunpack.c.l.b16 %v6420_v49  ;;  %v9320_v49 = vld [vmem:[%s12859_s3 + $0x20] sm:$0xff]  }
0x1925   :  { %v7763_v52 = vpack.c.b16 %v7762_v50, %v7762_v50  ;;  %v7826_v21 = vrot.slane %v7819_v17, 7  ;;  %v7824_v7 = vunpack.c.l.b16 %v6421_v26  ;;  %v7828_v59 = vrot.slane %v7820_v41, 6 }
0x1926   :  { %v7825_v13 = vunpack.c.l.b16 %v6422_v0  ;;  %v7830_v39 = vrot.slane %v7821_v5, 5  ;;  %v7269_v51 = vpack.c.bf16 %v7261_v4, %v7261_v4  ;;  %v7832_v20 = vrot.slane %v7822_v25, 4 }
0x1927   :  { %v7768_v14 = vsel %vm1900_vm10, %v7763_v52, 0  ;;  %v7827_v48 = vsel %vm1017_vm2, %v7826_v21, %v7818_v24  ;;  %v7834_v60 = vrot.slane %v7823_v37, 3  ;;  %v7836_v46 = vrot.slane %v7824_v7, 2 }
0x1928   :  { %9169 = vmatpush3.bf16.msra.mxu1 %v7768_v14  ;;  %v7829_v53 = vsel %vm1020_vm3, %v7828_v59, %v7827_v48  ;;  %v9456_v27 = vpop.eup %9455  ;;  %v7838_v29 = vrot.slane %v7825_v13, 1 }
0x1929   :  { %9180 = vmatprep.subr.bf16.mxu1 %v12996_v35  ;;  %v7831_v44 = vsel %vm1023_vm4, %v7830_v39, %v7829_v53  ;;  %v7262_v41 = vmul.f32 %v9456_v27, %v12425_v47 }
0x192a   :  { %v7833_v15 = vsel %vm1026_vm5, %v7832_v20, %v7831_v44 }
0x192b   :  { %9171 = vmatmul.mubr.msk.bf16.vlgmr.msra.gmra.mxu1 %vm1053_vm9, %v7269_v51  ;;  %v7835_v23 = vsel %vm1029_vm6, %v7834_v60, %v7833_v15  ;;  %v7270_v31 = vpack.c.bf16 %v7262_v41, %v7262_v41  ;;  %v12754_v15 = vld [vmem:[%s12862_s6 + $0x10] sm:$0xff]  ;;  %v13233_v41 = vld [vmem:[#allocation29_spill] sm:$0xff] }
0x192c   :  { %9184 = vmatprep.mubr.msk.bf16.mxu1 %vm9501_vm1, %v12996_v35  ;;  %v7837_v16 = vsel %vm1032_vm7, %v7836_v46, %v7835_v23  ;;  %9181 = vmatpush3.bf16.msra.mxu1 %v9319_v40  ;;  %v13232_v46 = vld [vmem:[#allocation7_spill] sm:$0xff]  ;;  %v9321_v40 = vld [vmem:[%s12860_s4 + $0x28] sm:$0xff]  }
0x192d   :  { %v7839_v61 = vsel %vm1035_vm8, %v7838_v29, %v7837_v16  ;;  %9182 = vmatprep.subr.bf16.mxu1 %v12996_v35  ;;  %v7926_v23 = vrot.slane %v12754_v15, %v13232_v46 }
0x192e   :  { %v7840_v32 = vpack.c.b16 %v7839_v61, %v7839_v61 }
0x1930   :  { %v7845_v54 = vsel %vm1900_vm10, %v7840_v32, 0  ;;  %9183 = vmatpush3.bf16.msra.mxu1 %v9320_v49 }
0x1931   :  { %9175 = vmatpush3.bf16.msra.mxu0 %v7845_v54  ;;  %9196 = vmatprep.subr.bf16.mxu1 %v12996_v35 }
0x1932   :  { %9188 = vmatprep.subr.bf16.mxu0 %v12996_v35 }
0x1934   :  { %9177 = vmatmul.mubr.msk.bf16.vlgmr.msra.gmra.mxu0 %vm1053_vm9, %v7270_v31 }
0x1935   :  { %9192 = vmatprep.mubr.msk.bf16.mxu0 %vm9501_vm1, %v12996_v35  ;;  %9189 = vmatpush3.bf16.msra.mxu0 %v9321_v40 }
0x1936   :  { %9190 = vmatprep.subr.bf16.mxu0 %v12996_v35 }
0x19b1   :  { %v7342_v10 = vpop.f32.mrf.mxu1 }
0x19b3   :  { %v9136_v22 = vpop.f32.mrf.mxu1 }
0x19b5   :  { %v7345_v56 = vpop.f32.mrf.mxu1 }
0x19b6   :  { %v13234_v56 = vld [vmem:[#allocation23_spill] sm:$0xff] }
0x19b7   :  { %v9137_v55 = vpop.f32.mrf.mxu1 }
0x19c3   :  { %v7419_v11 = vpop.f32.mrf.mxu0 }
0x19c5   :  { %v9142_v57 = vpop.f32.mrf.mxu0 }
0x19c7   :  { %v7422_v43 = vpop.f32.mrf.mxu0 }
0x19c9   :  { %v9143_v47 = vpop.f32.mrf.mxu0 }
0x19d2   :  { %v7496_v8 = vpop.f32.mrf.mxu1 }
0x19d4   :  { %v9148_v2 = vpop.f32.mrf.mxu1 }
0x19d6   :  { %v7499_v19 = vpop.f32.mrf.mxu1 }
0x19d8   :  { %v9149_v36 = vpop.f32.mrf.mxu1 }
0x19da   :  { %v7650_v33 = vpop.f32.mrf.mxu1 }
0x19db   :  { %v7573_v38 = vpop.f32.mrf.mxu0 }
0x19dc   :  { %v9282_v6 = vpack.i.bf16 %v7573_v38, %v7496_v8  ;;  %v9160_v12 = vpop.f32.mrf.mxu1 }
0x19dd   :  { %v9154_v1 = vpop.f32.mrf.mxu0 }
0x19de   :  { %9283 = vrot.lane.b32.xlu0 %v9282_v6, %s9516_s18  ;;  %v7653_v28 = vpop.f32.mrf.mxu1 }
0x19df   :  { %v7576_v45 = vpop.f32.mrf.mxu0 }
0x19e0   :  { %v9161_v18 = vpop.f32.mrf.mxu1 }
0x19e1   :  { %v9155_v34 = vpop.f32.mrf.mxu0 }
0x19e3   :  { %v7727_v62 = vpop.f32.mrf.mxu0 }
0x19e4   :  { %v9287_v63 = vpack.i.bf16 %v7727_v62, %v7650_v33  ;;  %v9322_v33 = vld [vmem:[%s12860_s4 + $0x20] sm:$0xff]  }
0x19e5   :  { %v9166_v30 = vpop.f32.mrf.mxu0  ;;  %9191 = vmatpush3.bf16.msra.mxu0 %v9322_v33 }
0x19e6   :  { %9288 = vrot.lane.b32.xlu1 %v9287_v63, %s13231_s26  ;;  %9208 = vmatprep.subr.bf16.mxu0 %v12996_v35  ;;  %v13235_v30 = vld [vmem:[#allocation17_spill] sm:$0xff] }
0x19e7   :  { %v7730_v42 = vpop.f32.mrf.mxu0 }
0x19e8   :  { %v8014_v42 = vrot.slane %v12754_v15, %v13235_v30 }
0x19e9   :  { %v9167_v58 = vpop.f32.mrf.mxu0 }
0x19eb   :  { %v7804_v9 = vpop.f32.mrf.mxu1 }
0x19ed   :  { %v9172_v3 = vpop.f32.mrf.mxu1 }
0x19ef   :  { %v7807_v26 = vpop.f32.mrf.mxu1 }
0x19f0   :  { %v13236_v26 = vld [vmem:[#allocation14_spill] sm:$0xff] }
0x19f1   :  { %v9173_v50 = vpop.f32.mrf.mxu1 }
0x19f2   :  { %v8020_v50 = vrot.slane %v12754_v15, %v13236_v26 }
0x19f4   :  { %v7881_v0 = vpop.f32.mrf.mxu0 }
0x19f5   :  { %v9292_v17 = vpack.i.bf16 %v7881_v0, %v7804_v9 }
0x19f6   :  { %v9178_v5 = vpop.f32.mrf.mxu0 }
0x19f7   :  { %9293 = vrot.lane.b32.xlu1 %v9292_v17, %s13142_s23 }
0x19f8   :  { %v7884_v52 = vpop.f32.mrf.mxu0 }
0x19fa   :  { %v9179_v4 = vpop.f32.mrf.mxu0 }
0x19fb   :  { %v9323_v4 = vld [vmem:[%s12861_s5 + $0x58] sm:$0xff]  }
0x1a50   :  { %v9284_v25 = vpop.permute.xlu0 %9283 }
0x1a51   :  { %v9286_v37 = vunpack.i.h.bf16 %v9284_v25  ;;  %v9285_v21 = vunpack.i.l.bf16 %v9284_v25  ;;  %v9324_v25 = vld [vmem:[%s12861_s5 + $0x50] sm:$0xff]  }
0x1a53   :  { %v7912_v13 = vsel %vm1053_vm9, %v7419_v11, %v9286_v37  ;;  %v7911_v48 = vsel %vm1053_vm9, %v7342_v10, %v9285_v21  ;;  %v9326_v37 = vld [vmem:[%s12861_s5 + $0x40] sm:$0xff]   ;;  %v13237_v21 = vld [vmem:[#allocation15_spill] sm:$0xff] }
0x1a58   :  { %v9289_v24 = vpop.permute.xlu1 %9288 }
0x1a59   :  { %v9291_v14 = vunpack.i.h.bf16 %v9289_v24  ;;  %v9290_v7 = vunpack.i.l.bf16 %v9289_v24  ;;  %v9325_v24 = vld [vmem:[%s12861_s5 + $0x48] sm:$0xff]  }
0x1a5b   :  { %v7914_v53 = vsel %vm2509_vm11, %v7912_v13, %v9291_v14  ;;  %v7913_v20 = vsel %vm2509_vm11, %v7911_v48, %v9290_v7  ;;  %v8032_v14 = vrot.slane %v12754_v15, %v13237_v21 }
0x1a69   :  { %v9294_v59 = vpop.permute.xlu1 %9293 }
0x1a6a   :  { %v9296_v39 = vunpack.i.h.bf16 %v9294_v59  ;;  %v9295_v51 = vunpack.i.l.bf16 %v9294_v59 }
0x1a6c   :  { %v7916_v27 = vsel %vm2512_vm12, %v7914_v53, %v9296_v39  ;;  %v7915_v44 = vsel %vm2512_vm12, %v7913_v20, %v9295_v51 }
0x1a6d   :  { %v7922_v60 = vpack.c.bf16 %v7916_v27, %v7915_v44 }
0x1a6f   :  { %9185 = vmatmul.mubr.msk.bf16.vlgmr.msra.gmra.mxu1 %vm66_vm0, %v7922_v60 }
0x1a70   :  { %9204 = vmatprep.mubr.msk.bf16.mxu1 %vm9501_vm1, %v12996_v35  ;;  %9197 = vmatpush3.bf16.msra.mxu1 %v9323_v4 }
0x1a71   :  { %9198 = vmatprep.subr.bf16.mxu1 %v12996_v35 }
0x1a74   :  { %9199 = vmatpush3.bf16.msra.mxu1 %v9324_v25 }
0x1a75   :  { %9200 = vmatprep.subr.bf16.mxu1 %v12996_v35 }
0x1a78   :  { %9201 = vmatpush3.bf16.msra.mxu1 %v9325_v24 }
0x1a79   :  { %9202 = vmatprep.subr.bf16.mxu1 %v12996_v35 }
0x1a7c   :  { %9203 = vmatpush3.bf16.msra.mxu1 %v9326_v37 }
0x1a7d   :  { %9224 = vmatprep.subr.bf16.mxu1 %v12996_v35 }
0x1b2f   :  { %v7976_v29 = vpop.f32.mrf.mxu1 }
0x1b30   :  { %v7977_v16 = vadd.f32 %v7976_v29, %v7926_v23 }
0x1b31   :  { %v9186_v61 = vpop.f32.mrf.mxu1 }
0x1b32   :  { %v7983_v32 = vadd.f32 %v7977_v16, %v13233_v41 }
0x1b33   :  { %v7979_v54 = vpop.f32.mrf.mxu1 }
0x1b34   :  { %v7980_v31 = vadd.f32 %v7979_v54, %v7926_v23  ;;  %v7985_v10 = vsel %vm66_vm0, %v7983_v32, 0.0 }
0x1b35   :  { %7986 = vadd.xlane.f32.xlu1 %v7985_v10  ;;  %v9187_v22 = vpop.f32.mrf.mxu1 }
0x1b36   :  { %v7984_v55 = vadd.f32 %v7980_v31, %v13234_v56 }
0x1b38   :  { %v7988_v11 = vsel %vm66_vm0, %v7984_v55, 0.0 }
0x1b39   :  { %7989 = vadd.xlane.f32.xlu0 %v7988_v11 }
0x1bbe   :  { %v7987_v57 = vpop.xlane.xlu1 %7986 }
0x1bbf   :  { %v7991_v43 = vmul.f32 0.03125, %v7987_v57 }
0x1bc1   :  { %v7993_v47 = vsub.f32 %v7983_v32, %v7991_v43  ;;  %v13238_v43 = vld [vmem:[#allocation30_spill] sm:$0xff] }
0x1bc2   :  { %v7990_v8 = vpop.xlane.xlu0 %7989 }
0x1bc3   :  { %v7992_v2 = vmul.f32 0.03125, %v7990_v8  ;;  %v7995_v19 = vmul.f32 %v7993_v47, %v7993_v47 }
0x1bc5   :  { %v7994_v38 = vsub.f32 %v7984_v55, %v7992_v2  ;;  %v7997_v36 = vsel %vm66_vm0, %v7995_v19, 0.0 }
0x1bc6   :  { %7998 = vadd.xlane.f32.xlu0 %v7997_v36 }
0x1bc7   :  { %v7996_v6 = vmul.f32 %v7994_v38, %v7994_v38 }
0x1bc9   :  { %v8000_v1 = vsel %vm66_vm0, %v7996_v6, 0.0 }
0x1bca   :  { %8001 = vadd.xlane.f32.xlu0 %v8000_v1 }
0x1c4f   :  { %v7999_v45 = vpop.xlane.xlu0 %7998 }
0x1c50   :  { %v8003_v12 = vmul.f32 0.03125, %v7999_v45 }
0x1c52   :  { %v8005_v34 = vadd.f32 1e-12, %v8003_v12 }
0x1c53   :  { %v8002_v28 = vpop.xlane.xlu0 %8001 }
0x1c54   :  { %9457 = vrsqrt.f32 %v8005_v34  ;;  %v8004_v18 = vmul.f32 0.03125, %v8002_v28 }
0x1c56   :  { %v8006_v62 = vadd.f32 1e-12, %v8004_v18 }
0x1c58   :  { %9459 = vrsqrt.f32 %v8006_v62 }
0x1c61   :  { %v9458_v63 = vpop.eup %9457 }
0x1c62   :  { %v8009_v58 = vmul.f32 %v9458_v63, %v7993_v47  ;;  %v8120_v47 = vrot.slane %v12754_v15, %v13238_v43 }
0x1c64   :  { %v8015_v3 = vmul.f32 %v8014_v42, %v8009_v58 }
0x1c65   :  { %v9460_v9 = vpop.eup %9459 }
0x1c66   :  { %v8010_v49 = vmul.f32 %v9460_v9, %v7994_v38  ;;  %v8021_v17 = vadd.f32 %v8020_v50, %v8015_v3 }
0x1c68   :  { %v8016_v0 = vmul.f32 %v8014_v42, %v8010_v49  ;;  %v9476_v49 = vld [vmem:[%s12857_s1] sm:$0x3] }
0x1c6a   :  { %v8022_v5 = vadd.f32 %v8020_v50, %v8016_v0  ;;  %v13239_v50 = vld [vmem:[#allocation6_spill] sm:$0xff] }
0x1c6b   :  { %v8232_v0 = vrot.slane %v9476_v49, %v13239_v50 }
0x1c6c   :  { %v8028_v52 = vpack.c.bf16 %v8022_v5, %v8021_v17 }
0x1c6e   :  { %9193 = vmatmul.mubr.msk.bf16.vlgmr.msra.gmra.mxu0 %vm66_vm0, %v8028_v52  ;;  %v9328_v52 = vld [vmem:[%s12864_s8 + $0x10] sm:$0xff]  }
0x1c6f   :  { %9212 = vmatprep.mubr.msk.bf16.mxu0 %vm9501_vm1, %v12996_v35 }
0x1d2e   :  { %v8082_v7 = vpop.f32.mrf.mxu0 }
0x1d2f   :  { %v8083_v59 = vadd.f32 %v8082_v7, %v8032_v14 }
0x1d30   :  { %v9194_v13 = vpop.f32.mrf.mxu0 }
0x1d31   :  { %v8089_v48 = vmul.f32 %v8083_v59, %v8083_v59 }
0x1d32   :  { %v8085_v39 = vpop.f32.mrf.mxu0 }
0x1d33   :  { %v8091_v51 = vmul.f32 %v8089_v48, %v8083_v59  ;;  %v8086_v53 = vadd.f32 %v8085_v39, %v8032_v14 }
0x1d34   :  { %v9195_v20 = vpop.f32.mrf.mxu0 }
0x1d35   :  { %v8093_v27 = vmul.f32 0.044715, %v8091_v51  ;;  %v8090_v44 = vmul.f32 %v8086_v53, %v8086_v53 }
0x1d37   :  { %v8095_v60 = vadd.f32 %v8093_v27, %v8083_v59  ;;  %v8092_v23 = vmul.f32 %v8090_v44, %v8086_v53 }
0x1d39   :  { %v8097_v29 = vmul.f32 0.7978846, %v8095_v60  ;;  %v8094_v16 = vmul.f32 0.044715, %v8092_v23  ;;  %v13240_v60 = vld [vmem:[#allocation25_spill] sm:$0xff] }
0x1d3a   :  { %v8220_v23 = vrot.slane %v12754_v15, %v13240_v60 }
0x1d3b   :  { %9461 = vtanh.f32 %v8097_v29  ;;  %v8096_v61 = vadd.f32 %v8094_v16, %v8086_v53 }
0x1d3d   :  { %v8098_v41 = vmul.f32 0.7978846, %v8096_v61 }
0x1d3f   :  { %9463 = vtanh.f32 %v8098_v41  ;;  %v13241_v41 = vld [vmem:[#allocation19_spill] sm:$0xff] }
0x1d48   :  { %v9462_v32 = vpop.eup %9461 }
0x1d49   :  { %v8101_v54 = vadd.f32 1.0, %v9462_v32  ;;  %v8226_v32 = vrot.slane %v12754_v15, %v13241_v41 }
0x1d4b   :  { %v8103_v10 = vmul.f32 0.5, %v8101_v54 }
0x1d4c   :  { %v9464_v31 = vpop.eup %9463 }
0x1d4d   :  { %v8102_v22 = vadd.f32 1.0, %v9464_v31  ;;  %v8105_v55 = vmul.f32 %v8103_v10, %v8083_v59 }
0x1d4f   :  { %v8104_v56 = vmul.f32 0.5, %v8102_v22 }
0x1d51   :  { %v8106_v11 = vmul.f32 %v8104_v56, %v8086_v53 }
0x1d53   :  { %v8116_v57 = vpack.c.bf16 %v8106_v11, %v8105_v55 }
0x1d55   :  { %9205 = vmatmul.mubr.msk.bf16.vlgmr.msra.gmra.mxu1 %vm2740_vm13, %v8116_v57 }
0x1d56   :  { %9228 = vmatprep.mubr.msk.bf16.mxu1 %vm9501_vm1, %v12996_v35 }
0x1e15   :  { %v8182_v8 = vpop.f32.mrf.mxu1 }
0x1e16   :  { %v8183_v2 = vadd.f32 %v8182_v8, %v8120_v47 }
0x1e17   :  { %v9206_v19 = vpop.f32.mrf.mxu1 }
0x1e18   :  { %v8189_v38 = vadd.f32 %v8183_v2, %v8021_v17  ;;  %v8239_v17 = vrot.slane %v9476_v49, %v13232_v46 }
0x1e19   :  { %v8185_v36 = vpop.f32.mrf.mxu1 }
0x1e1a   :  { %v8186_v6 = vadd.f32 %v8185_v36, %v8120_v47  ;;  %v8191_v1 = vsel %vm66_vm0, %v8189_v38, 0.0 }
0x1e1b   :  { %8192 = vadd.xlane.f32.xlu1 %v8191_v1  ;;  %v9207_v40 = vpop.f32.mrf.mxu1 }
0x1e1c   :  { %v8190_v33 = vadd.f32 %v8186_v6, %v8022_v5  ;;  %v9327_v5 = vld [vmem:[%s12864_s8 + $0x18] sm:$0xff]  }
0x1e1d   :  { %9209 = vmatpush3.bf16.msra.mxu0 %v9327_v5 }
0x1e1e   :  { %v8194_v45 = vsel %vm66_vm0, %v8190_v33, 0.0  ;;  %9210 = vmatprep.subr.bf16.mxu0 %v12996_v35 }
0x1e1f   :  { %8195 = vadd.xlane.f32.xlu0 %v8194_v45 }
0x1e21   :  { %9211 = vmatpush3.bf16.msra.mxu0 %v9328_v52 }
0x1e22   :  { %9216 = vmatprep.subr.bf16.mxu0 %v12996_v35 }
0x1ea4   :  { %v8193_v12 = vpop.xlane.xlu1 %8192 }
0x1ea5   :  { %v8197_v34 = vmul.f32 0.03125, %v8193_v12 }
0x1ea7   :  { %v8199_v28 = vsub.f32 %v8189_v38, %v8197_v34 }
0x1ea8   :  { %v8196_v18 = vpop.xlane.xlu0 %8195 }
0x1ea9   :  { %v8198_v62 = vmul.f32 0.03125, %v8196_v18  ;;  %v8201_v63 = vmul.f32 %v8199_v28, %v8199_v28 }
0x1eab   :  { %v8200_v42 = vsub.f32 %v8190_v33, %v8198_v62  ;;  %v8203_v58 = vsel %vm66_vm0, %v8201_v63, 0.0 }
0x1eac   :  { %8204 = vadd.xlane.f32.xlu1 %v8203_v58 }
0x1ead   :  { %v8202_v9 = vmul.f32 %v8200_v42, %v8200_v42 }
0x1eaf   :  { %v8206_v3 = vsel %vm66_vm0, %v8202_v9, 0.0 }
0x1eb0   :  { %8207 = vadd.xlane.f32.xlu0 %v8206_v3 }
0x1ebd   :  { %8234 = vbcast.lane.b32.xlu1 %v8232_v0, 256 }
0x1ec6   :  { %8241 = vbcast.lane.b32.xlu0 %v8239_v17, 256 }
0x1f35   :  { %v8205_v4 = vpop.xlane.xlu1 %8204 }
0x1f36   :  { %v8209_v25 = vmul.f32 0.03125, %v8205_v4 }
0x1f38   :  { %v8211_v24 = vadd.f32 1e-12, %v8209_v25 }
0x1f39   :  { %v8208_v37 = vpop.xlane.xlu0 %8207  ;;  %v8235_v46 = vpop.permute.xlu1 %8234 }
0x1f3a   :  { %9465 = vrsqrt.f32 %v8211_v24  ;;  %v8210_v21 = vmul.f32 0.03125, %v8208_v37  ;;  %v8243_v14 = vrot.slane %v8235_v46, 4  ;;  %vm8277_vm14 = vcmp.eq.f32.partialorder %v8235_v46, 0.0 }
0x1f3c   :  { %v8212_v7 = vadd.f32 1e-12, %v8210_v21  ;;  %v8244_v59 = vadd.f32 %v8243_v14, %v8235_v46 }
0x1f3d   :  { %v8242_v13 = vpop.permute.xlu0 %8241 }
0x1f3e   :  { %9467 = vrsqrt.f32 %v8212_v7  ;;  %v8245_v48 = vrot.slane %v8244_v59, 2  ;;  %v8249_v39 = vrot.slane %v8242_v13, 4  ;;  %vm8278_vm15 = vcmp.eq.f32.partialorder %v8242_v13, 0.0 }
0x1f40   :  { %v8246_v51 = vadd.f32 %v8245_v48, %v8244_v59  ;;  %v8250_v53 = vadd.f32 %v8249_v39, %v8242_v13 }
0x1f42   :  { %v8251_v20 = vrot.slane %v8250_v53, 2  ;;  %v8247_v27 = vrot.slane %v8246_v51, 1 }
0x1f44   :  { %v8252_v44 = vadd.f32 %v8251_v20, %v8250_v53  ;;  %v8248_v54 = vadd.f32 %v8247_v27, %v8246_v51 }
0x1f46   :  { %v8253_v29 = vrot.slane %v8252_v44, 1  ;;  %v8255_v55 = vmax.f32 %v8248_v54, 1.0  ;;  %v9332_v54 = vld [vmem:[%s12865_s9] sm:$0xff]  }
0x1f47   :  { %v9466_v16 = vpop.eup %9465 }
0x1f48   :  { %v8215_v61 = vmul.f32 %v9466_v16, %v8199_v28  ;;  %v8254_v31 = vadd.f32 %v8253_v29, %v8252_v44  ;;  %9469 = vrcp.f32 %v8255_v55  ;;  %v9329_v44 = vld [vmem:[%s12864_s8 + $0x8] sm:$0xff]   ;;  %v9330_v16 = vld [vmem:[%s12864_s8] sm:$0xff]  }
0x1f49   :  { %v9477_v55 = vld [vmem:[%s12863_s7] sm:$0xff] }
0x1f4a   :  { %v8221_v10 = vmul.f32 %v8220_v23, %v8215_v61  ;;  %v8256_v57 = vmax.f32 %v8254_v31, 1.0 }
0x1f4b   :  { %v9468_v22 = vpop.eup %9467 }
0x1f4c   :  { %v8227_v56 = vadd.f32 %v8226_v32, %v8221_v10  ;;  %v8216_v11 = vmul.f32 %v9468_v22, %v8200_v42  ;;  %9471 = vrcp.f32 %v8256_v57 }
0x1f4e   :  { %v8257_v43 = vmul.f32 %v8235_v46, %v8227_v56  ;;  %v8283_v47 = vsel %vm8277_vm14, -1e+30, %v8227_v56  ;;  %v8222_v8 = vmul.f32 %v8220_v23, %v8216_v11  ;;  %v8437_v11 = vrot.slane %v9477_v55, %v13235_v30 }
0x1f4f   :  { %v8285_v2 = vsel %vm66_vm0, %v8283_v47, -inf }
0x1f50   :  { %v8259_v19 = vsel %vm66_vm0, %v8257_v43, 0.0  ;;  %v8286_v38 = vrot.slane %v8285_v2, 4  ;;  %v8228_v36 = vadd.f32 %v8226_v32, %v8222_v8  ;;  %v9331_v32 = vld [vmem:[%s12865_s9 + $0x8] sm:$0xff]   ;;  %s9519_s9 = smov [#allocation2]  }
0x1f51   :  { %v8260_v15 = vrot.slane %v8259_v19, 4  ;;  %9225 = vmatpush3.bf16.msra.mxu1 %v9331_v32  ;;  %s8512_s6 = sshll.u32 %s9519_s9, 4  ;;  %s8513_s6 = int_to_ptr.vmem [resolvable:$true] %s8512_s6 }
0x1f52   :  { %v8287_v6 = vmax.f32 %v8285_v2, %v8286_v38  ;;  %v8258_v1 = vmul.f32 %v8242_v13, %v8228_v36  ;;  %v8284_v40 = vsel %vm8278_vm15, -1e+30, %v8228_v36  ;;  %9226 = vmatprep.subr.bf16.mxu1 %v12996_v35  ;;  %s9478_s7 = scalar_lea.vmem %s8513_s6, 32  ;;  %p9483_p1 = scmp.lt.s32.totalorder %s8513_s6, %s8513_s6 }
0x1f53   :  { %v8261_v33 = vadd.f32 %v8260_v15, %v8259_v19  ;;  %v8292_v45 = vsel %vm66_vm0, %v8284_v40, -inf  ;;  %p9479_p0 = scmp.ne.s32.totalorder %s8513_s6, %s9478_s7  ;;  %p9484_p2 = scmp.lt.s32.totalorder %s9478_s7, %s9478_s7 }
0x1f54   :  { %v8288_v12 = vrot.slane %v8287_v6, 2  ;;  %v8266_v34 = vsel %vm66_vm0, %v8258_v1, 0.0  ;;  %v8293_v28 = vrot.slane %v8292_v45, 4 }
0x1f55   :  { %v8262_v18 = vrot.slane %v8261_v33, 2  ;;  %v8267_v62 = vrot.slane %v8266_v34, 4  ;;  %v9470_v24 = vpop.eup %9469  ;;  %9227 = vmatpush3.bf16.msra.mxu1 %v9332_v54  ;;  %p9485_p3 = por %p9484_p2, %p9483_p1 }
0x1f56   :  { %v8289_v63 = vmax.f32 %v8287_v6, %v8288_v12  ;;  %v8294_v42 = vmax.f32 %v8292_v45, %v8293_v28 }
0x1f57   :  { %v8263_v58 = vadd.f32 %v8262_v18, %v8261_v33  ;;  %v8268_v9 = vadd.f32 %v8267_v62, %v8266_v34  ;;  %p9486_p4 = pnand %p9485_p3, %p9479_p0 }
0x1f58   :  { %v8290_v3 = vrot.slane %v8289_v63, 1  ;;  %v8295_v49 = vrot.slane %v8294_v42, 2 }
0x1f59   :  { %v8264_v50 = vrot.slane %v8263_v58, 1  ;;  %v8269_v0 = vrot.slane %v8268_v9, 2  ;;  %v9472_v46 = vpop.eup %9471 }
0x1f5a   :  { %v8291_v17 = vmax.f32 %v8289_v63, %v8290_v3  ;;  %v8296_v5 = vmax.f32 %v8294_v42, %v8295_v49 }
0x1f5b   :  { %v8270_v52 = vadd.f32 %v8269_v0, %v8268_v9  ;;  %v8265_v4 = vadd.f32 %v8264_v50, %v8263_v58 }
0x1f5c   :  { %v8297_v25 = vrot.slane %v8296_v5, 1  ;;  %v8310_v21 = vpack.c.bf16 %v8291_v17, %v8291_v17 }
0x1f5d   :  { %v8271_v37 = vrot.slane %v8270_v52, 1  ;;  %v8275_v59 = vmul.f32 %v9470_v24, %v8265_v4 }
0x1f5e   :  { %v8298_v14 = vmax.f32 %v8296_v5, %v8297_v25  ;;  %v8314_v39 = vunpack.c.l.b16 %v8310_v21 }
0x1f5f   :  { %v8272_v7 = vadd.f32 %v8271_v37, %v8270_v52  ;;  %v8303_v20 = vpack.c.bf16 %v8275_v59, %v8275_v59 }
0x1f60   :  { %v8311_v13 = vpack.c.bf16 %v8298_v14, %v8298_v14 }
0x1f61   :  { %v8276_v48 = vmul.f32 %v9472_v46, %v8272_v7  ;;  %v8375_v29 = vunpack.c.l.b16 %v8303_v20 }
0x1f62   :  { %v8315_v51 = vunpack.c.l.b16 %v8311_v13 }
0x1f63   :  { %v8304_v53 = vpack.c.bf16 %v8276_v48, %v8276_v48 }
0x1f64   :  { %v8316_v27 = vsel %vm1017_vm2, %v8315_v51, %v8314_v39 }
0x1f65   :  { %v8317_v60 = vpack.c.b16 %v8316_v27, %v8316_v27  ;;  %v8376_v23 = vunpack.c.l.b16 %v8304_v53 }
0x1f67   :  { %9213 = vmatmul.mubr.msk.bf16.vlgmr.msra.gmra.mxu0 %vm66_vm0, %v8317_v60  ;;  %v8377_v61 = vsel %vm1017_vm2, %v8376_v23, %v8375_v29 }
0x1f68   :  { %9217 = vmatpush3.bf16.msra.mxu0 %v9329_v44  ;;  %9220 = vmatprep.mubr.msk.bf16.mxu0 %vm9501_vm1, %v12996_v35  ;;  %v8378_v41 = vpack.c.b16 %v8377_v61, %v8377_v61  ;;  %vm8504_vm1 = vcmask 17408  }
0x1f69   :  { %9218 = vmatprep.subr.bf16.mxu0 %v12996_v35  ;;  %v8448_v35 = vrot.slane %v9477_v55, %v13236_v26 }
0x1f6c   :  { %9219 = vmatpush3.bf16.msra.mxu0 %v9330_v16 }
0x1f6f   :  { %9221 = vmatmul.mubr.msk.bf16.vlgmr.msra.gmra.mxu0 %vm66_vm0, %v8378_v41 }
0x2027   :  { %v8367_v31 = vpop.f32.mrf.mxu0 }
0x2029   :  { %v9214_v10 = vpop.f32.mrf.mxu0 }
0x202b   :  { %v8370_v22 = vpop.f32.mrf.mxu0 }
0x202d   :  { %v9215_v56 = vpop.f32.mrf.mxu0 }
0x202f   :  { %v8428_v57 = vpop.f32.mrf.mxu0 }
0x2030   :  { %v8429_v43 = vadd.f32 %v8428_v57, %v8367_v31 }
0x2031   :  { %v9222_v47 = vpop.f32.mrf.mxu0 }
0x2032   :  { %v8438_v8 = vadd.f32 %v8437_v11, %v8429_v43 }
0x2033   :  { %v8431_v2 = vpop.f32.mrf.mxu0 }
0x2034   :  { %v8439_v19 = vmax.f32 %v8438_v8, 0.0 }
0x2035   :  { %v9223_v38 = vpop.f32.mrf.mxu0 }
0x2036   :  { %v8444_v36 = vpack.c.bf16 %v8439_v19, %v8439_v19 }
0x2038   :  { %9229 = vmatmul.mubr.msk.bf16.vlgmr.msra.gmra.mxu1 %vm66_vm0, %v8444_v36 }
0x20f8   :  { %v8498_v15 = vpop.f32.mrf.mxu1 }
0x20f9   :  { %v8499_v6 = vadd.f32 %v8498_v15, %v8448_v35 }
0x20fa   :  { %v9230_v1 = vpop.f32.mrf.mxu1 }
0x20fb   :  { %8505 = vst.msk [vmem:[#allocation2] sm:$0x3] %vm8504_vm1, %v8499_v6 }
0x20fc   :  { %v8501_v30 = vpop.f32.mrf.mxu1 }
0x20fd   :  { %9489 = shalt.err (!%p9486_p4)
}
0x20fe   :  { %8515 = dma.vmem_to_hbm [thread:$0]  %s8513_s6, 32, %s12866_s10, [#allocation3]   ;;  %v9231_v26 = vpop.f32.mrf.mxu1 }
0x20ff   :  { %9498 = dma.done.wait [#allocation3], 32  }
0x2100   :  { %9499 = vsyncadd [#allocation3], 4294967264 }
0x2101   :  { %8519 = vsyncpa [#allocation3], 1 }

</bundles_post_ra>
